<compile_context>
chip_gen: v5e
topology: v5e:2x2
jax: 0.10.0
libtpu: 0.0.40
codegen_flags: <defaults>
</compile_context>

<pallas_src>
import jax
import jax.numpy as jnp
from jax.experimental import pallas as pl
from jax.experimental.pallas import tpu as pltpu


# ----------------------------------------------------------------------------
# Fused kernel: num_convs x (3x3 conv + bias + ReLU) followed by 2x2 max pool.
# Processes one batch element per grid step, entirely in VMEM.
# ----------------------------------------------------------------------------
def _make_vgg_block_kernel(num_convs, H, W, cins, cout, cmax):
    HW = H * W
    Hh, Wh = H // 2, W // 2

    def kernel(*refs):
        # refs = (x, w0, b0, w1, b1, ..., out, xp_scratch, patch_scratch)
        x_ref = refs[0]
        o_ref = refs[1 + 2 * num_convs]
        xp_ref = refs[2 + 2 * num_convs]      # (H+2, W+2, cmax)  zero-bordered activation
        patch_ref = refs[3 + 2 * num_convs]   # (H*W, 9*cmax_in)  im2col patch

        # Zero ONLY the 1-pixel border of the padded scratch.  The interior is always fully
        # overwritten (input placement below / conv write-back) before any tap reads it, so
        # zeroing it too would be wasted store bandwidth.  Re-zeroing the border every step
        # keeps this correct under "parallel" megacore scheduling (each core owns its own
        # scratch instance; no cross-step carried state).
        zrow = jnp.zeros((1, W + 2, cmax), jnp.float32)
        xp_ref[0:1, :, :] = zrow
        xp_ref[H + 1:H + 2, :, :] = zrow
        zcol = jnp.zeros((H + 2, 1, cmax), jnp.float32)
        xp_ref[:, 0:1, :] = zcol
        xp_ref[:, W + 1:W + 2, :] = zcol

        # Place this image (NHWC tile) in the interior of the padded scratch.
        xp_ref[1:H + 1, 1:W + 1, 0:cins[0]] = x_ref[0]

        for i in range(num_convs):
            cin = cins[i]
            w_ref = refs[1 + 2 * i]           # (9*cin, cout), rows ordered (3*dy+dx)*cin + ci
            b_ref = refs[2 + 2 * i]           # (1, cout)

            # im2col: column block t = 3*dy + dx holds the (dy, dx)-shifted window.
            for dy in range(3):
                for dx in range(3):
                    t = 3 * dy + dx
                    tap = xp_ref[dy:dy + H, dx:dx + W, 0:cin].reshape(HW, cin)
                    patch_ref[:, t * cin:(t + 1) * cin] = tap

            # Single MXU pass per conv: (HW, 9*cin) @ (9*cin, cout) -> (HW, cout), f32 acc.
            y = jnp.dot(patch_ref[:, 0:9 * cin], w_ref[...],
                        preferred_element_type=jnp.float32)
            y = jnp.maximum(y + b_ref[...], 0.0)          # bias + ReLU on the VPU

            if i + 1 < num_convs:
                # Next conv's input: back into the zero-bordered scratch interior.
                xp_ref[1:H + 1, 1:W + 1, 0:cout] = y.reshape(H, W, cout)
            else:
                # Fused 2x2 / stride-2 max-pool epilogue.
                p = y.reshape(H, Wh, 2, cout)
                p = jnp.max(p, axis=2)                    # pool along W -> (H, Wh, cout)
                p = p.reshape(Hh, 2, Wh, cout)
                p = jnp.max(p, axis=1)                    # pool along H -> (Hh, Wh, cout)
                o_ref[0] = p.astype(o_ref.dtype)

    return kernel


# ----------------------------------------------------------------------------
# Wrapper: layout plumbing (free reshapes + tiny boundary transposes) + pallas_call
# ----------------------------------------------------------------------------
@jax.jit
def vgg_block_forward(x_nchw, weights, biases):
    """Exact VGGBlock.forward semantics. Input/output NCHW (PyTorch convention)."""
    N, C0, H, W = x_nchw.shape
    assert H % 2 == 0 and W % 2 == 0, "MaxPool2d(2,2) assumes even spatial dims"
    num_convs = len(weights)
    cout = int(weights[0].shape[0])
    cins = tuple(int(w.shape[1]) for w in weights)
    cmax = max(max(cins), cout)
    cmax_in = max(cins)
    Hh, Wh = H // 2, W // 2

    x_nhwc = jnp.transpose(x_nchw, (0, 2, 3, 1))            # (N, H, W, C0); tiny copy

    operands = [x_nhwc]
    in_specs = [pl.BlockSpec((1, H, W, C0), lambda n: (n, 0, 0, 0))]
    for w, b in zip(weights, biases):
        cin = int(w.shape[1])
        # (Cout, Cin, 3, 3) -> (3, 3, Cin, Cout) -> (9*Cin, Cout); row = (3*dy+dx)*Cin + ci
        wmat = jnp.transpose(w, (2, 3, 1, 0)).reshape(9 * cin, cout)
        operands += [wmat, b.reshape(1, cout)]
        # Constant index_map -> block stays resident across grid steps (no re-DMA).
        in_specs += [pl.BlockSpec((9 * cin, cout), lambda n: (0, 0)),
                     pl.BlockSpec((1, cout), lambda n: (0, 0))]

    kernel = _make_vgg_block_kernel(num_convs, H, W, cins, cout, cmax)

    out_nhwc = pl.pallas_call(
        kernel,
        out_shape=jax.ShapeDtypeStruct((N, Hh, Wh, cout), x_nchw.dtype),
        grid=(N,),
        in_specs=in_specs,
        out_specs=pl.BlockSpec((1, Hh, Wh, cout), lambda n: (n, 0, 0, 0)),
        scratch_shapes=[
            pltpu.VMEM((H + 2, W + 2, cmax), jnp.float32),   # zero-bordered activation
            pltpu.VMEM((H * W, 9 * cmax_in), jnp.float32),   # im2col patch
        ],
        compiler_params=pltpu.CompilerParams(
            dimension_semantics=("parallel",),               # batch across cores (v7x: 2 TCs)
        ),
    )(*operands)

    return jnp.transpose(out_nhwc, (0, 3, 1, 2))             # NHWC -> NCHW


# ----------------------------------------------------------------------------
# Pure-JAX reference (sanity check only)
# ----------------------------------------------------------------------------
def vgg_block_reference(x_nchw, weights, biases):
    y = x_nchw
    for w, b in zip(weights, biases):
        y = jax.lax.conv_general_dilated(
            y, w, window_strides=(1, 1), padding=((1, 1), (1, 1)),
            dimension_numbers=("NCHW", "OIHW", "NCHW"))
        y = jnp.maximum(y + b[None, :, None, None], 0.0)
    y = jax.lax.reduce_window(
        y, -jnp.inf, jax.lax.max,
        window_dimensions=(1, 1, 2, 2), window_strides=(1, 1, 2, 2),
        padding="VALID")
    return y


# ----------------------------------------------------------------------------
if __name__ == "__main__":
    # VGGBlock(in_channels=4, out_channels=8, num_convs=2) on 16x16 images, batch 2.
    batch, in_channels, out_channels, num_convs, spatial = 2, 4, 8, 2, 16

    key = jax.random.PRNGKey(0)
    k_x, *k_params = jax.random.split(key, 1 + 2 * num_convs)

    x = jax.random.normal(k_x, (batch, in_channels, spatial, spatial), jnp.float32)

    weights, biases = [], []
    cin = in_channels
    for i in range(num_convs):
        kw, kb = k_params[2 * i], k_params[2 * i + 1]
        bound = 1.0 / float(jnp.sqrt(cin * 9.0))
        weights.append(jax.random.uniform(kw, (out_channels, cin, 3, 3),
                                          jnp.float32, -bound, bound))
        biases.append(jax.random.uniform(kb, (out_channels,),
                                         jnp.float32, -bound, bound))
        cin = out_channels

    out = jax.block_until_ready(vgg_block_forward(x, weights, biases))

    ref = vgg_block_reference(x, weights, biases)
    assert out.shape == (batch, out_channels, spatial // 2, spatial // 2), out.shape
    assert jnp.allclose(out, ref, atol=1e-4, rtol=1e-4), float(jnp.max(jnp.abs(out - ref)))

    print("KERNEL_OK")
</pallas_src>

<mosaic_0001>
module attributes {stable_mosaic.version = 11 : i64} {
  func.func @kernel(%arg0: i32, %arg1: memref<1x16x16x4xf32, #tpu.memory_space<vmem>>, %arg2: memref<36x8xf32, #tpu.memory_space<vmem>>, %arg3: memref<1x8xf32, #tpu.memory_space<vmem>>, %arg4: memref<72x8xf32, #tpu.memory_space<vmem>>, %arg5: memref<1x8xf32, #tpu.memory_space<vmem>>, %arg6: memref<1x8x8x8xf32, #tpu.memory_space<vmem>>, %arg7: memref<18x18x8xf32, #tpu.memory_space<vmem>>, %arg8: memref<256x72xf32, #tpu.memory_space<vmem>>) attributes {dimension_semantics = [#tpu.dimension_semantics<parallel>], iteration_bounds = array<i64: 2>, scalar_prefetch = 0 : i64, scratch_operands = 2 : i64, tpu.core_type = #tpu.core_type<tc>, window_params = [{transform_indices = @transform_0, window_bounds = array<i64: 1, 16, 16, 4>}, {pipeline_mode = #tpu.pipeline_mode<synchronous>, transform_indices = @transform_1, window_bounds = array<i64: 36, 8>}, {pipeline_mode = #tpu.pipeline_mode<synchronous>, transform_indices = @transform_2, window_bounds = array<i64: 1, 8>}, {pipeline_mode = #tpu.pipeline_mode<synchronous>, transform_indices = @transform_3, window_bounds = array<i64: 72, 8>}, {pipeline_mode = #tpu.pipeline_mode<synchronous>, transform_indices = @transform_4, window_bounds = array<i64: 1, 8>}, {transform_indices = @transform_5, window_bounds = array<i64: 1, 8, 8, 8>}]} {
    %cst = arith.constant 0.000000e+00 : f32
    %0 = vector.broadcast %cst : f32 to vector<1x18x8xf32>
    %c0 = arith.constant 0 : index
    %c0_0 = arith.constant 0 : index
    %c0_1 = arith.constant 0 : index
    %1 = vector.load %arg7[%c0, %c0_0, %c0_1] : memref<18x18x8xf32, #tpu.memory_space<vmem>>, vector<1x18x8xf32>
    tpu.vector_store %arg7[%c0, %c0_0, %c0_1], %0 {strides = array<i32>} : memref<18x18x8xf32, #tpu.memory_space<vmem>>, vector<1x18x8xf32>,
    %c17 = arith.constant 17 : index
    %c0_2 = arith.constant 0 : index
    %c0_3 = arith.constant 0 : index
    %2 = vector.load %arg7[%c17, %c0_2, %c0_3] : memref<18x18x8xf32, #tpu.memory_space<vmem>>, vector<1x18x8xf32>
    tpu.vector_store %arg7[%c17, %c0_2, %c0_3], %0 {strides = array<i32>} : memref<18x18x8xf32, #tpu.memory_space<vmem>>, vector<1x18x8xf32>,
    %cst_4 = arith.constant 0.000000e+00 : f32
    %3 = vector.broadcast %cst_4 : f32 to vector<18x1x8xf32>
    %c0_5 = arith.constant 0 : index
    %c0_6 = arith.constant 0 : index
    %c0_7 = arith.constant 0 : index
    %4 = vector.load %arg7[%c0_5, %c0_6, %c0_7] : memref<18x18x8xf32, #tpu.memory_space<vmem>>, vector<18x1x8xf32>
    tpu.vector_store %arg7[%c0_5, %c0_6, %c0_7], %3 {strides = array<i32>} : memref<18x18x8xf32, #tpu.memory_space<vmem>>, vector<18x1x8xf32>,
    %c0_8 = arith.constant 0 : index
    %c17_9 = arith.constant 17 : index
    %c0_10 = arith.constant 0 : index
    %5 = vector.load %arg7[%c0_8, %c17_9, %c0_10] : memref<18x18x8xf32, #tpu.memory_space<vmem>>, vector<18x1x8xf32>
    tpu.vector_store %arg7[%c0_8, %c17_9, %c0_10], %3 {strides = array<i32>} : memref<18x18x8xf32, #tpu.memory_space<vmem>>, vector<18x1x8xf32>,
    %c0_11 = arith.constant 0 : index
    %c0_12 = arith.constant 0 : index
    %c0_13 = arith.constant 0 : index
    %c0_14 = arith.constant 0 : index
    %6 = vector.load %arg1[%c0_11, %c0_12, %c0_13, %c0_14] : memref<1x16x16x4xf32, #tpu.memory_space<vmem>>, vector<1x16x16x4xf32>
    %7 = vector.shape_cast %6 : vector<1x16x16x4xf32> to vector<16x16x4xf32>
    %c1 = arith.constant 1 : index
    %c1_15 = arith.constant 1 : index
    %c0_16 = arith.constant 0 : index
    %8 = vector.load %arg7[%c1, %c1_15, %c0_16] : memref<18x18x8xf32, #tpu.memory_space<vmem>>, vector<16x16x4xf32>
    tpu.vector_store %arg7[%c1, %c1_15, %c0_16], %7 {strides = array<i32>} : memref<18x18x8xf32, #tpu.memory_space<vmem>>, vector<16x16x4xf32>,
    %c0_17 = arith.constant 0 : index
    %c0_18 = arith.constant 0 : index
    %c0_19 = arith.constant 0 : index
    %9 = vector.load %arg7[%c0_17, %c0_18, %c0_19] : memref<18x18x8xf32, #tpu.memory_space<vmem>>, vector<16x16x4xf32>
    %10 = vector.shape_cast %9 : vector<16x16x4xf32> to vector<256x4xf32>
    %c0_20 = arith.constant 0 : index
    %c0_21 = arith.constant 0 : index
    %11 = vector.load %arg8[%c0_20, %c0_21] : memref<256x72xf32, #tpu.memory_space<vmem>>, vector<256x4xf32>
    tpu.vector_store %arg8[%c0_20, %c0_21], %10 {strides = array<i32>} : memref<256x72xf32, #tpu.memory_space<vmem>>, vector<256x4xf32>,
    %c0_22 = arith.constant 0 : index
    %c1_23 = arith.constant 1 : index
    %c0_24 = arith.constant 0 : index
    %12 = vector.load %arg7[%c0_22, %c1_23, %c0_24] : memref<18x18x8xf32, #tpu.memory_space<vmem>>, vector<16x16x4xf32>
    %13 = vector.shape_cast %12 : vector<16x16x4xf32> to vector<256x4xf32>
    %c0_25 = arith.constant 0 : index
    %c4 = arith.constant 4 : index
    %14 = vector.load %arg8[%c0_25, %c4] : memref<256x72xf32, #tpu.memory_space<vmem>>, vector<256x4xf32>
    tpu.vector_store %arg8[%c0_25, %c4], %13 {strides = array<i32>} : memref<256x72xf32, #tpu.memory_space<vmem>>, vector<256x4xf32>,
    %c0_26 = arith.constant 0 : index
    %c2 = arith.constant 2 : index
    %c0_27 = arith.constant 0 : index
    %15 = vector.load %arg7[%c0_26, %c2, %c0_27] : memref<18x18x8xf32, #tpu.memory_space<vmem>>, vector<16x16x4xf32>
    %16 = vector.shape_cast %15 : vector<16x16x4xf32> to vector<256x4xf32>
    %c0_28 = arith.constant 0 : index
    %c8 = arith.constant 8 : index
    %17 = vector.load %arg8[%c0_28, %c8] : memref<256x72xf32, #tpu.memory_space<vmem>>, vector<256x4xf32>
    tpu.vector_store %arg8[%c0_28, %c8], %16 {strides = array<i32>} : memref<256x72xf32, #tpu.memory_space<vmem>>, vector<256x4xf32>,
    %c1_29 = arith.constant 1 : index
    %c0_30 = arith.constant 0 : index
    %c0_31 = arith.constant 0 : index
    %18 = vector.load %arg7[%c1_29, %c0_30, %c0_31] : memref<18x18x8xf32, #tpu.memory_space<vmem>>, vector<16x16x4xf32>
    %19 = vector.shape_cast %18 : vector<16x16x4xf32> to vector<256x4xf32>
    %c0_32 = arith.constant 0 : index
    %c12 = arith.constant 12 : index
    %20 = vector.load %arg8[%c0_32, %c12] : memref<256x72xf32, #tpu.memory_space<vmem>>, vector<256x4xf32>
    tpu.vector_store %arg8[%c0_32, %c12], %19 {strides = array<i32>} : memref<256x72xf32, #tpu.memory_space<vmem>>, vector<256x4xf32>,
    %c1_33 = arith.constant 1 : index
    %c1_34 = arith.constant 1 : index
    %c0_35 = arith.constant 0 : index
    %21 = vector.load %arg7[%c1_33, %c1_34, %c0_35] : memref<18x18x8xf32, #tpu.memory_space<vmem>>, vector<16x16x4xf32>
    %22 = vector.shape_cast %21 : vector<16x16x4xf32> to vector<256x4xf32>
    %c0_36 = arith.constant 0 : index
    %c16 = arith.constant 16 : index
    %23 = vector.load %arg8[%c0_36, %c16] : memref<256x72xf32, #tpu.memory_space<vmem>>, vector<256x4xf32>
    tpu.vector_store %arg8[%c0_36, %c16], %22 {strides = array<i32>} : memref<256x72xf32, #tpu.memory_space<vmem>>, vector<256x4xf32>,
    %c1_37 = arith.constant 1 : index
    %c2_38 = arith.constant 2 : index
    %c0_39 = arith.constant 0 : index
    %24 = vector.load %arg7[%c1_37, %c2_38, %c0_39] : memref<18x18x8xf32, #tpu.memory_space<vmem>>, vector<16x16x4xf32>
    %25 = vector.shape_cast %24 : vector<16x16x4xf32> to vector<256x4xf32>
    %c0_40 = arith.constant 0 : index
    %c20 = arith.constant 20 : index
    %26 = vector.load %arg8[%c0_40, %c20] : memref<256x72xf32, #tpu.memory_space<vmem>>, vector<256x4xf32>
    tpu.vector_store %arg8[%c0_40, %c20], %25 {strides = array<i32>} : memref<256x72xf32, #tpu.memory_space<vmem>>, vector<256x4xf32>,
    %c2_41 = arith.constant 2 : index
    %c0_42 = arith.constant 0 : index
    %c0_43 = arith.constant 0 : index
    %27 = vector.load %arg7[%c2_41, %c0_42, %c0_43] : memref<18x18x8xf32, #tpu.memory_space<vmem>>, vector<16x16x4xf32>
    %28 = vector.shape_cast %27 : vector<16x16x4xf32> to vector<256x4xf32>
    %c0_44 = arith.constant 0 : index
    %c24 = arith.constant 24 : index
    %29 = vector.load %arg8[%c0_44, %c24] : memref<256x72xf32, #tpu.memory_space<vmem>>, vector<256x4xf32>
    tpu.vector_store %arg8[%c0_44, %c24], %28 {strides = array<i32>} : memref<256x72xf32, #tpu.memory_space<vmem>>, vector<256x4xf32>,
    %c2_45 = arith.constant 2 : index
    %c1_46 = arith.constant 1 : index
    %c0_47 = arith.constant 0 : index
    %30 = vector.load %arg7[%c2_45, %c1_46, %c0_47] : memref<18x18x8xf32, #tpu.memory_space<vmem>>, vector<16x16x4xf32>
    %31 = vector.shape_cast %30 : vector<16x16x4xf32> to vector<256x4xf32>
    %c0_48 = arith.constant 0 : index
    %c28 = arith.constant 28 : index
    %32 = vector.load %arg8[%c0_48, %c28] : memref<256x72xf32, #tpu.memory_space<vmem>>, vector<256x4xf32>
    tpu.vector_store %arg8[%c0_48, %c28], %31 {strides = array<i32>} : memref<256x72xf32, #tpu.memory_space<vmem>>, vector<256x4xf32>,
    %c2_49 = arith.constant 2 : index
    %c2_50 = arith.constant 2 : index
    %c0_51 = arith.constant 0 : index
    %33 = vector.load %arg7[%c2_49, %c2_50, %c0_51] : memref<18x18x8xf32, #tpu.memory_space<vmem>>, vector<16x16x4xf32>
    %34 = vector.shape_cast %33 : vector<16x16x4xf32> to vector<256x4xf32>
    %c0_52 = arith.constant 0 : index
    %c32 = arith.constant 32 : index
    %35 = vector.load %arg8[%c0_52, %c32] : memref<256x72xf32, #tpu.memory_space<vmem>>, vector<256x4xf32>
    tpu.vector_store %arg8[%c0_52, %c32], %34 {strides = array<i32>} : memref<256x72xf32, #tpu.memory_space<vmem>>, vector<256x4xf32>,
    %c0_53 = arith.constant 0 : index
    %c0_54 = arith.constant 0 : index
    %36 = vector.load %arg8[%c0_53, %c0_54] : memref<256x72xf32, #tpu.memory_space<vmem>>, vector<256x36xf32>
    %c0_55 = arith.constant 0 : index
    %c0_56 = arith.constant 0 : index
    %37 = vector.load %arg2[%c0_55, %c0_56] : memref<36x8xf32, #tpu.memory_space<vmem>>, vector<36x8xf32>
    %cst_57 = arith.constant dense<0.000000e+00> : vector<256x8xf32>
    %38 = tpu.matmul %36, %37, %cst_57 {dimension_numbers = #tpu.dot_dimension_numbers<[1], [0], [0], [1], [0, 0, 1, 1], [], []>} : vector<256x36xf32>, vector<36x8xf32>, vector<256x8xf32> -> vector<256x8xf32>
    %c0_58 = arith.constant 0 : index
    %c0_59 = arith.constant 0 : index
    %39 = vector.load %arg3[%c0_58, %c0_59] : memref<1x8xf32, #tpu.memory_space<vmem>>, vector<1x8xf32>
    %40 = vector.broadcast %39 : vector<1x8xf32> to vector<256x8xf32>
    %41 = arith.addf %38, %40 : vector<256x8xf32>
    %cst_60 = arith.constant 0.000000e+00 : f32
    %42 = vector.broadcast %cst_60 : f32 to vector<256x8xf32>
    %43 = arith.maximumf %41, %42 : vector<256x8xf32>
    %44 = vector.shape_cast %43 : vector<256x8xf32> to vector<16x16x8xf32>
    %c1_61 = arith.constant 1 : index
    %c1_62 = arith.constant 1 : index
    %c0_63 = arith.constant 0 : index
    %45 = vector.load %arg7[%c1_61, %c1_62, %c0_63] : memref<18x18x8xf32, #tpu.memory_space<vmem>>, vector<16x16x8xf32>
    tpu.vector_store %arg7[%c1_61, %c1_62, %c0_63], %44 {strides = array<i32>} : memref<18x18x8xf32, #tpu.memory_space<vmem>>, vector<16x16x8xf32>,
    %c0_64 = arith.constant 0 : index
    %c0_65 = arith.constant 0 : index
    %c0_66 = arith.constant 0 : index
    %46 = vector.load %arg7[%c0_64, %c0_65, %c0_66] : memref<18x18x8xf32, #tpu.memory_space<vmem>>, vector<16x16x8xf32>
    %47 = vector.shape_cast %46 : vector<16x16x8xf32> to vector<256x8xf32>
    %c0_67 = arith.constant 0 : index
    %c0_68 = arith.constant 0 : index
    %48 = vector.load %arg8[%c0_67, %c0_68] : memref<256x72xf32, #tpu.memory_space<vmem>>, vector<256x8xf32>
    tpu.vector_store %arg8[%c0_67, %c0_68], %47 {strides = array<i32>} : memref<256x72xf32, #tpu.memory_space<vmem>>, vector<256x8xf32>,
    %c0_69 = arith.constant 0 : index
    %c1_70 = arith.constant 1 : index
    %c0_71 = arith.constant 0 : index
    %49 = vector.load %arg7[%c0_69, %c1_70, %c0_71] : memref<18x18x8xf32, #tpu.memory_space<vmem>>, vector<16x16x8xf32>
    %50 = vector.shape_cast %49 : vector<16x16x8xf32> to vector<256x8xf32>
    %c0_72 = arith.constant 0 : index
    %c8_73 = arith.constant 8 : index
    %51 = vector.load %arg8[%c0_72, %c8_73] : memref<256x72xf32, #tpu.memory_space<vmem>>, vector<256x8xf32>
    tpu.vector_store %arg8[%c0_72, %c8_73], %50 {strides = array<i32>} : memref<256x72xf32, #tpu.memory_space<vmem>>, vector<256x8xf32>,
    %c0_74 = arith.constant 0 : index
    %c2_75 = arith.constant 2 : index
    %c0_76 = arith.constant 0 : index
    %52 = vector.load %arg7[%c0_74, %c2_75, %c0_76] : memref<18x18x8xf32, #tpu.memory_space<vmem>>, vector<16x16x8xf32>
    %53 = vector.shape_cast %52 : vector<16x16x8xf32> to vector<256x8xf32>
    %c0_77 = arith.constant 0 : index
    %c16_78 = arith.constant 16 : index
    %54 = vector.load %arg8[%c0_77, %c16_78] : memref<256x72xf32, #tpu.memory_space<vmem>>, vector<256x8xf32>
    tpu.vector_store %arg8[%c0_77, %c16_78], %53 {strides = array<i32>} : memref<256x72xf32, #tpu.memory_space<vmem>>, vector<256x8xf32>,
    %c1_79 = arith.constant 1 : index
    %c0_80 = arith.constant 0 : index
    %c0_81 = arith.constant 0 : index
    %55 = vector.load %arg7[%c1_79, %c0_80, %c0_81] : memref<18x18x8xf32, #tpu.memory_space<vmem>>, vector<16x16x8xf32>
    %56 = vector.shape_cast %55 : vector<16x16x8xf32> to vector<256x8xf32>
    %c0_82 = arith.constant 0 : index
    %c24_83 = arith.constant 24 : index
    %57 = vector.load %arg8[%c0_82, %c24_83] : memref<256x72xf32, #tpu.memory_space<vmem>>, vector<256x8xf32>
    tpu.vector_store %arg8[%c0_82, %c24_83], %56 {strides = array<i32>} : memref<256x72xf32, #tpu.memory_space<vmem>>, vector<256x8xf32>,
    %c1_84 = arith.constant 1 : index
    %c1_85 = arith.constant 1 : index
    %c0_86 = arith.constant 0 : index
    %58 = vector.load %arg7[%c1_84, %c1_85, %c0_86] : memref<18x18x8xf32, #tpu.memory_space<vmem>>, vector<16x16x8xf32>
    %59 = vector.shape_cast %58 : vector<16x16x8xf32> to vector<256x8xf32>
    %c0_87 = arith.constant 0 : index
    %c32_88 = arith.constant 32 : index
    %60 = vector.load %arg8[%c0_87, %c32_88] : memref<256x72xf32, #tpu.memory_space<vmem>>, vector<256x8xf32>
    tpu.vector_store %arg8[%c0_87, %c32_88], %59 {strides = array<i32>} : memref<256x72xf32, #tpu.memory_space<vmem>>, vector<256x8xf32>,
    %c1_89 = arith.constant 1 : index
    %c2_90 = arith.constant 2 : index
    %c0_91 = arith.constant 0 : index
    %61 = vector.load %arg7[%c1_89, %c2_90, %c0_91] : memref<18x18x8xf32, #tpu.memory_space<vmem>>, vector<16x16x8xf32>
    %62 = vector.shape_cast %61 : vector<16x16x8xf32> to vector<256x8xf32>
    %c0_92 = arith.constant 0 : index
    %c40 = arith.constant 40 : index
    %63 = vector.load %arg8[%c0_92, %c40] : memref<256x72xf32, #tpu.memory_space<vmem>>, vector<256x8xf32>
    tpu.vector_store %arg8[%c0_92, %c40], %62 {strides = array<i32>} : memref<256x72xf32, #tpu.memory_space<vmem>>, vector<256x8xf32>,
    %c2_93 = arith.constant 2 : index
    %c0_94 = arith.constant 0 : index
    %c0_95 = arith.constant 0 : index
    %64 = vector.load %arg7[%c2_93, %c0_94, %c0_95] : memref<18x18x8xf32, #tpu.memory_space<vmem>>, vector<16x16x8xf32>
    %65 = vector.shape_cast %64 : vector<16x16x8xf32> to vector<256x8xf32>
    %c0_96 = arith.constant 0 : index
    %c48 = arith.constant 48 : index
    %66 = vector.load %arg8[%c0_96, %c48] : memref<256x72xf32, #tpu.memory_space<vmem>>, vector<256x8xf32>
    tpu.vector_store %arg8[%c0_96, %c48], %65 {strides = array<i32>} : memref<256x72xf32, #tpu.memory_space<vmem>>, vector<256x8xf32>,
    %c2_97 = arith.constant 2 : index
    %c1_98 = arith.constant 1 : index
    %c0_99 = arith.constant 0 : index
    %67 = vector.load %arg7[%c2_97, %c1_98, %c0_99] : memref<18x18x8xf32, #tpu.memory_space<vmem>>, vector<16x16x8xf32>
    %68 = vector.shape_cast %67 : vector<16x16x8xf32> to vector<256x8xf32>
    %c0_100 = arith.constant 0 : index
    %c56 = arith.constant 56 : index
    %69 = vector.load %arg8[%c0_100, %c56] : memref<256x72xf32, #tpu.memory_space<vmem>>, vector<256x8xf32>
    tpu.vector_store %arg8[%c0_100, %c56], %68 {strides = array<i32>} : memref<256x72xf32, #tpu.memory_space<vmem>>, vector<256x8xf32>,
    %c2_101 = arith.constant 2 : index
    %c2_102 = arith.constant 2 : index
    %c0_103 = arith.constant 0 : index
    %70 = vector.load %arg7[%c2_101, %c2_102, %c0_103] : memref<18x18x8xf32, #tpu.memory_space<vmem>>, vector<16x16x8xf32>
    %71 = vector.shape_cast %70 : vector<16x16x8xf32> to vector<256x8xf32>
    %c0_104 = arith.constant 0 : index
    %c64 = arith.constant 64 : index
    %72 = vector.load %arg8[%c0_104, %c64] : memref<256x72xf32, #tpu.memory_space<vmem>>, vector<256x8xf32>
    tpu.vector_store %arg8[%c0_104, %c64], %71 {strides = array<i32>} : memref<256x72xf32, #tpu.memory_space<vmem>>, vector<256x8xf32>,
    %c0_105 = arith.constant 0 : index
    %c0_106 = arith.constant 0 : index
    %73 = vector.load %arg8[%c0_105, %c0_106] : memref<256x72xf32, #tpu.memory_space<vmem>>, vector<256x72xf32>
    %c0_107 = arith.constant 0 : index
    %c0_108 = arith.constant 0 : index
    %74 = vector.load %arg4[%c0_107, %c0_108] : memref<72x8xf32, #tpu.memory_space<vmem>>, vector<72x8xf32>
    %cst_109 = arith.constant dense<0.000000e+00> : vector<256x8xf32>
    %75 = tpu.matmul %73, %74, %cst_109 {dimension_numbers = #tpu.dot_dimension_numbers<[1], [0], [0], [1], [0, 0, 1, 1], [], []>} : vector<256x72xf32>, vector<72x8xf32>, vector<256x8xf32> -> vector<256x8xf32>
    %c0_110 = arith.constant 0 : index
    %c0_111 = arith.constant 0 : index
    %76 = vector.load %arg5[%c0_110, %c0_111] : memref<1x8xf32, #tpu.memory_space<vmem>>, vector<1x8xf32>
    %77 = vector.broadcast %76 : vector<1x8xf32> to vector<256x8xf32>
    %78 = arith.addf %75, %77 : vector<256x8xf32>
    %cst_112 = arith.constant 0.000000e+00 : f32
    %79 = vector.broadcast %cst_112 : f32 to vector<256x8xf32>
    %80 = arith.maximumf %78, %79 : vector<256x8xf32>
    %81 = vector.shape_cast %80 : vector<256x8xf32> to vector<16x8x2x8xf32>
    %cst_113 = arith.constant dense<0xFF800000> : vector<16x8x8xf32>
    %82 = vector.multi_reduction <maximumf>, %81, %cst_113 [2] : vector<16x8x2x8xf32> to vector<16x8x8xf32>
    %83 = vector.shape_cast %82 : vector<16x8x8xf32> to vector<8x2x8x8xf32>
    %cst_114 = arith.constant dense<0xFF800000> : vector<8x8x8xf32>
    %84 = vector.multi_reduction <maximumf>, %83, %cst_114 [1] : vector<8x2x8x8xf32> to vector<8x8x8xf32>
    %c0_115 = arith.constant 0 : index
    %c0_116 = arith.constant 0 : index
    %c0_117 = arith.constant 0 : index
    %c0_118 = arith.constant 0 : index
    %85 = vector.load %arg6[%c0_115, %c0_116, %c0_117, %c0_118] : memref<1x8x8x8xf32, #tpu.memory_space<vmem>>, vector<1x8x8x8xf32>
    %86 = vector.shape_cast %85 : vector<1x8x8x8xf32> to vector<8x8x8xf32>
    %87 = vector.shape_cast %84 : vector<8x8x8xf32> to vector<1x8x8x8xf32>
    tpu.vector_store %arg6[%c0_115, %c0_116, %c0_117, %c0_118], %87 {strides = array<i32>} : memref<1x8x8x8xf32, #tpu.memory_space<vmem>>, vector<1x8x8x8xf32>,
    return
  }
  func.func @transform_0(%arg0: i32) -> (i32, i32, i32, i32) {
    %c0_i32 = arith.constant 0 : i32
    %c0_i32_0 = arith.constant 0 : i32
    %c0_i32_1 = arith.constant 0 : i32
    %c0_i32_2 = arith.constant 0 : i32
    return %arg0, %c0_i32, %c0_i32_0, %c0_i32_1 : i32, i32, i32, i32
  }
  func.func @transform_1(%arg0: i32) -> (i32, i32) {
    %c0_i32 = arith.constant 0 : i32
    %c0_i32_0 = arith.constant 0 : i32
    %c0_i32_1 = arith.constant 0 : i32
    return %c0_i32, %c0_i32_0 : i32, i32
  }
  func.func @transform_2(%arg0: i32) -> (i32, i32) {
    %c0_i32 = arith.constant 0 : i32
    %c0_i32_0 = arith.constant 0 : i32
    %c0_i32_1 = arith.constant 0 : i32
    return %c0_i32, %c0_i32_0 : i32, i32
  }
  func.func @transform_3(%arg0: i32) -> (i32, i32) {
    %c0_i32 = arith.constant 0 : i32
    %c0_i32_0 = arith.constant 0 : i32
    %c0_i32_1 = arith.constant 0 : i32
    return %c0_i32, %c0_i32_0 : i32, i32
  }
  func.func @transform_4(%arg0: i32) -> (i32, i32) {
    %c0_i32 = arith.constant 0 : i32
    %c0_i32_0 = arith.constant 0 : i32
    %c0_i32_1 = arith.constant 0 : i32
    return %c0_i32, %c0_i32_0 : i32, i32
  }
  func.func @transform_5(%arg0: i32) -> (i32, i32, i32, i32) {
    %c0_i32 = arith.constant 0 : i32
    %c0_i32_0 = arith.constant 0 : i32
    %c0_i32_1 = arith.constant 0 : i32
    %c0_i32_2 = arith.constant 0 : i32
    return %arg0, %c0_i32, %c0_i32_0, %c0_i32_1 : i32, i32, i32, i32
  }
}

</mosaic_0001>

<bundles_post_ra>
// kernel: vgg_block_forward.1
= control target key start
LH: loop header
LB: loop body
LE: loop exit
PB: predicated region body
PF: predicated region fallthrough
CT: control target
= control target key end

     0   :  { %s5838_s18 = smov 0   ;;  %s8701_s0 = inlined_call_operand.vmem [shape: f32[2,16,16,4], index: 0, kind: input, shape index: {}]   ;;  %s8702_s1 = inlined_call_operand.vmem [shape: f32[36,8], index: 1, kind: input, shape index: {}]   ;;  %s8703_s2 = inlined_call_operand.vmem [shape: f32[1,8], index: 2, kind: input, shape index: {}]   ;;  %s8704_s3 = inlined_call_operand.vmem [shape: f32[72,8], index: 3, kind: input, shape index: {}]   ;;  %s8705_s4 = inlined_call_operand.vmem [shape: f32[1,8], index: 4, kind: input, shape index: {}]   ;;  %s8706_s5 = inlined_call_operand.vmem [shape: f32[2,8,8,8], index: 5, kind: output, shape index: {}]  }
   0x1 LB: > { %s5670_s19 = sadd.s32 4294967295, %s5793_s18   ;;  %p5674_p0 = scmp.ge.s32.totalorder %s5793_s18, 1  ;;  %s5793_s18 = sphi %s5838_s18, %s15_s18  }
   0x2   : > { %p187_p1 = scmp.lt.s32.totalorder %s5793_s18, 3 }
   0x4   : > { %p188_p2 = pnand %p5674_p0, %p187_p1 }
   0x6   : > { %191 = sbr.rel (%p188_p2) target bundleno = 1941 (0x795), region = 40 }
   0xb   : > { %vm225_vm0 = vcmask 64512   ;;  %p215_p3 = scmp.lt.s32.totalorder %s5670_s19, 1  ;;  %v5795_v0 = vmov 0.0   ;;  %vm228_vm1 = vcmask 58368   ;;  %vm304_vm2 = vcmask 31744   ;;  %s5796_s24 = smov 4  }
   0xc   : > { %226 = vst.msk [vmem:[#allocation2] sm:$0xff] %vm225_vm0, %v5795_v0  ;;  %vm234_vm3 = vcmask 57344   ;;  %s5797_s25 = smov 8   ;;  %vm561_vm4 = vcmask 64544   ;;  %s5798_s26 = smov 12   ;;  %vm754_vm5 = vcmask 97344  }
   0xd   : > { %227 = vst.msk [vmem:[#allocation2 + $0x8] sm:$0xff] %vm225_vm0, %v5795_v0  ;;  %s8880_s19 = smov (!%p215_p3, %s5670_s19), 1  ;;  %s5799_s27 = smov 16   ;;  %vm947_vm6 = vcmask 130144   ;;  %vm1140_vm7 = vcmask 162944   ;;  %vm1333_vm8 = vcmask 195744  }
   0xe   : > { %231 = vst.msk [vmem:[#allocation2 + $0x198] sm:$0xff] %vm225_vm0, %v5795_v0  ;;  %s5746_s20 = sshll.u32 %s8880_s19, 8  ;;  %s5800_s28 = smov 20   ;;  %vm1527_vm9 = vcmask 228544   ;;  %vm1720_vm10 = vcmask 261344   ;;  %vm2084_vm11 = vcmask 1043456  }
   0xf   : > { %232 = vst.msk [vmem:[#allocation2 + $0x1a0] sm:$0xff] %vm225_vm0, %v5795_v0  ;;  %s5860_s23 = scalar_lea.vmem %s8701_s0, %s5746_s20  ;;  %s5801_s29 = smov 24   ;;  %vm1913_vm12 = vcmask 294144   ;;  %vm1987_vm13 = vcmask 293888   ;;  %vm2489_vm14 = vcmask 130112   ;;  %vm2682_vm15 = vcmask 195712  }
  0x10   : > { %229 = vst.msk [vmem:[#allocation2 + $0x10] sm:$0x3] %vm228_vm1, %v5795_v0  ;;  %v271_v1 = vld [vmem:[%s5860_s23] sm:$0xff]  ;;  %v272_v2 = vld [vmem:[%s5860_s23 + $0x8] sm:$0xff]  ;;  %v278_v5 = vld [vmem:[%s5860_s23 + $0x38] sm:$0xff]  ;;  %s5802_s30 = smov 28  }
  0x11   : > { %233 = vst.msk [vmem:[#allocation2 + $0x1a8] sm:$0x3] %vm228_vm1, %v5795_v0  ;;  %v275_v3 = vld [vmem:[%s5860_s23 + $0x20] sm:$0xff]  ;;  %v276_v4 = vld [vmem:[%s5860_s23 + $0x28] sm:$0xff]  ;;  %v273_v7 = vld [vmem:[%s5860_s23 + $0x10] sm:$0xff]  ;;  %s5803_s6 = smov 32  }
  0x12   : > { %305 = vst.msk [vmem:[#allocation2 + $0x19] sm:$0xff] %vm304_vm2, %v271_v1  ;;  %v279_v8 = vld [vmem:[%s5860_s23 + $0x40] sm:$0xff]  ;;  %v281_v9 = vld [vmem:[%s5860_s23 + $0x50] sm:$0xff]  ;;  %v274_v10 = vld [vmem:[%s5860_s23 + $0x18] sm:$0xff]  ;;  %s5804_s21 = smov 40   ;;  %s5805_s22 = smov 48  }
  0x13   : > { %306 = vst.msk [vmem:[#allocation2 + $0x21] sm:$0xff] %vm304_vm2, %v272_v2  ;;  %v282_v11 = vld [vmem:[%s5860_s23 + $0x58] sm:$0xff]  ;;  %v284_v13 = vld [vmem:[%s5860_s23 + $0x68] sm:$0xff]  ;;  %v277_v15 = vld [vmem:[%s5860_s23 + $0x30] sm:$0xff] }
  0x14   : > { %v401_v6 = vld [vmem:[#allocation2 + $0x1] sm:$0xff]  ;;  %309 = vst.msk [vmem:[#allocation2 + $0x49] sm:$0xff] %vm304_vm2, %v275_v3  ;;  %v285_v16 = vld [vmem:[%s5860_s23 + $0x70] sm:$0xff]  ;;  %v290_v24 = vld [vmem:[%s5860_s23 + $0x98] sm:$0xff] }
  0x15   : > { %465 = vrot.lane.b32.xlu0 %v401_v6, %s5796_s24  ;;  %310 = vst.msk [vmem:[#allocation2 + $0x51] sm:$0xff] %vm304_vm2, %v276_v4  ;;  %v287_v17 = vld [vmem:[%s5860_s23 + $0x80] sm:$0xff]  ;;  %v280_v18 = vld [vmem:[%s5860_s23 + $0x48] sm:$0xff]  ;;  %v293_v30 = vld [vmem:[%s5860_s23 + $0xb0] sm:$0xff] }
  0x16   : > { %312 = vst.msk [vmem:[#allocation2 + $0x69] sm:$0xff] %vm304_vm2, %v278_v5  ;;  %v288_v22 = vld [vmem:[%s5860_s23 + $0x88] sm:$0xff]  ;;  %v283_v25 = vld [vmem:[%s5860_s23 + $0x60] sm:$0xff]  ;;  %v286_v31 = vld [vmem:[%s5860_s23 + $0x78] sm:$0xff] }
  0x17   : > { %307 = vst.msk [vmem:[#allocation2 + $0x31] sm:$0xff] %vm304_vm2, %v273_v7  ;;  %v402_v14 = vld [vmem:[#allocation2 + $0x9] sm:$0xff]  ;;  %v291_v28 = vld [vmem:[%s5860_s23 + $0xa0] sm:$0xff]  ;;  %v294_v34 = vld [vmem:[%s5860_s23 + $0xb8] sm:$0xff] }
  0x18   : > { %313 = vst.msk [vmem:[#allocation2 + $0x79] sm:$0xff] %vm304_vm2, %v279_v8  ;;  %v296_v36 = vld [vmem:[%s5860_s23 + $0xc8] sm:$0xff]  ;;  %v289_v37 = vld [vmem:[%s5860_s23 + $0x90] sm:$0xff]  ;;  %v299_v42 = vld [vmem:[%s5860_s23 + $0xe0] sm:$0xff] }
  0x19   : > { %v5884_v12 = vld [vmem:[#allocation2 + $0x19] sm:$0xff]  ;;  %315 = vst.msk [vmem:[#allocation2 + $0x91] sm:$0xff] %vm304_vm2, %v281_v9  ;;  %v297_v40 = vld [vmem:[%s5860_s23 + $0xd0] sm:$0xff]  ;;  %v292_v43 = vld [vmem:[%s5860_s23 + $0xa8] sm:$0xff] }
  0x1a   : > { %469 = vrot.lane.b32.xlu1 %v5884_v12, %s5796_s24  ;;  %308 = vst.msk [vmem:[#allocation2 + $0x39] sm:$0xff] %vm304_vm2, %v274_v10  ;;  %v5902_v20 = vld [vmem:[#allocation2 + $0x21] sm:$0xff]  ;;  %v298_v60 = vld [vmem:[%s5860_s23 + $0xd8] sm:$0xff] }
  0x1b   : > { %316 = vst.msk [vmem:[#allocation2 + $0x99] sm:$0xff] %vm304_vm2, %v282_v11  ;;  %v5910_v21 = vld [vmem:[#allocation2 + $0x49] sm:$0xff]  ;;  %v295_v58 = vld [vmem:[%s5860_s23 + $0xc0] sm:$0xff] }
  0x1c   : > { %318 = vst.msk [vmem:[#allocation2 + $0xb1] sm:$0xff] %vm304_vm2, %v284_v13  ;;  %v5922_v26 = vld [vmem:[#allocation2 + $0x51] sm:$0xff]  ;;  %v300_v46 = vld [vmem:[%s5860_s23 + $0xe8] sm:$0xff]  ;;  %v6145_v9 = vld [vmem:[#allocation2 + $0x20] sm:$0xff] }
  0x1d   : > { %467 = vrot.lane.b32.xlu0 %v402_v14, %s5796_s24  ;;  %311 = vst.msk [vmem:[#allocation2 + $0x61] sm:$0xff] %vm304_vm2, %v277_v15  ;;  %v5928_v27 = vld [vmem:[#allocation2 + $0x69] sm:$0xff] }
  0x1e   : > { %v5899_v19 = vld [vmem:[#allocation2 + $0x31] sm:$0xff]  ;;  %319 = vst.msk [vmem:[#allocation2 + $0xc1] sm:$0xff] %vm304_vm2, %v285_v16  ;;  %v338_v3 = vld [vmem:[#allocation2 + $0x8] sm:$0xff] }
  0x1f   : > { %473 = vrot.lane.b32.xlu2 %v5899_v19, %s5796_s24  ;;  %321 = vst.msk [vmem:[#allocation2 + $0xd9] sm:$0xff] %vm304_vm2, %v287_v17  ;;  %v5940_v32 = vld [vmem:[#allocation2 + $0x79] sm:$0xff]  ;;  %v594_v14 = vld [vmem:[#allocation2 + $0x2] sm:$0xff]  ;;  %v6167_v17 = vld [vmem:[#allocation2 + $0x50] sm:$0xff] }
  0x20   : > { %314 = vst.msk [vmem:[#allocation2 + $0x81] sm:$0xff] %vm304_vm2, %v280_v18  ;;  %v5946_v33 = vld [vmem:[#allocation2 + $0x91] sm:$0xff] }
  0x21   : > { %322 = vst.msk [vmem:[#allocation2 + $0xe1] sm:$0xff] %vm304_vm2, %v288_v22  ;;  %v5914_v23 = vld [vmem:[#allocation2 + $0x39] sm:$0xff] }
  0x22   : > { %471 = vrot.lane.b32.xlu1 %v5902_v20, %s5796_s24  ;;  %324 = vst.msk [vmem:[#allocation2 + $0xf9] sm:$0xff] %vm304_vm2, %v290_v24  ;;  %v5958_v38 = vld [vmem:[#allocation2 + $0x99] sm:$0xff] }
  0x23   : > { %317 = vst.msk [vmem:[#allocation2 + $0xa9] sm:$0xff] %vm304_vm2, %v283_v25  ;;  %v5964_v39 = vld [vmem:[#allocation2 + $0xb1] sm:$0xff] }
  0x24   : > { %325 = vst.msk [vmem:[#allocation2 + $0x109] sm:$0xff] %vm304_vm2, %v291_v28  ;;  %v5932_v29 = vld [vmem:[#allocation2 + $0x61] sm:$0xff]  ;;  %v6128_v4 = vld [vmem:[#allocation2 + $0x32] sm:$0xff] }
  0x25   : > { %477 = vrot.lane.b32.xlu0 %v5910_v21, %s5796_s24  ;;  %327 = vst.msk [vmem:[#allocation2 + $0x121] sm:$0xff] %vm304_vm2, %v293_v30  ;;  %v5976_v44 = vld [vmem:[#allocation2 + $0xc1] sm:$0xff]  ;;  %v6132_v5 = vld [vmem:[#allocation2 + $0x38] sm:$0xff] }
  0x26   : > { %320 = vst.msk [vmem:[#allocation2 + $0xc9] sm:$0xff] %vm304_vm2, %v286_v31  ;;  %v5982_v45 = vld [vmem:[#allocation2 + $0xd9] sm:$0xff]  ;;  %v6164_v15 = vld [vmem:[#allocation2 + $0x62] sm:$0xff] }
  0x27   : > { %475 = vrot.lane.b32.xlu2 %v5914_v23, %s5796_s24  ;;  %328 = vst.msk [vmem:[#allocation2 + $0x129] sm:$0xff] %vm304_vm2, %v294_v34  ;;  %v5950_v35 = vld [vmem:[#allocation2 + $0x81] sm:$0xff] }
  0x28   : > { %330 = vst.msk [vmem:[#allocation2 + $0x141] sm:$0xff] %vm304_vm2, %v296_v36  ;;  %v5994_v48 = vld [vmem:[#allocation2 + $0xe1] sm:$0xff] }
  0x29   : > { %323 = vst.msk [vmem:[#allocation2 + $0xf1] sm:$0xff] %vm304_vm2, %v289_v37  ;;  %v6006_v49 = vld [vmem:[#allocation2 + $0xf9] sm:$0xff]  ;;  %v6169_v18 = vld [vmem:[#allocation2 + $0x68] sm:$0xff] }
  0x2a   : > { %479 = vrot.lane.b32.xlu1 %v5922_v26, %s5796_s24  ;;  %331 = vst.msk [vmem:[#allocation2 + $0x151] sm:$0xff] %vm304_vm2, %v297_v40  ;;  %v5968_v41 = vld [vmem:[#allocation2 + $0xa9] sm:$0xff]  ;;  %v6173_v22 = vld [vmem:[#allocation2 + $0x7a] sm:$0xff] }
  0x2b   : > { %333 = vst.msk [vmem:[#allocation2 + $0x169] sm:$0xff] %vm304_vm2, %v299_v42  ;;  %v6022_v51 = vld [vmem:[#allocation2 + $0x109] sm:$0xff]  ;;  %v6176_v24 = vld [vmem:[#allocation2 + $0x80] sm:$0xff] }
  0x2c   : > { %326 = vst.msk [vmem:[#allocation2 + $0x111] sm:$0xff] %vm304_vm2, %v292_v43  ;;  %v6034_v52 = vld [vmem:[#allocation2 + $0x121] sm:$0xff]  ;;  %v6211_v43 = vld [vmem:[#allocation2 + $0x4a] sm:$0xff] }
  0x2d   : > { %483 = vrot.lane.b32.xlu0 %v5928_v27, %s5796_s24  ;;  %334 = vst.msk [vmem:[#allocation2 + $0x171] sm:$0xff] %vm304_vm2, %v300_v46  ;;  %v5986_v47 = vld [vmem:[#allocation2 + $0xc9] sm:$0xff] }
  0x2e   : > { %253 = vst.msk [vmem:[#allocation2 + $0x11] sm:$0x1] %vm234_vm3, %v5795_v0  ;;  %v6050_v54 = vld [vmem:[#allocation2 + $0x129] sm:$0xff] }
  0x2f   : > { %481 = vrot.lane.b32.xlu2 %v5932_v29, %s5796_s24  ;;  %235 = vst.msk [vmem:[#allocation2] sm:$0x1] %vm234_vm3, %v5795_v0  ;;  %v6062_v55 = vld [vmem:[#allocation2 + $0x141] sm:$0xff] }
  0x30   : > { %236 = vst.msk [vmem:[#allocation2 + $0x18] sm:$0x1] %vm234_vm3, %v5795_v0  ;;  %v6012_v50 = vld [vmem:[#allocation2 + $0xf1] sm:$0xff] }
  0x31   : > { %237 = vst.msk [vmem:[#allocation2 + $0x30] sm:$0x1] %vm234_vm3, %v5795_v0  ;;  %v6076_v56 = vld [vmem:[#allocation2 + $0x151] sm:$0xff] }
  0x32   : > { %485 = vrot.lane.b32.xlu1 %v5940_v32, %s5796_s24  ;;  %238 = vst.msk [vmem:[#allocation2 + $0x48] sm:$0x1] %vm234_vm3, %v5795_v0  ;;  %v6086_v57 = vld [vmem:[#allocation2 + $0x169] sm:$0xff] }
  0x33   : > { %239 = vst.msk [vmem:[#allocation2 + $0x60] sm:$0x1] %vm234_vm3, %v5795_v0  ;;  %v6040_v53 = vld [vmem:[#allocation2 + $0x111] sm:$0xff] }
  0x34   : > { %240 = vst.msk [vmem:[#allocation2 + $0x78] sm:$0x1] %vm234_vm3, %v5795_v0  ;;  %v6101_v59 = vld [vmem:[#allocation2 + $0x171] sm:$0xff] }
  0x35   : > { %489 = vrot.lane.b32.xlu0 %v5946_v33, %s5796_s24  ;;  %241 = vst.msk [vmem:[#allocation2 + $0x90] sm:$0x1] %vm234_vm3, %v5795_v0  ;;  %v595_v63 = vld [vmem:[#allocation2 + $0xa] sm:$0xff] }
  0x36   : > { %242 = vst.msk [vmem:[#allocation2 + $0xa8] sm:$0x1] %vm234_vm3, %v5795_v0  ;;  %v337_v61 = vld [vmem:[#allocation2] sm:$0xff] }
  0x37   : > { %487 = vrot.lane.b32.xlu2 %v5950_v35, %s5796_s24  ;;  %243 = vst.msk [vmem:[#allocation2 + $0xc0] sm:$0x1] %vm234_vm3, %v5795_v0  ;;  %v6124_v2 = vld [vmem:[#allocation2 + $0x18] sm:$0xff] }
  0x38   : > { %244 = vst.msk [vmem:[#allocation2 + $0xd8] sm:$0x1] %vm234_vm3, %v5795_v0  ;;  %v6109_v62 = vld [vmem:[#allocation2 + $0x30] sm:$0xff] }
  0x39   : > { %245 = vst.msk [vmem:[#allocation2 + $0xf0] sm:$0x1] %vm234_vm3, %v5795_v0  ;;  %v6147_v10 = vld [vmem:[#allocation2 + $0x48] sm:$0xff] }
  0x3a   : > { %491 = vrot.lane.b32.xlu1 %v5958_v38, %s5796_s24  ;;  %246 = vst.msk [vmem:[#allocation2 + $0x108] sm:$0x1] %vm234_vm3, %v5795_v0  ;;  %v6154_v13 = vld [vmem:[#allocation2 + $0x60] sm:$0xff] }
  0x3b   : > { %247 = vst.msk [vmem:[#allocation2 + $0x120] sm:$0x1] %vm234_vm3, %v5795_v0  ;;  %v6193_v34 = vld [vmem:[#allocation2 + $0x78] sm:$0xff] }
  0x3c   : > { %248 = vst.msk [vmem:[#allocation2 + $0x138] sm:$0x1] %vm234_vm3, %v5795_v0  ;;  %v6195_v36 = vld [vmem:[#allocation2 + $0x90] sm:$0xff] }
  0x3d   : > { %495 = vrot.lane.b32.xlu0 %v5964_v39, %s5796_s24  ;;  %249 = vst.msk [vmem:[#allocation2 + $0x150] sm:$0x1] %vm234_vm3, %v5795_v0  ;;  %v6204_v40 = vld [vmem:[#allocation2 + $0xa8] sm:$0xff] }
  0x3e   : > { %250 = vst.msk [vmem:[#allocation2 + $0x168] sm:$0x1] %vm234_vm3, %v5795_v0 }
  0x3f   : > { %493 = vrot.lane.b32.xlu2 %v5968_v41, %s5796_s24  ;;  %251 = vst.msk [vmem:[#allocation2 + $0x180] sm:$0x1] %vm234_vm3, %v5795_v0 }
  0x40   : > { %252 = vst.msk [vmem:[#allocation2 + $0x198] sm:$0x1] %vm234_vm3, %v5795_v0 }
  0x41   : > { %254 = vst.msk [vmem:[#allocation2 + $0x29] sm:$0x1] %vm234_vm3, %v5795_v0 }
  0x42   : > { %497 = vrot.lane.b32.xlu1 %v5976_v44, %s5796_s24  ;;  %255 = vst.msk [vmem:[#allocation2 + $0x41] sm:$0x1] %vm234_vm3, %v5795_v0 }
  0x43   : > { %256 = vst.msk [vmem:[#allocation2 + $0x59] sm:$0x1] %vm234_vm3, %v5795_v0 }
  0x44   : > { %257 = vst.msk [vmem:[#allocation2 + $0x71] sm:$0x1] %vm234_vm3, %v5795_v0 }
  0x45   : > { %501 = vrot.lane.b32.xlu0 %v5982_v45, %s5796_s24  ;;  %258 = vst.msk [vmem:[#allocation2 + $0x89] sm:$0x1] %vm234_vm3, %v5795_v0 }
  0x46   : > { %259 = vst.msk [vmem:[#allocation2 + $0xa1] sm:$0x1] %vm234_vm3, %v5795_v0 }
  0x47   : > { %499 = vrot.lane.b32.xlu2 %v5986_v47, %s5796_s24  ;;  %260 = vst.msk [vmem:[#allocation2 + $0xb9] sm:$0x1] %vm234_vm3, %v5795_v0 }
  0x48   : > { %261 = vst.msk [vmem:[#allocation2 + $0xd1] sm:$0x1] %vm234_vm3, %v5795_v0  ;;  %v6186_v25 = vld [vmem:[#allocation2 + $0x22] sm:$0xff] }
  0x49   : > { %262 = vst.msk [vmem:[#allocation2 + $0xe9] sm:$0x1] %vm234_vm3, %v5795_v0  ;;  %v6141_v7 = vld [vmem:[#allocation2 + $0x3a] sm:$0xff] }
  0x4a   : > { %503 = vrot.lane.b32.xlu1 %v5994_v48, %s5796_s24  ;;  %263 = vst.msk [vmem:[#allocation2 + $0x101] sm:$0x1] %vm234_vm3, %v5795_v0  ;;  %v6151_v11 = vld [vmem:[#allocation2 + $0x52] sm:$0xff] }
  0x4b   : > { %264 = vst.msk [vmem:[#allocation2 + $0x119] sm:$0x1] %vm234_vm3, %v5795_v0 }
  0x4c   : > { %265 = vst.msk [vmem:[#allocation2 + $0x131] sm:$0x1] %vm234_vm3, %v5795_v0  ;;  %v6188_v30 = vld [vmem:[#allocation2 + $0x82] sm:$0xff] }
  0x4d   : > { %507 = vrot.lane.b32.xlu0 %v6006_v49, %s5796_s24  ;;  %266 = vst.msk [vmem:[#allocation2 + $0x149] sm:$0x1] %vm234_vm3, %v5795_v0  ;;  %v6199_v37 = vld [vmem:[#allocation2 + $0x9a] sm:$0xff] }
  0x4e   : > { %267 = vst.msk [vmem:[#allocation2 + $0x161] sm:$0x1] %vm234_vm3, %v5795_v0 }
  0x4f   : > { %505 = vrot.lane.b32.xlu2 %v6012_v50, %s5796_s24  ;;  %268 = vst.msk [vmem:[#allocation2 + $0x179] sm:$0x1] %vm234_vm3, %v5795_v0 }
  0x50   : > { %8767 = vst [vmem:[#allocation4_spill] sm:$0xff] %v6101_v59 }
  0x51   : > { %269 = vst.msk [vmem:[#allocation2 + $0x191] sm:$0x1] %vm234_vm3, %v5795_v0 }
  0x52   : > { %509 = vrot.lane.b32.xlu1 %v6022_v51, %s5796_s24  ;;  %270 = vst.msk [vmem:[#allocation2 + $0x1a9] sm:$0x1] %vm234_vm3, %v5795_v0  ;;  %v6118_v0 = vld [vmem:[#allocation2 + $0x1a] sm:$0xff]  ;;  %vm3068_vm3 = vcmask 326912  }
  0x53   : > { %329 = vst.msk [vmem:[#allocation2 + $0x139] sm:$0xff] %vm304_vm2, %v295_v58  ;;  %v6215_v58 = vld [vmem:[#allocation2 + $0xaa] sm:$0xff] }
  0x54   : > { %332 = vst.msk [vmem:[#allocation2 + $0x159] sm:$0xff] %vm304_vm2, %v298_v60 }
  0x55   : > { %513 = vrot.lane.b32.xlu0 %v6034_v52, %s5796_s24  ;;  %369 = vst.msk [vmem:[#allocation3] sm:$0xff] %vm304_vm2, %v337_v61  ;;  %v6220_v61 = vld [vmem:[#allocation2 + $0x98] sm:$0xff] }
  0x56   : > { %373 = vst.msk [vmem:[#allocation3 + $0x20] sm:$0xff] %vm304_vm2, %v6109_v62 }
  0x57   : > { %511 = vrot.lane.b32.xlu2 %v6040_v53, %s5796_s24  ;;  %8768 = vst [vmem:[#allocation5_spill] sm:$0xff] %v6118_v0 }
  0x58   : > { %8769 = vst [vmem:[#allocation6_spill] sm:$0xff] %v6128_v4 }
  0x59   : > { %371 = vst.msk [vmem:[#allocation3 + $0x10] sm:$0xff] %vm304_vm2, %v6124_v2 }
  0x5a   : > { %515 = vrot.lane.b32.xlu1 %v6050_v54, %s5796_s24  ;;  %v6120_v1 = vld [vmem:[#allocation2 + $0x139] sm:$0xff]  ;;  %370 = vst.msk [vmem:[#allocation3 + $0x8] sm:$0xff] %vm304_vm2, %v338_v3  ;;  %v6226_v3 = vld [vmem:[#allocation2 + $0xc2] sm:$0xff] }
  0x5b   : > { %374 = vst.msk [vmem:[#allocation3 + $0x28] sm:$0xff] %vm304_vm2, %v6132_v5  ;;  %v6139_v6 = vld [vmem:[#allocation2 + $0x159] sm:$0xff] }
  0x5c   : > { %8770 = vst [vmem:[#allocation7_spill] sm:$0xff] %v6141_v7 }
  0x5d   : > { %519 = vrot.lane.b32.xlu0 %v6062_v55, %s5796_s24  ;;  %8771 = vst [vmem:[#allocation8_spill] sm:$0xff] %v6151_v11 }
  0x5e   : > { %372 = vst.msk [vmem:[#allocation3 + $0x18] sm:$0xff] %vm304_vm2, %v6145_v9 }
  0x5f   : > { %517 = vrot.lane.b32.xlu2 %v6120_v1, %s5796_s24  ;;  %375 = vst.msk [vmem:[#allocation3 + $0x30] sm:$0xff] %vm304_vm2, %v6147_v10 }
  0x60   : > { %377 = vst.msk [vmem:[#allocation3 + $0x40] sm:$0xff] %vm304_vm2, %v6154_v13 }
  0x61   : > { %8772 = vst [vmem:[#allocation9_spill] sm:$0xff] %v6164_v15 }
  0x62   : > { %521 = vrot.lane.b32.xlu1 %v6076_v56, %s5796_s24  ;;  %8773 = vst [vmem:[#allocation10_spill] sm:$0xff] %v6173_v22 }
  0x63   : > { %376 = vst.msk [vmem:[#allocation3 + $0x38] sm:$0xff] %vm304_vm2, %v6167_v17 }
  0x64   : > { %378 = vst.msk [vmem:[#allocation3 + $0x48] sm:$0xff] %vm304_vm2, %v6169_v18 }
  0x65   : > { %525 = vrot.lane.b32.xlu0 %v6086_v57, %s5796_s24  ;;  %380 = vst.msk [vmem:[#allocation3 + $0x58] sm:$0xff] %vm304_vm2, %v6176_v24 }
  0x66   : > { %8774 = vst [vmem:[#allocation11_spill] sm:$0xff] %v6188_v30 }
  0x67   : > { %523 = vrot.lane.b32.xlu2 %v6139_v6, %s5796_s24  ;;  %8775 = vst [vmem:[#allocation12_spill] sm:$0xff] %v6199_v37 }
  0x68   : > { %379 = vst.msk [vmem:[#allocation3 + $0x50] sm:$0xff] %vm304_vm2, %v6193_v34 }
  0x69   : > { %381 = vst.msk [vmem:[#allocation3 + $0x60] sm:$0xff] %vm304_vm2, %v6195_v36 }
  0x6a   : > { %527 = vrot.lane.b32.xlu1 %v6101_v59, %s5796_s24  ;;  %8776 = vst [vmem:[#allocation13_spill] sm:$0xff] %v6211_v43  ;;  %v6330_v59 = vld [vmem:[#allocation2 + $0x140] sm:$0xff]  ;;  %s5807_s24 = smov 64  }
  0x6b   : > { %383 = vst.msk [vmem:[#allocation3 + $0x70] sm:$0xff] %vm304_vm2, %v6204_v40 }
  0x6c   : > { %8777 = vst [vmem:[#allocation14_spill] sm:$0xff] %v6215_v58 }
  0x6d   : > { %660 = vrot.lane.b32.xlu0 %v595_v63, %s5797_s25  ;;  %v6222_v63 = vld [vmem:[#allocation2 + $0xb0] sm:$0xff]  ;;  %8778 = vst [vmem:[#allocation15_spill] sm:$0xff] %v6226_v3 }
  0x6e   : > { %382 = vst.msk [vmem:[#allocation3 + $0x68] sm:$0xff] %vm304_vm2, %v6220_v61 }
  0x6f   : > { %658 = vrot.lane.b32.xlu2 %v594_v14, %s5797_s25  ;;  %384 = vst.msk [vmem:[#allocation3 + $0x78] sm:$0xff] %vm304_vm2, %v6222_v63 }
  0x70   : > { %396 = vst.msk [vmem:[#allocation3 + $0xd8] sm:$0xff] %vm304_vm2, %v6330_v59 }
  0x72   : > { %662 = vrot.lane.b32.xlu1 %v6118_v0, %s5797_s25  ;;  %v6303_v0 = vld [vmem:[#allocation2 + $0x120] sm:$0xff] }
  0x73   : > { %393 = vst.msk [vmem:[#allocation3 + $0xc0] sm:$0xff] %vm304_vm2, %v6303_v0 }
  0x75   : > { %666 = vrot.lane.b32.xlu0 %v6128_v4, %s5797_s25  ;;  %v6357_v4 = vld [vmem:[#allocation2 + $0x168] sm:$0xff] }
  0x76   : > { %399 = vst.msk [vmem:[#allocation3 + $0xf0] sm:$0xff] %vm304_vm2, %v6357_v4 }
  0x77   : > { %664 = vrot.lane.b32.xlu2 %v6186_v25, %s5797_s25 }
  0x79   : > { %v474_v8 = vpop.permute.xlu2 %473 }
  0x7a   : > { %668 = vrot.lane.b32.xlu1 %v6141_v7, %s5797_s25  ;;  %566 = vst.msk [vmem:[#allocation3 + $0x20] sm:$0xff] %vm561_vm4, %v474_v8  ;;  %v6231_v8 = vld [vmem:[#allocation2 + $0xc8] sm:$0xff]  ;;  %v6292_v7 = vld [vmem:[#allocation2 + $0xb2] sm:$0xff] }
  0x7b   : > { %386 = vst.msk [vmem:[#allocation3 + $0x88] sm:$0xff] %vm304_vm2, %v6231_v8 }
  0x7c   : > { %8785 = vst [vmem:[#allocation22_spill] sm:$0xff] %v6292_v7 }
  0x7d   : > { %672 = vrot.lane.b32.xlu0 %v6151_v11, %s5797_s25  ;;  %v6328_v11 = vld [vmem:[#allocation2 + $0x128] sm:$0xff] }
  0x7e   : > { %394 = vst.msk [vmem:[#allocation3 + $0xc8] sm:$0xff] %vm304_vm2, %v6328_v11 }
  0x7f   : > { %670 = vrot.lane.b32.xlu2 %v6211_v43, %s5797_s25  ;;  %v6355_v43 = vld [vmem:[#allocation2 + $0x150] sm:$0xff] }
  0x80   : > { %397 = vst.msk [vmem:[#allocation3 + $0xe0] sm:$0xff] %vm304_vm2, %v6355_v43 }
  0x81   : > { %v476_v16 = vpop.permute.xlu2 %475 }
  0x82   : > { %674 = vrot.lane.b32.xlu1 %v6164_v15, %s5797_s25  ;;  %567 = vst.msk [vmem:[#allocation3 + $0x28] sm:$0xff] %vm561_vm4, %v476_v16  ;;  %v6238_v16 = vld [vmem:[#allocation2 + $0x6a] sm:$0xff]  ;;  %v6274_v15 = vld [vmem:[#allocation2 + $0xe0] sm:$0xff] }
  0x83   : > { %8779 = vst [vmem:[#allocation16_spill] sm:$0xff] %v6238_v16 }
  0x84   : > { %388 = vst.msk [vmem:[#allocation3 + $0x98] sm:$0xff] %vm304_vm2, %v6274_v15 }
  0x85   : > { %678 = vrot.lane.b32.xlu0 %v6173_v22, %s5797_s25  ;;  %v6301_v22 = vld [vmem:[#allocation2 + $0x108] sm:$0xff] }
  0x86   : > { %391 = vst.msk [vmem:[#allocation3 + $0xb0] sm:$0xff] %vm304_vm2, %v6301_v22 }
  0x87   : > { %v466_v28 = vpop.permute.xlu0 %465  ;;  %676 = vrot.lane.b32.xlu2 %v6238_v16, %s5797_s25 }
  0x88   : > { %562 = vst.msk [vmem:[#allocation3] sm:$0xff] %vm561_vm4, %v466_v28 }
  0x89   : > { %v482_v31 = vpop.permute.xlu2 %481 }
  0x8a   : > { %680 = vrot.lane.b32.xlu1 %v6188_v30, %s5797_s25  ;;  %570 = vst.msk [vmem:[#allocation3 + $0x40] sm:$0xff] %vm561_vm4, %v482_v31  ;;  %v6242_v31 = vld [vmem:[#allocation2 + $0xca] sm:$0xff]  ;;  %v6265_v30 = vld [vmem:[#allocation2 + $0x92] sm:$0xff] }
  0x8b   : > { %8780 = vst [vmem:[#allocation17_spill] sm:$0xff] %v6242_v31 }
  0x8c   : > { %v470_v42 = vpop.permute.xlu1 %469  ;;  %8782 = vst [vmem:[#allocation19_spill] sm:$0xff] %v6265_v30 }
  0x8d   : > { %684 = vrot.lane.b32.xlu0 %v6199_v37, %s5797_s25  ;;  %564 = vst.msk [vmem:[#allocation3 + $0x10] sm:$0xff] %vm561_vm4, %v470_v42  ;;  %v6276_v37 = vld [vmem:[#allocation2 + $0xf8] sm:$0xff] }
  0x8e   : > { %390 = vst.msk [vmem:[#allocation3 + $0xa8] sm:$0xff] %vm304_vm2, %v6276_v37 }
  0x8f   : > { %v468_v46 = vpop.permute.xlu0 %467  ;;  %682 = vrot.lane.b32.xlu2 %v6265_v30, %s5797_s25 }
  0x90   : > { %563 = vst.msk [vmem:[#allocation3 + $0x8] sm:$0xff] %vm561_vm4, %v468_v46  ;;  %v6247_v46 = vld [vmem:[#allocation2 + $0xc0] sm:$0xff] }
  0x91   : > { %v488_v60 = vpop.permute.xlu2 %487  ;;  %385 = vst.msk [vmem:[#allocation3 + $0x80] sm:$0xff] %vm304_vm2, %v6247_v46 }
  0x92   : > { %686 = vrot.lane.b32.xlu1 %v6215_v58, %s5797_s25  ;;  %573 = vst.msk [vmem:[#allocation3 + $0x58] sm:$0xff] %vm561_vm4, %v488_v60  ;;  %v6249_v60 = vld [vmem:[#allocation2 + $0xd8] sm:$0xff]  ;;  %v6258_v58 = vld [vmem:[#allocation2 + $0xf0] sm:$0xff] }
  0x93   : > { %387 = vst.msk [vmem:[#allocation3 + $0x90] sm:$0xff] %vm304_vm2, %v6249_v60 }
  0x94   : > { %v472_v14 = vpop.permute.xlu1 %471  ;;  %389 = vst.msk [vmem:[#allocation3 + $0xa0] sm:$0xff] %vm304_vm2, %v6258_v58 }
  0x95   : > { %690 = vrot.lane.b32.xlu0 %v6226_v3, %s5797_s25  ;;  %565 = vst.msk [vmem:[#allocation3 + $0x18] sm:$0xff] %vm561_vm4, %v472_v14  ;;  %v6253_v14 = vld [vmem:[#allocation2 + $0xe2] sm:$0xff] }
  0x96   : > { %8781 = vst [vmem:[#allocation18_spill] sm:$0xff] %v6253_v14 }
  0x97   : > { %v478_v28 = vpop.permute.xlu0 %477  ;;  %688 = vrot.lane.b32.xlu2 %v6292_v7, %s5797_s25  ;;  %v6319_v7 = vld [vmem:[#allocation2 + $0xda] sm:$0xff] }
  0x98   : > { %568 = vst.msk [vmem:[#allocation3 + $0x30] sm:$0xff] %vm561_vm4, %v478_v28 }
  0x99   : > { %v494_v42 = vpop.permute.xlu2 %493  ;;  %8788 = vst [vmem:[#allocation25_spill] sm:$0xff] %v6319_v7 }
  0x9a   : > { %692 = vrot.lane.b32.xlu1 %v6242_v31, %s5797_s25  ;;  %576 = vst.msk [vmem:[#allocation3 + $0x70] sm:$0xff] %vm561_vm4, %v494_v42  ;;  %v6269_v31 = vld [vmem:[#allocation2 + $0xf2] sm:$0xff] }
  0x9b   : > { %8783 = vst [vmem:[#allocation20_spill] sm:$0xff] %v6269_v31 }
  0x9c   : > { %v480_v28 = vpop.permute.xlu1 %479 }
  0x9d   : > { %696 = vrot.lane.b32.xlu0 %v6253_v14, %s5797_s25  ;;  %569 = vst.msk [vmem:[#allocation3 + $0x38] sm:$0xff] %vm561_vm4, %v480_v28  ;;  %v6280_v28 = vld [vmem:[#allocation2 + $0x10a] sm:$0xff] }
  0x9e   : > { %8784 = vst [vmem:[#allocation21_spill] sm:$0xff] %v6280_v28  ;;  %v6285_v14 = vld [vmem:[#allocation2 + $0x110] sm:$0xff] }
  0x9f   : > { %v484_v42 = vpop.permute.xlu0 %483  ;;  %392 = vst.msk [vmem:[#allocation3 + $0xb8] sm:$0xff] %vm304_vm2, %v6285_v14  ;;  %694 = vrot.lane.b32.xlu2 %v6319_v7, %s5797_s25  ;;  %v6346_v7 = vld [vmem:[#allocation2 + $0xfa] sm:$0xff] }
  0xa0   : > { %571 = vst.msk [vmem:[#allocation3 + $0x48] sm:$0xff] %vm561_vm4, %v484_v42 }
  0xa1   : > { %v500_v3 = vpop.permute.xlu2 %499  ;;  %8791 = vst [vmem:[#allocation28_spill] sm:$0xff] %v6346_v7 }
  0xa2   : > { %698 = vrot.lane.b32.xlu1 %v6269_v31, %s5797_s25  ;;  %579 = vst.msk [vmem:[#allocation3 + $0x88] sm:$0xff] %vm561_vm4, %v500_v3  ;;  %v6296_v31 = vld [vmem:[#allocation2 + $0x112] sm:$0xff] }
  0xa3   : > { %8786 = vst [vmem:[#allocation23_spill] sm:$0xff] %v6296_v31 }
  0xa4   : > { %v486_v42 = vpop.permute.xlu1 %485 }
  0xa5   : > { %702 = vrot.lane.b32.xlu0 %v6280_v28, %s5797_s25  ;;  %572 = vst.msk [vmem:[#allocation3 + $0x50] sm:$0xff] %vm561_vm4, %v486_v42  ;;  %v6307_v42 = vld [vmem:[#allocation2 + $0x12a] sm:$0xff]  ;;  %v6312_v28 = vld [vmem:[#allocation2 + $0x138] sm:$0xff] }
  0xa6   : > { %8787 = vst [vmem:[#allocation24_spill] sm:$0xff] %v6307_v42 }
  0xa7   : > { %v490_v3 = vpop.permute.xlu0 %489  ;;  %395 = vst.msk [vmem:[#allocation3 + $0xd0] sm:$0xff] %vm304_vm2, %v6312_v28  ;;  %700 = vrot.lane.b32.xlu2 %v6346_v7, %s5797_s25 }
  0xa8   : > { %574 = vst.msk [vmem:[#allocation3 + $0x60] sm:$0xff] %vm561_vm4, %v490_v3 }
  0xa9   : > { %v506_v30 = vpop.permute.xlu2 %505 }
  0xaa   : > { %704 = vrot.lane.b32.xlu1 %v6296_v31, %s5797_s25  ;;  %582 = vst.msk [vmem:[#allocation3 + $0xa0] sm:$0xff] %vm561_vm4, %v506_v30  ;;  %v6323_v31 = vld [vmem:[#allocation2 + $0x13a] sm:$0xff] }
  0xab   : > { %8789 = vst [vmem:[#allocation26_spill] sm:$0xff] %v6323_v31 }
  0xac   : > { %v492_v3 = vpop.permute.xlu1 %491 }
  0xad   : > { %708 = vrot.lane.b32.xlu0 %v6307_v42, %s5797_s25  ;;  %575 = vst.msk [vmem:[#allocation3 + $0x68] sm:$0xff] %vm561_vm4, %v492_v3  ;;  %v6334_v3 = vld [vmem:[#allocation2 + $0x152] sm:$0xff] }
  0xae   : > { %8790 = vst [vmem:[#allocation27_spill] sm:$0xff] %v6334_v3  ;;  %v6339_v42 = vld [vmem:[#allocation2 + $0x158] sm:$0xff] }
  0xaf   : > { %v496_v30 = vpop.permute.xlu0 %495  ;;  %398 = vst.msk [vmem:[#allocation3 + $0xe8] sm:$0xff] %vm304_vm2, %v6339_v42 }
  0xb0   : > { %577 = vst.msk [vmem:[#allocation3 + $0x78] sm:$0xff] %vm561_vm4, %v496_v30 }
  0xb1   : > { %v512_v16 = vpop.permute.xlu2 %511 }
  0xb2   : > { %710 = vrot.lane.b32.xlu1 %v6323_v31, %s5797_s25  ;;  %585 = vst.msk [vmem:[#allocation3 + $0xb8] sm:$0xff] %vm561_vm4, %v512_v16  ;;  %v6350_v31 = vld [vmem:[#allocation2 + $0x15a] sm:$0xff] }
  0xb3   : > { %8792 = vst [vmem:[#allocation29_spill] sm:$0xff] %v6350_v31 }
  0xb4   : > { %v498_v30 = vpop.permute.xlu1 %497 }
  0xb5   : > { %714 = vrot.lane.b32.xlu0 %v6334_v3, %s5797_s25  ;;  %578 = vst.msk [vmem:[#allocation3 + $0x80] sm:$0xff] %vm561_vm4, %v498_v30  ;;  %v6361_v30 = vld [vmem:[#allocation2 + $0x172] sm:$0xff] }
  0xb6   : > { %8793 = vst [vmem:[#allocation30_spill] sm:$0xff] %v6361_v30 }
  0xb7   : > { %v502_v16 = vpop.permute.xlu0 %501 }
  0xb8   : > { %580 = vst.msk [vmem:[#allocation3 + $0x90] sm:$0xff] %vm561_vm4, %v502_v16  ;;  %v6370_v16 = vld [vmem:[#allocation2 + $0x122] sm:$0xff] }
  0xb9   : > { %8794 = vst [vmem:[#allocation31_spill] sm:$0xff] %v6370_v16  ;;  %706 = vrot.lane.b32.xlu2 %v6370_v16, %s5797_s25 }
  0xba   : > { %716 = vrot.lane.b32.xlu1 %v6350_v31, %s5797_s25  ;;  %v6375_v31 = vld [vmem:[#allocation2 + $0x170] sm:$0xff] }
  0xbb   : > { %400 = vst.msk [vmem:[#allocation3 + $0xf8] sm:$0xff] %vm304_vm2, %v6375_v31 }
  0xbc   : > { %v504_v3 = vpop.permute.xlu1 %503 }
  0xbd   : > { %720 = vrot.lane.b32.xlu0 %v6361_v30, %s5797_s25  ;;  %581 = vst.msk [vmem:[#allocation3 + $0x98] sm:$0xff] %vm561_vm4, %v504_v3  ;;  %v6384_v3 = vld [vmem:[#allocation2 + $0x142] sm:$0xff] }
  0xbf   : > { %v508_v7 = vpop.permute.xlu0 %507 }
  0xc0   : > { %583 = vst.msk [vmem:[#allocation3 + $0xa8] sm:$0xff] %vm561_vm4, %v508_v7 }
  0xc1   : > { %712 = vrot.lane.b32.xlu2 %v6384_v3, %s5797_s25 }
  0xc2   : > { %851 = vrot.lane.b32.xlu1 %v6124_v2, %s5798_s26  ;;  %v518_v2 = vpop.permute.xlu2 %517 }
  0xc3   : > { %588 = vst.msk [vmem:[#allocation3 + $0xd0] sm:$0xff] %vm561_vm4, %v518_v2 }
  0xc4   : > { %v510_v30 = vpop.permute.xlu1 %509 }
  0xc5   : > { %855 = vrot.lane.b32.xlu0 %v6109_v62, %s5798_s26  ;;  %584 = vst.msk [vmem:[#allocation3 + $0xb0] sm:$0xff] %vm561_vm4, %v510_v30  ;;  %v6395_v62 = vld [vmem:[#allocation2 + $0x16a] sm:$0xff] }
  0xc7   : > { %v514_v7 = vpop.permute.xlu0 %513 }
  0xc8   : > { %586 = vst.msk [vmem:[#allocation3 + $0xc0] sm:$0xff] %vm561_vm4, %v514_v7 }
  0xc9   : > { %718 = vrot.lane.b32.xlu2 %v6395_v62, %s5797_s25 }
  0xca   : > { %857 = vrot.lane.b32.xlu1 %v6132_v5, %s5798_s26  ;;  %v524_v5 = vpop.permute.xlu2 %523 }
  0xcb   : > { %591 = vst.msk [vmem:[#allocation3 + $0xe8] sm:$0xff] %vm561_vm4, %v524_v5 }
  0xcc   : > { %v516_v16 = vpop.permute.xlu1 %515 }
  0xcd   : > { %861 = vrot.lane.b32.xlu0 %v6167_v17, %s5798_s26  ;;  %587 = vst.msk [vmem:[#allocation3 + $0xc8] sm:$0xff] %vm561_vm4, %v516_v16 }
  0xcf   : > { %v520_v30 = vpop.permute.xlu0 %519 }
  0xd0   : > { %589 = vst.msk [vmem:[#allocation3 + $0xd8] sm:$0xff] %vm561_vm4, %v520_v30 }
  0xd1   : > { %853 = vrot.lane.b32.xlu2 %v6145_v9, %s5798_s26 }
  0xd2   : > { %863 = vrot.lane.b32.xlu1 %v6154_v13, %s5798_s26  ;;  %v659_v13 = vpop.permute.xlu2 %658 }
  0xd3   : > { %755 = vst.msk [vmem:[#allocation3] sm:$0xff] %vm754_vm5, %v659_v13 }
  0xd4   : > { %v522_v7 = vpop.permute.xlu1 %521 }
  0xd5   : > { %867 = vrot.lane.b32.xlu0 %v6193_v34, %s5798_s26  ;;  %590 = vst.msk [vmem:[#allocation3 + $0xe0] sm:$0xff] %vm561_vm4, %v522_v7 }
  0xd7   : > { %v526_v16 = vpop.permute.xlu0 %525 }
  0xd8   : > { %592 = vst.msk [vmem:[#allocation3 + $0xf0] sm:$0xff] %vm561_vm4, %v526_v16  ;;  %v301_v16 = vld [vmem:[%s5860_s23 + $0xf0] sm:$0xff] }
  0xd9   : > { %859 = vrot.lane.b32.xlu2 %v6147_v10, %s5798_s26  ;;  %335 = vst.msk [vmem:[#allocation2 + $0x181] sm:$0xff] %vm304_vm2, %v301_v16 }
  0xda   : > { %869 = vrot.lane.b32.xlu1 %v6176_v24, %s5798_s26  ;;  %v665_v9 = vpop.permute.xlu2 %664 }
  0xdb   : > { %758 = vst.msk [vmem:[#allocation3 + $0x18] sm:$0xff] %vm754_vm5, %v665_v9 }
  0xdc   : > { %v528_v2 = vpop.permute.xlu1 %527 }
  0xdd   : > { %873 = vrot.lane.b32.xlu0 %v6220_v61, %s5798_s26  ;;  %593 = vst.msk [vmem:[#allocation3 + $0xf8] sm:$0xff] %vm561_vm4, %v528_v2  ;;  %vm3261_vm4 = vcmask 392512  }
  0xdf   : > { %v661_v30 = vpop.permute.xlu0 %660 }
  0xe0   : > { %756 = vst.msk [vmem:[#allocation3 + $0x8] sm:$0xff] %vm754_vm5, %v661_v30 }
  0xe1   : > { %865 = vrot.lane.b32.xlu2 %v6169_v18, %s5798_s26 }
  0xe2   : > { %875 = vrot.lane.b32.xlu1 %v6204_v40, %s5798_s26  ;;  %v671_v7 = vpop.permute.xlu2 %670 }
  0xe3   : > { %761 = vst.msk [vmem:[#allocation3 + $0x30] sm:$0xff] %vm754_vm5, %v671_v7 }
  0xe4   : > { %v663_v24 = vpop.permute.xlu1 %662 }
  0xe5   : > { %879 = vrot.lane.b32.xlu0 %v6247_v46, %s5798_s26  ;;  %757 = vst.msk [vmem:[#allocation3 + $0x10] sm:$0xff] %vm754_vm5, %v663_v24 }
  0xe7   : > { %v667_v5 = vpop.permute.xlu0 %666 }
  0xe8   : > { %759 = vst.msk [vmem:[#allocation3 + $0x20] sm:$0xff] %vm754_vm5, %v667_v5  ;;  %v302_v5 = vld [vmem:[%s5860_s23 + $0xf8] sm:$0xff]  ;;  %s5806_s23 = smov 56  }
  0xe9   : > { %871 = vrot.lane.b32.xlu2 %v6195_v36, %s5798_s26  ;;  %336 = vst.msk [vmem:[#allocation2 + $0x189] sm:$0xff] %vm304_vm2, %v302_v5  ;;  %vm2875_vm2 = vcmask 261312  }
  0xea   : > { %881 = vrot.lane.b32.xlu1 %v6231_v8, %s5798_s26  ;;  %v677_v8 = vpop.permute.xlu2 %676 }
  0xeb   : > { %764 = vst.msk [vmem:[#allocation3 + $0x48] sm:$0xff] %vm754_vm5, %v677_v8 }
  0xec   : > { %v669_v40 = vpop.permute.xlu1 %668 }
  0xed   : > { %885 = vrot.lane.b32.xlu0 %v6274_v15, %s5798_s26  ;;  %760 = vst.msk [vmem:[#allocation3 + $0x28] sm:$0xff] %vm754_vm5, %v669_v40 }
  0xef   : > { %v673_v13 = vpop.permute.xlu0 %672 }
  0xf0   : > { %762 = vst.msk [vmem:[#allocation3 + $0x38] sm:$0xff] %vm754_vm5, %v673_v13 }
  0xf1   : > { %877 = vrot.lane.b32.xlu2 %v6222_v63, %s5798_s26 }
  0xf2   : > { %887 = vrot.lane.b32.xlu1 %v6258_v58, %s5798_s26  ;;  %v683_v58 = vpop.permute.xlu2 %682 }
  0xf3   : > { %767 = vst.msk [vmem:[#allocation3 + $0x60] sm:$0xff] %vm754_vm5, %v683_v58 }
  0xf4   : > { %v675_v2 = vpop.permute.xlu1 %674 }
  0xf5   : > { %891 = vrot.lane.b32.xlu0 %v6301_v22, %s5798_s26  ;;  %763 = vst.msk [vmem:[#allocation3 + $0x40] sm:$0xff] %vm754_vm5, %v675_v2  ;;  %v6473_v2 = vld [vmem:[#allocation2 + $0x180] sm:$0xff] }
  0xf7   : > { %v679_v30 = vpop.permute.xlu0 %678 }
  0xf8   : > { %765 = vst.msk [vmem:[#allocation3 + $0x50] sm:$0xff] %vm754_vm5, %v679_v30 }
  0xf9   : > { %883 = vrot.lane.b32.xlu2 %v6249_v60, %s5798_s26 }
  0xfa   : > { %893 = vrot.lane.b32.xlu1 %v6285_v14, %s5798_s26  ;;  %v689_v14 = vpop.permute.xlu2 %688 }
  0xfb   : > { %770 = vst.msk [vmem:[#allocation3 + $0x78] sm:$0xff] %vm754_vm5, %v689_v14 }
  0xfc   : > { %v681_v9 = vpop.permute.xlu1 %680 }
  0xfd   : > { %897 = vrot.lane.b32.xlu0 %v6328_v11, %s5798_s26  ;;  %766 = vst.msk [vmem:[#allocation3 + $0x58] sm:$0xff] %vm754_vm5, %v681_v9 }
  0xff   : > { %v685_v24 = vpop.permute.xlu0 %684 }
 0x100   : > { %768 = vst.msk [vmem:[#allocation3 + $0x68] sm:$0xff] %vm754_vm5, %v685_v24 }
 0x101   : > { %889 = vrot.lane.b32.xlu2 %v6276_v37, %s5798_s26 }
 0x102   : > { %899 = vrot.lane.b32.xlu1 %v6312_v28, %s5798_s26  ;;  %v695_v16 = vpop.permute.xlu2 %694 }
 0x103   : > { %773 = vst.msk [vmem:[#allocation3 + $0x90] sm:$0xff] %vm754_vm5, %v695_v16 }
 0x104   : > { %v687_v7 = vpop.permute.xlu1 %686 }
 0x105   : > { %903 = vrot.lane.b32.xlu0 %v6355_v43, %s5798_s26  ;;  %769 = vst.msk [vmem:[#allocation3 + $0x70] sm:$0xff] %vm754_vm5, %v687_v7 }
 0x107   : > { %v691_v40 = vpop.permute.xlu0 %690 }
 0x108   : > { %771 = vst.msk [vmem:[#allocation3 + $0x80] sm:$0xff] %vm754_vm5, %v691_v40 }
 0x109   : > { %895 = vrot.lane.b32.xlu2 %v6303_v0, %s5798_s26 }
 0x10a   : > { %905 = vrot.lane.b32.xlu1 %v6339_v42, %s5798_s26  ;;  %v701_v30 = vpop.permute.xlu2 %700 }
 0x10b   : > { %776 = vst.msk [vmem:[#allocation3 + $0xa8] sm:$0xff] %vm754_vm5, %v701_v30 }
 0x10c   : > { %v693_v13 = vpop.permute.xlu1 %692 }
 0x10d   : > { %909 = vrot.lane.b32.xlu0 %v6375_v31, %s5798_s26  ;;  %772 = vst.msk [vmem:[#allocation3 + $0x88] sm:$0xff] %vm754_vm5, %v693_v13 }
 0x10f   : > { %v697_v8 = vpop.permute.xlu0 %696 }
 0x110   : > { %774 = vst.msk [vmem:[#allocation3 + $0x98] sm:$0xff] %vm754_vm5, %v697_v8  ;;  %v6578_v8 = vld [vmem:[#allocation2 + $0x189] sm:$0xff] }
 0x111   : > { %901 = vrot.lane.b32.xlu2 %v6330_v59, %s5798_s26 }
 0x112   : > { %911 = vrot.lane.b32.xlu1 %v6473_v2, %s5798_s26 }
 0x113   : > { %v707_v24 = vpop.permute.xlu2 %706 }
 0x114   : > { %v699_v58 = vpop.permute.xlu1 %698  ;;  %779 = vst.msk [vmem:[#allocation3 + $0xc0] sm:$0xff] %vm754_vm5, %v707_v24  ;;  %v8796_v24 = vld [vmem:[#allocation13_spill] sm:$0xff] }
 0x115   : > { %1044 = vrot.lane.b32.xlu0 %v5884_v12, %s5799_s27  ;;  %775 = vst.msk [vmem:[#allocation3 + $0xa0] sm:$0xff] %vm754_vm5, %v699_v58 }
 0x117   : > { %v703_v9 = vpop.permute.xlu0 %702 }
 0x118   : > { %777 = vst.msk [vmem:[#allocation3 + $0xb0] sm:$0xff] %vm754_vm5, %v703_v9 }
 0x119   : > { %907 = vrot.lane.b32.xlu2 %v6357_v4, %s5798_s26 }
 0x11a   : > { %1046 = vrot.lane.b32.xlu1 %v5902_v20, %s5799_s27 }
 0x11b   : > { %v713_v14 = vpop.permute.xlu2 %712 }
 0x11c   : > { %v705_v5 = vpop.permute.xlu1 %704  ;;  %782 = vst.msk [vmem:[#allocation3 + $0xd8] sm:$0xff] %vm754_vm5, %v713_v14 }
 0x11d   : > { %1050 = vrot.lane.b32.xlu0 %v5914_v23, %s5799_s27  ;;  %778 = vst.msk [vmem:[#allocation3 + $0xb8] sm:$0xff] %vm754_vm5, %v705_v5  ;;  %v6502_v23 = vld [vmem:[#allocation2 + $0x188] sm:$0xff]  ;;  %v8797_v5 = vld [vmem:[#allocation4_spill] sm:$0xff] }
 0x11f   : > { %v709_v12 = vpop.permute.xlu0 %708 }
 0x120   : > { %780 = vst.msk [vmem:[#allocation3 + $0xc8] sm:$0xff] %vm754_vm5, %v709_v12 }
 0x121   : > { %913 = vrot.lane.b32.xlu2 %v6502_v23, %s5798_s26 }
 0x122   : > { %1052 = vrot.lane.b32.xlu1 %v5910_v21, %s5799_s27 }
 0x123   : > { %v719_v21 = vpop.permute.xlu2 %718 }
 0x124   : > { %v711_v20 = vpop.permute.xlu1 %710  ;;  %785 = vst.msk [vmem:[#allocation3 + $0xf0] sm:$0xff] %vm754_vm5, %v719_v21  ;;  %v8800_v21 = vld [vmem:[#allocation5_spill] sm:$0xff] }
 0x125   : > { %1056 = vrot.lane.b32.xlu0 %v5932_v29, %s5799_s27  ;;  %781 = vst.msk [vmem:[#allocation3 + $0xd0] sm:$0xff] %vm754_vm5, %v711_v20  ;;  %v8799_v20 = vld [vmem:[#allocation16_spill] sm:$0xff] }
 0x127   : > { %v715_v7 = vpop.permute.xlu0 %714 }
 0x128   : > { %783 = vst.msk [vmem:[#allocation3 + $0xe0] sm:$0xff] %vm754_vm5, %v715_v7 }
 0x129   : > { %1048 = vrot.lane.b32.xlu2 %v5899_v19, %s5799_s27 }
 0x12a   : > { %1058 = vrot.lane.b32.xlu1 %v5928_v27, %s5799_s27 }
 0x12b   : > { %v854_v27 = vpop.permute.xlu2 %853 }
 0x12c   : > { %v717_v40 = vpop.permute.xlu1 %716  ;;  %949 = vst.msk [vmem:[#allocation3 + $0x8] sm:$0xff] %vm947_vm6, %v854_v27 }
 0x12d   : > { %1062 = vrot.lane.b32.xlu0 %v5950_v35, %s5799_s27  ;;  %784 = vst.msk [vmem:[#allocation3 + $0xe8] sm:$0xff] %vm754_vm5, %v717_v40  ;;  %v8801_v40 = vld [vmem:[#allocation10_spill] sm:$0xff] }
 0x12f   : > { %v721_v29 = vpop.permute.xlu0 %720 }
 0x130   : > { %786 = vst.msk [vmem:[#allocation3 + $0xf8] sm:$0xff] %vm754_vm5, %v721_v29  ;;  %vm3454_vm5 = vcmask 458112  }
 0x131   : > { %1054 = vrot.lane.b32.xlu2 %v5922_v26, %s5799_s27 }
 0x132   : > { %1064 = vrot.lane.b32.xlu1 %v5946_v33, %s5799_s27 }
 0x133   : > { %v860_v19 = vpop.permute.xlu2 %859 }
 0x134   : > { %v852_v16 = vpop.permute.xlu1 %851  ;;  %952 = vst.msk [vmem:[#allocation3 + $0x20] sm:$0xff] %vm947_vm6, %v860_v19  ;;  %v8803_v19 = vld [vmem:[#allocation7_spill] sm:$0xff] }
 0x135   : > { %1068 = vrot.lane.b32.xlu0 %v5968_v41, %s5799_s27  ;;  %948 = vst.msk [vmem:[#allocation3] sm:$0xff] %vm947_vm6, %v852_v16  ;;  %v8802_v16 = vld [vmem:[#allocation19_spill] sm:$0xff] }
 0x137   : > { %v856_v35 = vpop.permute.xlu0 %855 }
 0x138   : > { %950 = vst.msk [vmem:[#allocation3 + $0x10] sm:$0xff] %vm947_vm6, %v856_v35 }
 0x139   : > { %1060 = vrot.lane.b32.xlu2 %v5940_v32, %s5799_s27 }
 0x13a   : > { %1070 = vrot.lane.b32.xlu1 %v5964_v39, %s5799_s27 }
 0x13b   : > { %v866_v26 = vpop.permute.xlu2 %865 }
 0x13c   : > { %v858_v33 = vpop.permute.xlu1 %857  ;;  %955 = vst.msk [vmem:[#allocation3 + $0x38] sm:$0xff] %vm947_vm6, %v866_v26 }
 0x13d   : > { %1074 = vrot.lane.b32.xlu0 %v5986_v47, %s5799_s27  ;;  %951 = vst.msk [vmem:[#allocation3 + $0x18] sm:$0xff] %vm947_vm6, %v858_v33  ;;  %v8804_v33 = vld [vmem:[#allocation12_spill] sm:$0xff] }
 0x13f   : > { %v862_v41 = vpop.permute.xlu0 %861 }
 0x140   : > { %953 = vst.msk [vmem:[#allocation3 + $0x28] sm:$0xff] %vm947_vm6, %v862_v41 }
 0x141   : > { %1066 = vrot.lane.b32.xlu2 %v5958_v38, %s5799_s27 }
 0x142   : > { %1076 = vrot.lane.b32.xlu1 %v5982_v45, %s5799_s27 }
 0x143   : > { %v872_v32 = vpop.permute.xlu2 %871 }
 0x144   : > { %v864_v39 = vpop.permute.xlu1 %863  ;;  %958 = vst.msk [vmem:[#allocation3 + $0x50] sm:$0xff] %vm947_vm6, %v872_v32  ;;  %v8806_v32 = vld [vmem:[#allocation9_spill] sm:$0xff] }
 0x145   : > { %1080 = vrot.lane.b32.xlu0 %v6012_v50, %s5799_s27  ;;  %954 = vst.msk [vmem:[#allocation3 + $0x30] sm:$0xff] %vm947_vm6, %v864_v39  ;;  %v8805_v39 = vld [vmem:[#allocation22_spill] sm:$0xff] }
 0x147   : > { %v868_v47 = vpop.permute.xlu0 %867 }
 0x148   : > { %956 = vst.msk [vmem:[#allocation3 + $0x40] sm:$0xff] %vm947_vm6, %v868_v47 }
 0x149   : > { %1072 = vrot.lane.b32.xlu2 %v5976_v44, %s5799_s27 }
 0x14a   : > { %1082 = vrot.lane.b32.xlu1 %v6006_v49, %s5799_s27 }
 0x14b   : > { %v878_v38 = vpop.permute.xlu2 %877 }
 0x14c   : > { %v870_v45 = vpop.permute.xlu1 %869  ;;  %961 = vst.msk [vmem:[#allocation3 + $0x68] sm:$0xff] %vm947_vm6, %v878_v38 }
 0x14d   : > { %1086 = vrot.lane.b32.xlu0 %v6040_v53, %s5799_s27  ;;  %957 = vst.msk [vmem:[#allocation3 + $0x48] sm:$0xff] %vm947_vm6, %v870_v45  ;;  %v8807_v45 = vld [vmem:[#allocation15_spill] sm:$0xff] }
 0x14f   : > { %v874_v50 = vpop.permute.xlu0 %873 }
 0x150   : > { %959 = vst.msk [vmem:[#allocation3 + $0x58] sm:$0xff] %vm947_vm6, %v874_v50 }
 0x151   : > { %1078 = vrot.lane.b32.xlu2 %v5994_v48, %s5799_s27  ;;  %v6572_v48 = vld [vmem:[#allocation2 + $0x181] sm:$0xff] }
 0x152   : > { %1088 = vrot.lane.b32.xlu1 %v6034_v52, %s5799_s27 }
 0x153   : > { %v884_v44 = vpop.permute.xlu2 %883 }
 0x154   : > { %v876_v49 = vpop.permute.xlu1 %875  ;;  %964 = vst.msk [vmem:[#allocation3 + $0x80] sm:$0xff] %vm947_vm6, %v884_v44  ;;  %v8809_v44 = vld [vmem:[#allocation11_spill] sm:$0xff] }
 0x155   : > { %1092 = vrot.lane.b32.xlu0 %v6120_v1, %s5799_s27  ;;  %960 = vst.msk [vmem:[#allocation3 + $0x60] sm:$0xff] %vm947_vm6, %v876_v49  ;;  %v8808_v49 = vld [vmem:[#allocation25_spill] sm:$0xff] }
 0x157   : > { %v880_v53 = vpop.permute.xlu0 %879 }
 0x158   : > { %962 = vst.msk [vmem:[#allocation3 + $0x70] sm:$0xff] %vm947_vm6, %v880_v53 }
 0x159   : > { %1084 = vrot.lane.b32.xlu2 %v6022_v51, %s5799_s27 }
 0x15a   : > { %1094 = vrot.lane.b32.xlu1 %v6062_v55, %s5799_s27 }
 0x15b   : > { %v890_v55 = vpop.permute.xlu2 %889 }
 0x15c   : > { %v882_v52 = vpop.permute.xlu1 %881  ;;  %967 = vst.msk [vmem:[#allocation3 + $0x98] sm:$0xff] %vm947_vm6, %v890_v55 }
 0x15d   : > { %1098 = vrot.lane.b32.xlu0 %v6139_v6, %s5799_s27  ;;  %963 = vst.msk [vmem:[#allocation3 + $0x78] sm:$0xff] %vm947_vm6, %v882_v52  ;;  %v8810_v52 = vld [vmem:[#allocation18_spill] sm:$0xff] }
 0x15f   : > { %v886_v1 = vpop.permute.xlu0 %885 }
 0x160   : > { %965 = vst.msk [vmem:[#allocation3 + $0x88] sm:$0xff] %vm947_vm6, %v886_v1 }
 0x161   : > { %1090 = vrot.lane.b32.xlu2 %v6050_v54, %s5799_s27  ;;  %v8795_v54 = vld [vmem:[#allocation6_spill] sm:$0xff] }
 0x162   : > { %1100 = vrot.lane.b32.xlu1 %v6086_v57, %s5799_s27 }
 0x163   : > { %v896_v51 = vpop.permute.xlu2 %895 }
 0x164   : > { %v888_v13 = vpop.permute.xlu1 %887  ;;  %970 = vst.msk [vmem:[#allocation3 + $0xb0] sm:$0xff] %vm947_vm6, %v896_v51  ;;  %v8812_v51 = vld [vmem:[#allocation14_spill] sm:$0xff] }
 0x165   : > { %1104 = vrot.lane.b32.xlu0 %v6572_v48, %s5799_s27  ;;  %966 = vst.msk [vmem:[#allocation3 + $0x90] sm:$0xff] %vm947_vm6, %v888_v13  ;;  %v8811_v13 = vld [vmem:[#allocation28_spill] sm:$0xff] }
 0x167   : > { %v892_v6 = vpop.permute.xlu0 %891 }
 0x168   : > { %968 = vst.msk [vmem:[#allocation3 + $0xa0] sm:$0xff] %vm947_vm6, %v892_v6 }
 0x169   : > { %1096 = vrot.lane.b32.xlu2 %v6076_v56, %s5799_s27  ;;  %v8798_v56 = vld [vmem:[#allocation8_spill] sm:$0xff] }
 0x16a   : > { %1106 = vrot.lane.b32.xlu1 %v6578_v8, %s5799_s27 }
 0x16b   : > { %v902_v58 = vpop.permute.xlu2 %901 }
 0x16c   : > { %v894_v57 = vpop.permute.xlu1 %893  ;;  %973 = vst.msk [vmem:[#allocation3 + $0xc8] sm:$0xff] %vm947_vm6, %v902_v58  ;;  %v8814_v58 = vld [vmem:[#allocation31_spill] sm:$0xff] }
 0x16d   : > { %1239 = vrot.lane.b32.xlu0 %v6186_v25, %s5800_s28  ;;  %969 = vst.msk [vmem:[#allocation3 + $0xa8] sm:$0xff] %vm947_vm6, %v894_v57  ;;  %v8813_v57 = vld [vmem:[#allocation21_spill] sm:$0xff] }
 0x16f   : > { %v898_v30 = vpop.permute.xlu0 %897 }
 0x170   : > { %971 = vst.msk [vmem:[#allocation3 + $0xb8] sm:$0xff] %vm947_vm6, %v898_v30 }
 0x171   : > { %1102 = vrot.lane.b32.xlu2 %v8797_v5, %s5799_s27 }
 0x172   : > { %1241 = vrot.lane.b32.xlu1 %v8795_v54, %s5800_s28 }
 0x173   : > { %v908_v12 = vpop.permute.xlu2 %907 }
 0x174   : > { %v900_v9 = vpop.permute.xlu1 %899  ;;  %976 = vst.msk [vmem:[#allocation3 + $0xe0] sm:$0xff] %vm947_vm6, %v908_v12 }
 0x175   : > { %1245 = vrot.lane.b32.xlu0 %v8796_v24, %s5800_s28  ;;  %972 = vst.msk [vmem:[#allocation3 + $0xc0] sm:$0xff] %vm947_vm6, %v900_v9  ;;  %v8815_v24 = vld [vmem:[#allocation17_spill] sm:$0xff] }
 0x177   : > { %v904_v25 = vpop.permute.xlu0 %903 }
 0x178   : > { %974 = vst.msk [vmem:[#allocation3 + $0xd0] sm:$0xff] %vm947_vm6, %v904_v25  ;;  %v8816_v25 = vld [vmem:[#allocation24_spill] sm:$0xff] }
 0x179   : > { %1237 = vrot.lane.b32.xlu2 %v8800_v21, %s5800_s28 }
 0x17a   : > { %1247 = vrot.lane.b32.xlu1 %v8798_v56, %s5800_s28 }
 0x17b   : > { %v914_v29 = vpop.permute.xlu2 %913 }
 0x17c   : > { %v906_v14 = vpop.permute.xlu1 %905  ;;  %979 = vst.msk [vmem:[#allocation3 + $0xf8] sm:$0xff] %vm947_vm6, %v914_v29  ;;  %v8820_v29 = vld [vmem:[#allocation30_spill] sm:$0xff] }
 0x17d   : > { %1251 = vrot.lane.b32.xlu0 %v8799_v20, %s5800_s28  ;;  %975 = vst.msk [vmem:[#allocation3 + $0xd8] sm:$0xff] %vm947_vm6, %v906_v14  ;;  %v8817_v14 = vld [vmem:[#allocation20_spill] sm:$0xff]  ;;  %v8818_v20 = vld [vmem:[#allocation27_spill] sm:$0xff] }
 0x17f   : > { %v910_v7 = vpop.permute.xlu0 %909 }
 0x180   : > { %977 = vst.msk [vmem:[#allocation3 + $0xe8] sm:$0xff] %vm947_vm6, %v910_v7 }
 0x181   : > { %1243 = vrot.lane.b32.xlu2 %v8803_v19, %s5800_s28  ;;  %v1367_v19 = vld [vmem:[#allocation2 + $0x30] sm:$0xff] }
 0x182   : > { %1253 = vrot.lane.b32.xlu1 %v8801_v40, %s5800_s28  ;;  %v8819_v40 = vld [vmem:[#allocation23_spill] sm:$0xff] }
 0x183   : > { %v1049_v41 = vpop.permute.xlu2 %1048 }
 0x184   : > { %v912_v27 = vpop.permute.xlu1 %911  ;;  %1143 = vst.msk [vmem:[#allocation3 + $0x10] sm:$0xff] %vm1140_vm7, %v1049_v41 }
 0x185   : > { %1257 = vrot.lane.b32.xlu0 %v8802_v16, %s5800_s28  ;;  %978 = vst.msk [vmem:[#allocation3 + $0xf0] sm:$0xff] %vm947_vm6, %v912_v27  ;;  %v6675_v27 = vld [vmem:[#allocation2 + $0x18a] sm:$0xff]  ;;  %vm3647_vm6 = vcmask 523712  }
 0x187   : > { %v1045_v35 = vpop.permute.xlu0 %1044 }
 0x188   : > { %1141 = vst.msk [vmem:[#allocation3] sm:$0xff] %vm1140_vm7, %v1045_v35 }
 0x189   : > { %1249 = vrot.lane.b32.xlu2 %v8806_v32, %s5800_s28 }
 0x18a   : > { %1259 = vrot.lane.b32.xlu1 %v8804_v33, %s5800_s28  ;;  %v8821_v33 = vld [vmem:[#allocation26_spill] sm:$0xff] }
 0x18b   : > { %v1055_v50 = vpop.permute.xlu2 %1054 }
 0x18c   : > { %v1047_v26 = vpop.permute.xlu1 %1046  ;;  %1146 = vst.msk [vmem:[#allocation3 + $0x28] sm:$0xff] %vm1140_vm7, %v1055_v50 }
 0x18d   : > { %1263 = vrot.lane.b32.xlu0 %v8805_v39, %s5800_s28  ;;  %1142 = vst.msk [vmem:[#allocation3 + $0x8] sm:$0xff] %vm1140_vm7, %v1047_v26 }
 0x18f   : > { %v1051_v47 = vpop.permute.xlu0 %1050 }
 0x190   : > { %1144 = vst.msk [vmem:[#allocation3 + $0x18] sm:$0xff] %vm1140_vm7, %v1051_v47  ;;  %v8822_v47 = vld [vmem:[#allocation29_spill] sm:$0xff] }
 0x191   : > { %1255 = vrot.lane.b32.xlu2 %v8809_v44, %s5800_s28 }
 0x192   : > { %1265 = vrot.lane.b32.xlu1 %v8807_v45, %s5800_s28 }
 0x193   : > { %v1061_v1 = vpop.permute.xlu2 %1060 }
 0x194   : > { %v1053_v38 = vpop.permute.xlu1 %1052  ;;  %1149 = vst.msk [vmem:[#allocation3 + $0x40] sm:$0xff] %vm1140_vm7, %v1061_v1 }
 0x195   : > { %1269 = vrot.lane.b32.xlu0 %v8808_v49, %s5800_s28  ;;  %1145 = vst.msk [vmem:[#allocation3 + $0x20] sm:$0xff] %vm1140_vm7, %v1053_v38 }
 0x197   : > { %v1057_v53 = vpop.permute.xlu0 %1056 }
 0x198   : > { %1147 = vst.msk [vmem:[#allocation3 + $0x30] sm:$0xff] %vm1140_vm7, %v1057_v53 }
 0x199   : > { %1261 = vrot.lane.b32.xlu2 %v8812_v51, %s5800_s28 }
 0x19a   : > { %1271 = vrot.lane.b32.xlu1 %v8810_v52, %s5800_s28 }
 0x19b   : > { %v1067_v30 = vpop.permute.xlu2 %1066 }
 0x19c   : > { %v1059_v55 = vpop.permute.xlu1 %1058  ;;  %1152 = vst.msk [vmem:[#allocation3 + $0x58] sm:$0xff] %vm1140_vm7, %v1067_v30 }
 0x19d   : > { %1275 = vrot.lane.b32.xlu0 %v8811_v13, %s5800_s28  ;;  %1148 = vst.msk [vmem:[#allocation3 + $0x38] sm:$0xff] %vm1140_vm7, %v1059_v55 }
 0x19f   : > { %v1063_v6 = vpop.permute.xlu0 %1062 }
 0x1a0   : > { %1150 = vst.msk [vmem:[#allocation3 + $0x48] sm:$0xff] %vm1140_vm7, %v1063_v6 }
 0x1a1   : > { %1267 = vrot.lane.b32.xlu2 %v8815_v24, %s5800_s28  ;;  %v1397_v24 = vld [vmem:[#allocation2 + $0x198] sm:$0xff] }
 0x1a2   : > { %1277 = vrot.lane.b32.xlu1 %v8813_v57, %s5800_s28 }
 0x1a3   : > { %v1073_v5 = vpop.permute.xlu2 %1072 }
 0x1a4   : > { %v1065_v54 = vpop.permute.xlu1 %1064  ;;  %1155 = vst.msk [vmem:[#allocation3 + $0x70] sm:$0xff] %vm1140_vm7, %v1073_v5 }
 0x1a5   : > { %1281 = vrot.lane.b32.xlu0 %v8814_v58, %s5800_s28  ;;  %1151 = vst.msk [vmem:[#allocation3 + $0x50] sm:$0xff] %vm1140_vm7, %v1065_v54 }
 0x1a7   : > { %v1069_v9 = vpop.permute.xlu0 %1068 }
 0x1a8   : > { %1153 = vst.msk [vmem:[#allocation3 + $0x60] sm:$0xff] %vm1140_vm7, %v1069_v9 }
 0x1a9   : > { %1273 = vrot.lane.b32.xlu2 %v8817_v14, %s5800_s28 }
 0x1aa   : > { %1283 = vrot.lane.b32.xlu1 %v8816_v25, %s5800_s28  ;;  %v1560_v25 = vld [vmem:[#allocation2 + $0x31] sm:$0xff] }
 0x1ab   : > { %v1079_v7 = vpop.permute.xlu2 %1078 }
 0x1ac   : > { %v1071_v56 = vpop.permute.xlu1 %1070  ;;  %1158 = vst.msk [vmem:[#allocation3 + $0x88] sm:$0xff] %vm1140_vm7, %v1079_v7  ;;  %v1564_v7 = vld [vmem:[#allocation2 + $0x61] sm:$0xff] }
 0x1ad   : > { %1287 = vrot.lane.b32.xlu0 %v6384_v3, %s5800_s28  ;;  %1154 = vst.msk [vmem:[#allocation3 + $0x68] sm:$0xff] %vm1140_vm7, %v1071_v56  ;;  %v1561_v56 = vld [vmem:[#allocation2 + $0x39] sm:$0xff] }
 0x1af   : > { %v1075_v12 = vpop.permute.xlu0 %1074 }
 0x1b0   : > { %1156 = vst.msk [vmem:[#allocation3 + $0x78] sm:$0xff] %vm1140_vm7, %v1075_v12 }
 0x1b1   : > { %1279 = vrot.lane.b32.xlu2 %v8819_v40, %s5800_s28  ;;  %v1398_v40 = vld [vmem:[#allocation2 + $0x1a0] sm:$0xff] }
 0x1b2   : > { %1289 = vrot.lane.b32.xlu1 %v8818_v20, %s5800_s28 }
 0x1b3   : > { %v1085_v16 = vpop.permute.xlu2 %1084 }
 0x1b4   : > { %v1077_v21 = vpop.permute.xlu1 %1076  ;;  %1161 = vst.msk [vmem:[#allocation3 + $0xa0] sm:$0xff] %vm1140_vm7, %v1085_v16  ;;  %v1567_v16 = vld [vmem:[#allocation2 + $0x81] sm:$0xff] }
 0x1b5   : > { %1293 = vrot.lane.b32.xlu0 %v6395_v62, %s5800_s28  ;;  %1157 = vst.msk [vmem:[#allocation3 + $0x80] sm:$0xff] %vm1140_vm7, %v1077_v21 }
 0x1b7   : > { %v1081_v3 = vpop.permute.xlu0 %1080 }
 0x1b8   : > { %1159 = vst.msk [vmem:[#allocation3 + $0x90] sm:$0xff] %vm1140_vm7, %v1081_v3 }
 0x1b9   : > { %1285 = vrot.lane.b32.xlu2 %v8821_v33, %s5800_s28 }
 0x1ba   : > { %1295 = vrot.lane.b32.xlu1 %v8820_v29, %s5800_s28 }
 0x1bb   : > { %v1091_v41 = vpop.permute.xlu2 %1090 }
 0x1bc   : > { %v1083_v35 = vpop.permute.xlu1 %1082  ;;  %1164 = vst.msk [vmem:[#allocation3 + $0xb8] sm:$0xff] %vm1140_vm7, %v1091_v41  ;;  %v1570_v41 = vld [vmem:[#allocation2 + $0xa9] sm:$0xff] }
 0x1bd   : > { %1299 = vrot.lane.b32.xlu0 %v6675_v27, %s5800_s28  ;;  %1160 = vst.msk [vmem:[#allocation3 + $0x98] sm:$0xff] %vm1140_vm7, %v1083_v35 }
 0x1bf   : > { %v1087_v62 = vpop.permute.xlu0 %1086 }
 0x1c0   : > { %1162 = vst.msk [vmem:[#allocation3 + $0xa8] sm:$0xff] %vm1140_vm7, %v1087_v62 }
 0x1c1   : > { %1291 = vrot.lane.b32.xlu2 %v8822_v47, %s5800_s28 }
 0x1c2   : > { %1431 = vrot.lane.b32.xlu1 %v1367_v19, %s5801_s29  ;;  %v1562_v19 = vld [vmem:[#allocation2 + $0x49] sm:$0xff] }
 0x1c3   : > { %v1097_v32 = vpop.permute.xlu2 %1096 }
 0x1c4   : > { %v1089_v26 = vpop.permute.xlu1 %1088  ;;  %1167 = vst.msk [vmem:[#allocation3 + $0xd0] sm:$0xff] %vm1140_vm7, %v1097_v32  ;;  %v1565_v32 = vld [vmem:[#allocation2 + $0x69] sm:$0xff] }
 0x1c5   : > { %1435 = vrot.lane.b32.xlu0 %v6147_v10, %s5801_s29  ;;  %1163 = vst.msk [vmem:[#allocation3 + $0xb0] sm:$0xff] %vm1140_vm7, %v1089_v26  ;;  %v6698_v10 = vld [vmem:[#allocation2 + $0x182] sm:$0xff] }
 0x1c6   : > { %v1572_v26 = vld [vmem:[#allocation2 + $0xc1] sm:$0xff] }
 0x1c7   : > { %v1093_v39 = vpop.permute.xlu0 %1092 }
 0x1c8   : > { %1165 = vst.msk [vmem:[#allocation3 + $0xc0] sm:$0xff] %vm1140_vm7, %v1093_v39 }
 0x1c9   : > { %1297 = vrot.lane.b32.xlu2 %v6698_v10, %s5800_s28 }
 0x1ca   : > { %1437 = vrot.lane.b32.xlu1 %v6167_v17, %s5801_s29 }
 0x1cb   : > { %v1103_v17 = vpop.permute.xlu2 %1102 }
 0x1cc   : > { %v1095_v45 = vpop.permute.xlu1 %1094  ;;  %1170 = vst.msk [vmem:[#allocation3 + $0xe8] sm:$0xff] %vm1140_vm7, %v1103_v17  ;;  %v1575_v17 = vld [vmem:[#allocation2 + $0xe1] sm:$0xff] }
 0x1cd   : > { %1441 = vrot.lane.b32.xlu0 %v6169_v18, %s5801_s29  ;;  %1166 = vst.msk [vmem:[#allocation3 + $0xc8] sm:$0xff] %vm1140_vm7, %v1095_v45  ;;  %v1368_v18 = vld [vmem:[#allocation2 + $0x38] sm:$0xff] }
 0x1cf   : > { %v1099_v50 = vpop.permute.xlu0 %1098 }
 0x1d0   : > { %1168 = vst.msk [vmem:[#allocation3 + $0xd8] sm:$0xff] %vm1140_vm7, %v1099_v50  ;;  %v1573_v50 = vld [vmem:[#allocation2 + $0xc9] sm:$0xff] }
 0x1d1   : > { %1433 = vrot.lane.b32.xlu2 %v1368_v18, %s5801_s29 }
 0x1d2   : > { %1443 = vrot.lane.b32.xlu1 %v6193_v34, %s5801_s29 }
 0x1d3   : > { %v1238_v34 = vpop.permute.xlu2 %1237 }
 0x1d4   : > { %v1101_v38 = vpop.permute.xlu1 %1100  ;;  %1334 = vst.msk [vmem:[#allocation3] sm:$0xff] %vm1333_vm8, %v1238_v34 }
 0x1d5   : > { %1447 = vrot.lane.b32.xlu0 %v6195_v36, %s5801_s29  ;;  %1169 = vst.msk [vmem:[#allocation3 + $0xe0] sm:$0xff] %vm1140_vm7, %v1101_v38  ;;  %v1371_v36 = vld [vmem:[#allocation2 + $0x60] sm:$0xff] }
 0x1d7   : > { %v1105_v49 = vpop.permute.xlu0 %1104 }
 0x1d8   : > { %1171 = vst.msk [vmem:[#allocation3 + $0xf0] sm:$0xff] %vm1140_vm7, %v1105_v49  ;;  %v1568_v49 = vld [vmem:[#allocation2 + $0x91] sm:$0xff] }
 0x1d9   : > { %1439 = vrot.lane.b32.xlu2 %v1371_v36, %s5801_s29  ;;  %v1578_v36 = vld [vmem:[#allocation2 + $0x109] sm:$0xff] }
 0x1da   : > { %1449 = vrot.lane.b32.xlu1 %v6220_v61, %s5801_s29 }
 0x1db   : > { %v1244_v52 = vpop.permute.xlu2 %1243 }
 0x1dc   : > { %v1107_v53 = vpop.permute.xlu1 %1106  ;;  %1337 = vst.msk [vmem:[#allocation3 + $0x18] sm:$0xff] %vm1333_vm8, %v1244_v52 }
 0x1dd   : > { %1453 = vrot.lane.b32.xlu0 %v6222_v63, %s5801_s29  ;;  %1172 = vst.msk [vmem:[#allocation3 + $0xf8] sm:$0xff] %vm1140_vm7, %v1107_v53  ;;  %v1374_v63 = vld [vmem:[#allocation2 + $0x80] sm:$0xff]  ;;  %v1576_v53 = vld [vmem:[#allocation2 + $0xf1] sm:$0xff]  ;;  %vm3840_vm7 = vcmask 589312  }
 0x1df   : > { %v1240_v44 = vpop.permute.xlu0 %1239 }
 0x1e0   : > { %1335 = vst.msk [vmem:[#allocation3 + $0x8] sm:$0xff] %vm1333_vm8, %v1240_v44 }
 0x1e1   : > { %1445 = vrot.lane.b32.xlu2 %v1374_v63, %s5801_s29 }
 0x1e2   : > { %1455 = vrot.lane.b32.xlu1 %v6247_v46, %s5801_s29 }
 0x1e3   : > { %v1250_v55 = vpop.permute.xlu2 %1249 }
 0x1e4   : > { %v1242_v61 = vpop.permute.xlu1 %1241  ;;  %1340 = vst.msk [vmem:[#allocation3 + $0x30] sm:$0xff] %vm1333_vm8, %v1250_v55  ;;  %v1581_v55 = vld [vmem:[#allocation2 + $0x129] sm:$0xff] }
 0x1e5   : > { %1459 = vrot.lane.b32.xlu0 %v6249_v60, %s5801_s29  ;;  %1336 = vst.msk [vmem:[#allocation3 + $0x10] sm:$0xff] %vm1333_vm8, %v1242_v61  ;;  %v1377_v60 = vld [vmem:[#allocation2 + $0xa8] sm:$0xff]  ;;  %v1571_v61 = vld [vmem:[#allocation2 + $0xb1] sm:$0xff] }
 0x1e7   : > { %v1246_v1 = vpop.permute.xlu0 %1245 }
 0x1e8   : > { %1338 = vst.msk [vmem:[#allocation3 + $0x20] sm:$0xff] %vm1333_vm8, %v1246_v1  ;;  %v1579_v1 = vld [vmem:[#allocation2 + $0x111] sm:$0xff] }
 0x1e9   : > { %1451 = vrot.lane.b32.xlu2 %v1377_v60, %s5801_s29 }
 0x1ea   : > { %1461 = vrot.lane.b32.xlu1 %v6274_v15, %s5801_s29 }
 0x1eb   : > { %v1256_v6 = vpop.permute.xlu2 %1255 }
 0x1ec   : > { %v1248_v46 = vpop.permute.xlu1 %1247  ;;  %1343 = vst.msk [vmem:[#allocation3 + $0x48] sm:$0xff] %vm1333_vm8, %v1256_v6 }
 0x1ed   : > { %1465 = vrot.lane.b32.xlu0 %v6276_v37, %s5801_s29  ;;  %1339 = vst.msk [vmem:[#allocation3 + $0x28] sm:$0xff] %vm1333_vm8, %v1248_v46  ;;  %v1380_v37 = vld [vmem:[#allocation2 + $0xc8] sm:$0xff] }
 0x1ef   : > { %v1252_v13 = vpop.permute.xlu0 %1251 }
 0x1f0   : > { %1341 = vst.msk [vmem:[#allocation3 + $0x38] sm:$0xff] %vm1333_vm8, %v1252_v13  ;;  %v1574_v13 = vld [vmem:[#allocation2 + $0xd9] sm:$0xff] }
 0x1f1   : > { %1457 = vrot.lane.b32.xlu2 %v1380_v37, %s5801_s29  ;;  %v1584_v37 = vld [vmem:[#allocation2 + $0x151] sm:$0xff] }
 0x1f2   : > { %1467 = vrot.lane.b32.xlu1 %v6301_v22, %s5801_s29 }
 0x1f3   : > { %v1262_v57 = vpop.permute.xlu2 %1261 }
 0x1f4   : > { %v1254_v15 = vpop.permute.xlu1 %1253  ;;  %1346 = vst.msk [vmem:[#allocation3 + $0x60] sm:$0xff] %vm1333_vm8, %v1262_v57 }
 0x1f5   : > { %1471 = vrot.lane.b32.xlu0 %v6303_v0, %s5801_s29  ;;  %1342 = vst.msk [vmem:[#allocation3 + $0x40] sm:$0xff] %vm1333_vm8, %v1254_v15  ;;  %v1383_v0 = vld [vmem:[#allocation2 + $0xf0] sm:$0xff]  ;;  %v1582_v15 = vld [vmem:[#allocation2 + $0x139] sm:$0xff] }
 0x1f7   : > { %v1258_v51 = vpop.permute.xlu0 %1257 }
 0x1f8   : > { %1344 = vst.msk [vmem:[#allocation3 + $0x50] sm:$0xff] %vm1333_vm8, %v1258_v51 }
 0x1f9   : > { %1463 = vrot.lane.b32.xlu2 %v1383_v0, %s5801_s29 }
 0x1fa   : > { %1473 = vrot.lane.b32.xlu1 %v6328_v11, %s5801_s29 }
 0x1fb   : > { %v1268_v54 = vpop.permute.xlu2 %1267 }
 0x1fc   : > { %v1260_v22 = vpop.permute.xlu1 %1259  ;;  %1349 = vst.msk [vmem:[#allocation3 + $0x78] sm:$0xff] %vm1333_vm8, %v1268_v54  ;;  %v1587_v54 = vld [vmem:[#allocation2 + $0x171] sm:$0xff] }
 0x1fd   : > { %1477 = vrot.lane.b32.xlu0 %v6330_v59, %s5801_s29  ;;  %1345 = vst.msk [vmem:[#allocation3 + $0x58] sm:$0xff] %vm1333_vm8, %v1260_v22  ;;  %v1386_v59 = vld [vmem:[#allocation2 + $0x110] sm:$0xff]  ;;  %v1577_v22 = vld [vmem:[#allocation2 + $0xf9] sm:$0xff] }
 0x1ff   : > { %v1264_v30 = vpop.permute.xlu0 %1263 }
 0x200   : > { %1347 = vst.msk [vmem:[#allocation3 + $0x68] sm:$0xff] %vm1333_vm8, %v1264_v30  ;;  %v1585_v30 = vld [vmem:[#allocation2 + $0x159] sm:$0xff] }
 0x201   : > { %1469 = vrot.lane.b32.xlu2 %v1386_v59, %s5801_s29 }
 0x202   : > { %1479 = vrot.lane.b32.xlu1 %v6355_v43, %s5801_s29 }
 0x203   : > { %v1274_v9 = vpop.permute.xlu2 %1273 }
 0x204   : > { %v1266_v11 = vpop.permute.xlu1 %1265  ;;  %1352 = vst.msk [vmem:[#allocation3 + $0x90] sm:$0xff] %vm1333_vm8, %v1274_v9 }
 0x205   : > { %1483 = vrot.lane.b32.xlu0 %v6357_v4, %s5801_s29  ;;  %1348 = vst.msk [vmem:[#allocation3 + $0x70] sm:$0xff] %vm1333_vm8, %v1266_v11 }
 0x207   : > { %v1270_v58 = vpop.permute.xlu0 %1269 }
 0x208   : > { %1350 = vst.msk [vmem:[#allocation3 + $0x80] sm:$0xff] %vm1333_vm8, %v1270_v58  ;;  %v1580_v58 = vld [vmem:[#allocation2 + $0x121] sm:$0xff] }
 0x209   : > { %1475 = vrot.lane.b32.xlu2 %v6312_v28, %s5801_s29  ;;  %v1563_v28 = vld [vmem:[#allocation2 + $0x51] sm:$0xff] }
 0x20a   : > { %1485 = vrot.lane.b32.xlu1 %v6375_v31, %s5801_s29 }
 0x20b   : > { %v1280_v31 = vpop.permute.xlu2 %1279 }
 0x20c   : > { %v1272_v43 = vpop.permute.xlu1 %1271  ;;  %1355 = vst.msk [vmem:[#allocation3 + $0xa8] sm:$0xff] %vm1333_vm8, %v1280_v31 }
 0x20d   : > { %1489 = vrot.lane.b32.xlu0 %v6502_v23, %s5801_s29  ;;  %1351 = vst.msk [vmem:[#allocation3 + $0x88] sm:$0xff] %vm1333_vm8, %v1272_v43  ;;  %v1590_v43 = vld [vmem:[#allocation2 + $0x199] sm:$0xff] }
 0x20f   : > { %v1276_v4 = vpop.permute.xlu0 %1275 }
 0x210   : > { %1353 = vst.msk [vmem:[#allocation3 + $0x98] sm:$0xff] %vm1333_vm8, %v1276_v4 }
 0x211   : > { %1481 = vrot.lane.b32.xlu2 %v6339_v42, %s5801_s29  ;;  %v1566_v42 = vld [vmem:[#allocation2 + $0x79] sm:$0xff] }
 0x212   : > { %1491 = vrot.lane.b32.xlu1 %v1397_v24, %s5801_s29 }
 0x213   : > { %v1286_v12 = vpop.permute.xlu2 %1285 }
 0x214   : > { %v1278_v5 = vpop.permute.xlu1 %1277  ;;  %1358 = vst.msk [vmem:[#allocation3 + $0xc0] sm:$0xff] %vm1333_vm8, %v1286_v12 }
 0x215   : > { %1624 = vrot.lane.b32.xlu0 %v1560_v25, %s5802_s30  ;;  %1354 = vst.msk [vmem:[#allocation3 + $0xa0] sm:$0xff] %vm1333_vm8, %v1278_v5  ;;  %v1583_v25 = vld [vmem:[#allocation2 + $0x141] sm:$0xff] }
 0x216   : > { %v1591_v5 = vld [vmem:[#allocation2 + $0x1a1] sm:$0xff] }
 0x217   : > { %v1282_v23 = vpop.permute.xlu0 %1281 }
 0x218   : > { %1356 = vst.msk [vmem:[#allocation3 + $0xb0] sm:$0xff] %vm1333_vm8, %v1282_v23  ;;  %v1754_v23 = vld [vmem:[#allocation2 + $0x3a] sm:$0xff] }
 0x219   : > { %1487 = vrot.lane.b32.xlu2 %v6473_v2, %s5801_s29  ;;  %v1569_v2 = vld [vmem:[#allocation2 + $0x99] sm:$0xff] }
 0x21a   : > { %1626 = vrot.lane.b32.xlu1 %v1561_v56, %s5802_s30 }
 0x21b   : > { %v1292_v21 = vpop.permute.xlu2 %1291 }
 0x21c   : > { %v1284_v14 = vpop.permute.xlu1 %1283  ;;  %1361 = vst.msk [vmem:[#allocation3 + $0xd8] sm:$0xff] %vm1333_vm8, %v1292_v21 }
 0x21d   : > { %1630 = vrot.lane.b32.xlu0 %v1563_v28, %s5802_s30  ;;  %1357 = vst.msk [vmem:[#allocation3 + $0xb8] sm:$0xff] %vm1333_vm8, %v1284_v14  ;;  %v1586_v28 = vld [vmem:[#allocation2 + $0x169] sm:$0xff] }
 0x21e   : > { %v1755_v14 = vld [vmem:[#allocation2 + $0x4a] sm:$0xff] }
 0x21f   : > { %v1288_v20 = vpop.permute.xlu0 %1287 }
 0x220   : > { %1359 = vst.msk [vmem:[#allocation3 + $0xc8] sm:$0xff] %vm1333_vm8, %v1288_v20  ;;  %v1757_v20 = vld [vmem:[#allocation2 + $0x62] sm:$0xff] }
 0x221   : > { %1493 = vrot.lane.b32.xlu2 %v1398_v40, %s5801_s29  ;;  %v1760_v40 = vld [vmem:[#allocation2 + $0x82] sm:$0xff] }
 0x222   : > { %1632 = vrot.lane.b32.xlu1 %v1564_v7, %s5802_s30 }
 0x223   : > { %v1298_v35 = vpop.permute.xlu2 %1297 }
 0x224   : > { %v1290_v3 = vpop.permute.xlu1 %1289  ;;  %1364 = vst.msk [vmem:[#allocation3 + $0xf0] sm:$0xff] %vm1333_vm8, %v1298_v35 }
 0x225   : > { %1636 = vrot.lane.b32.xlu0 %v1566_v42, %s5802_s30  ;;  %1360 = vst.msk [vmem:[#allocation3 + $0xd0] sm:$0xff] %vm1333_vm8, %v1290_v3  ;;  %v1758_v3 = vld [vmem:[#allocation2 + $0x6a] sm:$0xff] }
 0x227   : > { %v1294_v29 = vpop.permute.xlu0 %1293 }
 0x228   : > { %1362 = vst.msk [vmem:[#allocation3 + $0xe0] sm:$0xff] %vm1333_vm8, %v1294_v29 }
 0x229   : > { %1628 = vrot.lane.b32.xlu2 %v1562_v19, %s5802_s30 }
 0x22a   : > { %1638 = vrot.lane.b32.xlu1 %v1567_v16, %s5802_s30 }
 0x22b   : > { %v1434_v39 = vpop.permute.xlu2 %1433 }
 0x22c   : > { %v1296_v62 = vpop.permute.xlu1 %1295  ;;  %1529 = vst.msk [vmem:[#allocation3 + $0x8] sm:$0xff] %vm1527_vm9, %v1434_v39  ;;  %v1764_v39 = vld [vmem:[#allocation2 + $0xb2] sm:$0xff] }
 0x22d   : > { %1642 = vrot.lane.b32.xlu0 %v1569_v2, %s5802_s30  ;;  %1363 = vst.msk [vmem:[#allocation3 + $0xe8] sm:$0xff] %vm1333_vm8, %v1296_v62  ;;  %v1753_v2 = vld [vmem:[#allocation2 + $0x32] sm:$0xff] }
 0x22e   : > { %v1761_v62 = vld [vmem:[#allocation2 + $0x92] sm:$0xff] }
 0x22f   : > { %v1300_v33 = vpop.permute.xlu0 %1299 }
 0x230   : > { %1365 = vst.msk [vmem:[#allocation3 + $0xf8] sm:$0xff] %vm1333_vm8, %v1300_v33  ;;  %vm3918_vm8 = vcmask 588800  }
 0x231   : > { %1634 = vrot.lane.b32.xlu2 %v1565_v32, %s5802_s30 }
 0x232   : > { %1644 = vrot.lane.b32.xlu1 %v1570_v41, %s5802_s30  ;;  %v1756_v41 = vld [vmem:[#allocation2 + $0x52] sm:$0xff] }
 0x233   : > { %v1440_v38 = vpop.permute.xlu2 %1439 }
 0x234   : > { %v1432_v47 = vpop.permute.xlu1 %1431  ;;  %1532 = vst.msk [vmem:[#allocation3 + $0x20] sm:$0xff] %vm1527_vm9, %v1440_v38  ;;  %v1767_v38 = vld [vmem:[#allocation2 + $0xda] sm:$0xff] }
 0x235   : > { %1648 = vrot.lane.b32.xlu0 %v1572_v26, %s5802_s30  ;;  %1528 = vst.msk [vmem:[#allocation3] sm:$0xff] %vm1527_vm9, %v1432_v47  ;;  %v1766_v47 = vld [vmem:[#allocation2 + $0xca] sm:$0xff] }
 0x237   : > { %v1436_v45 = vpop.permute.xlu0 %1435 }
 0x238   : > { %1530 = vst.msk [vmem:[#allocation3 + $0x10] sm:$0xff] %vm1527_vm9, %v1436_v45 }
 0x239   : > { %1640 = vrot.lane.b32.xlu2 %v1568_v49, %s5802_s30 }
 0x23a   : > { %1650 = vrot.lane.b32.xlu1 %v1573_v50, %s5802_s30  ;;  %v1759_v50 = vld [vmem:[#allocation2 + $0x7a] sm:$0xff] }
 0x23b   : > { %v1446_v44 = vpop.permute.xlu2 %1445 }
 0x23c   : > { %v1438_v18 = vpop.permute.xlu1 %1437  ;;  %1535 = vst.msk [vmem:[#allocation3 + $0x38] sm:$0xff] %vm1527_vm9, %v1446_v44  ;;  %v1770_v44 = vld [vmem:[#allocation2 + $0xfa] sm:$0xff] }
 0x23d   : > { %1654 = vrot.lane.b32.xlu0 %v1575_v17, %s5802_s30  ;;  %1531 = vst.msk [vmem:[#allocation3 + $0x18] sm:$0xff] %vm1527_vm9, %v1438_v18  ;;  %v1769_v18 = vld [vmem:[#allocation2 + $0xf2] sm:$0xff] }
 0x23f   : > { %v1442_v34 = vpop.permute.xlu0 %1441 }
 0x240   : > { %1533 = vst.msk [vmem:[#allocation3 + $0x28] sm:$0xff] %vm1527_vm9, %v1442_v34 }
 0x241   : > { %1646 = vrot.lane.b32.xlu2 %v1571_v61, %s5802_s30 }
 0x242   : > { %1656 = vrot.lane.b32.xlu1 %v1576_v53, %s5802_s30  ;;  %v1762_v53 = vld [vmem:[#allocation2 + $0x9a] sm:$0xff] }
 0x243   : > { %v1452_v46 = vpop.permute.xlu2 %1451 }
 0x244   : > { %v1444_v52 = vpop.permute.xlu1 %1443  ;;  %1538 = vst.msk [vmem:[#allocation3 + $0x50] sm:$0xff] %vm1527_vm9, %v1452_v46  ;;  %v1773_v46 = vld [vmem:[#allocation2 + $0x122] sm:$0xff] }
 0x245   : > { %1660 = vrot.lane.b32.xlu0 %v1578_v36, %s5802_s30  ;;  %1534 = vst.msk [vmem:[#allocation3 + $0x30] sm:$0xff] %vm1527_vm9, %v1444_v52  ;;  %v1772_v52 = vld [vmem:[#allocation2 + $0x112] sm:$0xff] }
 0x247   : > { %v1448_v63 = vpop.permute.xlu0 %1447 }
 0x248   : > { %1536 = vst.msk [vmem:[#allocation3 + $0x40] sm:$0xff] %vm1527_vm9, %v1448_v63 }
 0x249   : > { %1652 = vrot.lane.b32.xlu2 %v1574_v13, %s5802_s30 }
 0x24a   : > { %1662 = vrot.lane.b32.xlu1 %v1579_v1, %s5802_s30  ;;  %v1765_v1 = vld [vmem:[#allocation2 + $0xc2] sm:$0xff] }
 0x24b   : > { %v1458_v51 = vpop.permute.xlu2 %1457 }
 0x24c   : > { %v1450_v60 = vpop.permute.xlu1 %1449  ;;  %1541 = vst.msk [vmem:[#allocation3 + $0x68] sm:$0xff] %vm1527_vm9, %v1458_v51 }
 0x24d   : > { %1666 = vrot.lane.b32.xlu0 %v1581_v55, %s5802_s30  ;;  %1537 = vst.msk [vmem:[#allocation3 + $0x48] sm:$0xff] %vm1527_vm9, %v1450_v60 }
 0x24f   : > { %v1454_v6 = vpop.permute.xlu0 %1453 }
 0x250   : > { %1539 = vst.msk [vmem:[#allocation3 + $0x58] sm:$0xff] %vm1527_vm9, %v1454_v6  ;;  %v1775_v6 = vld [vmem:[#allocation2 + $0x13a] sm:$0xff] }
 0x251   : > { %1658 = vrot.lane.b32.xlu2 %v1577_v22, %s5802_s30  ;;  %v1776_v22 = vld [vmem:[#allocation2 + $0x142] sm:$0xff] }
 0x252   : > { %1668 = vrot.lane.b32.xlu1 %v1582_v15, %s5802_s30  ;;  %v1768_v15 = vld [vmem:[#allocation2 + $0xe2] sm:$0xff] }
 0x253   : > { %v1464_v11 = vpop.permute.xlu2 %1463 }
 0x254   : > { %v1456_v57 = vpop.permute.xlu1 %1455  ;;  %1544 = vst.msk [vmem:[#allocation3 + $0x80] sm:$0xff] %vm1527_vm9, %v1464_v11 }
 0x255   : > { %1672 = vrot.lane.b32.xlu0 %v1584_v37, %s5802_s30  ;;  %1540 = vst.msk [vmem:[#allocation3 + $0x60] sm:$0xff] %vm1527_vm9, %v1456_v57 }
 0x257   : > { %v1460_v0 = vpop.permute.xlu0 %1459 }
 0x258   : > { %1542 = vst.msk [vmem:[#allocation3 + $0x70] sm:$0xff] %vm1527_vm9, %v1460_v0  ;;  %v1771_v0 = vld [vmem:[#allocation2 + $0x10a] sm:$0xff] }
 0x259   : > { %1664 = vrot.lane.b32.xlu2 %v1580_v58, %s5802_s30  ;;  %v1774_v58 = vld [vmem:[#allocation2 + $0x12a] sm:$0xff] }
 0x25a   : > { %1674 = vrot.lane.b32.xlu1 %v1585_v30, %s5802_s30 }
 0x25b   : > { %v1470_v4 = vpop.permute.xlu2 %1469 }
 0x25c   : > { %v1462_v59 = vpop.permute.xlu1 %1461  ;;  %1547 = vst.msk [vmem:[#allocation3 + $0x98] sm:$0xff] %vm1527_vm9, %v1470_v4 }
 0x25d   : > { %1678 = vrot.lane.b32.xlu0 %v1587_v54, %s5802_s30  ;;  %1543 = vst.msk [vmem:[#allocation3 + $0x78] sm:$0xff] %vm1527_vm9, %v1462_v59  ;;  %v1982_v59 = vld [vmem:[%s8702_s1 + $0x20] sm:$0xf] }
 0x25e   : > { %5679 = vmatpush.msk.msra.mxu0 %vm2084_vm11, %v1982_v59  ;;  %5748 = vmatpush.msk.msra.mxu3 %vm2084_vm11, %v1982_v59  ;;  %vm5540_vm11 = vcmask 1043459  }
 0x25f   : > { %v1466_v9 = vpop.permute.xlu0 %1465 }
 0x260   : > { %1545 = vst.msk [vmem:[#allocation3 + $0x88] sm:$0xff] %vm1527_vm9, %v1466_v9 }
 0x261   : > { %1670 = vrot.lane.b32.xlu2 %v1583_v25, %s5802_s30  ;;  %v1980_v25 = vld [vmem:[%s8702_s1 + $0x10] sm:$0xff] }
 0x262   : > { %1680 = vrot.lane.b32.xlu1 %v6572_v48, %s5802_s30 }
 0x263   : > { %v1476_v48 = vpop.permute.xlu2 %1475 }
 0x264   : > { %v1468_v24 = vpop.permute.xlu1 %1467  ;;  %1550 = vst.msk [vmem:[#allocation3 + $0xb0] sm:$0xff] %vm1527_vm9, %v1476_v48  ;;  %v1978_v48 = vld [vmem:[%s8702_s1] sm:$0xff] }
 0x265   : > { %1684 = vrot.lane.b32.xlu0 %v1590_v43, %s5802_s30  ;;  %1546 = vst.msk [vmem:[#allocation3 + $0x90] sm:$0xff] %vm1527_vm9, %v1468_v24  ;;  %v1981_v24 = vld [vmem:[%s8702_s1 + $0x18] sm:$0xff] }
 0x266   : > { %2100 = vmatpush.msra.mxu0 %v1981_v24  ;;  %5749 = vmatpush.msra.mxu3 %v1981_v24 }
 0x267   : > { %v1472_v31 = vpop.permute.xlu0 %1471 }
 0x268   : > { %1548 = vst.msk [vmem:[#allocation3 + $0xa0] sm:$0xff] %vm1527_vm9, %v1472_v31  ;;  %v1778_v31 = vld [vmem:[#allocation2 + $0x15a] sm:$0xff]  ;;  %2101 = vmatpush.msra.mxu0 %v1980_v25  ;;  %5750 = vmatpush.msra.mxu3 %v1980_v25 }
 0x269   : > { %1676 = vrot.lane.b32.xlu2 %v1586_v28, %s5802_s30 }
 0x26a   : > { %1686 = vrot.lane.b32.xlu1 %v1591_v5, %s5802_s30  ;;  %v1979_v5 = vld [vmem:[%s8702_s1 + $0x8] sm:$0xff] }
 0x26b   : > { %v1482_v7 = vpop.permute.xlu2 %1481  ;;  %2102 = vmatpush.msra.mxu0 %v1979_v5  ;;  %5751 = vmatpush.msra.mxu3 %v1979_v5  ;;  %v1784_v5 = vld [vmem:[#allocation2 + $0x1a2] sm:$0xff] }
 0x26c   : > { %v1474_v56 = vpop.permute.xlu1 %1473  ;;  %1553 = vst.msk [vmem:[#allocation3 + $0xc8] sm:$0xff] %vm1527_vm9, %v1482_v7 }
 0x26d   : > { %1819 = vrot.lane.b32.xlu0 %v1754_v23, %s5803_s6  ;;  %1549 = vst.msk [vmem:[#allocation3 + $0xa8] sm:$0xff] %vm1527_vm9, %v1474_v56  ;;  %2103 = vmatpush.msra.mxu0 %v1978_v48 }
 0x26e   : > { %5752 = vmatpush.msra.mxu3 %v1978_v48 }
 0x26f   : > { %v1478_v12 = vpop.permute.xlu0 %1477 }
 0x270   : > { %1551 = vst.msk [vmem:[#allocation3 + $0xb8] sm:$0xff] %vm1527_vm9, %v1478_v12  ;;  %v1779_v12 = vld [vmem:[#allocation2 + $0x16a] sm:$0xff] }
 0x271   : > { %1682 = vrot.lane.b32.xlu2 %v6578_v8, %s5802_s30  ;;  %v1763_v8 = vld [vmem:[#allocation2 + $0xaa] sm:$0xff] }
 0x272   : > { %1821 = vrot.lane.b32.xlu1 %v1755_v14, %s5803_s6 }
 0x273   : > { %v1488_v29 = vpop.permute.xlu2 %1487 }
 0x274   : > { %v1480_v42 = vpop.permute.xlu1 %1479  ;;  %1556 = vst.msk [vmem:[#allocation3 + $0xe0] sm:$0xff] %vm1527_vm9, %v1488_v29 }
 0x275   : > { %1552 = vst.msk [vmem:[#allocation3 + $0xc0] sm:$0xff] %vm1527_vm9, %v1480_v42  ;;  %1825 = vrot.lane.b32.xlu0 %v1757_v20, %s5803_s6  ;;  %v1777_v42 = vld [vmem:[#allocation2 + $0x152] sm:$0xff] }
 0x277   : > { %v1484_v21 = vpop.permute.xlu0 %1483 }
 0x278   : > { %1554 = vst.msk [vmem:[#allocation3 + $0xd0] sm:$0xff] %vm1527_vm9, %v1484_v21 }
 0x279   : > { %1817 = vrot.lane.b32.xlu2 %v1753_v2, %s5803_s6 }
 0x27a   : > { %1827 = vrot.lane.b32.xlu1 %v1758_v3, %s5803_s6 }
 0x27b   : > { %v1494_v19 = vpop.permute.xlu2 %1493 }
 0x27c   : > { %v1486_v16 = vpop.permute.xlu1 %1485  ;;  %1559 = vst.msk [vmem:[#allocation3 + $0xf8] sm:$0xff] %vm1527_vm9, %v1494_v19 }
 0x27d   : > { %1555 = vst.msk [vmem:[#allocation3 + $0xd8] sm:$0xff] %vm1527_vm9, %v1486_v16  ;;  %1831 = vrot.lane.b32.xlu0 %v1760_v40, %s5803_s6 }
 0x27f   : > { %v1490_v35 = vpop.permute.xlu0 %1489 }
 0x280   : > { %1557 = vst.msk [vmem:[#allocation3 + $0xe8] sm:$0xff] %vm1527_vm9, %v1490_v35 }
 0x281   : > { %1823 = vrot.lane.b32.xlu2 %v1756_v41, %s5803_s6 }
 0x282   : > { %1833 = vrot.lane.b32.xlu1 %v1761_v62, %s5803_s6 }
 0x283   : > { %v1629_v32 = vpop.permute.xlu2 %1628 }
 0x284   : > { %v1492_v33 = vpop.permute.xlu1 %1491  ;;  %1723 = vst.msk [vmem:[#allocation3 + $0x10] sm:$0xff] %vm1720_vm10, %v1629_v32 }
 0x285   : > { %1558 = vst.msk [vmem:[#allocation3 + $0xf0] sm:$0xff] %vm1527_vm9, %v1492_v33  ;;  %1837 = vrot.lane.b32.xlu0 %v1763_v8, %s5803_s6  ;;  %v1780_v8 = vld [vmem:[#allocation2 + $0x172] sm:$0xff]  ;;  %vm5536_vm9 = vcmask 1041409  }
 0x287   : > { %v1625_v26 = vpop.permute.xlu0 %1624 }
 0x288   : > { %1721 = vst.msk [vmem:[#allocation3] sm:$0xff] %vm1720_vm10, %v1625_v26 }
 0x289   : > { %1829 = vrot.lane.b32.xlu2 %v1759_v50, %s5803_s6 }
 0x28a   : > { %1839 = vrot.lane.b32.xlu1 %v1764_v39, %s5803_s6 }
 0x28b   : > { %v1635_v49 = vpop.permute.xlu2 %1634 }
 0x28c   : > { %v1627_v45 = vpop.permute.xlu1 %1626  ;;  %1726 = vst.msk [vmem:[#allocation3 + $0x28] sm:$0xff] %vm1720_vm10, %v1635_v49 }
 0x28d   : > { %1722 = vst.msk [vmem:[#allocation3 + $0x8] sm:$0xff] %vm1720_vm10, %v1627_v45  ;;  %1843 = vrot.lane.b32.xlu0 %v1766_v47, %s5803_s6 }
 0x28f   : > { %v1631_v17 = vpop.permute.xlu0 %1630 }
 0x290   : > { %1724 = vst.msk [vmem:[#allocation3 + $0x18] sm:$0xff] %vm1720_vm10, %v1631_v17 }
 0x291   : > { %1835 = vrot.lane.b32.xlu2 %v1762_v53, %s5803_s6 }
 0x292   : > { %1845 = vrot.lane.b32.xlu1 %v1767_v38, %s5803_s6 }
 0x293   : > { %v1641_v61 = vpop.permute.xlu2 %1640 }
 0x294   : > { %v1633_v34 = vpop.permute.xlu1 %1632  ;;  %1729 = vst.msk [vmem:[#allocation3 + $0x40] sm:$0xff] %vm1720_vm10, %v1641_v61 }
 0x295   : > { %1725 = vst.msk [vmem:[#allocation3 + $0x20] sm:$0xff] %vm1720_vm10, %v1633_v34  ;;  %1849 = vrot.lane.b32.xlu0 %v1769_v18, %s5803_s6 }
 0x297   : > { %v1637_v36 = vpop.permute.xlu0 %1636 }
 0x298   : > { %1727 = vst.msk [vmem:[#allocation3 + $0x30] sm:$0xff] %vm1720_vm10, %v1637_v36 }
 0x299   : > { %1841 = vrot.lane.b32.xlu2 %v1765_v1, %s5803_s6 }
 0x29a   : > { %1851 = vrot.lane.b32.xlu1 %v1770_v44, %s5803_s6 }
 0x29b   : > { %v1647_v60 = vpop.permute.xlu2 %1646 }
 0x29c   : > { %v1639_v63 = vpop.permute.xlu1 %1638  ;;  %1732 = vst.msk [vmem:[#allocation3 + $0x58] sm:$0xff] %vm1720_vm10, %v1647_v60 }
 0x29d   : > { %1728 = vst.msk [vmem:[#allocation3 + $0x38] sm:$0xff] %vm1720_vm10, %v1639_v63  ;;  %1855 = vrot.lane.b32.xlu0 %v1772_v52, %s5803_s6 }
 0x29f   : > { %v1643_v55 = vpop.permute.xlu0 %1642 }
 0x2a0   : > { %1730 = vst.msk [vmem:[#allocation3 + $0x48] sm:$0xff] %vm1720_vm10, %v1643_v55 }
 0x2a1   : > { %1847 = vrot.lane.b32.xlu2 %v1768_v15, %s5803_s6 }
 0x2a2   : > { %1857 = vrot.lane.b32.xlu1 %v1773_v46, %s5803_s6 }
 0x2a3   : > { %v1653_v51 = vpop.permute.xlu2 %1652 }
 0x2a4   : > { %v1645_v13 = vpop.permute.xlu1 %1644  ;;  %1735 = vst.msk [vmem:[#allocation3 + $0x70] sm:$0xff] %vm1720_vm10, %v1653_v51 }
 0x2a5   : > { %1731 = vst.msk [vmem:[#allocation3 + $0x50] sm:$0xff] %vm1720_vm10, %v1645_v13  ;;  %1861 = vrot.lane.b32.xlu0 %v1775_v6, %s5803_s6 }
 0x2a7   : > { %v1649_v37 = vpop.permute.xlu0 %1648 }
 0x2a8   : > { %1733 = vst.msk [vmem:[#allocation3 + $0x60] sm:$0xff] %vm1720_vm10, %v1649_v37 }
 0x2a9   : > { %1853 = vrot.lane.b32.xlu2 %v1771_v0, %s5803_s6 }
 0x2aa   : > { %1863 = vrot.lane.b32.xlu1 %v1776_v22, %s5803_s6 }
 0x2ab   : > { %v1659_v54 = vpop.permute.xlu2 %1658 }
 0x2ac   : > { %v1651_v57 = vpop.permute.xlu1 %1650  ;;  %1738 = vst.msk [vmem:[#allocation3 + $0x88] sm:$0xff] %vm1720_vm10, %v1659_v54 }
 0x2ad   : > { %1734 = vst.msk [vmem:[#allocation3 + $0x68] sm:$0xff] %vm1720_vm10, %v1651_v57  ;;  %1867 = vrot.lane.b32.xlu0 %v1778_v31, %s5803_s6 }
 0x2af   : > { %v1655_v30 = vpop.permute.xlu0 %1654 }
 0x2b0   : > { %1736 = vst.msk [vmem:[#allocation3 + $0x78] sm:$0xff] %vm1720_vm10, %v1655_v30 }
 0x2b1   : > { %1859 = vrot.lane.b32.xlu2 %v1774_v58, %s5803_s6 }
 0x2b2   : > { %1869 = vrot.lane.b32.xlu1 %v1779_v12, %s5803_s6  ;;  %v2329_v12 = vld [vmem:[#allocation2 + $0x1] sm:$0xff] }
 0x2b3   : > { %v1665_v43 = vpop.permute.xlu2 %1664 }
 0x2b4   : > { %v1657_v11 = vpop.permute.xlu1 %1656  ;;  %1741 = vst.msk [vmem:[#allocation3 + $0xa0] sm:$0xff] %vm1720_vm10, %v1665_v43 }
 0x2b5   : > { %1737 = vst.msk [vmem:[#allocation3 + $0x80] sm:$0xff] %vm1720_vm10, %v1657_v11  ;;  %1873 = vrot.lane.b32.xlu0 %v6698_v10, %s5803_s6 }
 0x2b7   : > { %v1661_v9 = vpop.permute.xlu0 %1660 }
 0x2b8   : > { %1739 = vst.msk [vmem:[#allocation3 + $0x90] sm:$0xff] %vm1720_vm10, %v1661_v9 }
 0x2b9   : > { %1865 = vrot.lane.b32.xlu2 %v1777_v42, %s5803_s6  ;;  %v2330_v42 = vld [vmem:[#allocation2 + $0x9] sm:$0xff] }
 0x2ba   : > { %1875 = vrot.lane.b32.xlu1 %v6675_v27, %s5803_s6 }
 0x2bb   : > { %v1671_v56 = vpop.permute.xlu2 %1670 }
 0x2bc   : > { %v1663_v4 = vpop.permute.xlu1 %1662  ;;  %1744 = vst.msk [vmem:[#allocation3 + $0xb8] sm:$0xff] %vm1720_vm10, %v1671_v56 }
 0x2bd   : > { %1740 = vst.msk [vmem:[#allocation3 + $0x98] sm:$0xff] %vm1720_vm10, %v1663_v4  ;;  %1879 = vrot.lane.b32.xlu0 %v1784_v5, %s5803_s6 }
 0x2bf   : > { %v1667_v23 = vpop.permute.xlu0 %1666 }
 0x2c0   : > { %1742 = vst.msk [vmem:[#allocation3 + $0xa8] sm:$0xff] %vm1720_vm10, %v1667_v23 }
 0x2c1   : > { %1871 = vrot.lane.b32.xlu2 %v1780_v8, %s5803_s6 }
 0x2c2   : > { %2393 = vrot.lane.b32.xlu1 %v2329_v12, %s5797_s25 }
 0x2c3   : > { %v1677_v20 = vpop.permute.xlu2 %1676 }
 0x2c4   : > { %v1669_v28 = vpop.permute.xlu1 %1668  ;;  %1747 = vst.msk [vmem:[#allocation3 + $0xd0] sm:$0xff] %vm1720_vm10, %v1677_v20 }
 0x2c5   : > { %1743 = vst.msk [vmem:[#allocation3 + $0xb0] sm:$0xff] %vm1720_vm10, %v1669_v28  ;;  %v1783_v28 = vld [vmem:[#allocation2 + $0x19a] sm:$0xff] }
 0x2c7   : > { %v1673_v14 = vpop.permute.xlu0 %1672 }
 0x2c8   : > { %1745 = vst.msk [vmem:[#allocation3 + $0xc0] sm:$0xff] %vm1720_vm10, %v1673_v14 }
 0x2c9   : > { %1877 = vrot.lane.b32.xlu2 %v1783_v28, %s5803_s6 }
 0x2cb   : > { %v1683_v3 = vpop.permute.xlu2 %1682 }
 0x2cc   : > { %v1675_v7 = vpop.permute.xlu1 %1674  ;;  %1750 = vst.msk [vmem:[#allocation3 + $0xe8] sm:$0xff] %vm1720_vm10, %v1683_v3 }
 0x2cd   : > { %1746 = vst.msk [vmem:[#allocation3 + $0xc8] sm:$0xff] %vm1720_vm10, %v1675_v7 }
 0x2cf   : > { %v1679_v21 = vpop.permute.xlu0 %1678 }
 0x2d0   : > { %1748 = vst.msk [vmem:[#allocation3 + $0xd8] sm:$0xff] %vm1720_vm10, %v1679_v21 }
 0x2d1   : > { %2395 = vrot.lane.b32.xlu2 %v2330_v42, %s5797_s25 }
 0x2d3   : > { %v1818_v29 = vpop.permute.xlu2 %1817 }
 0x2d4   : > { %v1681_v10 = vpop.permute.xlu1 %1680  ;;  %1914 = vst.msk [vmem:[#allocation3] sm:$0xff] %vm1913_vm12, %v1818_v29 }
 0x2d5   : > { %1749 = vst.msk [vmem:[#allocation3 + $0xe0] sm:$0xff] %vm1720_vm10, %v1681_v10  ;;  %v6994_v10 = vld [vmem:[%s8703_s2] ss:$0 sm:$0xff] }
 0x2d7   : > { %v1685_v40 = vpop.permute.xlu0 %1684 }
 0x2d8   : > { %1751 = vst.msk [vmem:[#allocation3 + $0xf0] sm:$0xff] %vm1720_vm10, %v1685_v40 }
 0x2db   : > { %v1946_v2 = vld [vmem:[#allocation3] sm:$0xff]  ;;  %v1824_v35 = vpop.permute.xlu2 %1823 }
 0x2dc   : > { %v1687_v16 = vpop.permute.xlu1 %1686  ;;  %5680 = vmatmul.msk.f32.vlgmr.msra.gmra.mxu0 %vm1987_vm13, %v1946_v2  ;;  %1917 = vst.msk [vmem:[#allocation3 + $0x18] sm:$0xff] %vm1913_vm12, %v1824_v35 }
 0x2dd   : > { %1752 = vst.msk [vmem:[#allocation3 + $0xf8] sm:$0xff] %vm1720_vm10, %v1687_v16  ;;  %vm5538_vm10 = vcmask 1042434  }
 0x2df   : > { %v1820_v27 = vpop.permute.xlu0 %1819 }
 0x2e0   : > { %1915 = vst.msk [vmem:[#allocation3 + $0x8] sm:$0xff] %vm1913_vm12, %v1820_v27 }
 0x2e3   : > { %v1830_v41 = vpop.permute.xlu2 %1829  ;;  %v1949_v17 = vld [vmem:[#allocation3 + $0x18] sm:$0xff] }
 0x2e4   : > { %v1822_v62 = vpop.permute.xlu1 %1821  ;;  %1920 = vst.msk [vmem:[#allocation3 + $0x30] sm:$0xff] %vm1913_vm12, %v1830_v41 }
 0x2e5   : > { %1916 = vst.msk [vmem:[#allocation3 + $0x10] sm:$0xff] %vm1913_vm12, %v1822_v62 }
 0x2e7   : > { %v1826_v19 = vpop.permute.xlu0 %1825  ;;  %v1947_v33 = vld [vmem:[#allocation3 + $0x8] sm:$0xff] }
 0x2e8   : > { %1918 = vst.msk [vmem:[#allocation3 + $0x20] sm:$0xff] %vm1913_vm12, %v1826_v19  ;;  %5681 = vmatmul.msk.f32.gmra.mxu0 %vm1987_vm13, %v1947_v33 }
 0x2eb   : > { %v1836_v32 = vpop.permute.xlu2 %1835  ;;  %v1952_v55 = vld [vmem:[#allocation3 + $0x30] sm:$0xff] }
 0x2ec   : > { %v1828_v26 = vpop.permute.xlu1 %1827  ;;  %v1948_v47 = vld [vmem:[#allocation3 + $0x10] sm:$0xff]  ;;  %1923 = vst.msk [vmem:[#allocation3 + $0x48] sm:$0xff] %vm1913_vm12, %v1836_v32 }
 0x2ed   : > { %1919 = vst.msk [vmem:[#allocation3 + $0x28] sm:$0xff] %vm1913_vm12, %v1828_v26 }
 0x2ef   : > { %v1832_v39 = vpop.permute.xlu0 %1831  ;;  %v1950_v34 = vld [vmem:[#allocation3 + $0x20] sm:$0xff] }
 0x2f0   : > { %1921 = vst.msk [vmem:[#allocation3 + $0x38] sm:$0xff] %vm1913_vm12, %v1832_v39  ;;  %5682 = vmatmul.msk.f32.gmra.mxu0 %vm1987_vm13, %v1948_v47 }
 0x2f3   : > { %v1842_v38 = vpop.permute.xlu2 %1841  ;;  %v1955_v54 = vld [vmem:[#allocation3 + $0x48] sm:$0xff] }
 0x2f4   : > { %v1834_v45 = vpop.permute.xlu1 %1833  ;;  %1926 = vst.msk [vmem:[#allocation3 + $0x60] sm:$0xff] %vm1913_vm12, %v1842_v38  ;;  %v1951_v52 = vld [vmem:[#allocation3 + $0x28] sm:$0xff] }
 0x2f5   : > { %1922 = vst.msk [vmem:[#allocation3 + $0x40] sm:$0xff] %vm1913_vm12, %v1834_v45 }
 0x2f7   : > { %v1838_v50 = vpop.permute.xlu0 %1837  ;;  %v1953_v37 = vld [vmem:[#allocation3 + $0x38] sm:$0xff] }
 0x2f8   : > { %1924 = vst.msk [vmem:[#allocation3 + $0x50] sm:$0xff] %vm1913_vm12, %v1838_v50  ;;  %5683 = vmatmul.msk.f32.gmra.mxu0 %vm1987_vm13, %v1949_v17 }
 0x2fb   : > { %v1848_v53 = vpop.permute.xlu2 %1847  ;;  %v1958_v31 = vld [vmem:[#allocation3 + $0x60] sm:$0xff] }
 0x2fc   : > { %v1840_v18 = vpop.permute.xlu1 %1839  ;;  %1929 = vst.msk [vmem:[#allocation3 + $0x78] sm:$0xff] %vm1913_vm12, %v1848_v53  ;;  %v1954_v22 = vld [vmem:[#allocation3 + $0x40] sm:$0xff] }
 0x2fd   : > { %1925 = vst.msk [vmem:[#allocation3 + $0x58] sm:$0xff] %vm1913_vm12, %v1840_v18 }
 0x2ff   : > { %v1844_v49 = vpop.permute.xlu0 %1843  ;;  %v1956_v58 = vld [vmem:[#allocation3 + $0x50] sm:$0xff] }
 0x300   : > { %1927 = vst.msk [vmem:[#allocation3 + $0x68] sm:$0xff] %vm1913_vm12, %v1844_v49  ;;  %5684 = vmatmul.msk.f32.gmra.mxu0 %vm1987_vm13, %v1950_v34 }
 0x303   : > { %v1854_v61 = vpop.permute.xlu2 %1853  ;;  %v1961_v3 = vld [vmem:[#allocation3 + $0x78] sm:$0xff] }
 0x304   : > { %v1846_v36 = vpop.permute.xlu1 %1845  ;;  %1932 = vst.msk [vmem:[#allocation3 + $0x90] sm:$0xff] %vm1913_vm12, %v1854_v61  ;;  %v1957_v4 = vld [vmem:[#allocation3 + $0x58] sm:$0xff] }
 0x305   : > { %1928 = vst.msk [vmem:[#allocation3 + $0x70] sm:$0xff] %vm1913_vm12, %v1846_v36 }
 0x307   : > { %v1850_v44 = vpop.permute.xlu0 %1849  ;;  %v1959_v56 = vld [vmem:[#allocation3 + $0x68] sm:$0xff] }
 0x308   : > { %1930 = vst.msk [vmem:[#allocation3 + $0x80] sm:$0xff] %vm1913_vm12, %v1850_v44  ;;  %5685 = vmatmul.msk.f32.gmra.mxu0 %vm1987_vm13, %v1951_v52 }
 0x30b   : > { %v1860_v46 = vpop.permute.xlu2 %1859  ;;  %v1964_v15 = vld [vmem:[#allocation3 + $0x90] sm:$0xff] }
 0x30c   : > { %v1852_v63 = vpop.permute.xlu1 %1851  ;;  %1935 = vst.msk [vmem:[#allocation3 + $0xa8] sm:$0xff] %vm1913_vm12, %v1860_v46  ;;  %v1960_v7 = vld [vmem:[#allocation3 + $0x70] sm:$0xff] }
 0x30d   : > { %1931 = vst.msk [vmem:[#allocation3 + $0x88] sm:$0xff] %vm1913_vm12, %v1852_v63 }
 0x30f   : > { %v1856_v1 = vpop.permute.xlu0 %1855  ;;  %v1962_v27 = vld [vmem:[#allocation3 + $0x80] sm:$0xff] }
 0x310   : > { %1933 = vst.msk [vmem:[#allocation3 + $0x98] sm:$0xff] %vm1913_vm12, %v1856_v1  ;;  %5686 = vmatmul.msk.f32.gmra.mxu0 %vm1987_vm13, %v1952_v55 }
 0x313   : > { %v1866_v0 = vpop.permute.xlu2 %1865  ;;  %v1967_v59 = vld [vmem:[#allocation3 + $0xa8] sm:$0xff] }
 0x314   : > { %v1963_v60 = vld [vmem:[#allocation3 + $0x88] sm:$0xff]  ;;  %v1858_v13 = vpop.permute.xlu1 %1857  ;;  %1938 = vst.msk [vmem:[#allocation3 + $0xc0] sm:$0xff] %vm1913_vm12, %v1866_v0 }
 0x315   : > { %5697 = vmatmul.msk.f32.vlgmr.msra.gmra.mxu3 %vm1987_vm13, %v1963_v60  ;;  %1934 = vst.msk [vmem:[#allocation3 + $0xa0] sm:$0xff] %vm1913_vm12, %v1858_v13 }
 0x317   : > { %v1862_v6 = vpop.permute.xlu0 %1861  ;;  %v1965_v57 = vld [vmem:[#allocation3 + $0x98] sm:$0xff] }
 0x318   : > { %1936 = vst.msk [vmem:[#allocation3 + $0xb0] sm:$0xff] %vm1913_vm12, %v1862_v6  ;;  %5687 = vmatmul.msk.f32.gmra.mxu0 %vm1987_vm13, %v1953_v37 }
 0x31b   : > { %v1872_v24 = vpop.permute.xlu2 %1871  ;;  %v1970_v48 = vld [vmem:[#allocation3 + $0xc0] sm:$0xff] }
 0x31c   : > { %v1864_v51 = vpop.permute.xlu1 %1863  ;;  %v1966_v30 = vld [vmem:[#allocation3 + $0xa0] sm:$0xff]  ;;  %1941 = vst.msk [vmem:[#allocation3 + $0xd8] sm:$0xff] %vm1913_vm12, %v1872_v24 }
 0x31d   : > { %5698 = vmatmul.msk.f32.gmra.mxu3 %vm1987_vm13, %v1964_v15  ;;  %1937 = vst.msk [vmem:[#allocation3 + $0xb8] sm:$0xff] %vm1913_vm12, %v1864_v51 }
 0x31f   : > { %v1868_v11 = vpop.permute.xlu0 %1867  ;;  %v1968_v43 = vld [vmem:[#allocation3 + $0xb0] sm:$0xff] }
 0x320   : > { %5688 = vmatmul.msk.f32.gmra.mxu0 %vm1987_vm13, %v1954_v22  ;;  %1939 = vst.msk [vmem:[#allocation3 + $0xc8] sm:$0xff] %vm1913_vm12, %v1868_v11 }
 0x323   : > { %v1973_v16 = vld [vmem:[#allocation3 + $0xd8] sm:$0xff] }
 0x324   : > { %v1870_v9 = vpop.permute.xlu1 %1869  ;;  %v1969_v25 = vld [vmem:[#allocation3 + $0xb8] sm:$0xff] }
 0x325   : > { %5699 = vmatmul.msk.f32.gmra.mxu3 %vm1987_vm13, %v1965_v57  ;;  %1940 = vst.msk [vmem:[#allocation3 + $0xd0] sm:$0xff] %vm1913_vm12, %v1870_v9 }
 0x327   : > { %v1874_v23 = vpop.permute.xlu0 %1873  ;;  %v1971_v20 = vld [vmem:[#allocation3 + $0xc8] sm:$0xff] }
 0x328   : > { %5689 = vmatmul.msk.f32.gmra.mxu0 %vm1987_vm13, %v1955_v54  ;;  %1942 = vst.msk [vmem:[#allocation3 + $0xe0] sm:$0xff] %vm1913_vm12, %v1874_v23 }
 0x32c   : > { %v1876_v14 = vpop.permute.xlu1 %1875  ;;  %v1972_v21 = vld [vmem:[#allocation3 + $0xd0] sm:$0xff] }
 0x32d   : > { %5700 = vmatmul.msk.f32.gmra.mxu3 %vm1987_vm13, %v1966_v30  ;;  %1943 = vst.msk [vmem:[#allocation3 + $0xe8] sm:$0xff] %vm1913_vm12, %v1876_v14 }
 0x32f   : > { %v1974_v8 = vld [vmem:[#allocation3 + $0xe0] sm:$0xff] }
 0x330   : > { %5690 = vmatmul.msk.f32.gmra.mxu0 %vm1987_vm13, %v1956_v58 }
 0x334   : > { %v1975_v47 = vld [vmem:[#allocation3 + $0xe8] sm:$0xff] }
 0x335   : > { %5701 = vmatmul.msk.f32.gmra.mxu3 %vm1987_vm13, %v1967_v59 }
 0x338   : > { %5691 = vmatmul.msk.f32.gmra.mxu0 %vm1987_vm13, %v1957_v4 }
 0x33d   : > { %5702 = vmatmul.msk.f32.gmra.mxu3 %vm1987_vm13, %v1968_v43 }
 0x340   : > { %5692 = vmatmul.msk.f32.gmra.mxu0 %vm1987_vm13, %v1958_v31 }
 0x345   : > { %5703 = vmatmul.msk.f32.gmra.mxu3 %vm1987_vm13, %v1969_v25 }
 0x348   : > { %5693 = vmatmul.msk.f32.gmra.mxu0 %vm1987_vm13, %v1959_v56  ;;  %v1878_v56 = vpop.permute.xlu2 %1877 }
 0x349   : > { %1944 = vst.msk [vmem:[#allocation3 + $0xf0] sm:$0xff] %vm1913_vm12, %v1878_v56 }
 0x34d   : > { %5704 = vmatmul.msk.f32.gmra.mxu3 %vm1987_vm13, %v1970_v48 }
 0x350   : > { %5694 = vmatmul.msk.f32.gmra.mxu0 %vm1987_vm13, %v1960_v7 }
 0x355   : > { %5705 = vmatmul.msk.f32.gmra.mxu3 %vm1987_vm13, %v1971_v20 }
 0x358   : > { %5695 = vmatmul.msk.f32.gmra.mxu0 %vm1987_vm13, %v1961_v3  ;;  %v2266_v3 = vld [vmem:[#allocation2 + $0x8] sm:$0xff] }
 0x359   : > { %v2105_v40 = vpop.f32.mrf.mxu0  ;;  %2298 = vst.msk [vmem:[#allocation3 + $0x8] sm:$0xff] %vm225_vm0, %v2266_v3 }
 0x35a   : > { %v2106_v29 = vadd.f32 %v6994_v10, %v2105_v40 }
 0x35c   : > { %v2201_v2 = vmax.f32 %v2106_v29, 0.0 }
 0x35d   : > { %5706 = vmatmul.msk.f32.gmra.mxu3 %vm1987_vm13, %v1972_v21 }
 0x35e   : > { %2233 = vst.msk [vmem:[#allocation2 + $0x19] sm:$0xff] %vm225_vm0, %v2201_v2 }
 0x360   : > { %5696 = vmatmul.msk.f32.gmra.mxu0 %vm1987_vm13, %v1962_v27 }
 0x365   : > { %5707 = vmatmul.msk.f32.gmra.mxu3 %vm1987_vm13, %v1973_v16  ;;  %v2108_v35 = vpop.f32.mrf.mxu0  ;;  %v7001_v33 = vld [vmem:[#allocation2 + $0x19] sm:$0xff]  ;;  %v2396_v16 = vpop.permute.xlu2 %2395 }
 0x366   : > { %v2109_v62 = vadd.f32 %v6994_v10, %v2108_v35  ;;  %v7004_v41 = vld [vmem:[#allocation2 + $0x18] sm:$0xff]  ;;  %2397 = vrot.lane.b32.xlu0 %v7001_v33, %s5797_s25  ;;  %2491 = vst.msk [vmem:[#allocation3 + $0x8] sm:$0xff] %vm2489_vm14, %v2396_v16 }
 0x367   : > { %2299 = vst.msk [vmem:[#allocation3 + $0x10] sm:$0xff] %vm225_vm0, %v7004_v41 }
 0x368   : > { %v2202_v19 = vmax.f32 %v2109_v62, 0.0 }
 0x36a   : > { %2234 = vst.msk [vmem:[#allocation2 + $0x21] sm:$0xff] %vm225_vm0, %v2202_v19 }
 0x36d   : > { %5708 = vmatmul.msk.f32.gmra.mxu3 %vm1987_vm13, %v1974_v8  ;;  %v2111_v26 = vpop.f32.mrf.mxu0 }
 0x36e   : > { %v2112_v39 = vadd.f32 %v6994_v10, %v2111_v26 }
 0x370   : > { %v2203_v32 = vmax.f32 %v2112_v39, 0.0 }
 0x371   : > { %v7012_v45 = vld [vmem:[#allocation2 + $0x21] sm:$0xff] }
 0x372   : > { %v7015_v50 = vld [vmem:[#allocation2 + $0x20] sm:$0xff]  ;;  %2235 = vst.msk [vmem:[#allocation2 + $0x31] sm:$0xff] %vm225_vm0, %v2203_v32  ;;  %2399 = vrot.lane.b32.xlu1 %v7012_v45, %s5797_s25  ;;  %v1880_v32 = vpop.permute.xlu0 %1879 }
 0x373   : > { %2300 = vst.msk [vmem:[#allocation3 + $0x18] sm:$0xff] %vm225_vm0, %v7015_v50 }
 0x374   : > { %1945 = vst.msk [vmem:[#allocation3 + $0xf8] sm:$0xff] %vm1913_vm12, %v1880_v32  ;;  %vm5542_vm12 = vcmask 1044484  }
 0x375   : > { %5709 = vmatmul.msk.f32.gmra.mxu3 %vm1987_vm13, %v1975_v47  ;;  %v2114_v17 = vpop.f32.mrf.mxu0 }
 0x376   : > { %v2115_v38 = vadd.f32 %v6994_v10, %v2114_v17 }
 0x378   : > { %v2204_v18 = vmax.f32 %v2115_v38, 0.0 }
 0x379   : > { %v7023_v49 = vld [vmem:[#allocation2 + $0x31] sm:$0xff] }
 0x37a   : > { %v7025_v34 = vld [vmem:[#allocation2 + $0x30] sm:$0xff]  ;;  %2236 = vst.msk [vmem:[#allocation2 + $0x39] sm:$0xff] %vm225_vm0, %v2204_v18  ;;  %2401 = vrot.lane.b32.xlu2 %v7023_v49, %s5797_s25 }
 0x37b   : > { %2301 = vst.msk [vmem:[#allocation3 + $0x20] sm:$0xff] %vm225_vm0, %v7025_v34 }
 0x37d   : > { %v2117_v53 = vpop.f32.mrf.mxu0 }
 0x37e   : > { %v2118_v36 = vadd.f32 %v6994_v10, %v2117_v53 }
 0x380   : > { %v2205_v44 = vmax.f32 %v2118_v36, 0.0 }
 0x381   : > { %v7033_v52 = vld [vmem:[#allocation2 + $0x39] sm:$0xff] }
 0x382   : > { %v7035_v61 = vld [vmem:[#allocation2 + $0x38] sm:$0xff]  ;;  %2237 = vst.msk [vmem:[#allocation2 + $0x49] sm:$0xff] %vm225_vm0, %v2205_v44  ;;  %2403 = vrot.lane.b32.xlu0 %v7033_v52, %s5797_s25 }
 0x383   : > { %2302 = vst.msk [vmem:[#allocation3 + $0x28] sm:$0xff] %vm225_vm0, %v7035_v61 }
 0x385   : > { %v2120_v63 = vpop.f32.mrf.mxu0 }
 0x386   : > { %v2121_v1 = vadd.f32 %v6994_v10, %v2120_v63 }
 0x388   : > { %v2206_v55 = vmax.f32 %v2121_v1, 0.0  ;;  %v2265_v1 = vld [vmem:[#allocation2] sm:$0xff] }
 0x389   : > { %v7043_v46 = vld [vmem:[#allocation2 + $0x49] sm:$0xff]  ;;  %2297 = vst.msk [vmem:[#allocation3] sm:$0xff] %vm225_vm0, %v2265_v1 }
 0x38a   : > { %v7045_v60 = vld [vmem:[#allocation2 + $0x48] sm:$0xff]  ;;  %2238 = vst.msk [vmem:[#allocation2 + $0x51] sm:$0xff] %vm225_vm0, %v2206_v55  ;;  %2405 = vrot.lane.b32.xlu1 %v7043_v46, %s5797_s25 }
 0x38b   : > { %2303 = vst.msk [vmem:[#allocation3 + $0x30] sm:$0xff] %vm225_vm0, %v7045_v60 }
 0x38d   : > { %v2123_v13 = vpop.f32.mrf.mxu0 }
 0x38e   : > { %v2124_v6 = vadd.f32 %v6994_v10, %v2123_v13 }
 0x390   : > { %v2207_v15 = vmax.f32 %v2124_v6, 0.0  ;;  %v2394_v6 = vpop.permute.xlu1 %2393 }
 0x391   : > { %v7053_v37 = vld [vmem:[#allocation2 + $0x51] sm:$0xff]  ;;  %2490 = vst.msk [vmem:[#allocation3] sm:$0xff] %vm2489_vm14, %v2394_v6 }
 0x392   : > { %v7055_v51 = vld [vmem:[#allocation2 + $0x50] sm:$0xff]  ;;  %2239 = vst.msk [vmem:[#allocation2 + $0x61] sm:$0xff] %vm225_vm0, %v2207_v15  ;;  %2407 = vrot.lane.b32.xlu2 %v7053_v37, %s5797_s25 }
 0x393   : > { %2304 = vst.msk [vmem:[#allocation3 + $0x38] sm:$0xff] %vm225_vm0, %v7055_v51 }
 0x395   : > { %v2126_v22 = vpop.f32.mrf.mxu0 }
 0x396   : > { %v2127_v30 = vadd.f32 %v6994_v10, %v2126_v22 }
 0x398   : > { %v2156_v57 = vpop.f32.mrf.mxu3  ;;  %v2208_v11 = vmax.f32 %v2127_v30, 0.0 }
 0x399   : > { %v2157_v0 = vadd.f32 %v6994_v10, %v2156_v57  ;;  %v7065_v59 = vld [vmem:[#allocation2 + $0x61] sm:$0xff] }
 0x39a   : > { %v7067_v58 = vld [vmem:[#allocation2 + $0x60] sm:$0xff]  ;;  %2240 = vst.msk [vmem:[#allocation2 + $0x69] sm:$0xff] %vm225_vm0, %v2208_v11  ;;  %2409 = vrot.lane.b32.xlu0 %v7065_v59, %s5797_s25 }
 0x39b   : > { %v2218_v54 = vmax.f32 %v2157_v0, 0.0  ;;  %2305 = vst.msk [vmem:[#allocation3 + $0x40] sm:$0xff] %vm225_vm0, %v7067_v58 }
 0x39d   : > { %2250 = vst.msk [vmem:[#allocation2 + $0xe1] sm:$0xff] %vm225_vm0, %v2218_v54  ;;  %v2129_v43 = vpop.f32.mrf.mxu0 }
 0x39e   : > { %v2130_v24 = vadd.f32 %v6994_v10, %v2129_v43 }
 0x3a0   : > { %v2159_v9 = vpop.f32.mrf.mxu3  ;;  %v2209_v31 = vmax.f32 %v2130_v24, 0.0 }
 0x3a1   : > { %v2160_v4 = vadd.f32 %v6994_v10, %v2159_v9  ;;  %v7077_v5 = vld [vmem:[#allocation2 + $0x69] sm:$0xff] }
 0x3a2   : > { %v7079_v23 = vld [vmem:[#allocation2 + $0x68] sm:$0xff]  ;;  %2241 = vst.msk [vmem:[#allocation2 + $0x79] sm:$0xff] %vm225_vm0, %v2209_v31  ;;  %2411 = vrot.lane.b32.xlu1 %v7077_v5, %s5797_s25 }
 0x3a3   : > { %v2219_v25 = vmax.f32 %v2160_v4, 0.0  ;;  %2306 = vst.msk [vmem:[#allocation3 + $0x48] sm:$0xff] %vm225_vm0, %v7079_v23 }
 0x3a5   : > { %2251 = vst.msk [vmem:[#allocation2 + $0xf1] sm:$0xff] %vm225_vm0, %v2219_v25  ;;  %v2132_v28 = vpop.f32.mrf.mxu0 }
 0x3a6   : > { %v2133_v14 = vadd.f32 %v6994_v10, %v2132_v28 }
 0x3a8   : > { %v2162_v48 = vpop.f32.mrf.mxu3  ;;  %v2210_v7 = vmax.f32 %v2133_v14, 0.0 }
 0x3a9   : > { %v2163_v12 = vadd.f32 %v6994_v10, %v2162_v48  ;;  %v7090_v42 = vld [vmem:[#allocation2 + $0x79] sm:$0xff] }
 0x3aa   : > { %v7092_v21 = vld [vmem:[#allocation2 + $0x78] sm:$0xff]  ;;  %2242 = vst.msk [vmem:[#allocation2 + $0x81] sm:$0xff] %vm225_vm0, %v2210_v7  ;;  %2413 = vrot.lane.b32.xlu2 %v7090_v42, %s5797_s25 }
 0x3ab   : > { %v2220_v20 = vmax.f32 %v2163_v12, 0.0  ;;  %2307 = vst.msk [vmem:[#allocation3 + $0x50] sm:$0xff] %vm225_vm0, %v7092_v21 }
 0x3ac   : > { %v7098_v40 = vld [vmem:[#allocation2 + $0xf0] sm:$0xff] }
 0x3ad   : > { %2252 = vst.msk [vmem:[#allocation2 + $0xf9] sm:$0xff] %vm225_vm0, %v2220_v20  ;;  %v2135_v27 = vpop.f32.mrf.mxu0 }
 0x3ae   : > { %v2136_v35 = vadd.f32 %v6994_v10, %v2135_v27  ;;  %2317 = vst.msk [vmem:[#allocation3 + $0xa0] sm:$0xff] %vm225_vm0, %v7098_v40 }
 0x3b0   : > { %v2165_v29 = vpop.f32.mrf.mxu3  ;;  %v2211_v8 = vmax.f32 %v2136_v35, 0.0 }
 0x3b1   : > { %v2166_v2 = vadd.f32 %v6994_v10, %v2165_v29  ;;  %v7108_v19 = vld [vmem:[#allocation2 + $0x81] sm:$0xff] }
 0x3b2   : > { %v7110_v26 = vld [vmem:[#allocation2 + $0x80] sm:$0xff]  ;;  %2243 = vst.msk [vmem:[#allocation2 + $0x91] sm:$0xff] %vm225_vm0, %v2211_v8  ;;  %2415 = vrot.lane.b32.xlu0 %v7108_v19, %s5797_s25 }
 0x3b3   : > { %v2221_v62 = vmax.f32 %v2166_v2, 0.0  ;;  %2308 = vst.msk [vmem:[#allocation3 + $0x58] sm:$0xff] %vm225_vm0, %v7110_v26 }
 0x3b4   : > { %v7115_v39 = vld [vmem:[#allocation2 + $0xf8] sm:$0xff] }
 0x3b5   : > { %2253 = vst.msk [vmem:[#allocation2 + $0x109] sm:$0xff] %vm225_vm0, %v2221_v62  ;;  %v2138_v17 = vpop.f32.mrf.mxu0 }
 0x3b6   : > { %2318 = vst.msk [vmem:[#allocation3 + $0xa8] sm:$0xff] %vm225_vm0, %v7115_v39  ;;  %v2139_v18 = vadd.f32 %v6994_v10, %v2138_v17 }
 0x3b8   : > { %v2168_v47 = vpop.f32.mrf.mxu3  ;;  %v2212_v36 = vmax.f32 %v2139_v18, 0.0 }
 0x3b9   : > { %v2169_v38 = vadd.f32 %v6994_v10, %v2168_v47  ;;  %v7125_v44 = vld [vmem:[#allocation2 + $0x91] sm:$0xff] }
 0x3ba   : > { %v7127_v63 = vld [vmem:[#allocation2 + $0x90] sm:$0xff]  ;;  %2244 = vst.msk [vmem:[#allocation2 + $0x99] sm:$0xff] %vm225_vm0, %v2212_v36  ;;  %2417 = vrot.lane.b32.xlu1 %v7125_v44, %s5797_s25 }
 0x3bb   : > { %v2222_v53 = vmax.f32 %v2169_v38, 0.0  ;;  %2309 = vst.msk [vmem:[#allocation3 + $0x60] sm:$0xff] %vm225_vm0, %v7127_v63 }
 0x3bc   : > { %v7133_v55 = vld [vmem:[#allocation2 + $0x108] sm:$0xff] }
 0x3bd   : > { %2254 = vst.msk [vmem:[#allocation2 + $0x111] sm:$0xff] %vm225_vm0, %v2222_v53  ;;  %v2141_v15 = vpop.f32.mrf.mxu0 }
 0x3be   : > { %v2142_v22 = vadd.f32 %v6994_v10, %v2141_v15  ;;  %2319 = vst.msk [vmem:[#allocation3 + $0xb0] sm:$0xff] %vm225_vm0, %v7133_v55 }
 0x3c0   : > { %v2171_v13 = vpop.f32.mrf.mxu3  ;;  %v2213_v30 = vmax.f32 %v2142_v22, 0.0 }
 0x3c1   : > { %v2172_v57 = vadd.f32 %v6994_v10, %v2171_v13  ;;  %v7143_v54 = vld [vmem:[#allocation2 + $0x99] sm:$0xff] }
 0x3c2   : > { %v7145_v11 = vld [vmem:[#allocation2 + $0x98] sm:$0xff]  ;;  %2245 = vst.msk [vmem:[#allocation2 + $0xa9] sm:$0xff] %vm225_vm0, %v2213_v30  ;;  %2419 = vrot.lane.b32.xlu2 %v7143_v54, %s5797_s25 }
 0x3c3   : > { %v2223_v0 = vmax.f32 %v2172_v57, 0.0  ;;  %2310 = vst.msk [vmem:[#allocation3 + $0x68] sm:$0xff] %vm225_vm0, %v7145_v11 }
 0x3c4   : > { %v7150_v9 = vld [vmem:[#allocation2 + $0x110] sm:$0xff] }
 0x3c5   : > { %2255 = vst.msk [vmem:[#allocation2 + $0x121] sm:$0xff] %vm225_vm0, %v2223_v0  ;;  %v2144_v4 = vpop.f32.mrf.mxu0 }
 0x3c6   : > { %2320 = vst.msk [vmem:[#allocation3 + $0xb8] sm:$0xff] %vm225_vm0, %v7150_v9  ;;  %v2145_v25 = vadd.f32 %v6994_v10, %v2144_v4  ;;  %v7211_v4 = vld [vmem:[#allocation2 + $0xe1] sm:$0xff] }
 0x3c8   : > { %v2174_v43 = vpop.f32.mrf.mxu3  ;;  %v2214_v48 = vmax.f32 %v2145_v25, 0.0 }
 0x3c9   : > { %v2175_v24 = vadd.f32 %v6994_v10, %v2174_v43  ;;  %v7159_v56 = vld [vmem:[#allocation2 + $0xa9] sm:$0xff] }
 0x3ca   : > { %v7161_v28 = vld [vmem:[#allocation2 + $0xa8] sm:$0xff]  ;;  %2246 = vst.msk [vmem:[#allocation2 + $0xb1] sm:$0xff] %vm225_vm0, %v2214_v48  ;;  %2421 = vrot.lane.b32.xlu0 %v7159_v56, %s5797_s25 }
 0x3cb   : > { %v2224_v31 = vmax.f32 %v2175_v24, 0.0  ;;  %2311 = vst.msk [vmem:[#allocation3 + $0x70] sm:$0xff] %vm225_vm0, %v7161_v28 }
 0x3cc   : > { %v7163_v12 = vld [vmem:[#allocation2 + $0x120] sm:$0xff] }
 0x3cd   : > { %2256 = vst.msk [vmem:[#allocation2 + $0x129] sm:$0xff] %vm225_vm0, %v2224_v31  ;;  %v2147_v20 = vpop.f32.mrf.mxu0 }
 0x3ce   : > { %2321 = vst.msk [vmem:[#allocation3 + $0xc0] sm:$0xff] %vm225_vm0, %v7163_v12  ;;  %v2148_v3 = vadd.f32 %v6994_v10, %v2147_v20 }
 0x3d0   : > { %v2177_v14 = vpop.f32.mrf.mxu3  ;;  %v2215_v16 = vmax.f32 %v2148_v3, 0.0 }
 0x3d1   : > { %v2178_v7 = vadd.f32 %v6994_v10, %v2177_v14  ;;  %v7175_v27 = vld [vmem:[#allocation2 + $0xb1] sm:$0xff] }
 0x3d2   : > { %2247 = vst.msk [vmem:[#allocation2 + $0xc1] sm:$0xff] %vm225_vm0, %v2215_v16  ;;  %2423 = vrot.lane.b32.xlu1 %v7175_v27, %s5797_s25  ;;  %v7182_v35 = vld [vmem:[#allocation2 + $0xb0] sm:$0xff] }
 0x3d3   : > { %v2225_v29 = vmax.f32 %v2178_v7, 0.0  ;;  %2312 = vst.msk [vmem:[#allocation3 + $0x78] sm:$0xff] %vm225_vm0, %v7182_v35 }
 0x3d4   : > { %v7177_v2 = vld [vmem:[#allocation2 + $0x128] sm:$0xff]  ;;  %v2402_v62 = vpop.permute.xlu2 %2401 }
 0x3d5   : > { %2257 = vst.msk [vmem:[#allocation2 + $0x139] sm:$0xff] %vm225_vm0, %v2225_v29  ;;  %v2150_v47 = vpop.f32.mrf.mxu0  ;;  %v7233_v29 = vld [vmem:[#allocation2 + $0xf1] sm:$0xff] }
 0x3d6   : > { %2322 = vst.msk [vmem:[#allocation3 + $0xc8] sm:$0xff] %vm225_vm0, %v7177_v2  ;;  %v2151_v17 = vadd.f32 %v6994_v10, %v2150_v47  ;;  %v1976_v47 = vld [vmem:[#allocation3 + $0xf0] sm:$0xff] }
 0x3d7   : > { %2494 = vst.msk [vmem:[#allocation3 + $0x20] sm:$0xff] %vm2489_vm14, %v2402_v62  ;;  %v7241_v62 = vld [vmem:[#allocation2 + $0x109] sm:$0xff]  ;;  %5710 = vmatmul.msk.f32.gmra.mxu3 %vm1987_vm13, %v1976_v47  ;;  %v7281_v47 = vld [vmem:[#allocation2 + $0x121] sm:$0xff] }
 0x3d8   : > { %v2180_v8 = vpop.f32.mrf.mxu3  ;;  %v2216_v18 = vmax.f32 %v2151_v17, 0.0  ;;  %v2398_v13 = vpop.permute.xlu0 %2397 }
 0x3d9   : > { %v2181_v32 = vadd.f32 %v6994_v10, %v2180_v8  ;;  %v7192_v53 = vld [vmem:[#allocation2 + $0xc1] sm:$0xff]  ;;  %2492 = vst.msk [vmem:[#allocation3 + $0x10] sm:$0xff] %vm2489_vm14, %v2398_v13  ;;  %v7257_v13 = vld [vmem:[#allocation2 + $0xf9] sm:$0xff] }
 0x3da   : > { %v7194_v36 = vld [vmem:[#allocation2 + $0xc0] sm:$0xff]  ;;  %2248 = vst.msk [vmem:[#allocation2 + $0xc9] sm:$0xff] %vm225_vm0, %v2216_v18  ;;  %2425 = vrot.lane.b32.xlu2 %v7192_v53, %s5797_s25 }
 0x3db   : > { %v2226_v38 = vmax.f32 %v2181_v32, 0.0  ;;  %2313 = vst.msk [vmem:[#allocation3 + $0x80] sm:$0xff] %vm225_vm0, %v7194_v36 }
 0x3dc   : > { %v7196_v1 = vld [vmem:[#allocation2 + $0x138] sm:$0xff] }
 0x3dd   : > { %2258 = vst.msk [vmem:[#allocation2 + $0x141] sm:$0xff] %vm225_vm0, %v2226_v38  ;;  %v2153_v15 = vpop.f32.mrf.mxu0 }
 0x3de   : > { %2323 = vst.msk [vmem:[#allocation3 + $0xd0] sm:$0xff] %vm225_vm0, %v7196_v1  ;;  %v2154_v22 = vadd.f32 %v6994_v10, %v2153_v15 }
 0x3e0   : > { %v2183_v6 = vpop.f32.mrf.mxu3  ;;  %v2217_v30 = vmax.f32 %v2154_v22, 0.0  ;;  %v1977_v22 = vld [vmem:[#allocation3 + $0xf8] sm:$0xff] }
 0x3e1   : > { %v2184_v57 = vadd.f32 %v6994_v10, %v2183_v6  ;;  %v7209_v43 = vld [vmem:[#allocation2 + $0xc9] sm:$0xff]  ;;  %v7259_v6 = vld [vmem:[#allocation2 + $0x111] sm:$0xff]  ;;  %5711 = vmatmul.msk.f32.gmra.mxu3 %vm1987_vm13, %v1977_v22  ;;  %vm5544_vm13 = vcmask 1045509  }
 0x3e2   : > { %2249 = vst.msk [vmem:[#allocation2 + $0xd9] sm:$0xff] %vm225_vm0, %v2217_v30  ;;  %2427 = vrot.lane.b32.xlu0 %v7209_v43, %s5797_s25  ;;  %2431 = vrot.lane.b32.xlu2 %v7211_v4, %s5797_s25  ;;  %v7218_v24 = vld [vmem:[#allocation2 + $0xc8] sm:$0xff] }
 0x3e3   : > { %v2227_v0 = vmax.f32 %v2184_v57, 0.0  ;;  %2314 = vst.msk [vmem:[#allocation3 + $0x88] sm:$0xff] %vm225_vm0, %v7218_v24  ;;  %v7267_v57 = vld [vmem:[#allocation2 + $0x129] sm:$0xff] }
 0x3e4   : > { %v7220_v25 = vld [vmem:[#allocation2 + $0x140] sm:$0xff]  ;;  %v2400_v31 = vpop.permute.xlu1 %2399 }
 0x3e5   : > { %2259 = vst.msk [vmem:[#allocation2 + $0x151] sm:$0xff] %vm225_vm0, %v2227_v0 }
 0x3e6   : > { %2324 = vst.msk [vmem:[#allocation3 + $0xd8] sm:$0xff] %vm225_vm0, %v7220_v25 }
 0x3e7   : > { %2493 = vst.msk [vmem:[#allocation3 + $0x18] sm:$0xff] %vm2489_vm14, %v2400_v31 }
 0x3e8   : > { %v2186_v48 = vpop.f32.mrf.mxu3 }
 0x3e9   : > { %v2187_v14 = vadd.f32 %v6994_v10, %v2186_v48  ;;  %v7231_v3 = vld [vmem:[#allocation2 + $0xd9] sm:$0xff] }
 0x3ea   : > { %v7235_v16 = vld [vmem:[#allocation2 + $0xe0] sm:$0xff]  ;;  %2429 = vrot.lane.b32.xlu1 %v7231_v3, %s5797_s25  ;;  %2433 = vrot.lane.b32.xlu0 %v7233_v29, %s5797_s25  ;;  %v7245_v8 = vld [vmem:[#allocation2 + $0xd8] sm:$0xff] }
 0x3eb   : > { %v2228_v20 = vmax.f32 %v2187_v14, 0.0  ;;  %2316 = vst.msk [vmem:[#allocation3 + $0x98] sm:$0xff] %vm225_vm0, %v7235_v16  ;;  %2437 = vrot.lane.b32.xlu2 %v7241_v62, %s5797_s25 }
 0x3ec   : > { %v7228_v7 = vld [vmem:[#allocation2 + $0x150] sm:$0xff]  ;;  %v2408_v32 = vpop.permute.xlu2 %2407  ;;  %2315 = vst.msk [vmem:[#allocation3 + $0x90] sm:$0xff] %vm225_vm0, %v7245_v8 }
 0x3ed   : > { %2260 = vst.msk [vmem:[#allocation2 + $0x159] sm:$0xff] %vm225_vm0, %v2228_v20  ;;  %v7276_v14 = vld [vmem:[#allocation2 + $0x151] sm:$0xff] }
 0x3ee   : > { %2325 = vst.msk [vmem:[#allocation3 + $0xe0] sm:$0xff] %vm225_vm0, %v7228_v7 }
 0x3ef   : > { %2497 = vst.msk [vmem:[#allocation3 + $0x38] sm:$0xff] %vm2489_vm14, %v2408_v32  ;;  %v7283_v32 = vld [vmem:[#allocation2 + $0x139] sm:$0xff] }
 0x3f0   : > { %v2189_v17 = vpop.f32.mrf.mxu3  ;;  %8823 = vst [vmem:[#allocation6_spill] sm:$0xff] %v7276_v14 }
 0x3f1   : > { %v2190_v38 = vadd.f32 %v6994_v10, %v2189_v17  ;;  %8824 = vst [vmem:[#allocation13_spill] sm:$0xff] %v7283_v32 }
 0x3f2   : > { %2435 = vrot.lane.b32.xlu1 %v7257_v13, %s5797_s25  ;;  %2439 = vrot.lane.b32.xlu0 %v7259_v6, %s5797_s25 }
 0x3f3   : > { %v2229_v18 = vmax.f32 %v2190_v38, 0.0  ;;  %2443 = vrot.lane.b32.xlu2 %v7267_v57, %s5797_s25 }
 0x3f4   : > { %v7261_v15 = vld [vmem:[#allocation2 + $0x158] sm:$0xff]  ;;  %v2404_v0 = vpop.permute.xlu0 %2403 }
 0x3f5   : > { %2261 = vst.msk [vmem:[#allocation2 + $0x169] sm:$0xff] %vm225_vm0, %v2229_v18  ;;  %v7294_v38 = vld [vmem:[#allocation2 + $0x159] sm:$0xff] }
 0x3f6   : > { %2326 = vst.msk [vmem:[#allocation3 + $0xe8] sm:$0xff] %vm225_vm0, %v7261_v15 }
 0x3f7   : > { %2495 = vst.msk [vmem:[#allocation3 + $0x28] sm:$0xff] %vm2489_vm14, %v2404_v0  ;;  %v7300_v0 = vld [vmem:[#allocation2 + $0x141] sm:$0xff] }
 0x3f8   : > { %v2192_v30 = vpop.f32.mrf.mxu3  ;;  %8825 = vst [vmem:[#allocation4_spill] sm:$0xff] %v7294_v38 }
 0x3f9   : > { %v2193_v31 = vadd.f32 %v6994_v10, %v2192_v30 }
 0x3fa   : > { %2441 = vrot.lane.b32.xlu1 %v7281_v47, %s5797_s25  ;;  %2445 = vrot.lane.b32.xlu0 %v7283_v32, %s5797_s25  ;;  %v7321_v32 = vld [vmem:[#allocation2 + $0x22] sm:$0xff] }
 0x3fb   : > { %v2230_v48 = vmax.f32 %v2193_v31, 0.0  ;;  %2449 = vrot.lane.b32.xlu2 %v7276_v14, %s5797_s25  ;;  %8829 = vst [vmem:[#allocation10_spill] sm:$0xff] %v7321_v32 }
 0x3fc   : > { %v7278_v20 = vld [vmem:[#allocation2 + $0x168] sm:$0xff]  ;;  %v2406_v17 = vpop.permute.xlu1 %2405 }
 0x3fd   : > { %2262 = vst.msk [vmem:[#allocation2 + $0x171] sm:$0xff] %vm225_vm0, %v2230_v48  ;;  %v7311_v31 = vld [vmem:[#allocation2 + $0x169] sm:$0xff] }
 0x3fe   : > { %2327 = vst.msk [vmem:[#allocation3 + $0xf0] sm:$0xff] %vm225_vm0, %v7278_v20  ;;  %v2522_v48 = vld [vmem:[#allocation2 + $0x2] sm:$0xff] }
 0x3ff   : > { %2496 = vst.msk [vmem:[#allocation3 + $0x30] sm:$0xff] %vm2489_vm14, %v2406_v17  ;;  %v7316_v17 = vld [vmem:[#allocation2 + $0x1a] sm:$0xff] }
 0x400   : > { %8827 = vst [vmem:[#allocation16_spill] sm:$0xff] %v7311_v31 }
 0x401   : > { %8828 = vst [vmem:[#allocation5_spill] sm:$0xff] %v7316_v17 }
 0x402   : > { %2447 = vrot.lane.b32.xlu1 %v7300_v0, %s5797_s25  ;;  %2451 = vrot.lane.b32.xlu0 %v7294_v38, %s5797_s25 }
 0x404   : > { %v7296_v18 = vld [vmem:[#allocation2 + $0x171] sm:$0xff]  ;;  %v2414_v30 = vpop.permute.xlu2 %2413 }
 0x405   : > { %8826 = vst [vmem:[#allocation8_spill] sm:$0xff] %v7296_v18  ;;  %v7298_v22 = vld [vmem:[#allocation2 + $0x170] sm:$0xff]  ;;  %2455 = vrot.lane.b32.xlu2 %v7296_v18, %s5797_s25 }
 0x406   : > { %2328 = vst.msk [vmem:[#allocation3 + $0xf8] sm:$0xff] %vm225_vm0, %v7298_v22  ;;  %v2523_v18 = vld [vmem:[#allocation2 + $0xa] sm:$0xff] }
 0x407   : > { %2500 = vst.msk [vmem:[#allocation3 + $0x50] sm:$0xff] %vm2489_vm14, %v2414_v30  ;;  %v7326_v30 = vld [vmem:[#allocation2 + $0x3a] sm:$0xff] }
 0x408   : > { %8830 = vst [vmem:[#allocation19_spill] sm:$0xff] %v7326_v30 }
 0x40a   : > { %2453 = vrot.lane.b32.xlu1 %v7311_v31, %s5797_s25  ;;  %2586 = vrot.lane.b32.xlu0 %v2522_v48, %s5799_s27  ;;  %v7333_v31 = vld [vmem:[#allocation2 + $0x32] sm:$0xff] }
 0x40b   : > { %8832 = vst [vmem:[#allocation12_spill] sm:$0xff] %v7333_v31 }
 0x40c   : > { %v2410_v38 = vpop.permute.xlu0 %2409 }
 0x40d   : > { %2590 = vrot.lane.b32.xlu2 %v7316_v17, %s5799_s27  ;;  %2498 = vst.msk [vmem:[#allocation3 + $0x40] sm:$0xff] %vm2489_vm14, %v2410_v38  ;;  %v7331_v17 = vld [vmem:[#allocation2 + $0x4a] sm:$0xff]  ;;  %v7339_v38 = vld [vmem:[#allocation2 + $0x62] sm:$0xff] }
 0x40e   : > { %8831 = vst [vmem:[#allocation7_spill] sm:$0xff] %v7331_v17 }
 0x40f   : > { %8833 = vst [vmem:[#allocation22_spill] sm:$0xff] %v7339_v38 }
 0x412   : > { %2588 = vrot.lane.b32.xlu1 %v2523_v18, %s5799_s27  ;;  %2592 = vrot.lane.b32.xlu0 %v7321_v32, %s5799_s27  ;;  %v7344_v32 = vld [vmem:[#allocation2 + $0x6a] sm:$0xff] }
 0x413   : > { %8834 = vst [vmem:[#allocation9_spill] sm:$0xff] %v7344_v32 }
 0x414   : > { %v2412_v48 = vpop.permute.xlu1 %2411 }
 0x415   : > { %2596 = vrot.lane.b32.xlu2 %v7326_v30, %s5799_s27  ;;  %2499 = vst.msk [vmem:[#allocation3 + $0x48] sm:$0xff] %vm2489_vm14, %v2412_v48  ;;  %v7346_v48 = vld [vmem:[#allocation2 + $0x52] sm:$0xff] }
 0x416   : > { %8835 = vst [vmem:[#allocation15_spill] sm:$0xff] %v7346_v48 }
 0x41a   : > { %2598 = vrot.lane.b32.xlu0 %v7331_v17, %s5799_s27  ;;  %2594 = vrot.lane.b32.xlu1 %v7333_v31, %s5799_s27  ;;  %v7352_v17 = vld [vmem:[#allocation2 + $0x82] sm:$0xff] }
 0x41b   : > { %8836 = vst [vmem:[#allocation25_spill] sm:$0xff] %v7352_v17  ;;  %v7399_v31 = vld [vmem:[#allocation2 + $0xe2] sm:$0xff] }
 0x41c   : > { %v2420_v18 = vpop.permute.xlu2 %2419  ;;  %8847 = vst [vmem:[#allocation23_spill] sm:$0xff] %v7399_v31 }
 0x41d   : > { %2602 = vrot.lane.b32.xlu2 %v7339_v38, %s5799_s27  ;;  %2503 = vst.msk [vmem:[#allocation3 + $0x68] sm:$0xff] %vm2489_vm14, %v2420_v18  ;;  %v7357_v38 = vld [vmem:[#allocation2 + $0x92] sm:$0xff]  ;;  %v7359_v18 = vld [vmem:[#allocation2 + $0x7a] sm:$0xff] }
 0x41e   : > { %8837 = vst [vmem:[#allocation11_spill] sm:$0xff] %v7357_v38 }
 0x41f   : > { %8838 = vst [vmem:[#allocation18_spill] sm:$0xff] %v7359_v18 }
 0x422   : > { %2604 = vrot.lane.b32.xlu0 %v7344_v32, %s5799_s27  ;;  %2600 = vrot.lane.b32.xlu1 %v7346_v48, %s5799_s27  ;;  %v7365_v32 = vld [vmem:[#allocation2 + $0xaa] sm:$0xff] }
 0x423   : > { %8839 = vst [vmem:[#allocation28_spill] sm:$0xff] %v7365_v32 }
 0x424   : > { %v2416_v30 = vpop.permute.xlu0 %2415 }
 0x425   : > { %2608 = vrot.lane.b32.xlu2 %v7352_v17, %s5799_s27  ;;  %2501 = vst.msk [vmem:[#allocation3 + $0x58] sm:$0xff] %vm2489_vm14, %v2416_v30  ;;  %v7370_v17 = vld [vmem:[#allocation2 + $0xb2] sm:$0xff]  ;;  %v7372_v30 = vld [vmem:[#allocation2 + $0x9a] sm:$0xff] }
 0x426   : > { %8840 = vst [vmem:[#allocation14_spill] sm:$0xff] %v7370_v17 }
 0x427   : > { %8841 = vst [vmem:[#allocation21_spill] sm:$0xff] %v7372_v30 }
 0x42a   : > { %2610 = vrot.lane.b32.xlu0 %v7357_v38, %s5799_s27  ;;  %2606 = vrot.lane.b32.xlu1 %v7359_v18, %s5799_s27  ;;  %v7378_v38 = vld [vmem:[#allocation2 + $0xca] sm:$0xff] }
 0x42b   : > { %8842 = vst [vmem:[#allocation31_spill] sm:$0xff] %v7378_v38 }
 0x42c   : > { %v2418_v48 = vpop.permute.xlu1 %2417 }
 0x42d   : > { %2614 = vrot.lane.b32.xlu2 %v7365_v32, %s5799_s27  ;;  %2502 = vst.msk [vmem:[#allocation3 + $0x60] sm:$0xff] %vm2489_vm14, %v2418_v48  ;;  %v7383_v32 = vld [vmem:[#allocation2 + $0xda] sm:$0xff]  ;;  %v7385_v48 = vld [vmem:[#allocation2 + $0xc2] sm:$0xff] }
 0x42e   : > { %8843 = vst [vmem:[#allocation17_spill] sm:$0xff] %v7383_v32 }
 0x42f   : > { %8844 = vst [vmem:[#allocation24_spill] sm:$0xff] %v7385_v48 }
 0x432   : > { %2616 = vrot.lane.b32.xlu0 %v7370_v17, %s5799_s27  ;;  %2612 = vrot.lane.b32.xlu1 %v7372_v30, %s5799_s27  ;;  %v7391_v17 = vld [vmem:[#allocation2 + $0xf2] sm:$0xff] }
 0x433   : > { %8845 = vst [vmem:[#allocation20_spill] sm:$0xff] %v7391_v17 }
 0x434   : > { %v2426_v18 = vpop.permute.xlu2 %2425 }
 0x435   : > { %2620 = vrot.lane.b32.xlu2 %v7378_v38, %s5799_s27  ;;  %2506 = vst.msk [vmem:[#allocation3 + $0x80] sm:$0xff] %vm2489_vm14, %v2426_v18  ;;  %v7397_v18 = vld [vmem:[#allocation2 + $0xfa] sm:$0xff] }
 0x436   : > { %8846 = vst [vmem:[#allocation27_spill] sm:$0xff] %v7397_v18 }
 0x43a   : > { %2622 = vrot.lane.b32.xlu0 %v7383_v32, %s5799_s27  ;;  %2618 = vrot.lane.b32.xlu1 %v7385_v48, %s5799_s27  ;;  %v7405_v32 = vld [vmem:[#allocation2 + $0x112] sm:$0xff]  ;;  %v7413_v48 = vld [vmem:[#allocation2 + $0x10a] sm:$0xff] }
 0x43b   : > { %8848 = vst [vmem:[#allocation30_spill] sm:$0xff] %v7405_v32 }
 0x43c   : > { %v2422_v30 = vpop.permute.xlu0 %2421  ;;  %v2432_v38 = vpop.permute.xlu2 %2431  ;;  %8850 = vst [vmem:[#allocation29_spill] sm:$0xff] %v7413_v48 }
 0x43d   : > { %2626 = vrot.lane.b32.xlu2 %v7391_v17, %s5799_s27  ;;  %2504 = vst.msk [vmem:[#allocation3 + $0x70] sm:$0xff] %vm2489_vm14, %v2422_v30 }
 0x43e   : > { %2509 = vst.msk [vmem:[#allocation3 + $0x98] sm:$0xff] %vm2489_vm14, %v2432_v38  ;;  %v7411_v38 = vld [vmem:[#allocation2 + $0x122] sm:$0xff] }
 0x43f   : > { %8849 = vst [vmem:[#allocation26_spill] sm:$0xff] %v7411_v38 }
 0x442   : > { %2628 = vrot.lane.b32.xlu0 %v7397_v18, %s5799_s27  ;;  %2624 = vrot.lane.b32.xlu1 %v7399_v31, %s5799_s27  ;;  %v2548_v18 = vld [vmem:[#allocation2 + $0x13a] sm:$0xff]  ;;  %v2547_v31 = vld [vmem:[#allocation2 + $0x12a] sm:$0xff] }
 0x444   : > { %v2424_v17 = vpop.permute.xlu1 %2423 }
 0x445   : > { %2632 = vrot.lane.b32.xlu2 %v7405_v32, %s5799_s27  ;;  %2505 = vst.msk [vmem:[#allocation3 + $0x78] sm:$0xff] %vm2489_vm14, %v2424_v17  ;;  %v2438_v30 = vpop.permute.xlu2 %2437  ;;  %v2549_v17 = vld [vmem:[#allocation2 + $0x142] sm:$0xff] }
 0x446   : > { %2512 = vst.msk [vmem:[#allocation3 + $0xb0] sm:$0xff] %vm2489_vm14, %v2438_v30  ;;  %v2551_v30 = vld [vmem:[#allocation2 + $0x15a] sm:$0xff] }
 0x44a   : > { %2634 = vrot.lane.b32.xlu0 %v7411_v38, %s5799_s27  ;;  %2630 = vrot.lane.b32.xlu1 %v7413_v48, %s5799_s27  ;;  %v2552_v48 = vld [vmem:[#allocation2 + $0x16a] sm:$0xff] }
 0x44d   : > { %2638 = vrot.lane.b32.xlu2 %v2548_v18, %s5799_s27  ;;  %v2444_v32 = vpop.permute.xlu2 %2443  ;;  %v2550_v18 = vld [vmem:[#allocation2 + $0x152] sm:$0xff] }
 0x44e   : > { %2515 = vst.msk [vmem:[#allocation3 + $0xc8] sm:$0xff] %vm2489_vm14, %v2444_v32 }
 0x452   : > { %2640 = vrot.lane.b32.xlu0 %v2549_v17, %s5799_s27  ;;  %2636 = vrot.lane.b32.xlu1 %v2547_v31, %s5799_s27 }
 0x454   : > { %v2428_v14 = vpop.permute.xlu0 %2427 }
 0x455   : > { %2644 = vrot.lane.b32.xlu2 %v2551_v30, %s5799_s27  ;;  %2507 = vst.msk [vmem:[#allocation3 + $0x88] sm:$0xff] %vm2489_vm14, %v2428_v14  ;;  %v2450_v38 = vpop.permute.xlu2 %2449  ;;  %v2553_v14 = vld [vmem:[#allocation2 + $0x172] sm:$0xff] }
 0x456   : > { %2518 = vst.msk [vmem:[#allocation3 + $0xe0] sm:$0xff] %vm2489_vm14, %v2450_v38 }
 0x45a   : > { %2646 = vrot.lane.b32.xlu0 %v2552_v48, %s5799_s27  ;;  %2642 = vrot.lane.b32.xlu1 %v2550_v18, %s5799_s27 }
 0x45c   : > { %v2430_v32 = vpop.permute.xlu1 %2429  ;;  %v2434_v31 = vpop.permute.xlu0 %2433 }
 0x45d   : > { %2779 = vrot.lane.b32.xlu2 %v7004_v41, %s5801_s29  ;;  %2508 = vst.msk [vmem:[#allocation3 + $0x90] sm:$0xff] %vm2489_vm14, %v2430_v32 }
 0x45e   : > { %2510 = vst.msk [vmem:[#allocation3 + $0xa0] sm:$0xff] %vm2489_vm14, %v2434_v31 }
 0x45f   : > { %v2456_v17 = vpop.permute.xlu2 %2455 }
 0x460   : > { %2521 = vst.msk [vmem:[#allocation3 + $0xf8] sm:$0xff] %vm2489_vm14, %v2456_v17 }
 0x462   : > { %2781 = vrot.lane.b32.xlu0 %v7015_v50, %s5801_s29  ;;  %2648 = vrot.lane.b32.xlu1 %v2553_v14, %s5799_s27 }
 0x464   : > { %v2436_v48 = vpop.permute.xlu1 %2435  ;;  %v2440_v41 = vpop.permute.xlu0 %2439 }
 0x465   : > { %2785 = vrot.lane.b32.xlu2 %v7035_v61, %s5801_s29  ;;  %2511 = vst.msk [vmem:[#allocation3 + $0xa8] sm:$0xff] %vm2489_vm14, %v2436_v48 }
 0x466   : > { %2513 = vst.msk [vmem:[#allocation3 + $0xb8] sm:$0xff] %vm2489_vm14, %v2440_v41 }
 0x467   : > { %v2591_v38 = vpop.permute.xlu2 %2590 }
 0x468   : > { %2685 = vst.msk [vmem:[#allocation3 + $0x10] sm:$0xff] %vm2682_vm15, %v2591_v38 }
 0x46a   : > { %2787 = vrot.lane.b32.xlu0 %v7045_v60, %s5801_s29  ;;  %2783 = vrot.lane.b32.xlu1 %v7025_v34, %s5801_s29 }
 0x46c   : > { %v2442_v50 = vpop.permute.xlu1 %2441  ;;  %v2446_v61 = vpop.permute.xlu0 %2445 }
 0x46d   : > { %2791 = vrot.lane.b32.xlu2 %v7067_v58, %s5801_s29  ;;  %2514 = vst.msk [vmem:[#allocation3 + $0xc0] sm:$0xff] %vm2489_vm14, %v2442_v50 }
 0x46e   : > { %2516 = vst.msk [vmem:[#allocation3 + $0xd0] sm:$0xff] %vm2489_vm14, %v2446_v61 }
 0x46f   : > { %v2597_v30 = vpop.permute.xlu2 %2596 }
 0x470   : > { %2688 = vst.msk [vmem:[#allocation3 + $0x28] sm:$0xff] %vm2682_vm15, %v2597_v30 }
 0x472   : > { %2793 = vrot.lane.b32.xlu0 %v7079_v23, %s5801_s29  ;;  %2789 = vrot.lane.b32.xlu1 %v7055_v51, %s5801_s29  ;;  %v2195_v23 = vpop.f32.mrf.mxu3 }
 0x473   : > { %v2196_v51 = vadd.f32 %v6994_v10, %v2195_v23 }
 0x474   : > { %v2448_v34 = vpop.permute.xlu1 %2447  ;;  %v2452_v60 = vpop.permute.xlu0 %2451 }
 0x475   : > { %2797 = vrot.lane.b32.xlu2 %v7110_v26, %s5801_s29  ;;  %2517 = vst.msk [vmem:[#allocation3 + $0xd8] sm:$0xff] %vm2489_vm14, %v2448_v34  ;;  %v2231_v31 = vmax.f32 %v2196_v51, 0.0 }
 0x476   : > { %2519 = vst.msk [vmem:[#allocation3 + $0xe8] sm:$0xff] %vm2489_vm14, %v2452_v60 }
 0x477   : > { %v2603_v58 = vpop.permute.xlu2 %2602  ;;  %2263 = vst.msk [vmem:[#allocation2 + $0x181] sm:$0xff] %vm225_vm0, %v2231_v31  ;;  %v8854_v31 = vld [vmem:[#allocation8_spill] sm:$0xff] }
 0x478   : > { %2691 = vst.msk [vmem:[#allocation3 + $0x40] sm:$0xff] %vm2682_vm15, %v2603_v58 }
 0x47a   : > { %2799 = vrot.lane.b32.xlu0 %v7127_v63, %s5801_s29  ;;  %2795 = vrot.lane.b32.xlu1 %v7092_v21, %s5801_s29  ;;  %v2198_v21 = vpop.f32.mrf.mxu3 }
 0x47b   : > { %v2199_v63 = vadd.f32 %v6994_v10, %v2198_v21  ;;  %v8855_v21 = vld [vmem:[#allocation4_spill] sm:$0xff] }
 0x47c   : > { %v2454_v26 = vpop.permute.xlu1 %2453  ;;  %v2587_v18 = vpop.permute.xlu0 %2586 }
 0x47d   : > { %2803 = vrot.lane.b32.xlu2 %v7161_v28, %s5801_s29  ;;  %2520 = vst.msk [vmem:[#allocation3 + $0xf0] sm:$0xff] %vm2489_vm14, %v2454_v26  ;;  %v2232_v48 = vmax.f32 %v2199_v63, 0.0  ;;  %v8851_v26 = vld [vmem:[#allocation6_spill] sm:$0xff]  ;;  %vm5546_vm14 = vcmask 1046534  }
 0x47e   : > { %2683 = vst.msk [vmem:[#allocation3] sm:$0xff] %vm2682_vm15, %v2587_v18  ;;  %v2745_v34 = vld [vmem:[#allocation2 + $0x180] sm:$0xff] }
 0x47f   : > { %v2609_v32 = vpop.permute.xlu2 %2608  ;;  %2264 = vst.msk [vmem:[#allocation2 + $0x189] sm:$0xff] %vm225_vm0, %v2232_v48  ;;  %v7625_v48 = vld [vmem:[#allocation2 + $0x181] sm:$0xff] }
 0x480   : > { %2694 = vst.msk [vmem:[#allocation3 + $0x58] sm:$0xff] %vm2682_vm15, %v2609_v32 }
 0x482   : > { %2805 = vrot.lane.b32.xlu0 %v7182_v35, %s5801_s29  ;;  %2801 = vrot.lane.b32.xlu1 %v7145_v11, %s5801_s29 }
 0x484   : > { %v2589_v28 = vpop.permute.xlu1 %2588  ;;  %v2593_v17 = vpop.permute.xlu0 %2592 }
 0x485   : > { %2809 = vrot.lane.b32.xlu2 %v7218_v24, %s5801_s29  ;;  %2684 = vst.msk [vmem:[#allocation3 + $0x8] sm:$0xff] %vm2682_vm15, %v2589_v28 }
 0x486   : > { %2686 = vst.msk [vmem:[#allocation3 + $0x18] sm:$0xff] %vm2682_vm15, %v2593_v17  ;;  %v2746_v58 = vld [vmem:[#allocation2 + $0x188] sm:$0xff] }
 0x487   : > { %v2615_v14 = vpop.permute.xlu2 %2614  ;;  %v7618_v63 = vld [vmem:[#allocation2 + $0x189] sm:$0xff] }
 0x488   : > { %2697 = vst.msk [vmem:[#allocation3 + $0x70] sm:$0xff] %vm2682_vm15, %v2615_v14 }
 0x48a   : > { %2811 = vrot.lane.b32.xlu0 %v7245_v8, %s5801_s29  ;;  %2807 = vrot.lane.b32.xlu1 %v7194_v36, %s5801_s29 }
 0x48c   : > { %v2599_v10 = vpop.permute.xlu0 %2598  ;;  %v2595_v11 = vpop.permute.xlu1 %2594 }
 0x48d   : > { %2815 = vrot.lane.b32.xlu2 %v7098_v40, %s5801_s29  ;;  %2689 = vst.msk [vmem:[#allocation3 + $0x30] sm:$0xff] %vm2682_vm15, %v2599_v10  ;;  %v8856_v10 = vld [vmem:[#allocation5_spill] sm:$0xff] }
 0x48e   : > { %2687 = vst.msk [vmem:[#allocation3 + $0x20] sm:$0xff] %vm2682_vm15, %v2595_v11  ;;  %v8857_v11 = vld [vmem:[#allocation12_spill] sm:$0xff] }
 0x48f   : > { %v2621_v35 = vpop.permute.xlu2 %2620 }
 0x490   : > { %2700 = vst.msk [vmem:[#allocation3 + $0x88] sm:$0xff] %vm2682_vm15, %v2621_v35 }
 0x492   : > { %2817 = vrot.lane.b32.xlu0 %v7115_v39, %s5801_s29  ;;  %2813 = vrot.lane.b32.xlu1 %v7235_v16, %s5801_s29 }
 0x494   : > { %v2605_v36 = vpop.permute.xlu0 %2604  ;;  %v2601_v24 = vpop.permute.xlu1 %2600 }
 0x495   : > { %2821 = vrot.lane.b32.xlu2 %v7150_v9, %s5801_s29  ;;  %2692 = vst.msk [vmem:[#allocation3 + $0x48] sm:$0xff] %vm2682_vm15, %v2605_v36 }
 0x496   : > { %2690 = vst.msk [vmem:[#allocation3 + $0x38] sm:$0xff] %vm2682_vm15, %v2601_v24 }
 0x497   : > { %v2627_v8 = vpop.permute.xlu2 %2626 }
 0x498   : > { %2703 = vst.msk [vmem:[#allocation3 + $0xa0] sm:$0xff] %vm2682_vm15, %v2627_v8  ;;  %v8858_v8 = vld [vmem:[#allocation19_spill] sm:$0xff] }
 0x49a   : > { %2823 = vrot.lane.b32.xlu0 %v7163_v12, %s5801_s29  ;;  %2819 = vrot.lane.b32.xlu1 %v7133_v55, %s5801_s29 }
 0x49c   : > { %v2611_v16 = vpop.permute.xlu0 %2610  ;;  %v2607_v41 = vpop.permute.xlu1 %2606 }
 0x49d   : > { %2827 = vrot.lane.b32.xlu2 %v7196_v1, %s5801_s29  ;;  %2695 = vst.msk [vmem:[#allocation3 + $0x60] sm:$0xff] %vm2682_vm15, %v2611_v16  ;;  %v8859_v16 = vld [vmem:[#allocation10_spill] sm:$0xff] }
 0x49e   : > { %2693 = vst.msk [vmem:[#allocation3 + $0x50] sm:$0xff] %vm2682_vm15, %v2607_v41  ;;  %v8860_v41 = vld [vmem:[#allocation15_spill] sm:$0xff] }
 0x49f   : > { %v2633_v38 = vpop.permute.xlu2 %2632 }
 0x4a0   : > { %2706 = vst.msk [vmem:[#allocation3 + $0xb8] sm:$0xff] %vm2682_vm15, %v2633_v38 }
 0x4a2   : > { %2829 = vrot.lane.b32.xlu0 %v7220_v25, %s5801_s29  ;;  %2825 = vrot.lane.b32.xlu1 %v7177_v2, %s5801_s29 }
 0x4a4   : > { %v2617_v50 = vpop.permute.xlu0 %2616  ;;  %v2613_v61 = vpop.permute.xlu1 %2612 }
 0x4a5   : > { %2833 = vrot.lane.b32.xlu2 %v7261_v15, %s5801_s29  ;;  %2698 = vst.msk [vmem:[#allocation3 + $0x78] sm:$0xff] %vm2682_vm15, %v2617_v50 }
 0x4a6   : > { %2696 = vst.msk [vmem:[#allocation3 + $0x68] sm:$0xff] %vm2682_vm15, %v2613_v61 }
 0x4a7   : > { %v2639_v30 = vpop.permute.xlu2 %2638 }
 0x4a8   : > { %2709 = vst.msk [vmem:[#allocation3 + $0xd0] sm:$0xff] %vm2682_vm15, %v2639_v30  ;;  %v8861_v30 = vld [vmem:[#allocation22_spill] sm:$0xff] }
 0x4aa   : > { %2835 = vrot.lane.b32.xlu0 %v7278_v20, %s5801_s29  ;;  %2831 = vrot.lane.b32.xlu1 %v7228_v7, %s5801_s29 }
 0x4ac   : > { %v2623_v2 = vpop.permute.xlu0 %2622  ;;  %v2619_v15 = vpop.permute.xlu1 %2618 }
 0x4ad   : > { %2839 = vrot.lane.b32.xlu2 %v2745_v34, %s5801_s29  ;;  %2701 = vst.msk [vmem:[#allocation3 + $0x90] sm:$0xff] %vm2682_vm15, %v2623_v2  ;;  %v8862_v34 = vld [vmem:[#allocation7_spill] sm:$0xff]  ;;  %v8863_v2 = vld [vmem:[#allocation18_spill] sm:$0xff] }
 0x4ae   : > { %2699 = vst.msk [vmem:[#allocation3 + $0x80] sm:$0xff] %vm2682_vm15, %v2619_v15 }
 0x4af   : > { %v2645_v60 = vpop.permute.xlu2 %2644 }
 0x4b0   : > { %2712 = vst.msk [vmem:[#allocation3 + $0xe8] sm:$0xff] %vm2682_vm15, %v2645_v60 }
 0x4b2   : > { %2841 = vrot.lane.b32.xlu0 %v2746_v58, %s5801_s29  ;;  %2837 = vrot.lane.b32.xlu1 %v7298_v22, %s5801_s29 }
 0x4b4   : > { %v2629_v7 = vpop.permute.xlu0 %2628  ;;  %v2625_v20 = vpop.permute.xlu1 %2624 }
 0x4b5   : > { %2974 = vrot.lane.b32.xlu2 %v7012_v45, %s5803_s6  ;;  %2704 = vst.msk [vmem:[#allocation3 + $0xa8] sm:$0xff] %vm2682_vm15, %v2629_v7  ;;  %v8864_v7 = vld [vmem:[#allocation25_spill] sm:$0xff] }
 0x4b6   : > { %2702 = vst.msk [vmem:[#allocation3 + $0x98] sm:$0xff] %vm2682_vm15, %v2625_v20  ;;  %v8865_v20 = vld [vmem:[#allocation9_spill] sm:$0xff] }
 0x4b7   : > { %v2780_v23 = vpop.permute.xlu2 %2779 }
 0x4b8   : > { %2876 = vst.msk [vmem:[#allocation3] sm:$0xff] %vm2875_vm2, %v2780_v23  ;;  %v8866_v23 = vld [vmem:[#allocation21_spill] sm:$0xff] }
 0x4ba   : > { %2976 = vrot.lane.b32.xlu0 %v7023_v49, %s5803_s6  ;;  %2972 = vrot.lane.b32.xlu1 %v7001_v33, %s5803_s6 }
 0x4bc   : > { %v2635_v45 = vpop.permute.xlu0 %2634  ;;  %v2631_v22 = vpop.permute.xlu1 %2630 }
 0x4bd   : > { %2980 = vrot.lane.b32.xlu2 %v7043_v46, %s5803_s6  ;;  %2707 = vst.msk [vmem:[#allocation3 + $0xc0] sm:$0xff] %vm2682_vm15, %v2635_v45 }
 0x4be   : > { %2705 = vst.msk [vmem:[#allocation3 + $0xb0] sm:$0xff] %vm2682_vm15, %v2631_v22 }
 0x4bf   : > { %v2786_v51 = vpop.permute.xlu2 %2785 }
 0x4c0   : > { %2879 = vst.msk [vmem:[#allocation3 + $0x18] sm:$0xff] %vm2875_vm2, %v2786_v51 }
 0x4c2   : > { %2982 = vrot.lane.b32.xlu0 %v7053_v37, %s5803_s6  ;;  %2978 = vrot.lane.b32.xlu1 %v7033_v52, %s5803_s6 }
 0x4c4   : > { %v2641_v33 = vpop.permute.xlu0 %2640  ;;  %v2637_v49 = vpop.permute.xlu1 %2636 }
 0x4c5   : > { %2986 = vrot.lane.b32.xlu2 %v7077_v5, %s5803_s6  ;;  %2710 = vst.msk [vmem:[#allocation3 + $0xd8] sm:$0xff] %vm2682_vm15, %v2641_v33  ;;  %v8867_v33 = vld [vmem:[#allocation28_spill] sm:$0xff] }
 0x4c6   : > { %2708 = vst.msk [vmem:[#allocation3 + $0xc8] sm:$0xff] %vm2682_vm15, %v2637_v49  ;;  %v8868_v49 = vld [vmem:[#allocation11_spill] sm:$0xff] }
 0x4c7   : > { %v2792_v46 = vpop.permute.xlu2 %2791 }
 0x4c8   : > { %2882 = vst.msk [vmem:[#allocation3 + $0x30] sm:$0xff] %vm2875_vm2, %v2792_v46  ;;  %v8869_v46 = vld [vmem:[#allocation24_spill] sm:$0xff] }
 0x4ca   : > { %2988 = vrot.lane.b32.xlu0 %v7090_v42, %s5803_s6  ;;  %2984 = vrot.lane.b32.xlu1 %v7065_v59, %s5803_s6 }
 0x4cc   : > { %v2647_v52 = vpop.permute.xlu0 %2646  ;;  %v2643_v37 = vpop.permute.xlu1 %2642 }
 0x4cd   : > { %2992 = vrot.lane.b32.xlu2 %v7125_v44, %s5803_s6  ;;  %2713 = vst.msk [vmem:[#allocation3 + $0xf0] sm:$0xff] %vm2682_vm15, %v2647_v52 }
 0x4ce   : > { %2711 = vst.msk [vmem:[#allocation3 + $0xe0] sm:$0xff] %vm2682_vm15, %v2643_v37 }
 0x4cf   : > { %v2798_v5 = vpop.permute.xlu2 %2797 }
 0x4d0   : > { %2885 = vst.msk [vmem:[#allocation3 + $0x48] sm:$0xff] %vm2875_vm2, %v2798_v5 }
 0x4d2   : > { %2994 = vrot.lane.b32.xlu0 %v7143_v54, %s5803_s6  ;;  %2990 = vrot.lane.b32.xlu1 %v7108_v19, %s5803_s6 }
 0x4d4   : > { %v2782_v59 = vpop.permute.xlu0 %2781  ;;  %v2649_v42 = vpop.permute.xlu1 %2648 }
 0x4d5   : > { %2998 = vrot.lane.b32.xlu2 %v7175_v27, %s5803_s6  ;;  %2877 = vst.msk [vmem:[#allocation3 + $0x8] sm:$0xff] %vm2875_vm2, %v2782_v59  ;;  %v8870_v59 = vld [vmem:[#allocation31_spill] sm:$0xff] }
 0x4d6   : > { %2714 = vst.msk [vmem:[#allocation3 + $0xf8] sm:$0xff] %vm2682_vm15, %v2649_v42  ;;  %v8871_v42 = vld [vmem:[#allocation14_spill] sm:$0xff]  ;;  %vm5548_vm15 = vcmask 1047559  }
 0x4d7   : > { %v2804_v44 = vpop.permute.xlu2 %2803 }
 0x4d8   : > { %2888 = vst.msk [vmem:[#allocation3 + $0x60] sm:$0xff] %vm2875_vm2, %v2804_v44  ;;  %v8872_v44 = vld [vmem:[#allocation23_spill] sm:$0xff] }
 0x4da   : > { %3000 = vrot.lane.b32.xlu0 %v7192_v53, %s5803_s6  ;;  %2996 = vrot.lane.b32.xlu1 %v7159_v56, %s5803_s6 }
 0x4dc   : > { %v2788_v19 = vpop.permute.xlu0 %2787  ;;  %v2784_v54 = vpop.permute.xlu1 %2783 }
 0x4dd   : > { %3004 = vrot.lane.b32.xlu2 %v7231_v3, %s5803_s6  ;;  %2880 = vst.msk [vmem:[#allocation3 + $0x20] sm:$0xff] %vm2875_vm2, %v2788_v19 }
 0x4de   : > { %2878 = vst.msk [vmem:[#allocation3 + $0x10] sm:$0xff] %vm2875_vm2, %v2784_v54 }
 0x4df   : > { %v2810_v27 = vpop.permute.xlu2 %2809 }
 0x4e0   : > { %2891 = vst.msk [vmem:[#allocation3 + $0x78] sm:$0xff] %vm2875_vm2, %v2810_v27 }
 0x4e2   : > { %3006 = vrot.lane.b32.xlu0 %v7211_v4, %s5803_s6  ;;  %3002 = vrot.lane.b32.xlu1 %v7209_v43, %s5803_s6 }
 0x4e4   : > { %v2794_v56 = vpop.permute.xlu0 %2793  ;;  %v2790_v53 = vpop.permute.xlu1 %2789 }
 0x4e5   : > { %3010 = vrot.lane.b32.xlu2 %v7257_v13, %s5803_s6  ;;  %2883 = vst.msk [vmem:[#allocation3 + $0x38] sm:$0xff] %vm2875_vm2, %v2794_v56  ;;  %v8873_v56 = vld [vmem:[#allocation20_spill] sm:$0xff] }
 0x4e6   : > { %2881 = vst.msk [vmem:[#allocation3 + $0x28] sm:$0xff] %vm2875_vm2, %v2790_v53  ;;  %v8874_v53 = vld [vmem:[#allocation17_spill] sm:$0xff] }
 0x4e7   : > { %v2816_v3 = vpop.permute.xlu2 %2815 }
 0x4e8   : > { %2894 = vst.msk [vmem:[#allocation3 + $0x90] sm:$0xff] %vm2875_vm2, %v2816_v3 }
 0x4ea   : > { %3012 = vrot.lane.b32.xlu0 %v7241_v62, %s5803_s6  ;;  %3008 = vrot.lane.b32.xlu1 %v7233_v29, %s5803_s6 }
 0x4ec   : > { %v2800_v43 = vpop.permute.xlu0 %2799  ;;  %v2796_v4 = vpop.permute.xlu1 %2795 }
 0x4ed   : > { %3016 = vrot.lane.b32.xlu2 %v7281_v47, %s5803_s6  ;;  %2886 = vst.msk [vmem:[#allocation3 + $0x50] sm:$0xff] %vm2875_vm2, %v2800_v43 }
 0x4ee   : > { %2884 = vst.msk [vmem:[#allocation3 + $0x40] sm:$0xff] %vm2875_vm2, %v2796_v4 }
 0x4ef   : > { %v2822_v13 = vpop.permute.xlu2 %2821 }
 0x4f0   : > { %2897 = vst.msk [vmem:[#allocation3 + $0xa8] sm:$0xff] %vm2875_vm2, %v2822_v13  ;;  %v3503_v13 = vld [vmem:[#allocation2 + $0xf1] sm:$0xff] }
 0x4f2   : > { %3018 = vrot.lane.b32.xlu0 %v7267_v57, %s5803_s6  ;;  %3014 = vrot.lane.b32.xlu1 %v7259_v6, %s5803_s6  ;;  %v8852_v57 = vld [vmem:[#allocation13_spill] sm:$0xff]  ;;  %v8853_v6 = vld [vmem:[#allocation16_spill] sm:$0xff] }
 0x4f4   : > { %v2806_v29 = vpop.permute.xlu0 %2805  ;;  %v2802_v62 = vpop.permute.xlu1 %2801 }
 0x4f5   : > { %3022 = vrot.lane.b32.xlu2 %v7300_v0, %s5803_s6  ;;  %2889 = vst.msk [vmem:[#allocation3 + $0x68] sm:$0xff] %vm2875_vm2, %v2806_v29  ;;  %v8875_v29 = vld [vmem:[#allocation27_spill] sm:$0xff] }
 0x4f6   : > { %2887 = vst.msk [vmem:[#allocation3 + $0x58] sm:$0xff] %vm2875_vm2, %v2802_v62  ;;  %v3294_v62 = vld [vmem:[#allocation2 + $0x30] sm:$0xff] }
 0x4f7   : > { %v2828_v47 = vpop.permute.xlu2 %2827 }
 0x4f8   : > { %2900 = vst.msk [vmem:[#allocation3 + $0xc0] sm:$0xff] %vm2875_vm2, %v2828_v47 }
 0x4fa   : > { %3024 = vrot.lane.b32.xlu0 %v8851_v26, %s5803_s6  ;;  %3020 = vrot.lane.b32.xlu1 %v8852_v57, %s5803_s6  ;;  %v3487_v57 = vld [vmem:[#allocation2 + $0x31] sm:$0xff] }
 0x4fc   : > { %v2812_v18 = vpop.permute.xlu0 %2811  ;;  %v2808_v0 = vpop.permute.xlu1 %2807 }
 0x4fd   : > { %3028 = vrot.lane.b32.xlu2 %v8853_v6, %s5803_s6  ;;  %2892 = vst.msk [vmem:[#allocation3 + $0x80] sm:$0xff] %vm2875_vm2, %v2812_v18 }
 0x4fe   : > { %2890 = vst.msk [vmem:[#allocation3 + $0x70] sm:$0xff] %vm2875_vm2, %v2808_v0 }
 0x4ff   : > { %v2834_v32 = vpop.permute.xlu2 %2833 }
 0x500   : > { %2903 = vst.msk [vmem:[#allocation3 + $0xd8] sm:$0xff] %vm2875_vm2, %v2834_v32  ;;  %v3504_v32 = vld [vmem:[#allocation2 + $0xf9] sm:$0xff] }
 0x502   : > { %3030 = vrot.lane.b32.xlu0 %v8854_v31, %s5803_s6  ;;  %3026 = vrot.lane.b32.xlu1 %v8855_v21, %s5803_s6  ;;  %v3295_v31 = vld [vmem:[#allocation2 + $0x38] sm:$0xff] }
 0x504   : > { %v2818_v28 = vpop.permute.xlu0 %2817  ;;  %v2814_v17 = vpop.permute.xlu1 %2813 }
 0x505   : > { %3034 = vrot.lane.b32.xlu2 %v7618_v63, %s5803_s6  ;;  %2895 = vst.msk [vmem:[#allocation3 + $0x98] sm:$0xff] %vm2875_vm2, %v2818_v28 }
 0x506   : > { %2893 = vst.msk [vmem:[#allocation3 + $0x88] sm:$0xff] %vm2875_vm2, %v2814_v17 }
 0x507   : > { %v2840_v14 = vpop.permute.xlu2 %2839 }
 0x508   : > { %2906 = vst.msk [vmem:[#allocation3 + $0xf0] sm:$0xff] %vm2875_vm2, %v2840_v14  ;;  %v3488_v14 = vld [vmem:[#allocation2 + $0x39] sm:$0xff] }
 0x50a   : > { %3165 = vrot.lane.b32.xlu0 %v8856_v10, %s5804_s21  ;;  %3032 = vrot.lane.b32.xlu1 %v7625_v48, %s5803_s6  ;;  %v3681_v10 = vld [vmem:[#allocation2 + $0x3a] sm:$0xff] }
 0x50c   : > { %v2824_v35 = vpop.permute.xlu0 %2823  ;;  %v2820_v36 = vpop.permute.xlu1 %2819 }
 0x50d   : > { %3169 = vrot.lane.b32.xlu2 %v8857_v11, %s5804_s21  ;;  %2898 = vst.msk [vmem:[#allocation3 + $0xb0] sm:$0xff] %vm2875_vm2, %v2824_v35 }
 0x50e   : > { %2896 = vst.msk [vmem:[#allocation3 + $0xa0] sm:$0xff] %vm2875_vm2, %v2820_v36  ;;  %v3505_v36 = vld [vmem:[#allocation2 + $0x109] sm:$0xff] }
 0x50f   : > { %v2975_v24 = vpop.permute.xlu2 %2974 }
 0x510   : > { %3070 = vst.msk [vmem:[#allocation3 + $0x8] sm:$0xff] %vm3068_vm3, %v2975_v24  ;;  %v3296_v24 = vld [vmem:[#allocation2 + $0x48] sm:$0xff] }
 0x512   : > { %3171 = vrot.lane.b32.xlu0 %v8858_v8, %s5804_s21  ;;  %3167 = vrot.lane.b32.xlu1 %v8859_v16, %s5804_s21 }
 0x514   : > { %v2830_v38 = vpop.permute.xlu0 %2829  ;;  %v2826_v50 = vpop.permute.xlu1 %2825 }
 0x515   : > { %3175 = vrot.lane.b32.xlu2 %v8860_v41, %s5804_s21  ;;  %2901 = vst.msk [vmem:[#allocation3 + $0xc8] sm:$0xff] %vm2875_vm2, %v2830_v38  ;;  %v3489_v38 = vld [vmem:[#allocation2 + $0x49] sm:$0xff] }
 0x516   : > { %2899 = vst.msk [vmem:[#allocation3 + $0xb8] sm:$0xff] %vm2875_vm2, %v2826_v50  ;;  %v8876_v50 = vld [vmem:[#allocation29_spill] sm:$0xff] }
 0x517   : > { %v2981_v61 = vpop.permute.xlu2 %2980 }
 0x518   : > { %3073 = vst.msk [vmem:[#allocation3 + $0x20] sm:$0xff] %vm3068_vm3, %v2981_v61 }
 0x51a   : > { %3177 = vrot.lane.b32.xlu0 %v8861_v30, %s5804_s21  ;;  %3173 = vrot.lane.b32.xlu1 %v8862_v34, %s5804_s21 }
 0x51c   : > { %v2836_v15 = vpop.permute.xlu0 %2835  ;;  %v2832_v60 = vpop.permute.xlu1 %2831 }
 0x51d   : > { %3181 = vrot.lane.b32.xlu2 %v8863_v2, %s5804_s21  ;;  %2904 = vst.msk [vmem:[#allocation3 + $0xe0] sm:$0xff] %vm2875_vm2, %v2836_v15  ;;  %v3506_v2 = vld [vmem:[#allocation2 + $0x111] sm:$0xff] }
 0x51e   : > { %2902 = vst.msk [vmem:[#allocation3 + $0xd0] sm:$0xff] %vm2875_vm2, %v2832_v60  ;;  %v3297_v15 = vld [vmem:[#allocation2 + $0x50] sm:$0xff] }
 0x51f   : > { %v2987_v58 = vpop.permute.xlu2 %2986 }
 0x520   : > { %3076 = vst.msk [vmem:[#allocation3 + $0x38] sm:$0xff] %vm3068_vm3, %v2987_v58 }
 0x522   : > { %3183 = vrot.lane.b32.xlu0 %v8864_v7, %s5804_s21  ;;  %3179 = vrot.lane.b32.xlu1 %v8865_v20, %s5804_s21  ;;  %v8877_v20 = vld [vmem:[#allocation30_spill] sm:$0xff] }
 0x524   : > { %v2842_v45 = vpop.permute.xlu0 %2841  ;;  %v2838_v22 = vpop.permute.xlu1 %2837 }
 0x525   : > { %3187 = vrot.lane.b32.xlu2 %v8866_v23, %s5804_s21  ;;  %2907 = vst.msk [vmem:[#allocation3 + $0xf8] sm:$0xff] %vm2875_vm2, %v2842_v45 }
 0x526   : > { %2905 = vst.msk [vmem:[#allocation3 + $0xe8] sm:$0xff] %vm2875_vm2, %v2838_v22  ;;  %v3683_v22 = vld [vmem:[#allocation2 + $0x52] sm:$0xff] }
 0x527   : > { %v2993_v51 = vpop.permute.xlu2 %2992 }
 0x528   : > { %3079 = vst.msk [vmem:[#allocation3 + $0x50] sm:$0xff] %vm3068_vm3, %v2993_v51  ;;  %v3490_v51 = vld [vmem:[#allocation2 + $0x51] sm:$0xff] }
 0x52a   : > { %3189 = vrot.lane.b32.xlu0 %v8867_v33, %s5804_s21  ;;  %3185 = vrot.lane.b32.xlu1 %v8868_v49, %s5804_s21  ;;  %v8878_v33 = vld [vmem:[#allocation26_spill] sm:$0xff] }
 0x52c   : > { %v2977_v52 = vpop.permute.xlu0 %2976  ;;  %v2973_v37 = vpop.permute.xlu1 %2972 }
 0x52d   : > { %3193 = vrot.lane.b32.xlu2 %v8869_v46, %s5804_s21  ;;  %3071 = vst.msk [vmem:[#allocation3 + $0x10] sm:$0xff] %vm3068_vm3, %v2977_v52  ;;  %v3298_v52 = vld [vmem:[#allocation2 + $0x60] sm:$0xff] }
 0x52e   : > { %3069 = vst.msk [vmem:[#allocation3] sm:$0xff] %vm3068_vm3, %v2973_v37  ;;  %v3507_v37 = vld [vmem:[#allocation2 + $0x121] sm:$0xff] }
 0x52f   : > { %v2999_v5 = vpop.permute.xlu2 %2998 }
 0x530   : > { %3082 = vst.msk [vmem:[#allocation3 + $0x68] sm:$0xff] %vm3068_vm3, %v2999_v5  ;;  %v3491_v5 = vld [vmem:[#allocation2 + $0x61] sm:$0xff] }
 0x532   : > { %3195 = vrot.lane.b32.xlu0 %v8870_v59, %s5804_s21  ;;  %3191 = vrot.lane.b32.xlu1 %v8871_v42, %s5804_s21 }
 0x534   : > { %v2983_v19 = vpop.permute.xlu0 %2982  ;;  %v2979_v54 = vpop.permute.xlu1 %2978 }
 0x535   : > { %3199 = vrot.lane.b32.xlu2 %v8872_v44, %s5804_s21  ;;  %3074 = vst.msk [vmem:[#allocation3 + $0x28] sm:$0xff] %vm3068_vm3, %v2983_v19  ;;  %v3315_v19 = vld [vmem:[#allocation2 + $0x128] sm:$0xff] }
 0x536   : > { %3072 = vst.msk [vmem:[#allocation3 + $0x18] sm:$0xff] %vm3068_vm3, %v2979_v54  ;;  %v3122_v54 = vld [vmem:[#allocation2 + $0x112] sm:$0xff] }
 0x537   : > { %v3005_v27 = vpop.permute.xlu2 %3004 }
 0x538   : > { %3085 = vst.msk [vmem:[#allocation3 + $0x80] sm:$0xff] %vm3068_vm3, %v3005_v27  ;;  %v3508_v27 = vld [vmem:[#allocation2 + $0x129] sm:$0xff] }
 0x53a   : > { %3201 = vrot.lane.b32.xlu0 %v8873_v56, %s5804_s21  ;;  %3197 = vrot.lane.b32.xlu1 %v8874_v53, %s5804_s21 }
 0x53c   : > { %v2989_v3 = vpop.permute.xlu0 %2988  ;;  %v2985_v43 = vpop.permute.xlu1 %2984 }
 0x53d   : > { %3390 = vrot.lane.b32.xlu2 %v7098_v40, %s5805_s22  ;;  %3077 = vst.msk [vmem:[#allocation3 + $0x40] sm:$0xff] %vm3068_vm3, %v2989_v3 }
 0x53e   : > { %3075 = vst.msk [vmem:[#allocation3 + $0x30] sm:$0xff] %vm3068_vm3, %v2985_v43 }
 0x53f   : > { %v3011_v4 = vpop.permute.xlu2 %3010 }
 0x540   : > { %3088 = vst.msk [vmem:[#allocation3 + $0x98] sm:$0xff] %vm3068_vm3, %v3011_v4  ;;  %v3912_v4 = vld [vmem:[%s8704_s3 + $0x38] sm:$0xff] }
 0x542   : > { %3583 = vrot.lane.b32.xlu0 %v3503_v13, %s5806_s23  ;;  %3203 = vrot.lane.b32.xlu1 %v8875_v29, %s5804_s21  ;;  %v3911_v13 = vld [vmem:[%s8704_s3 + $0x30] sm:$0xff] }
 0x544   : > { %v2995_v40 = vpop.permute.xlu0 %2994  ;;  %v2991_v47 = vpop.permute.xlu1 %2990 }
 0x545   : > { %3358 = vrot.lane.b32.xlu2 %v3294_v62, %s5805_s22  ;;  %3080 = vst.msk [vmem:[#allocation3 + $0x58] sm:$0xff] %vm3068_vm3, %v2995_v40  ;;  %v3701_v62 = vld [vmem:[#allocation2 + $0x12a] sm:$0xff]  ;;  %v3684_v40 = vld [vmem:[#allocation2 + $0x62] sm:$0xff] }
 0x546   : > { %3078 = vst.msk [vmem:[#allocation3 + $0x48] sm:$0xff] %vm3068_vm3, %v2991_v47  ;;  %v3123_v47 = vld [vmem:[#allocation2 + $0x122] sm:$0xff] }
 0x547   : > { %v3017_v26 = vpop.permute.xlu2 %3016 }
 0x548   : > { %3091 = vst.msk [vmem:[#allocation3 + $0xb0] sm:$0xff] %vm3068_vm3, %v3017_v26  ;;  %v3909_v26 = vld [vmem:[%s8704_s3 + $0x20] sm:$0xff] }
 0x54a   : > { %3551 = vrot.lane.b32.xlu0 %v3487_v57, %s5806_s23  ;;  %3776 = vrot.lane.b32.xlu1 %v8873_v56, %s5807_s24  ;;  %v3913_v56 = vld [vmem:[%s8704_s3 + $0x40] sm:$0xff] }
 0x54b   : > { %5753 = vmatpush.msra.mxu2 %v3913_v56  ;;  %4022 = vmatpush.msra.mxu1 %v3913_v56 }
 0x54c   : > { %v3001_v6 = vpop.permute.xlu0 %3000  ;;  %v2997_v18 = vpop.permute.xlu1 %2996 }
 0x54d   : > { %3744 = vrot.lane.b32.xlu2 %v8857_v11, %s5807_s24  ;;  %3083 = vst.msk [vmem:[#allocation3 + $0x70] sm:$0xff] %vm3068_vm3, %v3001_v6  ;;  %5754 = vmatpush.msra.mxu2 %v3912_v4 }
 0x54e   : > { %3081 = vst.msk [vmem:[#allocation3 + $0x60] sm:$0xff] %vm3068_vm3, %v2997_v18  ;;  %4023 = vmatpush.msra.mxu1 %v3912_v4  ;;  %v3319_v4 = vld [vmem:[#allocation2 + $0x158] sm:$0xff] }
 0x54f   : > { %v3023_v0 = vpop.permute.xlu2 %3022  ;;  %5755 = vmatpush.msra.mxu2 %v3911_v13 }
 0x550   : > { %3094 = vst.msk [vmem:[#allocation3 + $0xc8] sm:$0xff] %vm3068_vm3, %v3023_v0  ;;  %4024 = vmatpush.msra.mxu1 %v3911_v13  ;;  %v3908_v0 = vld [vmem:[%s8704_s3 + $0x18] sm:$0xff] }
 0x551   : > { %v3303_v13 = vld [vmem:[#allocation2 + $0x98] sm:$0xff] }
 0x552   : > { %3585 = vrot.lane.b32.xlu0 %v3504_v32, %s5806_s23  ;;  %3392 = vrot.lane.b32.xlu1 %v7115_v39, %s5805_s22  ;;  %v3907_v32 = vld [vmem:[%s8704_s3 + $0x10] sm:$0xff] }
 0x554   : > { %v3007_v21 = vpop.permute.xlu0 %3006  ;;  %v3003_v28 = vpop.permute.xlu1 %3002 }
 0x555   : > { %3360 = vrot.lane.b32.xlu2 %v3295_v31, %s5805_s22  ;;  %3086 = vst.msk [vmem:[#allocation3 + $0x88] sm:$0xff] %vm3068_vm3, %v3007_v21  ;;  %v3492_v31 = vld [vmem:[#allocation2 + $0x69] sm:$0xff] }
 0x556   : > { %3084 = vst.msk [vmem:[#allocation3 + $0x78] sm:$0xff] %vm3068_vm3, %v3003_v28  ;;  %v3299_v21 = vld [vmem:[#allocation2 + $0x68] sm:$0xff] }
 0x557   : > { %v3029_v17 = vpop.permute.xlu2 %3028  ;;  %v3685_v28 = vld [vmem:[#allocation2 + $0x6a] sm:$0xff] }
 0x558   : > { %3097 = vst.msk [vmem:[#allocation3 + $0xe0] sm:$0xff] %vm3068_vm3, %v3029_v17  ;;  %v3906_v17 = vld [vmem:[%s8704_s3 + $0x8] sm:$0xff] }
 0x55a   : > { %3553 = vrot.lane.b32.xlu0 %v3488_v14, %s5806_s23  ;;  %3778 = vrot.lane.b32.xlu1 %v8875_v29, %s5807_s24  ;;  %v3910_v29 = vld [vmem:[%s8704_s3 + $0x28] sm:$0xff] }
 0x55b   : > { %5756 = vmatpush.msra.mxu2 %v3910_v29  ;;  %4025 = vmatpush.msra.mxu1 %v3910_v29 }
 0x55c   : > { %v3013_v39 = vpop.permute.xlu0 %3012  ;;  %v3009_v11 = vpop.permute.xlu1 %3008 }
 0x55d   : > { %3746 = vrot.lane.b32.xlu2 %v3681_v10, %s5807_s24  ;;  %3089 = vst.msk [vmem:[#allocation3 + $0xa0] sm:$0xff] %vm3068_vm3, %v3013_v39  ;;  %5757 = vmatpush.msra.mxu2 %v3909_v26  ;;  %v3905_v39 = vld [vmem:[%s8704_s3] sm:$0xff] }
 0x55e   : > { %3087 = vst.msk [vmem:[#allocation3 + $0x90] sm:$0xff] %vm3068_vm3, %v3009_v11  ;;  %4026 = vmatpush.msra.mxu1 %v3909_v26 }
 0x55f   : > { %v3035_v35 = vpop.permute.xlu2 %3034  ;;  %5758 = vmatpush.msra.mxu2 %v3908_v0 }
 0x560   : > { %3100 = vst.msk [vmem:[#allocation3 + $0xf8] sm:$0xff] %vm3068_vm3, %v3035_v35  ;;  %4027 = vmatpush.msra.mxu1 %v3908_v0  ;;  %v3509_v35 = vld [vmem:[#allocation2 + $0x139] sm:$0xff] }
 0x561   : > { %5759 = vmatpush.msra.mxu2 %v3907_v32 }
 0x562   : > { %3587 = vrot.lane.b32.xlu0 %v3505_v36, %s5806_s23  ;;  %3394 = vrot.lane.b32.xlu1 %v7133_v55, %s5805_s22  ;;  %v3682_v55 = vld [vmem:[#allocation2 + $0x4a] sm:$0xff]  ;;  %v3300_v36 = vld [vmem:[#allocation2 + $0x78] sm:$0xff] }
 0x563   : > { %4028 = vmatpush.msra.mxu1 %v3907_v32  ;;  %5760 = vmatpush.msra.mxu2 %v3906_v17 }
 0x564   : > { %v3019_v8 = vpop.permute.xlu0 %3018  ;;  %v3015_v16 = vpop.permute.xlu1 %3014 }
 0x565   : > { %3362 = vrot.lane.b32.xlu2 %v3296_v24, %s5805_s22  ;;  %3092 = vst.msk [vmem:[#allocation3 + $0xb8] sm:$0xff] %vm3068_vm3, %v3019_v8  ;;  %4029 = vmatpush.msra.mxu1 %v3906_v17 }
 0x566   : > { %3090 = vst.msk [vmem:[#allocation3 + $0xa8] sm:$0xff] %vm3068_vm3, %v3015_v16  ;;  %5761 = vmatpush.msra.mxu2 %v3905_v39 }
 0x567   : > { %v3170_v41 = vpop.permute.xlu2 %3169  ;;  %4030 = vmatpush.msra.mxu1 %v3905_v39 }
 0x568   : > { %3264 = vst.msk [vmem:[#allocation3 + $0x10] sm:$0xff] %vm3261_vm4, %v3170_v41  ;;  %v3702_v41 = vld [vmem:[#allocation2 + $0x13a] sm:$0xff] }
 0x56a   : > { %3555 = vrot.lane.b32.xlu0 %v3489_v38, %s5806_s23  ;;  %3780 = vrot.lane.b32.xlu1 %v8876_v50, %s5807_s24 }
 0x56c   : > { %v3025_v61 = vpop.permute.xlu0 %3024  ;;  %v3021_v30 = vpop.permute.xlu1 %3020 }
 0x56d   : > { %3748 = vrot.lane.b32.xlu2 %v3682_v55, %s5807_s24  ;;  %3095 = vst.msk [vmem:[#allocation3 + $0xd0] sm:$0xff] %vm3068_vm3, %v3025_v61  ;;  %v3686_v55 = vld [vmem:[#allocation2 + $0x7a] sm:$0xff] }
 0x56e   : > { %3093 = vst.msk [vmem:[#allocation3 + $0xc0] sm:$0xff] %vm3068_vm3, %v3021_v30  ;;  %v3493_v61 = vld [vmem:[#allocation2 + $0x79] sm:$0xff]  ;;  %v3703_v30 = vld [vmem:[#allocation2 + $0x142] sm:$0xff] }
 0x56f   : > { %v3176_v34 = vpop.permute.xlu2 %3175 }
 0x570   : > { %3267 = vst.msk [vmem:[#allocation3 + $0x28] sm:$0xff] %vm3261_vm4, %v3176_v34 }
 0x572   : > { %3589 = vrot.lane.b32.xlu0 %v3506_v2, %s5806_s23  ;;  %3396 = vrot.lane.b32.xlu1 %v7150_v9, %s5805_s22 }
 0x574   : > { %v3031_v60 = vpop.permute.xlu0 %3030  ;;  %v3027_v58 = vpop.permute.xlu1 %3026 }
 0x575   : > { %3364 = vrot.lane.b32.xlu2 %v3297_v15, %s5805_s22  ;;  %3098 = vst.msk [vmem:[#allocation3 + $0xe8] sm:$0xff] %vm3068_vm3, %v3031_v60  ;;  %v3301_v15 = vld [vmem:[#allocation2 + $0x80] sm:$0xff] }
 0x576   : > { %3096 = vst.msk [vmem:[#allocation3 + $0xd8] sm:$0xff] %vm3068_vm3, %v3027_v58  ;;  %v3510_v60 = vld [vmem:[#allocation2 + $0x141] sm:$0xff] }
 0x577   : > { %v3182_v7 = vpop.permute.xlu2 %3181  ;;  %v3494_v58 = vld [vmem:[#allocation2 + $0x81] sm:$0xff] }
 0x578   : > { %3270 = vst.msk [vmem:[#allocation3 + $0x40] sm:$0xff] %vm3261_vm4, %v3182_v7 }
 0x57a   : > { %3205 = vrot.lane.b32.xlu0 %v8876_v50, %s5804_s21  ;;  %3782 = vrot.lane.b32.xlu1 %v8877_v20, %s5807_s24 }
 0x57c   : > { %v3166_v9 = vpop.permute.xlu0 %3165  ;;  %v3033_v23 = vpop.permute.xlu1 %3032 }
 0x57d   : > { %3398 = vrot.lane.b32.xlu2 %v7163_v12, %s5805_s22  ;;  %3262 = vst.msk [vmem:[#allocation3] sm:$0xff] %vm3261_vm4, %v3166_v9 }
 0x57e   : > { %3099 = vst.msk [vmem:[#allocation3 + $0xf0] sm:$0xff] %vm3068_vm3, %v3033_v23 }
 0x57f   : > { %v3188_v45 = vpop.permute.xlu2 %3187 }
 0x580   : > { %3273 = vst.msk [vmem:[#allocation3 + $0x58] sm:$0xff] %vm3261_vm4, %v3188_v45 }
 0x582   : > { %3750 = vrot.lane.b32.xlu0 %v3683_v22, %s5807_s24  ;;  %3557 = vrot.lane.b32.xlu1 %v3490_v51, %s5806_s23  ;;  %v3318_v22 = vld [vmem:[#allocation2 + $0x150] sm:$0xff] }
 0x583   : > { %v3511_v51 = vld [vmem:[#allocation2 + $0x151] sm:$0xff] }
 0x584   : > { %v3172_v49 = vpop.permute.xlu0 %3171  ;;  %v3168_v12 = vpop.permute.xlu1 %3167 }
 0x585   : > { %3784 = vrot.lane.b32.xlu2 %v8878_v33, %s5807_s24  ;;  %3265 = vst.msk [vmem:[#allocation3 + $0x18] sm:$0xff] %vm3261_vm4, %v3172_v49 }
 0x586   : > { %3263 = vst.msk [vmem:[#allocation3 + $0x8] sm:$0xff] %vm3261_vm4, %v3168_v12 }
 0x587   : > { %v3194_v46 = vpop.permute.xlu2 %3193 }
 0x588   : > { %3276 = vst.msk [vmem:[#allocation3 + $0x70] sm:$0xff] %vm3261_vm4, %v3194_v46  ;;  %v3704_v46 = vld [vmem:[#allocation2 + $0x152] sm:$0xff] }
 0x58a   : > { %3366 = vrot.lane.b32.xlu0 %v3298_v52, %s5805_s22  ;;  %3591 = vrot.lane.b32.xlu1 %v3507_v37, %s5806_s23  ;;  %v3687_v52 = vld [vmem:[#allocation2 + $0x82] sm:$0xff] }
 0x58c   : > { %v3178_v59 = vpop.permute.xlu0 %3177  ;;  %v3174_v42 = vpop.permute.xlu1 %3173 }
 0x58d   : > { %3559 = vrot.lane.b32.xlu2 %v3491_v5, %s5806_s23  ;;  %3268 = vst.msk [vmem:[#allocation3 + $0x30] sm:$0xff] %vm3261_vm4, %v3178_v59 }
 0x58e   : > { %3266 = vst.msk [vmem:[#allocation3 + $0x20] sm:$0xff] %vm3261_vm4, %v3174_v42 }
 0x58f   : > { %v3200_v44 = vpop.permute.xlu2 %3199 }
 0x590   : > { %3279 = vst.msk [vmem:[#allocation3 + $0x88] sm:$0xff] %vm3261_vm4, %v3200_v44 }
 0x592   : > { %3400 = vrot.lane.b32.xlu0 %v3315_v19, %s5805_s22  ;;  %3207 = vrot.lane.b32.xlu1 %v3122_v54, %s5804_s21  ;;  %v3495_v19 = vld [vmem:[#allocation2 + $0x91] sm:$0xff] }
 0x593   : > { %v3302_v54 = vld [vmem:[#allocation2 + $0x90] sm:$0xff] }
 0x594   : > { %v3184_v53 = vpop.permute.xlu0 %3183  ;;  %v3180_v3 = vpop.permute.xlu1 %3179 }
 0x595   : > { %3593 = vrot.lane.b32.xlu2 %v3508_v27, %s5806_s23  ;;  %3271 = vst.msk [vmem:[#allocation3 + $0x48] sm:$0xff] %vm3261_vm4, %v3184_v53  ;;  %v3688_v27 = vld [vmem:[#allocation2 + $0x92] sm:$0xff] }
 0x596   : > { %3269 = vst.msk [vmem:[#allocation3 + $0x38] sm:$0xff] %vm3261_vm4, %v3180_v3 }
 0x597   : > { %v3391_v43 = vpop.permute.xlu2 %3390 }
 0x59a   : > { %3786 = vrot.lane.b32.xlu0 %v3701_v62, %s5807_s24  ;;  %3752 = vrot.lane.b32.xlu1 %v3684_v40, %s5807_s24 }
 0x59c   : > { %v3190_v57 = vpop.permute.xlu0 %3189  ;;  %v3186_v6 = vpop.permute.xlu1 %3185 }
 0x59d   : > { %3209 = vrot.lane.b32.xlu2 %v3123_v47, %s5804_s21  ;;  %3274 = vst.msk [vmem:[#allocation3 + $0x60] sm:$0xff] %vm3261_vm4, %v3190_v57  ;;  %v3705_v57 = vld [vmem:[#allocation2 + $0x15a] sm:$0xff] }
 0x59e   : > { %3272 = vst.msk [vmem:[#allocation3 + $0x50] sm:$0xff] %vm3261_vm4, %v3186_v6  ;;  %v3320_v6 = vld [vmem:[#allocation2 + $0x168] sm:$0xff] }
 0x59f   : > { %v3359_v18 = vpop.permute.xlu2 %3358 }
 0x5a0   : > { %3455 = vst.msk [vmem:[#allocation3] sm:$0xff] %vm3454_vm5, %v3359_v18 }
 0x5a2   : > { %3561 = vrot.lane.b32.xlu0 %v3492_v31, %s5806_s23  ;;  %3368 = vrot.lane.b32.xlu1 %v3299_v21, %s5805_s22  ;;  %v3689_v31 = vld [vmem:[#allocation2 + $0x9a] sm:$0xff] }
 0x5a3   : > { %v3496_v21 = vld [vmem:[#allocation2 + $0x99] sm:$0xff] }
 0x5a4   : > { %v3196_v14 = vpop.permute.xlu0 %3195  ;;  %v3192_v10 = vpop.permute.xlu1 %3191 }
 0x5a5   : > { %3754 = vrot.lane.b32.xlu2 %v3685_v28, %s5807_s24  ;;  %3277 = vst.msk [vmem:[#allocation3 + $0x78] sm:$0xff] %vm3261_vm4, %v3196_v14  ;;  %v3706_v28 = vld [vmem:[#allocation2 + $0x16a] sm:$0xff] }
 0x5a6   : > { %3275 = vst.msk [vmem:[#allocation3 + $0x68] sm:$0xff] %vm3261_vm4, %v3192_v10 }
 0x5a7   : > { %v3745_v11 = vpop.permute.xlu2 %3744 }
 0x5aa   : > { %3595 = vrot.lane.b32.xlu0 %v3509_v35, %s5806_s23  ;;  %3402 = vrot.lane.b32.xlu1 %v7196_v1, %s5805_s22  ;;  %v3513_v35 = vld [vmem:[#allocation2 + $0x169] sm:$0xff] }
 0x5ac   : > { %v3202_v24 = vpop.permute.xlu0 %3201  ;;  %v3198_v8 = vpop.permute.xlu1 %3197 }
 0x5ad   : > { %3370 = vrot.lane.b32.xlu2 %v3300_v36, %s5805_s22  ;;  %3280 = vst.msk [vmem:[#allocation3 + $0x90] sm:$0xff] %vm3261_vm4, %v3202_v24  ;;  %v3497_v36 = vld [vmem:[#allocation2 + $0xa9] sm:$0xff] }
 0x5ae   : > { %3278 = vst.msk [vmem:[#allocation3 + $0x80] sm:$0xff] %vm3261_vm4, %v3198_v8 }
 0x5af   : > { %v3361_v16 = vpop.permute.xlu2 %3360  ;;  %3471 = vst.msk [vmem:[#allocation3 + $0x80] sm:$0xff] %vm3454_vm5, %v3391_v43  ;;  %v3512_v43 = vld [vmem:[#allocation2 + $0x159] sm:$0xff] }
 0x5b0   : > { %3456 = vst.msk [vmem:[#allocation3 + $0x8] sm:$0xff] %vm3454_vm5, %v3361_v16 }
 0x5b2   : > { %3211 = vrot.lane.b32.xlu0 %v3701_v62, %s5804_s21  ;;  %3788 = vrot.lane.b32.xlu1 %v3702_v41, %s5807_s24 }
 0x5b4   : > { %v3584_v1 = vpop.permute.xlu0 %3583  ;;  %v3204_v38 = vpop.permute.xlu1 %3203 }
 0x5b5   : > { %3404 = vrot.lane.b32.xlu2 %v7220_v25, %s5805_s22  ;;  %3664 = vst.msk [vmem:[#allocation3 + $0x80] sm:$0xff] %vm3647_vm6, %v3584_v1  ;;  %v3321_v1 = vld [vmem:[#allocation2 + $0x170] sm:$0xff] }
 0x5b6   : > { %3281 = vst.msk [vmem:[#allocation3 + $0x98] sm:$0xff] %vm3261_vm4, %v3204_v38  ;;  %v3514_v38 = vld [vmem:[#allocation2 + $0x171] sm:$0xff] }
 0x5b7   : > { %v3747_v50 = vpop.permute.xlu2 %3746 }
 0x5ba   : > { %3756 = vrot.lane.b32.xlu0 %v3686_v55, %s5807_s24  ;;  %3563 = vrot.lane.b32.xlu1 %v3493_v61, %s5806_s23 }
 0x5bc   : > { %v3552_v34 = vpop.permute.xlu0 %3551  ;;  %v3777_v2 = vpop.permute.xlu1 %3776 }
 0x5bd   : > { %3790 = vrot.lane.b32.xlu2 %v3703_v30, %s5807_s24  ;;  %3648 = vst.msk [vmem:[#allocation3] sm:$0xff] %vm3647_vm6, %v3552_v34  ;;  %v3707_v34 = vld [vmem:[#allocation2 + $0x172] sm:$0xff] }
 0x5be   : > { %3841 = vst.msk [vmem:[#allocation3] sm:$0xff] %vm3840_vm7, %v3745_v11  ;;  %v3304_v11 = vld [vmem:[#allocation2 + $0xa8] sm:$0xff] }
 0x5bf   : > { %v3363_v25 = vpop.permute.xlu2 %3362  ;;  %3857 = vst.msk [vmem:[#allocation3 + $0x80] sm:$0xff] %vm3840_vm7, %v3777_v2  ;;  %v3690_v2 = vld [vmem:[#allocation2 + $0xaa] sm:$0xff] }
 0x5c0   : > { %3457 = vst.msk [vmem:[#allocation3 + $0x10] sm:$0xff] %vm3454_vm5, %v3363_v25 }
 0x5c2   : > { %3372 = vrot.lane.b32.xlu0 %v3301_v15, %s5805_s22  ;;  %3597 = vrot.lane.b32.xlu1 %v3510_v60, %s5806_s23 }
 0x5c4   : > { %v3586_v7 = vpop.permute.xlu0 %3585  ;;  %v3393_v20 = vpop.permute.xlu1 %3392 }
 0x5c5   : > { %3565 = vrot.lane.b32.xlu2 %v3494_v58, %s5806_s23  ;;  %3472 = vst.msk [vmem:[#allocation3 + $0x88] sm:$0xff] %vm3454_vm5, %v3393_v20  ;;  %v3873_v9 = vld [vmem:[#allocation3] sm:$0xff] }
 0x5c6   : > { %3665 = vst.msk [vmem:[#allocation3 + $0x88] sm:$0xff] %vm3647_vm6, %v3586_v7  ;;  %v3889_v45 = vld [vmem:[#allocation3 + $0x80] sm:$0xff]  ;;  %5712 = vmatmul.msk.f32.vlgmr.msra.gmra.mxu1 %vm3918_vm8, %v3873_v9 }
 0x5c7   : > { %v3749_v23 = vpop.permute.xlu2 %3748  ;;  %5728 = vmatmul.msk.f32.vlgmr.msra.gmra.mxu2 %vm3918_vm8, %v3889_v45  ;;  %v3498_v58 = vld [vmem:[#allocation2 + $0xb1] sm:$0xff] }
 0x5c8   : > { %v3305_v7 = vld [vmem:[#allocation2 + $0xb0] sm:$0xff] }
 0x5c9   : > { %v3691_v20 = vld [vmem:[#allocation2 + $0xb2] sm:$0xff] }
 0x5ca   : > { %3406 = vrot.lane.b32.xlu0 %v3318_v22, %s5805_s22  ;;  %3213 = vrot.lane.b32.xlu1 %v3702_v41, %s5804_s21 }
 0x5cc   : > { %v3554_v33 = vpop.permute.xlu0 %3553  ;;  %v3779_v49 = vpop.permute.xlu1 %3778 }
 0x5cd   : > { %3599 = vrot.lane.b32.xlu2 %v3511_v51, %s5806_s23  ;;  %3649 = vst.msk [vmem:[#allocation3 + $0x8] sm:$0xff] %vm3647_vm6, %v3554_v33  ;;  %v3322_v33 = vld [vmem:[#allocation2 + $0x180] sm:$0xff] }
 0x5ce   : > { %3842 = vst.msk [vmem:[#allocation3 + $0x8] sm:$0xff] %vm3840_vm7, %v3747_v50 }
 0x5cf   : > { %v3365_v12 = vpop.permute.xlu2 %3364  ;;  %3858 = vst.msk [vmem:[#allocation3 + $0x88] sm:$0xff] %vm3840_vm7, %v3779_v49  ;;  %v3306_v49 = vld [vmem:[#allocation2 + $0xc0] sm:$0xff] }
 0x5d0   : > { %3458 = vst.msk [vmem:[#allocation3 + $0x18] sm:$0xff] %vm3454_vm5, %v3365_v12 }
 0x5d2   : > { %3792 = vrot.lane.b32.xlu0 %v3704_v46, %s5807_s24  ;;  %3758 = vrot.lane.b32.xlu1 %v3687_v52, %s5807_s24 }
 0x5d4   : > { %v3588_v37 = vpop.permute.xlu0 %3587  ;;  %v3395_v5 = vpop.permute.xlu1 %3394 }
 0x5d5   : > { %3215 = vrot.lane.b32.xlu2 %v3703_v30, %s5804_s21  ;;  %3473 = vst.msk [vmem:[#allocation3 + $0x90] sm:$0xff] %vm3454_vm5, %v3395_v5  ;;  %v3874_v59 = vld [vmem:[#allocation3 + $0x8] sm:$0xff]  ;;  %v3708_v5 = vld [vmem:[#allocation2 + $0x182] sm:$0xff] }
 0x5d6   : > { %3666 = vst.msk [vmem:[#allocation3 + $0x90] sm:$0xff] %vm3647_vm6, %v3588_v37  ;;  %v3890_v44 = vld [vmem:[#allocation3 + $0x88] sm:$0xff]  ;;  %5713 = vmatmul.msk.f32.gmra.mxu1 %vm3918_vm8, %v3874_v59 }
 0x5d7   : > { %v3399_v42 = vpop.permute.xlu2 %3398  ;;  %5729 = vmatmul.msk.f32.gmra.mxu2 %vm3918_vm8, %v3890_v44 }
 0x5da   : > { %3567 = vrot.lane.b32.xlu0 %v3495_v19, %s5806_s23  ;;  %3374 = vrot.lane.b32.xlu1 %v3302_v54, %s5805_s22  ;;  %v3692_v19 = vld [vmem:[#allocation2 + $0xc2] sm:$0xff] }
 0x5db   : > { %v3499_v54 = vld [vmem:[#allocation2 + $0xc1] sm:$0xff] }
 0x5dc   : > { %v3556_v56 = vpop.permute.xlu0 %3555  ;;  %v3781_v53 = vpop.permute.xlu1 %3780 }
 0x5dd   : > { %3760 = vrot.lane.b32.xlu2 %v3688_v27, %s5807_s24  ;;  %3650 = vst.msk [vmem:[#allocation3 + $0x10] sm:$0xff] %vm3647_vm6, %v3556_v56  ;;  %v3709_v27 = vld [vmem:[#allocation2 + $0x18a] sm:$0xff] }
 0x5de   : > { %3843 = vst.msk [vmem:[#allocation3 + $0x10] sm:$0xff] %vm3840_vm7, %v3749_v23 }
 0x5df   : > { %v3785_v3 = vpop.permute.xlu2 %3784  ;;  %3859 = vst.msk [vmem:[#allocation3 + $0x90] sm:$0xff] %vm3840_vm7, %v3781_v53 }
 0x5e2   : > { %3601 = vrot.lane.b32.xlu0 %v3512_v43, %s5806_s23  ;;  %3408 = vrot.lane.b32.xlu1 %v3319_v4, %s5805_s22  ;;  %v3307_v4 = vld [vmem:[#allocation2 + $0xc8] sm:$0xff] }
 0x5e4   : > { %v3590_v29 = vpop.permute.xlu0 %3589  ;;  %v3397_v62 = vpop.permute.xlu1 %3396 }
 0x5e5   : > { %3376 = vrot.lane.b32.xlu2 %v3303_v13, %s5805_s22  ;;  %3474 = vst.msk [vmem:[#allocation3 + $0x98] sm:$0xff] %vm3454_vm5, %v3397_v62  ;;  %v3875_v40 = vld [vmem:[#allocation3 + $0x10] sm:$0xff]  ;;  %v3500_v13 = vld [vmem:[#allocation2 + $0xc9] sm:$0xff] }
 0x5e6   : > { %3667 = vst.msk [vmem:[#allocation3 + $0x98] sm:$0xff] %vm3647_vm6, %v3590_v29  ;;  %v3891_v26 = vld [vmem:[#allocation3 + $0x90] sm:$0xff]  ;;  %5714 = vmatmul.msk.f32.gmra.mxu1 %vm3918_vm8, %v3875_v40 }
 0x5e7   : > { %v3560_v47 = vpop.permute.xlu2 %3559  ;;  %5730 = vmatmul.msk.f32.gmra.mxu2 %vm3918_vm8, %v3891_v26  ;;  %v3324_v26 = vld [vmem:[#allocation2 + $0x198] sm:$0xff] }
 0x5ea   : > { %3217 = vrot.lane.b32.xlu0 %v3704_v46, %s5804_s21  ;;  %3794 = vrot.lane.b32.xlu1 %v3705_v57, %s5807_s24 }
 0x5ec   : > { %v3206_v18 = vpop.permute.xlu0 %3205  ;;  %v3783_v0 = vpop.permute.xlu1 %3782 }
 0x5ed   : > { %3410 = vrot.lane.b32.xlu2 %v3320_v6, %s5805_s22  ;;  %3282 = vst.msk [vmem:[#allocation3 + $0xa0] sm:$0xff] %vm3261_vm4, %v3206_v18 }
 0x5ee   : > { %3475 = vst.msk [vmem:[#allocation3 + $0xa0] sm:$0xff] %vm3454_vm5, %v3399_v42 }
 0x5ef   : > { %v3594_v32 = vpop.permute.xlu2 %3593  ;;  %3860 = vst.msk [vmem:[#allocation3 + $0x98] sm:$0xff] %vm3840_vm7, %v3783_v0 }
 0x5f2   : > { %3762 = vrot.lane.b32.xlu0 %v3689_v31, %s5807_s24  ;;  %3569 = vrot.lane.b32.xlu1 %v3496_v21, %s5806_s23  ;;  %v7944_v31 = vld [vmem:[%s8705_s4] ss:$0 sm:$0xff]  ;;  %v3693_v21 = vld [vmem:[#allocation2 + $0xca] sm:$0xff] }
 0x5f4   : > { %v3751_v17 = vpop.permute.xlu0 %3750  ;;  %v3558_v14 = vpop.permute.xlu1 %3557 }
 0x5f5   : > { %3796 = vrot.lane.b32.xlu2 %v3706_v28, %s5807_s24  ;;  %3651 = vst.msk [vmem:[#allocation3 + $0x18] sm:$0xff] %vm3647_vm6, %v3558_v14 }
 0x5f6   : > { %3844 = vst.msk [vmem:[#allocation3 + $0x18] sm:$0xff] %vm3840_vm7, %v3751_v17  ;;  %v3892_v39 = vld [vmem:[#allocation3 + $0x98] sm:$0xff] }
 0x5f7   : > { %v3210_v10 = vpop.permute.xlu2 %3209  ;;  %5731 = vmatmul.msk.f32.gmra.mxu2 %vm3918_vm8, %v3892_v39 }
 0x5f8   : > { %3284 = vst.msk [vmem:[#allocation3 + $0xb0] sm:$0xff] %vm3261_vm4, %v3210_v10 }
 0x5fa   : > { %3378 = vrot.lane.b32.xlu0 %v3304_v11, %s5805_s22  ;;  %3603 = vrot.lane.b32.xlu1 %v3513_v35, %s5806_s23 }
 0x5fc   : > { %v3367_v24 = vpop.permute.xlu0 %3366  ;;  %v3592_v8 = vpop.permute.xlu1 %3591 }
 0x5fd   : > { %3571 = vrot.lane.b32.xlu2 %v3497_v36, %s5806_s23  ;;  %3459 = vst.msk [vmem:[#allocation3 + $0x20] sm:$0xff] %vm3454_vm5, %v3367_v24  ;;  %v3876_v16 = vld [vmem:[#allocation3 + $0x18] sm:$0xff] }
 0x5fe   : > { %3652 = vst.msk [vmem:[#allocation3 + $0x20] sm:$0xff] %vm3647_vm6, %v3560_v47  ;;  %5715 = vmatmul.msk.f32.gmra.mxu1 %vm3918_vm8, %v3876_v16 }
 0x5ff   : > { %v3755_v41 = vpop.permute.xlu2 %3754  ;;  %3668 = vst.msk [vmem:[#allocation3 + $0xa0] sm:$0xff] %vm3647_vm6, %v3592_v8 }
 0x600   : > { %3861 = vst.msk [vmem:[#allocation3 + $0xa0] sm:$0xff] %vm3840_vm7, %v3785_v3 }
 0x602   : > { %3412 = vrot.lane.b32.xlu0 %v3321_v1, %s5805_s22  ;;  %3219 = vrot.lane.b32.xlu1 %v3705_v57, %s5804_s21  ;;  %v3308_v1 = vld [vmem:[#allocation2 + $0xd8] sm:$0xff] }
 0x604   : > { %v3401_v50 = vpop.permute.xlu0 %3400  ;;  %v3208_v55 = vpop.permute.xlu1 %3207 }
 0x605   : > { %3605 = vrot.lane.b32.xlu2 %v3514_v38, %s5806_s23  ;;  %3283 = vst.msk [vmem:[#allocation3 + $0xa8] sm:$0xff] %vm3261_vm4, %v3208_v55 }
 0x606   : > { %3476 = vst.msk [vmem:[#allocation3 + $0xa8] sm:$0xff] %vm3454_vm5, %v3401_v50 }
 0x607   : > { %v3371_v61 = vpop.permute.xlu2 %3370  ;;  %3669 = vst.msk [vmem:[#allocation3 + $0xa8] sm:$0xff] %vm3647_vm6, %v3594_v32  ;;  %v3893_v30 = vld [vmem:[#allocation3 + $0xa0] sm:$0xff]  ;;  %v3710_v32 = vld [vmem:[#allocation2 + $0x19a] sm:$0xff] }
 0x608   : > { %5732 = vmatmul.msk.f32.gmra.mxu2 %vm3918_vm8, %v3893_v30  ;;  %3461 = vst.msk [vmem:[#allocation3 + $0x30] sm:$0xff] %vm3454_vm5, %v3371_v61  ;;  %v3694_v30 = vld [vmem:[#allocation2 + $0xda] sm:$0xff] }
 0x60a   : > { %3798 = vrot.lane.b32.xlu0 %v3707_v34, %s5807_s24  ;;  %3764 = vrot.lane.b32.xlu1 %v3690_v2, %s5807_s24 }
 0x60c   : > { %v3787_v25 = vpop.permute.xlu0 %3786  ;;  %v3753_v15 = vpop.permute.xlu1 %3752 }
 0x60d   : > { %3221 = vrot.lane.b32.xlu2 %v3706_v28, %s5804_s21  ;;  %3862 = vst.msk [vmem:[#allocation3 + $0xa8] sm:$0xff] %vm3840_vm7, %v3787_v25 }
 0x60e   : > { %3845 = vst.msk [vmem:[#allocation3 + $0x20] sm:$0xff] %vm3840_vm7, %v3753_v15 }
 0x60f   : > { %v3405_v60 = vpop.permute.xlu2 %3404 }
 0x612   : > { %3573 = vrot.lane.b32.xlu0 %v3498_v58, %s5806_s23  ;;  %3380 = vrot.lane.b32.xlu1 %v3305_v7, %s5805_s22 }
 0x614   : > { %v3562_v9 = vpop.permute.xlu0 %3561  ;;  %v3369_v23 = vpop.permute.xlu1 %3368  ;;  %v3894_v45 = vld [vmem:[#allocation3 + $0xa8] sm:$0xff] }
 0x615   : > { %3766 = vrot.lane.b32.xlu2 %v3691_v20, %s5807_s24  ;;  %3460 = vst.msk [vmem:[#allocation3 + $0x28] sm:$0xff] %vm3454_vm5, %v3369_v23  ;;  %v3877_v22 = vld [vmem:[#allocation3 + $0x20] sm:$0xff]  ;;  %5733 = vmatmul.msk.f32.gmra.mxu2 %vm3918_vm8, %v3894_v45 }
 0x616   : > { %3653 = vst.msk [vmem:[#allocation3 + $0x28] sm:$0xff] %vm3647_vm6, %v3562_v9  ;;  %5716 = vmatmul.msk.f32.gmra.mxu1 %vm3918_vm8, %v3877_v22 }
 0x617   : > { %v3791_v51 = vpop.permute.xlu2 %3790  ;;  %3846 = vst.msk [vmem:[#allocation3 + $0x28] sm:$0xff] %vm3840_vm7, %v3755_v41  ;;  %v3501_v41 = vld [vmem:[#allocation2 + $0xd9] sm:$0xff] }
 0x61a   : > { %3607 = vrot.lane.b32.xlu0 %v7625_v48, %s5806_s23  ;;  %3414 = vrot.lane.b32.xlu1 %v3322_v33, %s5805_s22  ;;  %v3323_v48 = vld [vmem:[#allocation2 + $0x188] sm:$0xff] }
 0x61c   : > { %v3596_v12 = vpop.permute.xlu0 %3595  ;;  %v3403_v46 = vpop.permute.xlu1 %3402 }
 0x61d   : > { %3382 = vrot.lane.b32.xlu2 %v3306_v49, %s5805_s22  ;;  %3477 = vst.msk [vmem:[#allocation3 + $0xb0] sm:$0xff] %vm3454_vm5, %v3403_v46 }
 0x61e   : > { %3670 = vst.msk [vmem:[#allocation3 + $0xb0] sm:$0xff] %vm3647_vm6, %v3596_v12  ;;  %v3878_v37 = vld [vmem:[#allocation3 + $0x28] sm:$0xff] }
 0x61f   : > { %v3566_v52 = vpop.permute.xlu2 %3565  ;;  %5717 = vmatmul.msk.f32.gmra.mxu1 %vm3918_vm8, %v3878_v37  ;;  %v3518_v37 = vld [vmem:[#allocation2 + $0x1a1] sm:$0xff] }
 0x622   : > { %3223 = vrot.lane.b32.xlu0 %v3707_v34, %s5804_s21  ;;  %3800 = vrot.lane.b32.xlu1 %v3708_v5, %s5807_s24 }
 0x624   : > { %v3212_v59 = vpop.permute.xlu0 %3211  ;;  %v3789_v42 = vpop.permute.xlu1 %3788 }
 0x625   : > { %3416 = vrot.lane.b32.xlu2 %v3323_v48, %s5805_s22  ;;  %3285 = vst.msk [vmem:[#allocation3 + $0xb8] sm:$0xff] %vm3261_vm4, %v3212_v59 }
 0x626   : > { %3478 = vst.msk [vmem:[#allocation3 + $0xb8] sm:$0xff] %vm3454_vm5, %v3405_v60 }
 0x627   : > { %v3600_v44 = vpop.permute.xlu2 %3599  ;;  %3863 = vst.msk [vmem:[#allocation3 + $0xb0] sm:$0xff] %vm3840_vm7, %v3789_v42 }
 0x62a   : > { %3768 = vrot.lane.b32.xlu0 %v3692_v19, %s5807_s24  ;;  %3575 = vrot.lane.b32.xlu1 %v3499_v54, %s5806_s23 }
 0x62c   : > { %v3757_v56 = vpop.permute.xlu0 %3756  ;;  %v3564_v53 = vpop.permute.xlu1 %3563 }
 0x62d   : > { %3802 = vrot.lane.b32.xlu2 %v3709_v27, %s5807_s24  ;;  %3654 = vst.msk [vmem:[#allocation3 + $0x30] sm:$0xff] %vm3647_vm6, %v3564_v53 }
 0x62e   : > { %3847 = vst.msk [vmem:[#allocation3 + $0x30] sm:$0xff] %vm3840_vm7, %v3757_v56  ;;  %v3895_v43 = vld [vmem:[#allocation3 + $0xb0] sm:$0xff] }
 0x62f   : > { %v3216_v3 = vpop.permute.xlu2 %3215  ;;  %5734 = vmatmul.msk.f32.gmra.mxu2 %vm3918_vm8, %v3895_v43 }
 0x630   : > { %3287 = vst.msk [vmem:[#allocation3 + $0xc8] sm:$0xff] %vm3261_vm4, %v3216_v3  ;;  %v3309_v3 = vld [vmem:[#allocation2 + $0xe0] sm:$0xff] }
 0x632   : > { %3384 = vrot.lane.b32.xlu0 %v3307_v4, %s5805_s22  ;;  %3609 = vrot.lane.b32.xlu1 %v7618_v63, %s5806_s23  ;;  %v3517_v63 = vld [vmem:[#allocation2 + $0x199] sm:$0xff] }
 0x634   : > { %v3373_v29 = vpop.permute.xlu0 %3372  ;;  %v3598_v62 = vpop.permute.xlu1 %3597 }
 0x635   : > { %3577 = vrot.lane.b32.xlu2 %v3500_v13, %s5806_s23  ;;  %3462 = vst.msk [vmem:[#allocation3 + $0x38] sm:$0xff] %vm3454_vm5, %v3373_v29  ;;  %v3879_v40 = vld [vmem:[#allocation3 + $0x30] sm:$0xff] }
 0x636   : > { %3655 = vst.msk [vmem:[#allocation3 + $0x38] sm:$0xff] %vm3647_vm6, %v3566_v52  ;;  %5718 = vmatmul.msk.f32.gmra.mxu1 %vm3918_vm8, %v3879_v40 }
 0x637   : > { %v7927_v47 = vpop.permute.xlu2 %3760  ;;  %3671 = vst.msk [vmem:[#allocation3 + $0xb8] sm:$0xff] %vm3647_vm6, %v3598_v62 }
 0x638   : > { %3864 = vst.msk [vmem:[#allocation3 + $0xb8] sm:$0xff] %vm3840_vm7, %v3791_v51 }
 0x63a   : > { %3418 = vrot.lane.b32.xlu0 %v3324_v26, %s5805_s22  ;;  %3225 = vrot.lane.b32.xlu1 %v3708_v5, %s5804_s21  ;;  %v3325_v5 = vld [vmem:[#allocation2 + $0x1a0] sm:$0xff] }
 0x63c   : > { %v3407_v57 = vpop.permute.xlu0 %3406  ;;  %v3214_v6 = vpop.permute.xlu1 %3213 }
 0x63d   : > { %3611 = vrot.lane.b32.xlu2 %v3517_v63, %s5806_s23  ;;  %3286 = vst.msk [vmem:[#allocation3 + $0xc0] sm:$0xff] %vm3261_vm4, %v3214_v6 }
 0x63e   : > { %3479 = vst.msk [vmem:[#allocation3 + $0xc0] sm:$0xff] %vm3454_vm5, %v3407_v57 }
 0x63f   : > { %v3377_v18 = vpop.permute.xlu2 %3376  ;;  %3672 = vst.msk [vmem:[#allocation3 + $0xc0] sm:$0xff] %vm3647_vm6, %v3600_v44  ;;  %v3896_v0 = vld [vmem:[#allocation3 + $0xb8] sm:$0xff] }
 0x640   : > { %5735 = vmatmul.msk.f32.gmra.mxu2 %vm3918_vm8, %v3896_v0  ;;  %3464 = vst.msk [vmem:[#allocation3 + $0x48] sm:$0xff] %vm3454_vm5, %v3377_v18 }
 0x642   : > { %3804 = vrot.lane.b32.xlu0 %v3710_v32, %s5807_s24  ;;  %3770 = vrot.lane.b32.xlu1 %v3693_v21, %s5807_s24 }
 0x643   : > { %v4032_v28 = vpop.f32.mrf.mxu1 }
 0x644   : > { %v4033_v17 = vadd.f32 %v7944_v31, %v4032_v28  ;;  %v3793_v14 = vpop.permute.xlu0 %3792  ;;  %v3759_v10 = vpop.permute.xlu1 %3758 }
 0x645   : > { %3227 = vrot.lane.b32.xlu2 %v3709_v27, %s5804_s21  ;;  %3865 = vst.msk [vmem:[#allocation3 + $0xc0] sm:$0xff] %vm3840_vm7, %v3793_v14  ;;  %s5747_s21 = sshll.u32 %s8880_s19, 6 }
 0x646   : > { %v4128_v11 = vmax.f32 %v4033_v17, 0.0  ;;  %3848 = vst.msk [vmem:[#allocation3 + $0x38] sm:$0xff] %vm3840_vm7, %v3759_v10  ;;  %v3711_v10 = vld [vmem:[#allocation2 + $0x1a2] sm:$0xff] }
 0x647   : > { %v7951_v39 = vpop.permute.xlu2 %3410 }
 0x648   : > { %v4192_v35 = vrot.slane %v4128_v11, 2  ;;  %v4193_v36 = vrot.slane %v4128_v11, 4  ;;  %v4194_v24 = vrot.slane %v4128_v11, 6  ;;  %v4384_v8 = vsel %vm228_vm1, %v4128_v11, -inf }
 0x649   : > { %v4385_v16 = vrot.slane %v4384_v8, 4 }
 0x64a   : > { %v4391_v38 = vsel %vm228_vm1, %v4192_v35, -inf  ;;  %v4398_v50 = vsel %vm228_vm1, %v4193_v36, -inf  ;;  %v4405_v55 = vsel %vm228_vm1, %v4194_v24, -inf  ;;  %v4080_v61 = vpop.f32.mrf.mxu2  ;;  %3579 = vrot.lane.b32.xlu0 %v3501_v41, %s5806_s23  ;;  %3386 = vrot.lane.b32.xlu1 %v3308_v1, %s5805_s22 }
 0x64b   : > { %v4386_v34 = vmax.f32 %v4384_v8, %v4385_v16  ;;  %v4392_v2 = vrot.slane %v4391_v38, 4  ;;  %v4399_v25 = vrot.slane %v4398_v50, 4  ;;  %v4406_v15 = vrot.slane %v4405_v55, 4  ;;  %v3502_v16 = vld [vmem:[#allocation2 + $0xe1] sm:$0xff] }
 0x64c   : > { %v4081_v60 = vadd.f32 %v7944_v31, %v4080_v61  ;;  %v3568_v58 = vpop.permute.xlu0 %3567  ;;  %v3375_v7 = vpop.permute.xlu1 %3374  ;;  %v3897_v20 = vld [vmem:[#allocation3 + $0xc0] sm:$0xff] }
 0x64d   : > { %3772 = vrot.lane.b32.xlu2 %v3694_v30, %s5807_s24  ;;  %v4387_v9 = vrot.slane %v4386_v34, 2  ;;  %v4393_v23 = vmax.f32 %v4391_v38, %v4392_v2  ;;  %v4400_v45 = vmax.f32 %v4398_v50, %v4399_v25  ;;  %v4407_v22 = vmax.f32 %v4405_v55, %v4406_v15  ;;  %3463 = vst.msk [vmem:[#allocation3 + $0x40] sm:$0xff] %vm3454_vm5, %v3375_v7  ;;  %v3880_v51 = vld [vmem:[#allocation3 + $0x38] sm:$0xff] }
 0x64e   : > { %5736 = vmatmul.msk.f32.gmra.mxu2 %vm3918_vm8, %v3897_v20  ;;  %v4144_v49 = vmax.f32 %v4081_v60, 0.0  ;;  %3656 = vst.msk [vmem:[#allocation3 + $0x40] sm:$0xff] %vm3647_vm6, %v3568_v58  ;;  %5719 = vmatmul.msk.f32.gmra.mxu1 %vm3918_vm8, %v3880_v51 }
 0x64f   : > { %v7964_v33 = vpop.permute.xlu2 %3796  ;;  %v4394_v12 = vrot.slane %v4393_v23, 2  ;;  %v4401_v46 = vrot.slane %v4400_v45, 2  ;;  %v4408_v52 = vrot.slane %v4407_v22, 2  ;;  %3849 = vst.msk [vmem:[#allocation3 + $0x40] sm:$0xff] %vm3840_vm7, %v7927_v47  ;;  %v4388_v19 = vmax.f32 %v4386_v34, %v4387_v9 }
 0x650   : > { %v4240_v48 = vrot.slane %v4144_v49, 2  ;;  %v4241_v59 = vrot.slane %v4144_v49, 4  ;;  %v4242_v42 = vrot.slane %v4144_v49, 6  ;;  %v4832_v44 = vsel %vm228_vm1, %v4144_v49, -inf }
 0x651   : > { %v4833_v54 = vrot.slane %v4832_v44, 4  ;;  %v4395_v43 = vmax.f32 %v4393_v23, %v4394_v12  ;;  %v4402_v4 = vmax.f32 %v4400_v45, %v4401_v46  ;;  %v4409_v13 = vmax.f32 %v4407_v22, %v4408_v52 }
 0x652   : > { %v4839_v27 = vsel %vm228_vm1, %v4240_v48, -inf  ;;  %v4846_v56 = vsel %vm228_vm1, %v4241_v59, -inf  ;;  %v4853_v53 = vsel %vm228_vm1, %v4242_v42, -inf  ;;  %3613 = vrot.lane.b32.xlu0 %v3518_v37, %s5806_s23  ;;  %3420 = vrot.lane.b32.xlu1 %v3325_v5, %s5805_s22  ;;  %v4389_v6 = vrot.slane %v4388_v19, 1 }
 0x653   : > { %v4035_v29 = vpop.f32.mrf.mxu1  ;;  %v4834_v62 = vmax.f32 %v4832_v44, %v4833_v54  ;;  %v4840_v40 = vrot.slane %v4839_v27, 4  ;;  %v4847_v47 = vrot.slane %v4846_v56, 4  ;;  %v4854_v26 = vrot.slane %v4853_v53, 4 }
 0x654   : > { %v3602_v63 = vpop.permute.xlu0 %3601  ;;  %v3409_v57 = vpop.permute.xlu1 %3408  ;;  %v4036_v14 = vadd.f32 %v7944_v31, %v4035_v29  ;;  %v4396_v11 = vrot.slane %v4395_v43, 1  ;;  %v4403_v35 = vrot.slane %v4402_v4, 1  ;;  %v4410_v36 = vrot.slane %v4409_v13, 1 }
 0x655   : > { %3388 = vrot.lane.b32.xlu2 %v3309_v3, %s5805_s22  ;;  %3480 = vst.msk [vmem:[#allocation3 + $0xc8] sm:$0xff] %vm3454_vm5, %v3409_v57  ;;  %v4835_v0 = vrot.slane %v4834_v62, 2  ;;  %v4841_v32 = vmax.f32 %v4839_v27, %v4840_v40  ;;  %v4848_v21 = vmax.f32 %v4846_v56, %v4847_v47  ;;  %v4855_v28 = vmax.f32 %v4853_v53, %v4854_v26 }
 0x656   : > { %3673 = vst.msk [vmem:[#allocation3 + $0xc8] sm:$0xff] %vm3647_vm6, %v3602_v63  ;;  %v3881_v17 = vld [vmem:[#allocation3 + $0x40] sm:$0xff]  ;;  %v4129_v8 = vmax.f32 %v4036_v14, 0.0  ;;  %v4390_v41 = vmax.f32 %v4388_v19, %v4389_v6  ;;  %v4397_v2 = vmax.f32 %v4395_v43, %v4396_v11  ;;  %v4404_v25 = vmax.f32 %v4402_v4, %v4403_v35 }
 0x657   : > { %v7978_v18 = vpop.permute.xlu2 %3571  ;;  %5720 = vmatmul.msk.f32.gmra.mxu1 %vm3918_vm8, %v3881_v17  ;;  %v4836_v24 = vmax.f32 %v4834_v62, %v4835_v0  ;;  %v4842_v1 = vrot.slane %v4841_v32, 2  ;;  %v4849_v38 = vrot.slane %v4848_v21, 2  ;;  %v4856_v50 = vrot.slane %v4855_v28, 2 }
 0x658   : > { %v4195_v55 = vrot.slane %v4129_v8, 2  ;;  %v4196_v61 = vrot.slane %v4129_v8, 4  ;;  %v4197_v30 = vrot.slane %v4129_v8, 6  ;;  %v4412_v34 = vsel %vm228_vm1, %v4129_v8, -inf }
 0x659   : > { %v4411_v15 = vmax.f32 %v4409_v13, %v4410_v36  ;;  %v4837_v60 = vrot.slane %v4836_v24, 1  ;;  %v4413_v20 = vrot.slane %v4412_v34, 4  ;;  %v7993_v49 = vsel %vm225_vm0, %v4390_v41, -inf }
 0x65a   : > { %3581 = vrot.lane.b32.xlu0 %v3502_v16, %s5806_s23  ;;  %3806 = vrot.lane.b32.xlu1 %v3711_v10, %s5807_s24  ;;  %v4419_v9 = vsel %vm228_vm1, %v4195_v55, -inf  ;;  %v4426_v23 = vsel %vm228_vm1, %v4196_v61, -inf  ;;  %v4433_v45 = vsel %vm228_vm1, %v4197_v30, -inf  ;;  %v4083_v22 = vpop.f32.mrf.mxu2  ;;  %v4843_v12 = vmax.f32 %v4841_v32, %v4842_v1  ;;  %s8168_s23 = scalar_lea.vmem %s8706_s5, %s5747_s21 }
 0x65b   : > { %v4850_v46 = vmax.f32 %v4848_v21, %v4849_v38  ;;  %v4857_v52 = vmax.f32 %v4855_v28, %v4856_v50  ;;  %v4414_v37 = vmax.f32 %v4412_v34, %v4413_v20  ;;  %v4420_v5 = vrot.slane %v4419_v9, 4 }
 0x65c   : > { %v3218_v58 = vpop.permute.xlu0 %3217  ;;  %v3795_v7 = vpop.permute.xlu1 %3794  ;;  %v4427_v48 = vrot.slane %v4426_v23, 4  ;;  %v4434_v59 = vrot.slane %v4433_v45, 4  ;;  %v7999_v42 = vsel %vm225_vm0, %v4397_v2, -inf  ;;  %v8002_v44 = vsel %vm225_vm0, %v4404_v25, -inf }
 0x65d   : > { %3288 = vst.msk [vmem:[#allocation3 + $0xd0] sm:$0xff] %vm3261_vm4, %v3218_v58  ;;  %v4838_v19 = vmax.f32 %v4836_v24, %v4837_v60  ;;  %v4084_v54 = vadd.f32 %v7944_v31, %v4083_v22  ;;  %v4415_v27 = vrot.slane %v4414_v37, 2  ;;  %v4421_v56 = vmax.f32 %v4419_v9, %v4420_v5 }
 0x65e   : > { %3481 = vst.msk [vmem:[#allocation3 + $0xd0] sm:$0xff] %vm3454_vm5, %v7951_v39  ;;  %v4428_v53 = vmax.f32 %v4426_v23, %v4427_v48  ;;  %v4435_v3 = vmax.f32 %v4433_v45, %v4434_v59  ;;  %v3695_v39 = vld [vmem:[#allocation2 + $0xe2] sm:$0xff]  ;;  %v4844_v43 = vrot.slane %v4843_v12, 1  ;;  %v4851_v4 = vrot.slane %v4850_v46, 1 }
 0x65f   : > { %v7990_v51 = vpop.permute.xlu2 %3605  ;;  %3866 = vst.msk [vmem:[#allocation3 + $0xc8] sm:$0xff] %vm3840_vm7, %v3795_v7  ;;  %v4858_v13 = vrot.slane %v4857_v52, 1  ;;  %v4145_v29 = vmax.f32 %v4084_v54, 0.0  ;;  %v4416_v62 = vmax.f32 %v4414_v37, %v4415_v27  ;;  %v4422_v40 = vrot.slane %v4421_v56, 2 }
 0x660   : > { %v4429_v47 = vrot.slane %v4428_v53, 2  ;;  %v4436_v26 = vrot.slane %v4435_v3, 2  ;;  %v8013_v41 = vsel %vm225_vm0, %v4411_v15, -inf  ;;  %v4845_v1 = vmax.f32 %v4843_v12, %v4844_v43 }
 0x661   : > { %v4243_v63 = vrot.slane %v4145_v29, 2  ;;  %v4244_v57 = vrot.slane %v4145_v29, 4  ;;  %v4245_v6 = vrot.slane %v4145_v29, 6  ;;  %v4860_v0 = vsel %vm228_vm1, %v4145_v29, -inf }
 0x662   : > { %3774 = vrot.lane.b32.xlu1 %v3695_v39, %s5807_s24  ;;  %v4417_v28 = vrot.slane %v4416_v62, 1  ;;  %v4423_v17 = vmax.f32 %v4421_v56, %v4422_v40  ;;  %v4430_v14 = vmax.f32 %v4428_v53, %v4429_v47  ;;  %v4437_v10 = vmax.f32 %v4435_v3, %v4436_v26 }
 0x663   : > { %v4861_v35 = vrot.slane %v4860_v0, 4  ;;  %v4867_v36 = vsel %vm228_vm1, %v4243_v63, -inf  ;;  %v4874_v24 = vsel %vm228_vm1, %v4244_v57, -inf  ;;  %v4881_v8 = vsel %vm228_vm1, %v4245_v6, -inf  ;;  %v4038_v2 = vpop.f32.mrf.mxu1 }
 0x664   : > { %v3763_v32 = vpop.permute.xlu0 %3762  ;;  %v3570_v21 = vpop.permute.xlu1 %3569  ;;  %v4852_v38 = vmax.f32 %v4850_v46, %v4851_v4  ;;  %v4859_v50 = vmax.f32 %v4857_v52, %v4858_v13  ;;  %v4868_v61 = vrot.slane %v4867_v36, 4  ;;  %v4875_v30 = vrot.slane %v4874_v24, 4 }
 0x665   : > { %3657 = vst.msk [vmem:[#allocation3 + $0x48] sm:$0xff] %vm3647_vm6, %v3570_v21  ;;  %v4862_v55 = vmax.f32 %v4860_v0, %v4861_v35  ;;  %v4882_v34 = vrot.slane %v4881_v8, 4  ;;  %v4418_v25 = vmax.f32 %v4416_v62, %v4417_v28  ;;  %v4424_v60 = vrot.slane %v4423_v17, 1 }
 0x666   : > { %3850 = vst.msk [vmem:[#allocation3 + $0x48] sm:$0xff] %vm3840_vm7, %v3763_v32  ;;  %v3898_v16 = vld [vmem:[#allocation3 + $0xc8] sm:$0xff]  ;;  %v4431_v58 = vrot.slane %v4430_v14, 1  ;;  %v4438_v7 = vrot.slane %v4437_v10, 1  ;;  %v4869_v9 = vmax.f32 %v4867_v36, %v4868_v61  ;;  %v4876_v15 = vmax.f32 %v4874_v24, %v4875_v30 }
 0x667   : > { %v3222_v11 = vpop.permute.xlu2 %3221  ;;  %5737 = vmatmul.msk.f32.gmra.mxu2 %vm3918_vm8, %v3898_v16  ;;  %v4863_v20 = vrot.slane %v4862_v55, 2  ;;  %v4883_v23 = vmax.f32 %v4881_v8, %v4882_v34  ;;  %v8018_v45 = vsel %vm225_vm0, %v4838_v19, -inf  ;;  %v8021_v22 = vsel %vm225_vm0, %v4845_v1, -inf }
 0x668   : > { %3290 = vst.msk [vmem:[#allocation3 + $0xe0] sm:$0xff] %vm3261_vm4, %v3222_v11  ;;  %v8024_v12 = vsel %vm225_vm0, %v4852_v38, -inf  ;;  %v4039_v46 = vadd.f32 %v7944_v31, %v4038_v2  ;;  %v4870_v37 = vrot.slane %v4869_v9, 2  ;;  %v4877_v5 = vrot.slane %v4876_v15, 2 }
 0x669   : > { %v4864_v52 = vmax.f32 %v4862_v55, %v4863_v20  ;;  %v4884_v48 = vrot.slane %v4883_v23, 2  ;;  %v8028_v27 = vsel %vm225_vm0, %v4859_v50, -inf  ;;  %v4425_v56 = vmax.f32 %v4423_v17, %v4424_v60 }
 0x66a   : > { %v4432_v19 = vmax.f32 %v4430_v14, %v4431_v58  ;;  %v4130_v53 = vmax.f32 %v4039_v46, 0.0  ;;  %v4086_v3 = vpop.f32.mrf.mxu2  ;;  %v4439_v4 = vmax.f32 %v4437_v10, %v4438_v7  ;;  %v8034_v13 = vsel %vm225_vm0, %v4418_v25, -inf }
 0x66b   : > { %v4865_v29 = vrot.slane %v4864_v52, 1  ;;  %v4871_v62 = vmax.f32 %v4869_v9, %v4870_v37  ;;  %v8041_v6 = vmax.f32 %v4876_v15, %v4877_v5  ;;  %v8043_v0 = vmax.f32 %v4883_v23, %v4884_v48 }
 0x66c   : > { %v3379_v59 = vpop.permute.xlu0 %3378  ;;  %v3604_v54 = vpop.permute.xlu1 %3603  ;;  %v4198_v40 = vrot.slane %v4130_v53, 2  ;;  %v4199_v47 = vrot.slane %v4130_v53, 4  ;;  %v4200_v26 = vrot.slane %v4130_v53, 6  ;;  %v4440_v63 = vsel %vm228_vm1, %v4130_v53, -inf }
 0x66d   : > { %3465 = vst.msk [vmem:[#allocation3 + $0x50] sm:$0xff] %vm3454_vm5, %v3379_v59  ;;  %v3882_v39 = vld [vmem:[#allocation3 + $0x48] sm:$0xff]  ;;  %v4872_v57 = vrot.slane %v4871_v62, 1  ;;  %v4087_v32 = vadd.f32 %v7944_v31, %v4086_v3  ;;  %v8052_v14 = vsel %vm225_vm0, %v4425_v56, -inf  ;;  %v8055_v10 = vsel %vm225_vm0, %v4432_v19, -inf }
 0x66e   : > { %3658 = vst.msk [vmem:[#allocation3 + $0x50] sm:$0xff] %vm3647_vm6, %v7978_v18  ;;  %5721 = vmatmul.msk.f32.gmra.mxu1 %vm3918_vm8, %v3882_v39  ;;  %v4441_v18 = vrot.slane %v4440_v63, 4  ;;  %v4447_v21 = vsel %vm228_vm1, %v4198_v40, -inf  ;;  %v4454_v28 = vsel %vm228_vm1, %v4199_v47, -inf  ;;  %v4461_v17 = vsel %vm228_vm1, %v4200_v26, -inf }
 0x66f   : > { %v8031_v43 = vpop.permute.xlu2 %3766  ;;  %3674 = vst.msk [vmem:[#allocation3 + $0xd0] sm:$0xff] %vm3647_vm6, %v3604_v54  ;;  %v8058_v11 = vsel %vm225_vm0, %v4439_v4, -inf  ;;  %v8060_v35 = vmax.f32 %v4864_v52, %v4865_v29  ;;  %v4455_v24 = vrot.slane %v4454_v28, 4  ;;  %v4462_v8 = vrot.slane %v4461_v17, 4 }
 0x670   : > { %3867 = vst.msk [vmem:[#allocation3 + $0xd0] sm:$0xff] %vm3840_vm7, %v7964_v33  ;;  %v4442_v36 = vmax.f32 %v4440_v63, %v4441_v18  ;;  %v4448_v33 = vrot.slane %v4447_v21, 4  ;;  %v8062_v16 = vmax.f32 %v4871_v62, %v4872_v57  ;;  %v4879_v1 = vrot.slane %v8041_v6, 1 }
 0x671   : > { %v4886_v38 = vrot.slane %v8043_v0, 1  ;;  %v4146_v50 = vmax.f32 %v4087_v32, 0.0  ;;  %v4456_v2 = vmax.f32 %v4454_v28, %v4455_v24  ;;  %v4463_v25 = vmax.f32 %v4461_v17, %v4462_v8 }
 0x672   : > { %v4443_v30 = vrot.slane %v4442_v36, 2  ;;  %v4449_v34 = vmax.f32 %v4447_v21, %v4448_v33  ;;  %v4880_v17 = vmax.f32 %v8041_v6, %v4879_v1 }
 0x673   : > { %v4246_v58 = vrot.slane %v4146_v50, 2  ;;  %v4247_v7 = vrot.slane %v4146_v50, 4  ;;  %v4248_v20 = vrot.slane %v4146_v50, 6  ;;  %v4888_v9 = vsel %vm228_vm1, %v4146_v50, -inf }
 0x674   : > { %v3413_v55 = vpop.permute.xlu0 %3412  ;;  %v3220_v61 = vpop.permute.xlu1 %3219  ;;  %v4444_v15 = vmax.f32 %v4442_v36, %v4443_v30  ;;  %v4450_v23 = vrot.slane %v4449_v34, 2  ;;  %v4457_v46 = vrot.slane %v4456_v2, 2  ;;  %v4464_v52 = vrot.slane %v4463_v25, 2 }
 0x675   : > { %3289 = vst.msk [vmem:[#allocation3 + $0xd8] sm:$0xff] %vm3261_vm4, %v3220_v61  ;;  %v4889_v5 = vrot.slane %v4888_v9, 4  ;;  %v4895_v48 = vsel %vm228_vm1, %v4246_v58, -inf  ;;  %v4902_v59 = vsel %vm228_vm1, %v4247_v7, -inf  ;;  %v4909_v54 = vsel %vm228_vm1, %v4248_v20, -inf }
 0x676   : > { %3482 = vst.msk [vmem:[#allocation3 + $0xd8] sm:$0xff] %vm3454_vm5, %v3413_v55  ;;  %v4445_v56 = vrot.slane %v4444_v15, 1  ;;  %v4451_v19 = vmax.f32 %v4449_v34, %v4450_v23  ;;  %v4458_v53 = vmax.f32 %v4456_v2, %v4457_v46  ;;  %v4465_v3 = vmax.f32 %v4463_v25, %v4464_v52 }
 0x677   : > { %v3383_v60 = vpop.permute.xlu2 %3382  ;;  %3675 = vst.msk [vmem:[#allocation3 + $0xd8] sm:$0xff] %vm3647_vm6, %v7990_v51  ;;  %v3899_v37 = vld [vmem:[#allocation3 + $0xd0] sm:$0xff]  ;;  %v4890_v39 = vmax.f32 %v4888_v9, %v4889_v5  ;;  %v4896_v4 = vrot.slane %v4895_v48, 4  ;;  %v4903_v51 = vrot.slane %v4902_v59, 4  ;;  %v4910_v29 = vrot.slane %v4909_v54, 4 }
 0x678   : > { %5738 = vmatmul.msk.f32.gmra.mxu2 %vm3918_vm8, %v3899_v37  ;;  %3467 = vst.msk [vmem:[#allocation3 + $0x60] sm:$0xff] %vm3454_vm5, %v3383_v60  ;;  %v4446_v62 = vmax.f32 %v4444_v15, %v4445_v56  ;;  %v4452_v40 = vrot.slane %v4451_v19, 1  ;;  %v4459_v47 = vrot.slane %v4458_v53, 1  ;;  %v4466_v26 = vrot.slane %v4465_v3, 1 }
 0x679   : > { %v4891_v63 = vrot.slane %v4890_v39, 2  ;;  %v4897_v57 = vmax.f32 %v4895_v48, %v4896_v4  ;;  %v4904_v32 = vmax.f32 %v4902_v59, %v4903_v51  ;;  %v4911_v18 = vmax.f32 %v4909_v54, %v4910_v29 }
 0x67a   : > { %v4453_v36 = vmax.f32 %v4451_v19, %v4452_v40  ;;  %v4460_v33 = vmax.f32 %v4458_v53, %v4459_v47  ;;  %v4467_v24 = vmax.f32 %v4465_v3, %v4466_v26  ;;  %v4887_v50 = vmax.f32 %v8043_v0, %v4886_v38  ;;  %v4089_v34 = vpop.f32.mrf.mxu2 }
 0x67b   : > { %v4892_v55 = vmax.f32 %v4890_v39, %v4891_v63  ;;  %v4898_v61 = vrot.slane %v4897_v57, 2  ;;  %v4905_v30 = vrot.slane %v4904_v32, 2  ;;  %v8084_v2 = vsel %vm225_vm0, %v8060_v35, -inf }
 0x67c   : > { %v3799_v21 = vpop.permute.xlu0 %3798  ;;  %v3765_v28 = vpop.permute.xlu1 %3764  ;;  %v5281_v6 = vsel %vm225_vm0, %v4446_v62, -inf  ;;  %v5284_v1 = vsel %vm225_vm0, %v4453_v36, -inf  ;;  %v4912_v25 = vrot.slane %v4911_v18, 2  ;;  %v5287_v0 = vsel %vm225_vm0, %v4460_v33, -inf }
 0x67d   : > { %3868 = vst.msk [vmem:[#allocation3 + $0xd8] sm:$0xff] %vm3840_vm7, %v3799_v21  ;;  %v5285_v60 = vmax.f32 %v7999_v42, %v5284_v1  ;;  %v8091_v38 = vsel %vm225_vm0, %v4467_v24, -inf  ;;  %v4893_v58 = vrot.slane %v4892_v55, 1  ;;  %v4899_v7 = vmax.f32 %v4897_v57, %v4898_v61  ;;  %v4041_v36 = vpop.f32.mrf.mxu1 }
 0x67e   : > { %3851 = vst.msk [vmem:[#allocation3 + $0x50] sm:$0xff] %vm3840_vm7, %v3765_v28  ;;  %v4906_v20 = vmax.f32 %v4904_v32, %v4905_v30  ;;  %v4913_v9 = vmax.f32 %v4911_v18, %v4912_v25  ;;  %v4090_v35 = vadd.f32 %v7944_v31, %v4089_v34  ;;  %v8096_v15 = vsel %vm225_vm0, %v8062_v16, -inf }
 0x67f   : > { %v8078_v8 = vpop.permute.xlu2 %3416  ;;  %v8099_v23 = vsel %vm225_vm0, %v4880_v17, -inf  ;;  %v8102_v42 = vsel %vm225_vm0, %v4887_v50, -inf  ;;  %v4894_v46 = vmax.f32 %v4892_v55, %v4893_v58  ;;  %v5282_v52 = vmax.f32 %v7993_v49, %v5281_v6 }
 0x680   : > { %v4900_v37 = vrot.slane %v4899_v7, 1  ;;  %v4907_v5 = vrot.slane %v4906_v20, 1  ;;  %v4914_v48 = vrot.slane %v4913_v9, 1  ;;  %v5288_v59 = vmax.f32 %v8002_v44, %v5287_v0 }
 0x681   : > { %v5291_v54 = vmax.f32 %v8013_v41, %v8091_v38  ;;  %v5377_v16 = vsel %vm225_vm0, %v4894_v46, -inf  ;;  %v4147_v56 = vmax.f32 %v4090_v35, 0.0  ;;  %v5537_v39 = vsel %vm5536_vm9, %v5285_v60, %v5282_v52 }
 0x682   : > { %v4901_v4 = vmax.f32 %v4899_v7, %v4900_v37  ;;  %v4908_v51 = vmax.f32 %v4906_v20, %v4907_v5  ;;  %v4915_v29 = vmax.f32 %v4913_v9, %v4914_v48  ;;  %v5378_v26 = vmax.f32 %v8018_v45, %v5377_v16 }
 0x683   : > { %v4249_v44 = vrot.slane %v4147_v56, 2  ;;  %v4250_v40 = vrot.slane %v4147_v56, 4  ;;  %v4251_v47 = vrot.slane %v4147_v56, 6  ;;  %v4916_v41 = vsel %vm228_vm1, %v4147_v56, -inf }
 0x684   : > { %v3574_v19 = vpop.permute.xlu0 %3573  ;;  %v3381_v53 = vpop.permute.xlu1 %3380  ;;  %v3900_v3 = vld [vmem:[#allocation3 + $0xd8] sm:$0xff]  ;;  %v5380_v63 = vsel %vm225_vm0, %v4901_v4, -inf  ;;  %v5383_v57 = vsel %vm225_vm0, %v4908_v51, -inf  ;;  %v4917_v32 = vrot.slane %v4916_v41, 4  ;;  %v5386_v28 = vsel %vm225_vm0, %v4915_v29, -inf }
 0x685   : > { %3466 = vst.msk [vmem:[#allocation3 + $0x58] sm:$0xff] %vm3454_vm5, %v3381_v53  ;;  %v3883_v49 = vld [vmem:[#allocation3 + $0x50] sm:$0xff]  ;;  %5739 = vmatmul.msk.f32.gmra.mxu2 %vm3918_vm8, %v3900_v3  ;;  %v5381_v18 = vmax.f32 %v8021_v22, %v5380_v63  ;;  %v5384_v21 = vmax.f32 %v8024_v12, %v5383_v57  ;;  %v4923_v17 = vsel %vm228_vm1, %v4249_v44, -inf  ;;  %v4930_v45 = vsel %vm228_vm1, %v4250_v40, -inf }
 0x686   : > { %3659 = vst.msk [vmem:[#allocation3 + $0x58] sm:$0xff] %vm3647_vm6, %v3574_v19  ;;  %5722 = vmatmul.msk.f32.gmra.mxu1 %vm3918_vm8, %v3883_v49  ;;  %v4918_v33 = vmax.f32 %v4916_v41, %v4917_v32  ;;  %v4924_v24 = vrot.slane %v4923_v17, 4  ;;  %v4937_v50 = vsel %vm228_vm1, %v4251_v47, -inf  ;;  %v5539_v55 = vsel %vm5538_vm10, %v5288_v59, %v5537_v39 }
 0x687   : > { %v8111_v62 = vpop.permute.xlu2 %3802  ;;  %3852 = vst.msk [vmem:[#allocation3 + $0x58] sm:$0xff] %vm3840_vm7, %v8031_v43  ;;  %v5571_v61 = vsel %vm5536_vm9, %v5381_v18, %v5378_v26  ;;  %v4931_v43 = vrot.slane %v4930_v45, 4  ;;  %v4938_v30 = vrot.slane %v4937_v50, 4  ;;  %v4042_v6 = vadd.f32 %v7944_v31, %v4041_v36 }
 0x688   : > { %v5572_v22 = vsel %vm5538_vm10, %v5384_v21, %v5571_v61  ;;  %v4919_v12 = vrot.slane %v4918_v33, 2  ;;  %v4925_v34 = vmax.f32 %v4923_v17, %v4924_v24  ;;  %v5387_v25 = vmax.f32 %v8028_v27, %v5386_v28 }
 0x689   : > { %v4932_v60 = vmax.f32 %v4930_v45, %v4931_v43  ;;  %v4939_v0 = vmax.f32 %v4937_v50, %v4938_v30  ;;  %v8135_v20 = vsel %vm5540_vm11, %v5291_v54, %v5539_v55  ;;  %v4131_v46 = vmax.f32 %v4042_v6, 0.0 }
 0x68a   : > { %v4920_v9 = vmax.f32 %v4918_v33, %v4919_v12  ;;  %v4926_v35 = vrot.slane %v4925_v34, 2  ;;  %v5573_v37 = vsel %vm5540_vm11, %v5387_v25, %v5572_v22 }
 0x68b   : > { %v4092_v1 = vpop.f32.mrf.mxu2  ;;  %v4933_v27 = vrot.slane %v4932_v60, 2  ;;  %v4940_v5 = vrot.slane %v4939_v0, 2  ;;  %v4201_v56 = vrot.slane %v4131_v46, 2  ;;  %v4202_v19 = vrot.slane %v4131_v46, 4 }
 0x68c   : > { %v4093_v38 = vadd.f32 %v7944_v31, %v4092_v1  ;;  %v3608_v58 = vpop.permute.xlu0 %3607  ;;  %v3415_v7 = vpop.permute.xlu1 %3414  ;;  %v4921_v54 = vrot.slane %v4920_v9, 1  ;;  %v4927_v16 = vmax.f32 %v4925_v34, %v4926_v35  ;;  %v4203_v39 = vrot.slane %v4131_v46, 6 }
 0x68d   : > { %3483 = vst.msk [vmem:[#allocation3 + $0xe0] sm:$0xff] %vm3454_vm5, %v3415_v7  ;;  %v4934_v53 = vmax.f32 %v4932_v60, %v4933_v27  ;;  %v4941_v3 = vmax.f32 %v4939_v0, %v4940_v5  ;;  %v4468_v4 = vsel %vm228_vm1, %v4131_v46, -inf  ;;  %v4475_v44 = vsel %vm228_vm1, %v4201_v56, -inf }
 0x68e   : > { %v8141_v48 = vmax.f32 %v4093_v38, 0.0  ;;  %3676 = vst.msk [vmem:[#allocation3 + $0xe0] sm:$0xff] %vm3647_vm6, %v3608_v58  ;;  %v3884_v59 = vld [vmem:[#allocation3 + $0x58] sm:$0xff]  ;;  %v4922_v51 = vmax.f32 %v4920_v9, %v4921_v54  ;;  %v4928_v29 = vrot.slane %v4927_v16, 1  ;;  %v4469_v49 = vrot.slane %v4468_v4, 4 }
 0x68f   : > { %v8138_v52 = vpop.permute.xlu2 %3577  ;;  %5723 = vmatmul.msk.f32.gmra.mxu1 %vm3918_vm8, %v3884_v59  ;;  %v4935_v40 = vrot.slane %v4934_v53, 1  ;;  %v4942_v47 = vrot.slane %v4941_v3, 1  ;;  %v4476_v41 = vrot.slane %v4475_v44, 4  ;;  %v4482_v26 = vsel %vm228_vm1, %v4202_v19, -inf }
 0x690   : > { %v4929_v63 = vmax.f32 %v4927_v16, %v4928_v29  ;;  %v5389_v57 = vsel %vm225_vm0, %v4922_v51, -inf  ;;  %v4470_v32 = vmax.f32 %v4468_v4, %v4469_v49  ;;  %v4483_v18 = vrot.slane %v4482_v26, 4 }
 0x691   : > { %v4936_v21 = vmax.f32 %v4934_v53, %v4935_v40  ;;  %v4943_v28 = vmax.f32 %v4941_v3, %v4942_v47  ;;  %v5390_v17 = vmax.f32 %v8084_v2, %v5389_v57  ;;  %v4477_v36 = vmax.f32 %v4475_v44, %v4476_v41 }
 0x692   : > { %v5392_v45 = vsel %vm225_vm0, %v4929_v63, -inf  ;;  %v4471_v50 = vrot.slane %v4470_v32, 2  ;;  %v4484_v55 = vmax.f32 %v4482_v26, %v4483_v18  ;;  %v4489_v61 = vsel %vm228_vm1, %v4203_v39, -inf }
 0x693   : > { %v5393_v30 = vmax.f32 %v8096_v15, %v5392_v45  ;;  %v5395_v22 = vsel %vm225_vm0, %v4936_v21, -inf  ;;  %v5398_v2 = vsel %vm225_vm0, %v4943_v28, -inf  ;;  %v5574_v12 = vsel %vm5542_vm12, %v5390_v17, %v5573_v37  ;;  %v4044_v18 = vpop.f32.mrf.mxu1 }
 0x694   : > { %v3224_v33 = vpop.permute.xlu0 %3223  ;;  %v3801_v24 = vpop.permute.xlu1 %3800  ;;  %v5396_v34 = vmax.f32 %v8099_v23, %v5395_v22  ;;  %v5399_v6 = vmax.f32 %v8102_v42, %v5398_v2  ;;  %v4472_v1 = vmax.f32 %v4470_v32, %v4471_v50  ;;  %v4478_v25 = vrot.slane %v4477_v36, 2 }
 0x695   : > { %3291 = vst.msk [vmem:[#allocation3 + $0xe8] sm:$0xff] %vm3261_vm4, %v3224_v33  ;;  %v5575_v15 = vsel %vm5544_vm13, %v5393_v30, %v5574_v12  ;;  %v4485_v60 = vrot.slane %v4484_v55, 2  ;;  %v4490_v0 = vrot.slane %v4489_v61, 4  ;;  %v4253_v58 = vrot.slane %v8141_v48, 4 }
 0x696   : > { %3484 = vst.msk [vmem:[#allocation3 + $0xe8] sm:$0xff] %vm3454_vm5, %v8078_v8  ;;  %v4252_v8 = vrot.slane %v8141_v48, 2  ;;  %v5576_v23 = vsel %vm5546_vm14, %v5396_v34, %v5575_v15  ;;  %v4473_v38 = vrot.slane %v4472_v1, 1  ;;  %v4479_v42 = vmax.f32 %v4477_v36, %v4478_v25 }
 0x697   : > { %v8154_v43 = vpop.permute.xlu2 %3611  ;;  %3869 = vst.msk [vmem:[#allocation3 + $0xe0] sm:$0xff] %vm3840_vm7, %v3801_v24  ;;  %v5577_v7 = vsel %vm5548_vm15, %v5399_v6, %v5576_v23  ;;  %v4486_v9 = vmax.f32 %v4484_v55, %v4485_v60  ;;  %v4491_v35 = vmax.f32 %v4489_v61, %v4490_v0  ;;  %v4254_v46 = vrot.slane %v8141_v48, 6 }
 0x698   : > { %5611 = vst.msk [vmem:[%s8168_s23 + $0x20] sm:$0xff] %vm225_vm0, %v5577_v7  ;;  %v4474_v37 = vmax.f32 %v4472_v1, %v4473_v38  ;;  %v4480_v27 = vrot.slane %v4479_v42, 1  ;;  %v4944_v5 = vsel %vm228_vm1, %v8141_v48, -inf  ;;  %v4951_v59 = vsel %vm228_vm1, %v4252_v8, -inf  ;;  %v4095_v50 = vpop.f32.mrf.mxu2 }
 0x699   : > { %v4487_v54 = vrot.slane %v4486_v9, 1  ;;  %v4492_v16 = vrot.slane %v4491_v35, 2  ;;  %v4945_v56 = vrot.slane %v4944_v5, 4  ;;  %v4952_v19 = vrot.slane %v4951_v59, 4 }
 0x69a   : > { %v4481_v39 = vmax.f32 %v4479_v42, %v4480_v27  ;;  %v5293_v4 = vsel %vm225_vm0, %v4474_v37, -inf  ;;  %v4958_v51 = vsel %vm228_vm1, %v4253_v58, -inf  ;;  %v4965_v29 = vsel %vm228_vm1, %v4254_v46, -inf }
 0x69b   : > { %v4488_v44 = vmax.f32 %v4486_v9, %v4487_v54  ;;  %v4493_v48 = vmax.f32 %v4491_v35, %v4492_v16  ;;  %v5294_v40 = vmax.f32 %v8034_v13, %v5293_v4  ;;  %v4946_v47 = vmax.f32 %v4944_v5, %v4945_v56 }
 0x69c   : > { %v3769_v53 = vpop.permute.xlu0 %3768  ;;  %v3576_v3 = vpop.permute.xlu1 %3575  ;;  %v5296_v26 = vsel %vm225_vm0, %v4481_v39, -inf  ;;  %v4953_v63 = vmax.f32 %v4951_v59, %v4952_v19  ;;  %v4959_v57 = vrot.slane %v4958_v51, 4  ;;  %v4966_v32 = vrot.slane %v4965_v29, 4 }
 0x69d   : > { %3660 = vst.msk [vmem:[#allocation3 + $0x60] sm:$0xff] %vm3647_vm6, %v3576_v3  ;;  %v4494_v21 = vrot.slane %v4493_v48, 1  ;;  %v5297_v28 = vmax.f32 %v8052_v14, %v5296_v26  ;;  %v5299_v17 = vsel %vm225_vm0, %v4488_v44, -inf  ;;  %v5543_v13 = vsel %vm5542_vm12, %v5294_v40, %v8135_v20  ;;  %v4047_v56 = vpop.f32.mrf.mxu1 }
 0x69e   : > { %3853 = vst.msk [vmem:[#allocation3 + $0x60] sm:$0xff] %vm3840_vm7, %v3769_v53  ;;  %v3901_v41 = vld [vmem:[#allocation3 + $0xe0] sm:$0xff]  ;;  %v5300_v36 = vmax.f32 %v8055_v10, %v5299_v17  ;;  %v4947_v33 = vrot.slane %v4946_v47, 2  ;;  %v4954_v24 = vrot.slane %v4953_v63, 2  ;;  %v4960_v45 = vmax.f32 %v4958_v51, %v4959_v57 }
 0x69f   : > { %v3228_v49 = vpop.permute.xlu2 %3227  ;;  %5740 = vmatmul.msk.f32.gmra.mxu2 %vm3918_vm8, %v3901_v41  ;;  %v4495_v55 = vmax.f32 %v4493_v48, %v4494_v21  ;;  %v5545_v61 = vsel %vm5544_vm13, %v5297_v28, %v5543_v13  ;;  %v4967_v30 = vmax.f32 %v4965_v29, %v4966_v32  ;;  %v4045_v22 = vadd.f32 %v7944_v31, %v4044_v18 }
 0x6a0   : > { %3293 = vst.msk [vmem:[#allocation3 + $0xf8] sm:$0xff] %vm3261_vm4, %v3228_v49  ;;  %v5547_v2 = vsel %vm5546_vm14, %v5300_v36, %v5545_v61  ;;  %v4948_v14 = vmax.f32 %v4946_v47, %v4947_v33  ;;  %v4955_v12 = vmax.f32 %v4953_v63, %v4954_v24  ;;  %v4961_v34 = vrot.slane %v4960_v45, 2 }
 0x6a1   : > { %v5302_v6 = vsel %vm225_vm0, %v4495_v55, -inf  ;;  %v4968_v20 = vrot.slane %v4967_v30, 2  ;;  %v4132_v1 = vmax.f32 %v4045_v22, 0.0  ;;  %v4096_v10 = vadd.f32 %v7944_v31, %v4095_v50 }
 0x6a2   : > { %v5303_v60 = vmax.f32 %v8058_v11, %v5302_v6  ;;  %v4949_v0 = vrot.slane %v4948_v14, 1  ;;  %v4956_v8 = vrot.slane %v4955_v12, 1  ;;  %v4962_v23 = vmax.f32 %v4960_v45, %v4961_v34 }
 0x6a3   : > { %v4969_v58 = vmax.f32 %v4967_v30, %v4968_v20  ;;  %v4204_v7 = vrot.slane %v4132_v1, 2  ;;  %v4205_v9 = vrot.slane %v4132_v1, 4  ;;  %v4206_v35 = vrot.slane %v4132_v1, 6 }
 0x6a4   : > { %v3385_v25 = vpop.permute.xlu0 %3384  ;;  %v3610_v15 = vpop.permute.xlu1 %3609  ;;  %v5549_v31 = vsel %vm5548_vm15, %v5303_v60, %v5547_v2  ;;  %v4950_v11 = vmax.f32 %v4948_v14, %v4949_v0  ;;  %v4957_v46 = vmax.f32 %v4955_v12, %v4956_v8  ;;  %v4963_v37 = vrot.slane %v4962_v23, 1 }
 0x6a5   : > { %3468 = vst.msk [vmem:[#allocation3 + $0x68] sm:$0xff] %vm3454_vm5, %v3385_v25  ;;  %v3885_v38 = vld [vmem:[#allocation3 + $0x60] sm:$0xff]  ;;  %v4970_v27 = vrot.slane %v4969_v58, 1  ;;  %v4496_v5 = vsel %vm228_vm1, %v4132_v1, -inf  ;;  %v4503_v59 = vsel %vm228_vm1, %v4204_v7, -inf  ;;  %v4510_v54 = vsel %vm228_vm1, %v4205_v9, -inf }
 0x6a6   : > { %3661 = vst.msk [vmem:[#allocation3 + $0x68] sm:$0xff] %vm3647_vm6, %v8138_v52  ;;  %5724 = vmatmul.msk.f32.gmra.mxu1 %vm3918_vm8, %v3885_v38  ;;  %v4964_v16 = vmax.f32 %v4962_v23, %v4963_v37  ;;  %v4497_v52 = vrot.slane %v4496_v5, 4  ;;  %v8217_v19 = vsel %vm225_vm0, %v4950_v11, -inf  ;;  %v4504_v53 = vrot.slane %v4503_v59, 4 }
 0x6a7   : > { %v8202_v42 = vpop.permute.xlu2 %3772  ;;  %3677 = vst.msk [vmem:[#allocation3 + $0xe8] sm:$0xff] %vm3647_vm6, %v3610_v15  ;;  %v4511_v3 = vrot.slane %v4510_v54, 4  ;;  %v4517_v39 = vsel %vm228_vm1, %v4206_v35, -inf  ;;  %v8221_v4 = vsel %vm225_vm0, %v4957_v46, -inf  ;;  %v4149_v49 = vmax.f32 %v4096_v10, 0.0 }
 0x6a8   : > { %5607 = vst.msk [vmem:[%s8168_s23] sm:$0xff] %vm225_vm0, %v5549_v31  ;;  %v4498_v51 = vmax.f32 %v4496_v5, %v4497_v52  ;;  %v4518_v29 = vrot.slane %v4517_v39, 4  ;;  %v4971_v44 = vmax.f32 %v4969_v58, %v4970_v27  ;;  %v4505_v48 = vmax.f32 %v4503_v59, %v4504_v53 }
 0x6a9   : > { %3870 = vst.msk [vmem:[#allocation3 + $0xe8] sm:$0xff] %vm3840_vm7, %v8111_v62  ;;  %v4512_v40 = vmax.f32 %v4510_v54, %v4511_v3  ;;  %v8226_v62 = vld [vmem:[%s8705_s4] ss:$0 sm:$0xff]  ;;  %v4255_v32 = vrot.slane %v4149_v49, 2  ;;  %v4256_v18 = vrot.slane %v4149_v49, 4  ;;  %v4257_v13 = vrot.slane %v4149_v49, 6 }
 0x6aa   : > { %v4048_v47 = vadd.f32 %v8226_v62, %v4047_v56  ;;  %v4499_v63 = vrot.slane %v4498_v51, 2  ;;  %v4519_v57 = vmax.f32 %v4517_v39, %v4518_v29  ;;  %v4506_v28 = vrot.slane %v4505_v48, 2 }
 0x6ab   : > { %v4513_v17 = vrot.slane %v4512_v40, 2  ;;  %v4972_v36 = vsel %vm228_vm1, %v4149_v49, -inf  ;;  %v4979_v50 = vsel %vm228_vm1, %v4255_v32, -inf  ;;  %v4986_v22 = vsel %vm228_vm1, %v4256_v18, -inf }
 0x6ac   : > { %v3419_v41 = vpop.permute.xlu0 %3418  ;;  %v3226_v26 = vpop.permute.xlu1 %3225  ;;  %v4500_v33 = vmax.f32 %v4498_v51, %v4499_v63  ;;  %v4520_v24 = vrot.slane %v4519_v57, 2  ;;  %v4973_v45 = vrot.slane %v4972_v36, 4  ;;  %v4507_v55 = vmax.f32 %v4505_v48, %v4506_v28 }
 0x6ad   : > { %3292 = vst.msk [vmem:[#allocation3 + $0xf0] sm:$0xff] %vm3261_vm4, %v3226_v26  ;;  %v4514_v61 = vmax.f32 %v4512_v40, %v4513_v17  ;;  %v4980_v30 = vrot.slane %v4979_v50, 4  ;;  %v4987_v6 = vrot.slane %v4986_v22, 4  ;;  %v4993_v25 = vsel %vm228_vm1, %v4257_v13, -inf }
 0x6ae   : > { %3485 = vst.msk [vmem:[#allocation3 + $0xf0] sm:$0xff] %vm3454_vm5, %v3419_v41  ;;  %v4501_v14 = vrot.slane %v4500_v33, 1  ;;  %v4521_v12 = vmax.f32 %v4519_v57, %v4520_v24  ;;  %v4974_v34 = vmax.f32 %v4972_v36, %v4973_v45  ;;  %v4508_v20 = vrot.slane %v4507_v55, 1 }
 0x6af   : > { %v3389_v21 = vpop.permute.xlu2 %3388  ;;  %3678 = vst.msk [vmem:[#allocation3 + $0xf0] sm:$0xff] %vm3647_vm6, %v8154_v43  ;;  %v4515_v1 = vrot.slane %v4514_v61, 1  ;;  %v4981_v10 = vmax.f32 %v4979_v50, %v4980_v30  ;;  %v4988_v0 = vmax.f32 %v4986_v22, %v4987_v6  ;;  %v4994_v58 = vrot.slane %v4993_v25, 4 }
 0x6b0   : > { %v3902_v2 = vld [vmem:[#allocation3 + $0xe8] sm:$0xff]  ;;  %3470 = vst.msk [vmem:[#allocation3 + $0x78] sm:$0xff] %vm3454_vm5, %v3389_v21  ;;  %v4502_v43 = vmax.f32 %v4500_v33, %v4501_v14  ;;  %v4522_v15 = vrot.slane %v4521_v12, 1  ;;  %v4975_v60 = vrot.slane %v4974_v34, 2  ;;  %v4509_v8 = vmax.f32 %v4507_v55, %v4508_v20 }
 0x6b1   : > { %5741 = vmatmul.msk.f32.gmra.mxu2 %vm3918_vm8, %v3902_v2  ;;  %v4516_v23 = vmax.f32 %v4514_v61, %v4515_v1  ;;  %v4982_v38 = vrot.slane %v4981_v10, 2  ;;  %v8240_v35 = vsel %vm225_vm0, %v4964_v16, -inf  ;;  %v8243_v31 = vsel %vm225_vm0, %v4971_v44, -inf }
 0x6b2   : > { %v4976_v11 = vmax.f32 %v4974_v34, %v4975_v60  ;;  %v4989_v46 = vrot.slane %v4988_v0, 2  ;;  %v4098_v37 = vpop.f32.mrf.mxu2  ;;  %v4523_v27 = vmax.f32 %v4521_v12, %v4522_v15  ;;  %v8247_v5 = vsel %vm225_vm0, %v4502_v43, -inf }
 0x6b3   : > { %v4983_v59 = vmax.f32 %v4981_v10, %v4982_v38  ;;  %v4995_v54 = vmax.f32 %v4993_v25, %v4994_v58  ;;  %v8251_v52 = vsel %vm225_vm0, %v4509_v8, -inf  ;;  %v4133_v53 = vmax.f32 %v4048_v47, 0.0  ;;  %v4050_v41 = vpop.f32.mrf.mxu1 }
 0x6b4   : > { %v3805_v7 = vpop.permute.xlu0 %3804  ;;  %v3771_v9 = vpop.permute.xlu1 %3770  ;;  %v4977_v16 = vrot.slane %v4976_v11, 1  ;;  %v4990_v56 = vmax.f32 %v4988_v0, %v4989_v46  ;;  %v8254_v3 = vsel %vm225_vm0, %v4516_v23, -inf  ;;  %v4099_v29 = vadd.f32 %v8226_v62, %v4098_v37 }
 0x6b5   : > { %3871 = vst.msk [vmem:[#allocation3 + $0xf0] sm:$0xff] %vm3840_vm7, %v3805_v7  ;;  %v4984_v39 = vrot.slane %v4983_v59, 1  ;;  %v4996_v51 = vrot.slane %v4995_v54, 2  ;;  %v4207_v48 = vrot.slane %v4133_v53, 2  ;;  %v4208_v40 = vrot.slane %v4133_v53, 4 }
 0x6b6   : > { %3854 = vst.msk [vmem:[#allocation3 + $0x68] sm:$0xff] %vm3840_vm7, %v3771_v9  ;;  %v4978_v49 = vmax.f32 %v4976_v11, %v4977_v16  ;;  %v4991_v44 = vrot.slane %v4990_v56, 1  ;;  %v4209_v57 = vrot.slane %v4133_v53, 6  ;;  %v4524_v32 = vsel %vm228_vm1, %v4133_v53, -inf }
 0x6b7   : > { %v4985_v26 = vmax.f32 %v4983_v59, %v4984_v39  ;;  %v4997_v63 = vmax.f32 %v4995_v54, %v4996_v51  ;;  %v8259_v18 = vsel %vm225_vm0, %v4523_v27, -inf  ;;  %v4525_v21 = vrot.slane %v4524_v32, 4 }
 0x6b8   : > { %v4992_v47 = vmax.f32 %v4990_v56, %v4991_v44  ;;  %v4531_v28 = vsel %vm228_vm1, %v4207_v48, -inf  ;;  %v4538_v36 = vsel %vm228_vm1, %v4208_v40, -inf  ;;  %v4051_v33 = vadd.f32 %v8226_v62, %v4050_v41 }
 0x6b9   : > { %v4998_v17 = vrot.slane %v4997_v63, 1  ;;  %v4532_v13 = vrot.slane %v4531_v28, 4  ;;  %v8265_v55 = vsel %vm225_vm0, %v4978_v49, -inf  ;;  %v4526_v61 = vmax.f32 %v4524_v32, %v4525_v21 }
 0x6ba   : > { %v4539_v30 = vrot.slane %v4538_v36, 4  ;;  %v4545_v22 = vsel %vm228_vm1, %v4209_v57, -inf  ;;  %v8271_v14 = vsel %vm225_vm0, %v4985_v26, -inf  ;;  %v4150_v6 = vmax.f32 %v4099_v29, 0.0 }
 0x6bb   : > { %v4533_v12 = vmax.f32 %v4531_v28, %v4532_v13  ;;  %v4546_v34 = vrot.slane %v4545_v22, 4  ;;  %v4999_v20 = vmax.f32 %v4997_v63, %v4998_v17  ;;  %v8276_v1 = vsel %vm225_vm0, %v4992_v47, -inf }
 0x6bc   : > { %v3580_v24 = vpop.permute.xlu0 %3579  ;;  %v3387_v45 = vpop.permute.xlu1 %3386  ;;  %v3903_v50 = vld [vmem:[#allocation3 + $0xf0] sm:$0xff]  ;;  %v4527_v10 = vrot.slane %v4526_v61, 2  ;;  %v4540_v25 = vmax.f32 %v4538_v36, %v4539_v30  ;;  %v4258_v60 = vrot.slane %v4150_v6, 2  ;;  %v8280_v0 = vmax.f32 %v4051_v33, 0.0 }
 0x6bd   : > { %3469 = vst.msk [vmem:[#allocation3 + $0x70] sm:$0xff] %vm3454_vm5, %v3387_v45  ;;  %v3886_v2 = vld [vmem:[#allocation3 + $0x68] sm:$0xff]  ;;  %5742 = vmatmul.msk.f32.gmra.mxu2 %vm3918_vm8, %v3903_v50  ;;  %v4534_v43 = vrot.slane %v4533_v12, 2  ;;  %v4547_v15 = vmax.f32 %v4545_v22, %v4546_v34  ;;  %v4259_v38 = vrot.slane %v4150_v6, 4  ;;  %v4260_v58 = vrot.slane %v4150_v6, 6 }
 0x6be   : > { %3662 = vst.msk [vmem:[#allocation3 + $0x70] sm:$0xff] %vm3647_vm6, %v3580_v24  ;;  %5725 = vmatmul.msk.f32.gmra.mxu1 %vm3918_vm8, %v3886_v2  ;;  %v4528_v8 = vmax.f32 %v4526_v61, %v4527_v10  ;;  %v4541_v23 = vrot.slane %v4540_v25, 2  ;;  %v5000_v11 = vsel %vm228_vm1, %v4150_v6, -inf  ;;  %v5007_v46 = vsel %vm228_vm1, %v4258_v60, -inf }
 0x6bf   : > { %3855 = vst.msk [vmem:[#allocation3 + $0x70] sm:$0xff] %vm3840_vm7, %v8202_v42  ;;  %v4535_v7 = vmax.f32 %v4533_v12, %v4534_v43  ;;  %v4548_v9 = vrot.slane %v4547_v15, 2  ;;  %v5001_v59 = vrot.slane %v5000_v11, 4  ;;  %v5008_v54 = vrot.slane %v5007_v46, 4 }
 0x6c0   : > { %v4529_v37 = vrot.slane %v4528_v8, 1  ;;  %v4542_v27 = vmax.f32 %v4540_v25, %v4541_v23  ;;  %v5014_v56 = vsel %vm228_vm1, %v4259_v38, -inf  ;;  %v5021_v53 = vsel %vm228_vm1, %v4260_v58, -inf }
 0x6c1   : > { %v4536_v42 = vrot.slane %v4535_v7, 1  ;;  %v4549_v16 = vmax.f32 %v4547_v15, %v4548_v9  ;;  %v5002_v44 = vmax.f32 %v5000_v11, %v5001_v59  ;;  %v5009_v48 = vmax.f32 %v5007_v46, %v5008_v54 }
 0x6c2   : > { %v4530_v29 = vmax.f32 %v4528_v8, %v4529_v37  ;;  %v4543_v49 = vrot.slane %v4542_v27, 1  ;;  %v5015_v26 = vrot.slane %v5014_v56, 4  ;;  %v5022_v63 = vrot.slane %v5021_v53, 4 }
 0x6c3   : > { %v4537_v40 = vmax.f32 %v4535_v7, %v4536_v42  ;;  %v4550_v41 = vrot.slane %v4549_v16, 1  ;;  %v8289_v32 = vsel %vm225_vm0, %v4999_v20, -inf  ;;  %v5003_v21 = vrot.slane %v5002_v44, 2  ;;  %v4101_v34 = vpop.f32.mrf.mxu2 }
 0x6c4   : > { %v3614_v39 = vpop.permute.xlu0 %3613  ;;  %v3421_v51 = vpop.permute.xlu1 %3420  ;;  %v4544_v47 = vmax.f32 %v4542_v27, %v4543_v49  ;;  %v5010_v28 = vrot.slane %v5009_v48, 2  ;;  %v8295_v13 = vsel %vm225_vm0, %v4530_v29, -inf  ;;  %v5016_v36 = vmax.f32 %v5014_v56, %v5015_v26 }
 0x6c5   : > { %3486 = vst.msk [vmem:[#allocation3 + $0xf8] sm:$0xff] %vm3454_vm5, %v3421_v51  ;;  %v8292_v17 = vmax.f32 %v4549_v16, %v4550_v41  ;;  %v5023_v33 = vmax.f32 %v5021_v53, %v5022_v63  ;;  %v8298_v24 = vsel %vm225_vm0, %v4537_v40, -inf  ;;  %v5004_v45 = vmax.f32 %v5002_v44, %v5003_v21 }
 0x6c6   : > { %3679 = vst.msk [vmem:[#allocation3 + $0xf8] sm:$0xff] %vm3647_vm6, %v3614_v39  ;;  %v3887_v57 = vld [vmem:[#allocation3 + $0x70] sm:$0xff]  ;;  %v5011_v50 = vmax.f32 %v5009_v48, %v5010_v28  ;;  %v4210_v61 = vrot.slane %v8280_v0, 2  ;;  %v8302_v30 = vsel %vm225_vm0, %v4544_v47, -inf  ;;  %v5017_v22 = vrot.slane %v5016_v36, 2 }
 0x6c7   : > { %5726 = vmatmul.msk.f32.gmra.mxu1 %vm3918_vm8, %v3887_v57  ;;  %v5024_v2 = vrot.slane %v5023_v33, 2  ;;  %v4211_v12 = vrot.slane %v8280_v0, 4  ;;  %v5005_v6 = vrot.slane %v5004_v45, 1  ;;  %v4212_v10 = vrot.slane %v8280_v0, 6 }
 0x6c8   : > { %v5012_v20 = vrot.slane %v5011_v50, 1  ;;  %v4552_v25 = vsel %vm228_vm1, %v8280_v0, -inf  ;;  %v5018_v43 = vmax.f32 %v5016_v36, %v5017_v22  ;;  %v4559_v8 = vsel %vm228_vm1, %v4210_v61, -inf }
 0x6c9   : > { %v5025_v15 = vmax.f32 %v5023_v33, %v5024_v2  ;;  %v4553_v60 = vrot.slane %v4552_v25, 4  ;;  %v5006_v58 = vmax.f32 %v5004_v45, %v5005_v6  ;;  %v4560_v9 = vrot.slane %v4559_v8, 4 }
 0x6ca   : > { %v5013_v7 = vmax.f32 %v5011_v50, %v5012_v20  ;;  %v4566_v11 = vsel %vm228_vm1, %v4211_v12, -inf  ;;  %v5019_v46 = vrot.slane %v5018_v43, 1  ;;  %v4573_v16 = vsel %vm228_vm1, %v4212_v10, -inf }
 0x6cb   : > { %v5026_v37 = vrot.slane %v5025_v15, 1  ;;  %v4554_v27 = vmax.f32 %v4552_v25, %v4553_v60  ;;  %v4567_v59 = vrot.slane %v4566_v11, 4  ;;  %v5401_v0 = vsel %vm225_vm0, %v5006_v58, -inf  ;;  %v4053_v40 = vpop.f32.mrf.mxu1 }
 0x6cc   : > { %v3582_v23 = vpop.permute.xlu0 %3581  ;;  %v3807_v38 = vpop.permute.xlu1 %3806  ;;  %v5404_v54 = vsel %vm225_vm0, %v5013_v7, -inf  ;;  %v4561_v42 = vmax.f32 %v4559_v8, %v4560_v9  ;;  %v5020_v56 = vmax.f32 %v5018_v43, %v5019_v46  ;;  %v5402_v39 = vmax.f32 %v8217_v19, %v5401_v0 }
 0x6cd   : > { %3663 = vst.msk [vmem:[#allocation3 + $0x78] sm:$0xff] %vm3647_vm6, %v3582_v23  ;;  %v5027_v53 = vmax.f32 %v5025_v15, %v5026_v37  ;;  %v5405_v51 = vmax.f32 %v8221_v4, %v5404_v54  ;;  %v4555_v29 = vrot.slane %v4554_v27, 2  ;;  %v4568_v44 = vmax.f32 %v4566_v11, %v4567_v59 }
 0x6ce   : > { %3872 = vst.msk [vmem:[#allocation3 + $0xf8] sm:$0xff] %vm3840_vm7, %v3807_v38  ;;  %v4562_v49 = vrot.slane %v4561_v42, 2  ;;  %v4574_v48 = vrot.slane %v4573_v16, 4  ;;  %v5407_v41 = vsel %vm225_vm0, %v5020_v56, -inf  ;;  %v4102_v57 = vadd.f32 %v8226_v62, %v4101_v34 }
 0x6cf   : > { %v5410_v26 = vsel %vm225_vm0, %v5027_v53, -inf  ;;  %v5578_v63 = vsel %vm5536_vm9, %v5405_v51, %v5402_v39  ;;  %v5408_v21 = vmax.f32 %v8240_v35, %v5407_v41  ;;  %v4556_v28 = vmax.f32 %v4554_v27, %v4555_v29 }
 0x6d0   : > { %v5411_v19 = vmax.f32 %v8243_v31, %v5410_v26  ;;  %v4563_v4 = vmax.f32 %v4561_v42, %v4562_v49  ;;  %v4569_v36 = vrot.slane %v4568_v44, 2  ;;  %v4575_v33 = vmax.f32 %v4573_v16, %v4574_v48 }
 0x6d1   : > { %v4104_v47 = vpop.f32.mrf.mxu2  ;;  %v4151_v45 = vmax.f32 %v4102_v57, 0.0  ;;  %v4054_v50 = vadd.f32 %v8226_v62, %v4053_v40  ;;  %v5579_v22 = vsel %vm5538_vm10, %v5408_v21, %v5578_v63  ;;  %v4557_v2 = vrot.slane %v4556_v28, 1 }
 0x6d2   : > { %v4564_v12 = vrot.slane %v4563_v4, 1  ;;  %v4105_v6 = vadd.f32 %v8226_v62, %v4104_v47  ;;  %v8328_v35 = vsel %vm5540_vm11, %v5411_v19, %v5579_v22  ;;  %v4570_v31 = vmax.f32 %v4568_v44, %v4569_v36 }
 0x6d3   : > { %v4576_v20 = vrot.slane %v4575_v33, 2  ;;  %v4261_v10 = vrot.slane %v4151_v45, 2  ;;  %v4558_v25 = vmax.f32 %v4556_v28, %v4557_v2  ;;  %v4262_v15 = vrot.slane %v4151_v45, 4 }
 0x6d4   : > { %v3775_v61 = vpop.permute.xlu1 %3774  ;;  %v4565_v43 = vmax.f32 %v4563_v4, %v4564_v12  ;;  %v4263_v60 = vrot.slane %v4151_v45, 6  ;;  %v4571_v8 = vrot.slane %v4570_v31, 1  ;;  %v5028_v38 = vsel %vm228_vm1, %v4151_v45, -inf }
 0x6d5   : > { %3856 = vst.msk [vmem:[#allocation3 + $0x78] sm:$0xff] %vm3840_vm7, %v3775_v61  ;;  %v3904_v34 = vld [vmem:[#allocation3 + $0xf8] sm:$0xff]  ;;  %v4577_v23 = vmax.f32 %v4575_v33, %v4576_v20  ;;  %v5035_v58 = vsel %vm228_vm1, %v4261_v10, -inf  ;;  %v5305_v7 = vsel %vm225_vm0, %v4558_v25, -inf  ;;  %v5029_v11 = vrot.slane %v5028_v38, 4 }
 0x6d6   : > { %5743 = vmatmul.msk.f32.gmra.mxu2 %vm3918_vm8, %v3904_v34  ;;  %v5308_v9 = vsel %vm225_vm0, %v4565_v43, -inf  ;;  %v5036_v46 = vrot.slane %v5035_v58, 4  ;;  %v4572_v37 = vmax.f32 %v4570_v31, %v4571_v8  ;;  %v5306_v59 = vmax.f32 %v8247_v5, %v5305_v7 }
 0x6d7   : > { %v4578_v27 = vrot.slane %v4577_v23, 1  ;;  %v5309_v0 = vmax.f32 %v8251_v52, %v5308_v9  ;;  %v5030_v54 = vmax.f32 %v5028_v38, %v5029_v11  ;;  %v5042_v16 = vsel %vm228_vm1, %v4262_v15, -inf }
 0x6d8   : > { %v5037_v42 = vmax.f32 %v5035_v58, %v5036_v46  ;;  %v5049_v56 = vsel %vm228_vm1, %v4263_v60, -inf  ;;  %v5311_v39 = vsel %vm225_vm0, %v4572_v37, -inf  ;;  %v5043_v29 = vrot.slane %v5042_v16, 4 }
 0x6d9   : > { %v4579_v53 = vmax.f32 %v4577_v23, %v4578_v27  ;;  %v5550_v51 = vsel %vm5536_vm9, %v5309_v0, %v5306_v59  ;;  %v5312_v49 = vmax.f32 %v8254_v3, %v5311_v39  ;;  %v5031_v44 = vrot.slane %v5030_v54, 2 }
 0x6da   : > { %v5038_v48 = vrot.slane %v5037_v42, 2  ;;  %v5050_v40 = vrot.slane %v5049_v56, 4  ;;  %v5044_v41 = vmax.f32 %v5042_v16, %v5043_v29  ;;  %v4135_v26 = vmax.f32 %v4054_v50, 0.0 }
 0x6db   : > { %v5314_v52 = vsel %vm225_vm0, %v4579_v53, -inf  ;;  %v8343_v63 = vmax.f32 %v4105_v6, 0.0  ;;  %v5551_v47 = vsel %vm5538_vm10, %v5312_v49, %v5550_v51  ;;  %v5032_v21 = vmax.f32 %v5030_v54, %v5031_v44 }
 0x6dc   : > { %v3888_v5 = vld [vmem:[#allocation3 + $0x78] sm:$0xff]  ;;  %v5315_v57 = vmax.f32 %v8259_v18, %v5314_v52  ;;  %v5039_v19 = vmax.f32 %v5037_v42, %v5038_v48  ;;  %v5045_v28 = vrot.slane %v5044_v41, 2  ;;  %v5051_v3 = vmax.f32 %v5049_v56, %v5050_v40 }
 0x6dd   : > { %5727 = vmatmul.msk.f32.gmra.mxu1 %vm3918_vm8, %v3888_v5  ;;  %v4213_v4 = vrot.slane %v4135_v26, 2  ;;  %v4214_v36 = vrot.slane %v4135_v26, 4  ;;  %v5033_v45 = vrot.slane %v5032_v21, 1  ;;  %v4215_v50 = vrot.slane %v4135_v26, 6 }
 0x6de   : > { %v8349_v33 = vsel %vm5540_vm11, %v5315_v57, %v5551_v47  ;;  %v5040_v61 = vrot.slane %v5039_v19, 1  ;;  %v5046_v22 = vmax.f32 %v5044_v41, %v5045_v28  ;;  %v5052_v2 = vrot.slane %v5051_v3, 2 }
 0x6df   : > { %v4580_v12 = vsel %vm228_vm1, %v4135_v26, -inf  ;;  %v4587_v18 = vsel %vm228_vm1, %v4213_v4, -inf  ;;  %v5034_v6 = vmax.f32 %v5032_v21, %v5033_v45  ;;  %v4594_v43 = vsel %vm228_vm1, %v4214_v36, -inf  ;;  %v4056_v4 = vpop.f32.mrf.mxu1 }
 0x6e0   : > { %v5041_v34 = vmax.f32 %v5039_v19, %v5040_v61  ;;  %v4581_v31 = vrot.slane %v4580_v12, 4  ;;  %v4588_v20 = vrot.slane %v4587_v18, 4  ;;  %v5047_v10 = vrot.slane %v5046_v22, 1 }
 0x6e1   : > { %v5053_v25 = vmax.f32 %v5051_v3, %v5052_v2  ;;  %v4601_v15 = vsel %vm228_vm1, %v4215_v50, -inf  ;;  %v5413_v60 = vsel %vm225_vm0, %v5034_v6, -inf  ;;  %v4595_v27 = vrot.slane %v4594_v43, 4 }
 0x6e2   : > { %v5416_v8 = vsel %vm225_vm0, %v5041_v34, -inf  ;;  %v4582_v23 = vmax.f32 %v4580_v12, %v4581_v31  ;;  %v4589_v38 = vmax.f32 %v4587_v18, %v4588_v20  ;;  %v5048_v58 = vmax.f32 %v5046_v22, %v5047_v10 }
 0x6e3   : > { %v5054_v7 = vrot.slane %v5053_v25, 1  ;;  %v5414_v9 = vmax.f32 %v8265_v55, %v5413_v60  ;;  %v5417_v11 = vmax.f32 %v8271_v14, %v5416_v8  ;;  %v4602_v59 = vrot.slane %v4601_v15, 4 }
 0x6e4   : > { %v4583_v46 = vrot.slane %v4582_v23, 2  ;;  %v4590_v37 = vrot.slane %v4589_v38, 2  ;;  %v5419_v54 = vsel %vm225_vm0, %v5048_v58, -inf  ;;  %v4264_v16 = vrot.slane %v8343_v63, 2 }
 0x6e5   : > { %v5055_v0 = vmax.f32 %v5053_v25, %v5054_v7  ;;  %v5581_v42 = vsel %vm5542_vm12, %v5414_v9, %v8328_v35  ;;  %v5420_v56 = vmax.f32 %v8276_v1, %v5419_v54  ;;  %v4596_v51 = vmax.f32 %v4594_v43, %v4595_v27 }
 0x6e6   : > { %v5582_v53 = vsel %vm5544_vm13, %v5417_v11, %v5581_v42  ;;  %v4584_v39 = vmax.f32 %v4582_v23, %v4583_v46  ;;  %v4591_v55 = vmax.f32 %v4589_v38, %v4590_v37  ;;  %v4603_v29 = vmax.f32 %v4601_v15, %v4602_v59 }
 0x6e7   : > { %v5422_v14 = vsel %vm225_vm0, %v5055_v0, -inf  ;;  %v4265_v49 = vrot.slane %v8343_v63, 4  ;;  %v5583_v48 = vsel %vm5546_vm14, %v5420_v56, %v5582_v53  ;;  %v4597_v5 = vrot.slane %v4596_v51, 2 }
 0x6e8   : > { %v5423_v44 = vmax.f32 %v8289_v32, %v5422_v14  ;;  %v4585_v35 = vrot.slane %v4584_v39, 1  ;;  %v4592_v40 = vrot.slane %v4591_v55, 1  ;;  %v4604_v52 = vrot.slane %v4603_v29, 2 }
 0x6e9   : > { %v4266_v1 = vrot.slane %v8343_v63, 6  ;;  %v5056_v41 = vsel %vm228_vm1, %v8343_v63, -inf  ;;  %v4598_v19 = vmax.f32 %v4596_v51, %v4597_v5  ;;  %v5063_v28 = vsel %vm228_vm1, %v4264_v16, -inf }
 0x6ea   : > { %v5584_v26 = vsel %vm5548_vm15, %v5423_v44, %v5583_v48  ;;  %v4586_v57 = vmax.f32 %v4584_v39, %v4585_v35  ;;  %v4593_v47 = vmax.f32 %v4591_v55, %v4592_v40  ;;  %v5057_v21 = vrot.slane %v5056_v41, 4  ;;  %v4107_v7 = vpop.f32.mrf.mxu2 }
 0x6eb   : > { %5612 = vst.msk [vmem:[%s8168_s23 + $0x28] sm:$0xff] %vm225_vm0, %v5584_v26  ;;  %v4605_v32 = vmax.f32 %v4603_v29, %v4604_v52  ;;  %v5070_v3 = vsel %vm228_vm1, %v4265_v49, -inf  ;;  %v5064_v63 = vrot.slane %v5063_v28, 4  ;;  %v4599_v50 = vrot.slane %v4598_v19, 1  ;;  %v4059_v54 = vpop.f32.mrf.mxu1 }
 0x6ec   : > { %v5317_v36 = vsel %vm225_vm0, %v4586_v57, -inf  ;;  %v5320_v45 = vsel %vm225_vm0, %v4593_v47, -inf  ;;  %v5058_v61 = vmax.f32 %v5056_v41, %v5057_v21  ;;  %v5071_v34 = vrot.slane %v5070_v3, 4 }
 0x6ed   : > { %v4606_v22 = vrot.slane %v4605_v32, 1  ;;  %v5318_v2 = vmax.f32 %v8295_v13, %v5317_v36  ;;  %v5321_v12 = vmax.f32 %v8298_v24, %v5320_v45  ;;  %v5065_v6 = vmax.f32 %v5063_v28, %v5064_v63 }
 0x6ee   : > { %v5059_v18 = vrot.slane %v5058_v61, 2  ;;  %v5077_v31 = vsel %vm228_vm1, %v4266_v1, -inf  ;;  %v4600_v20 = vmax.f32 %v4598_v19, %v4599_v50  ;;  %v5072_v23 = vmax.f32 %v5070_v3, %v5071_v34 }
 0x6ef   : > { %v4607_v10 = vmax.f32 %v4605_v32, %v4606_v22  ;;  %v5553_v25 = vsel %vm5542_vm12, %v5318_v2, %v8349_v33  ;;  %v5078_v43 = vrot.slane %v5077_v31, 4  ;;  %v5066_v8 = vrot.slane %v5065_v6, 2 }
 0x6f0   : > { %v5554_v15 = vsel %vm5544_vm13, %v5321_v12, %v5553_v25  ;;  %v5060_v60 = vmax.f32 %v5058_v61, %v5059_v18  ;;  %v5323_v13 = vsel %vm225_vm0, %v4600_v20, -inf  ;;  %v4057_v58 = vadd.f32 %v8226_v62, %v4056_v4 }
 0x6f1   : > { %v5326_v24 = vsel %vm225_vm0, %v4607_v10, -inf  ;;  %v5079_v38 = vmax.f32 %v5077_v31, %v5078_v43  ;;  %v5325_v9 = vsel %vm225_vm0, %v8292_v17, -inf  ;;  %v5324_v11 = vmax.f32 %v8302_v30, %v5323_v13 }
 0x6f2   : > { %v5061_v33 = vrot.slane %v5060_v60, 1  ;;  %v5067_v46 = vmax.f32 %v5065_v6, %v5066_v8  ;;  %v5327_v37 = vmax.f32 %v5325_v9, %v5326_v24  ;;  %v5073_v27 = vrot.slane %v5072_v23, 2 }
 0x6f3   : > { %v5080_v59 = vrot.slane %v5079_v38, 2  ;;  %v4136_v0 = vmax.f32 %v4057_v58, 0.0  ;;  %v5555_v42 = vsel %vm5546_vm14, %v5324_v11, %v5554_v15  ;;  %v4108_v53 = vadd.f32 %v8226_v62, %v4107_v7 }
 0x6f4   : > { %v5062_v16 = vmax.f32 %v5060_v60, %v5061_v33  ;;  %v5068_v56 = vrot.slane %v5067_v46, 1  ;;  %v5556_v39 = vsel %vm5548_vm15, %v5327_v37, %v5555_v42  ;;  %v5074_v55 = vmax.f32 %v5072_v23, %v5073_v27 }
 0x6f5   : > { %v5081_v17 = vmax.f32 %v5079_v38, %v5080_v59  ;;  %v4216_v14 = vrot.slane %v4136_v0, 2  ;;  %5608 = vst.msk [vmem:[%s8168_s23 + $0x8] sm:$0xff] %vm225_vm0, %v5556_v39  ;;  %v4217_v51 = vrot.slane %v4136_v0, 4  ;;  %v4218_v29 = vrot.slane %v4136_v0, 6 }
 0x6f6   : > { %v5069_v30 = vmax.f32 %v5067_v46, %v5068_v56  ;;  %v4060_v49 = vadd.f32 %v8226_v62, %v4059_v54  ;;  %v5075_v44 = vrot.slane %v5074_v55, 1  ;;  %v4608_v35 = vsel %vm228_vm1, %v4136_v0, -inf }
 0x6f7   : > { %v5082_v48 = vrot.slane %v5081_v17, 1  ;;  %v4615_v40 = vsel %vm228_vm1, %v4216_v14, -inf  ;;  %v8400_v5 = vsel %vm225_vm0, %v5062_v16, -inf  ;;  %v4609_v52 = vrot.slane %v4608_v35, 4 }
 0x6f8   : > { %v4616_v1 = vrot.slane %v4615_v40, 4  ;;  %v4622_v41 = vsel %vm228_vm1, %v4217_v51, -inf  ;;  %v5076_v26 = vmax.f32 %v5074_v55, %v5075_v44  ;;  %v8404_v57 = vsel %vm225_vm0, %v5069_v30, -inf }
 0x6f9   : > { %v4623_v47 = vrot.slane %v4622_v41, 4  ;;  %v4629_v21 = vsel %vm228_vm1, %v4218_v29, -inf  ;;  %v4610_v19 = vmax.f32 %v4608_v35, %v4609_v52  ;;  %v4153_v3 = vmax.f32 %v4108_v53, 0.0 }
 0x6fa   : > { %v4617_v32 = vmax.f32 %v4615_v40, %v4616_v1  ;;  %v4630_v28 = vrot.slane %v4629_v21, 4  ;;  %v5083_v4 = vmax.f32 %v5081_v17, %v5082_v48  ;;  %v8408_v36 = vsel %vm225_vm0, %v5076_v26, -inf }
 0x6fb   : > { %v4624_v45 = vmax.f32 %v4622_v41, %v4623_v47  ;;  %v4137_v61 = vmax.f32 %v4060_v49, 0.0  ;;  %v4611_v63 = vrot.slane %v4610_v19, 2  ;;  %v4267_v2 = vrot.slane %v4153_v3, 2  ;;  %v4110_v55 = vpop.f32.mrf.mxu2 }
 0x6fc   : > { %v4618_v50 = vrot.slane %v4617_v32, 2  ;;  %v4631_v22 = vmax.f32 %v4629_v21, %v4630_v28  ;;  %v4268_v18 = vrot.slane %v4153_v3, 4  ;;  %v4269_v6 = vrot.slane %v4153_v3, 6 }
 0x6fd   : > { %v4625_v12 = vrot.slane %v4624_v45, 2  ;;  %v5084_v34 = vsel %vm228_vm1, %v4153_v3, -inf  ;;  %v4612_v31 = vmax.f32 %v4610_v19, %v4611_v63  ;;  %v5091_v15 = vsel %vm228_vm1, %v4267_v2, -inf }
 0x6fe   : > { %v4619_v20 = vmax.f32 %v4617_v32, %v4618_v50  ;;  %v4632_v10 = vrot.slane %v4631_v22, 2  ;;  %v5085_v25 = vrot.slane %v5084_v34, 4  ;;  %v5098_v60 = vsel %vm228_vm1, %v4268_v18, -inf }
 0x6ff   : > { %v4626_v43 = vmax.f32 %v4624_v45, %v4625_v12  ;;  %v5105_v8 = vsel %vm228_vm1, %v4269_v6, -inf  ;;  %v4613_v23 = vrot.slane %v4612_v31, 1  ;;  %v5092_v7 = vrot.slane %v5091_v15, 4 }
 0x700   : > { %v4620_v13 = vrot.slane %v4619_v20, 1  ;;  %v4633_v24 = vmax.f32 %v4631_v22, %v4632_v10  ;;  %v5086_v38 = vmax.f32 %v5084_v34, %v5085_v25  ;;  %v5099_v9 = vrot.slane %v5098_v60, 4 }
 0x701   : > { %v4627_v58 = vrot.slane %v4626_v43, 1  ;;  %v5106_v11 = vrot.slane %v5105_v8, 4  ;;  %v4614_v33 = vmax.f32 %v4612_v31, %v4613_v23  ;;  %v5093_v0 = vmax.f32 %v5091_v15, %v5092_v7 }
 0x702   : > { %v4621_v46 = vmax.f32 %v4619_v20, %v4620_v13  ;;  %v4634_v37 = vrot.slane %v4633_v24, 1  ;;  %v5087_v27 = vrot.slane %v5086_v38, 2  ;;  %v5100_v54 = vmax.f32 %v5098_v60, %v5099_v9 }
 0x703   : > { %v4628_v59 = vmax.f32 %v4626_v43, %v4627_v58  ;;  %v5107_v42 = vmax.f32 %v5105_v8, %v5106_v11  ;;  %v8415_v16 = vsel %vm225_vm0, %v5083_v4, -inf  ;;  %v8418_v53 = vsel %vm225_vm0, %v4614_v33, -inf  ;;  %v4062_v22 = vpop.f32.mrf.mxu1 }
 0x704   : > { %v4635_v56 = vmax.f32 %v4633_v24, %v4634_v37  ;;  %v5088_v39 = vmax.f32 %v5086_v38, %v5087_v27  ;;  %v8421_v17 = vsel %vm225_vm0, %v4621_v46, -inf  ;;  %v5094_v14 = vrot.slane %v5093_v0, 2 }
 0x705   : > { %v5101_v30 = vrot.slane %v5100_v54, 2  ;;  %v5108_v51 = vrot.slane %v5107_v42, 2  ;;  %v8424_v29 = vsel %vm225_vm0, %v4628_v59, -inf  ;;  %v4219_v44 = vrot.slane %v4137_v61, 2 }
 0x706   : > { %v5089_v49 = vrot.slane %v5088_v39, 1  ;;  %v4220_v48 = vrot.slane %v4137_v61, 4  ;;  %v5095_v35 = vmax.f32 %v5093_v0, %v5094_v14  ;;  %v4221_v1 = vrot.slane %v4137_v61, 6 }
 0x707   : > { %v5102_v40 = vmax.f32 %v5100_v54, %v5101_v30  ;;  %v5109_v52 = vmax.f32 %v5107_v42, %v5108_v51  ;;  %v4636_v26 = vsel %vm228_vm1, %v4137_v61, -inf  ;;  %v4643_v47 = vsel %vm228_vm1, %v4219_v44, -inf }
 0x708   : > { %v5090_v41 = vmax.f32 %v5088_v39, %v5089_v49  ;;  %v4650_v21 = vsel %vm228_vm1, %v4220_v48, -inf  ;;  %v5096_v19 = vrot.slane %v5095_v35, 1  ;;  %v4637_v3 = vrot.slane %v4636_v26, 4  ;;  %v4113_v10 = vpop.f32.mrf.mxu2 }
 0x709   : > { %v5103_v32 = vrot.slane %v5102_v40, 1  ;;  %v5110_v28 = vrot.slane %v5109_v52, 1  ;;  %v8430_v4 = vsel %vm225_vm0, %v4635_v56, -inf  ;;  %v4644_v45 = vrot.slane %v4643_v47, 4 }
 0x70a   : > { %v4651_v63 = vrot.slane %v4650_v21, 4  ;;  %v4657_v50 = vsel %vm228_vm1, %v4221_v1, -inf  ;;  %v5097_v2 = vmax.f32 %v5095_v35, %v5096_v19  ;;  %v4638_v61 = vmax.f32 %v4636_v26, %v4637_v3 }
 0x70b   : > { %v5104_v12 = vmax.f32 %v5102_v40, %v5103_v32  ;;  %v5111_v18 = vmax.f32 %v5109_v52, %v5110_v28  ;;  %v4645_v6 = vmax.f32 %v4643_v47, %v4644_v45  ;;  %v4658_v31 = vrot.slane %v4657_v50, 4 }
 0x70c   : > { %v4652_v34 = vmax.f32 %v4650_v21, %v4651_v63  ;;  %v4111_v20 = vadd.f32 %v8226_v62, %v4110_v55  ;;  %v8435_v25 = vsel %vm225_vm0, %v5090_v41, -inf  ;;  %v8438_v43 = vsel %vm225_vm0, %v5097_v2, -inf  ;;  %v4065_v14 = vpop.f32.mrf.mxu1 }
 0x70d   : > { %v8441_v15 = vsel %vm225_vm0, %v5104_v12, -inf  ;;  %v4639_v60 = vrot.slane %v4638_v61, 2  ;;  %v4646_v8 = vrot.slane %v4645_v6, 2  ;;  %v4659_v13 = vmax.f32 %v4657_v50, %v4658_v31 }
 0x70e   : > { %v4653_v23 = vrot.slane %v4652_v34, 2  ;;  %v4154_v24 = vmax.f32 %v4111_v20, 0.0  ;;  %v8444_v38 = vsel %vm225_vm0, %v5111_v18, -inf  ;;  %v4063_v7 = vadd.f32 %v8226_v62, %v4062_v22 }
 0x70f   : > { %v4640_v58 = vmax.f32 %v4638_v61, %v4639_v60  ;;  %v4114_v9 = vadd.f32 %v8226_v62, %v4113_v10  ;;  %v4647_v11 = vmax.f32 %v4645_v6, %v4646_v8  ;;  %v4660_v46 = vrot.slane %v4659_v13, 2 }
 0x710   : > { %v4654_v33 = vmax.f32 %v4652_v34, %v4653_v23  ;;  %v4270_v37 = vrot.slane %v4154_v24, 2  ;;  %v4271_v59 = vrot.slane %v4154_v24, 4  ;;  %v4272_v0 = vrot.slane %v4154_v24, 6 }
 0x711   : > { %v4641_v27 = vrot.slane %v4640_v58, 1  ;;  %v5112_v54 = vsel %vm228_vm1, %v4154_v24, -inf  ;;  %v4648_v42 = vrot.slane %v4647_v11, 1  ;;  %v4661_v39 = vmax.f32 %v4659_v13, %v4660_v46 }
 0x712   : > { %v4655_v56 = vrot.slane %v4654_v33, 1  ;;  %v5113_v55 = vrot.slane %v5112_v54, 4  ;;  %v5119_v51 = vsel %vm228_vm1, %v4270_v37, -inf  ;;  %v5126_v49 = vsel %vm228_vm1, %v4271_v59, -inf }
 0x713   : > { %v4642_v30 = vmax.f32 %v4640_v58, %v4641_v27  ;;  %v5133_v44 = vsel %vm228_vm1, %v4272_v0, -inf  ;;  %v4649_v48 = vmax.f32 %v4647_v11, %v4648_v42  ;;  %v4662_v40 = vrot.slane %v4661_v39, 1 }
 0x714   : > { %v4656_v35 = vmax.f32 %v4654_v33, %v4655_v56  ;;  %v5114_v52 = vmax.f32 %v5112_v54, %v5113_v55  ;;  %v5120_v1 = vrot.slane %v5119_v51, 4  ;;  %v5127_v41 = vrot.slane %v5126_v49, 4 }
 0x715   : > { %v5134_v26 = vrot.slane %v5133_v44, 4  ;;  %v4066_v47 = vadd.f32 %v8226_v62, %v4065_v14  ;;  %v4663_v21 = vmax.f32 %v4661_v39, %v4662_v40  ;;  %v8454_v19 = vsel %vm225_vm0, %v4642_v30, -inf }
 0x716   : > { %v8457_v32 = vsel %vm225_vm0, %v4649_v48, -inf  ;;  %v5115_v28 = vrot.slane %v5114_v52, 2  ;;  %v5121_v3 = vmax.f32 %v5119_v51, %v5120_v1  ;;  %v5128_v45 = vmax.f32 %v5126_v49, %v5127_v41 }
 0x717   : > { %v5135_v63 = vmax.f32 %v5133_v44, %v5134_v26  ;;  %v4138_v50 = vmax.f32 %v4063_v7, 0.0  ;;  %v8460_v22 = vsel %vm225_vm0, %v4656_v35, -inf  ;;  %v8463_v2 = vsel %vm225_vm0, %v4663_v21, -inf }
 0x718   : > { %v5116_v12 = vmax.f32 %v5114_v52, %v5115_v28  ;;  %v8465_v62 = vmax.f32 %v4114_v9, 0.0  ;;  %v5122_v18 = vrot.slane %v5121_v3, 2  ;;  %v5129_v61 = vrot.slane %v5128_v45, 2 }
 0x719   : > { %v5136_v6 = vrot.slane %v5135_v63, 2  ;;  %v4222_v34 = vrot.slane %v4138_v50, 2  ;;  %v4223_v20 = vrot.slane %v4138_v50, 4  ;;  %v4224_v10 = vrot.slane %v4138_v50, 6 }
 0x71a   : > { %v5117_v31 = vrot.slane %v5116_v12, 1  ;;  %v4664_v60 = vsel %vm228_vm1, %v4138_v50, -inf  ;;  %v5123_v8 = vmax.f32 %v5121_v3, %v5122_v18  ;;  %v5130_v23 = vmax.f32 %v5128_v45, %v5129_v61 }
 0x71b   : > { %v5137_v13 = vmax.f32 %v5135_v63, %v5136_v6  ;;  %v4665_v24 = vrot.slane %v4664_v60, 4  ;;  %v4671_v7 = vsel %vm228_vm1, %v4222_v34, -inf  ;;  %v4678_v11 = vsel %vm228_vm1, %v4223_v20, -inf }
 0x71c   : > { %v5118_v58 = vmax.f32 %v5116_v12, %v5117_v31  ;;  %v4685_v9 = vsel %vm228_vm1, %v4224_v10, -inf  ;;  %v5124_v33 = vrot.slane %v5123_v8, 1  ;;  %v5131_v46 = vrot.slane %v5130_v23, 1 }
 0x71d   : > { %v5138_v37 = vrot.slane %v5137_v13, 1  ;;  %v4666_v27 = vmax.f32 %v4664_v60, %v4665_v24  ;;  %v4672_v0 = vrot.slane %v4671_v7, 4  ;;  %v4679_v54 = vrot.slane %v4678_v11, 4 }
 0x71e   : > { %v5425_v59 = vsel %vm225_vm0, %v5118_v58, -inf  ;;  %v4686_v42 = vrot.slane %v4685_v9, 4  ;;  %v5125_v56 = vmax.f32 %v5123_v8, %v5124_v33  ;;  %v5132_v39 = vmax.f32 %v5130_v23, %v5131_v46 }
 0x71f   : > { %v5139_v55 = vmax.f32 %v5137_v13, %v5138_v37  ;;  %v8472_v14 = vmax.f32 %v4066_v47, 0.0  ;;  %v4667_v30 = vrot.slane %v4666_v27, 2  ;;  %v4673_v51 = vmax.f32 %v4671_v7, %v4672_v0 }
 0x720   : > { %v4680_v49 = vmax.f32 %v4678_v11, %v4679_v54  ;;  %v4687_v44 = vmax.f32 %v4685_v9, %v4686_v42  ;;  %v5426_v48 = vmax.f32 %v8400_v5, %v5425_v59  ;;  %v5428_v35 = vsel %vm225_vm0, %v5125_v56, -inf }
 0x721   : > { %v5431_v40 = vsel %vm225_vm0, %v5132_v39, -inf  ;;  %v5434_v52 = vsel %vm225_vm0, %v5139_v55, -inf  ;;  %v5429_v1 = vmax.f32 %v8404_v57, %v5428_v35  ;;  %v4668_v26 = vmax.f32 %v4666_v27, %v4667_v30 }
 0x722   : > { %v5432_v41 = vmax.f32 %v8408_v36, %v5431_v40  ;;  %v4273_v47 = vrot.slane %v8465_v62, 2  ;;  %v4674_v21 = vrot.slane %v4673_v51, 2  ;;  %v4681_v28 = vrot.slane %v4680_v49, 2 }
 0x723   : > { %v4688_v3 = vrot.slane %v4687_v44, 2  ;;  %v4274_v45 = vrot.slane %v8465_v62, 4  ;;  %v5585_v5 = vsel %vm5536_vm9, %v5429_v1, %v5426_v48  ;;  %v4669_v63 = vrot.slane %v4668_v26, 1 }
 0x724   : > { %v4275_v50 = vrot.slane %v8465_v62, 6  ;;  %v5140_v12 = vsel %vm228_vm1, %v8465_v62, -inf  ;;  %v5435_v57 = vmax.f32 %v8415_v16, %v5434_v52  ;;  %v4675_v18 = vmax.f32 %v4673_v51, %v4674_v21 }
 0x725   : > { %v4682_v36 = vmax.f32 %v4680_v49, %v4681_v28  ;;  %v4689_v61 = vmax.f32 %v4687_v44, %v4688_v3  ;;  %v5586_v6 = vsel %vm5538_vm10, %v5432_v41, %v5585_v5  ;;  %v4670_v34 = vmax.f32 %v4668_v26, %v4669_v63 }
 0x726   : > { %v5141_v31 = vrot.slane %v5140_v12, 4  ;;  %v5147_v20 = vsel %vm228_vm1, %v4273_v47, -inf  ;;  %v4676_v10 = vrot.slane %v4675_v18, 1  ;;  %v5154_v62 = vsel %vm228_vm1, %v4274_v45, -inf }
 0x727   : > { %v4683_v60 = vrot.slane %v4682_v36, 1  ;;  %v4690_v8 = vrot.slane %v4689_v61, 1  ;;  %v5148_v23 = vrot.slane %v5147_v20, 4  ;;  %v5329_v13 = vsel %vm225_vm0, %v4670_v34, -inf }
 0x728   : > { %v5142_v24 = vmax.f32 %v5140_v12, %v5141_v31  ;;  %v5161_v16 = vsel %vm228_vm1, %v4275_v50, -inf  ;;  %v5587_v58 = vsel %vm5540_vm11, %v5435_v57, %v5586_v6  ;;  %v4677_v7 = vmax.f32 %v4675_v18, %v4676_v10  ;;  %v4116_v10 = vpop.f32.mrf.mxu2 }
 0x729   : > { %v4684_v11 = vmax.f32 %v4682_v36, %v4683_v60  ;;  %v4691_v9 = vmax.f32 %v4689_v61, %v4690_v8  ;;  %v5149_v46 = vmax.f32 %v5147_v20, %v5148_v23  ;;  %v5155_v37 = vrot.slane %v5154_v62, 4 }
 0x72a   : > { %v5143_v33 = vrot.slane %v5142_v24, 2  ;;  %v5162_v27 = vrot.slane %v5161_v16, 4  ;;  %v5330_v59 = vmax.f32 %v8418_v53, %v5329_v13  ;;  %v5332_v0 = vsel %vm225_vm0, %v4677_v7, -inf }
 0x72b   : > { %v5335_v54 = vsel %vm225_vm0, %v4684_v11, -inf  ;;  %v5338_v42 = vsel %vm225_vm0, %v4691_v9, -inf  ;;  %v5333_v56 = vmax.f32 %v8421_v17, %v5332_v0  ;;  %v4225_v30 = vrot.slane %v8472_v14, 2 }
 0x72c   : > { %v5336_v39 = vmax.f32 %v8424_v29, %v5335_v54  ;;  %v5144_v55 = vmax.f32 %v5142_v24, %v5143_v33  ;;  %v5150_v51 = vrot.slane %v5149_v46, 2  ;;  %v5156_v49 = vmax.f32 %v5154_v62, %v5155_v37  ;;  %v8520_v33 = vld [vmem:[%s8705_s4] ss:$0 sm:$0xff]  ;;  %v4068_v37 = vpop.f32.mrf.mxu1 }
 0x72d   : > { %v5163_v44 = vmax.f32 %v5161_v16, %v5162_v27  ;;  %v4226_v48 = vrot.slane %v8472_v14, 4  ;;  %v5557_v53 = vsel %vm5536_vm9, %v5333_v56, %v5330_v59  ;;  %v4227_v40 = vrot.slane %v8472_v14, 6 }
 0x72e   : > { %v5145_v35 = vrot.slane %v5144_v55, 1  ;;  %v4692_v52 = vsel %vm228_vm1, %v8472_v14, -inf  ;;  %v5339_v17 = vmax.f32 %v8430_v4, %v5338_v42  ;;  %v5151_v1 = vmax.f32 %v5149_v46, %v5150_v51 }
 0x72f   : > { %v5157_v29 = vrot.slane %v5156_v49, 2  ;;  %v5164_v41 = vrot.slane %v5163_v44, 2  ;;  %v5558_v26 = vsel %vm5538_vm10, %v5336_v39, %v5557_v53  ;;  %v4693_v21 = vrot.slane %v4692_v52, 4 }
 0x730   : > { %v5146_v47 = vmax.f32 %v5144_v55, %v5145_v35  ;;  %v4699_v28 = vsel %vm228_vm1, %v4225_v30, -inf  ;;  %v5152_v3 = vrot.slane %v5151_v1, 1  ;;  %v4706_v14 = vsel %vm228_vm1, %v4226_v48, -inf }
 0x731   : > { %v5158_v45 = vmax.f32 %v5156_v49, %v5157_v29  ;;  %v5165_v5 = vmax.f32 %v5163_v44, %v5164_v41  ;;  %v4700_v63 = vrot.slane %v4699_v28, 4  ;;  %v4694_v12 = vmax.f32 %v4692_v52, %v4693_v21 }
 0x732   : > { %v5437_v50 = vsel %vm225_vm0, %v5146_v47, -inf  ;;  %v4713_v4 = vsel %vm228_vm1, %v4227_v40, -inf  ;;  %v5153_v57 = vmax.f32 %v5151_v1, %v5152_v3  ;;  %v4707_v31 = vrot.slane %v4706_v14, 4 }
 0x733   : > { %v5159_v18 = vrot.slane %v5158_v45, 1  ;;  %v5166_v36 = vrot.slane %v5165_v5, 1  ;;  %v5438_v61 = vmax.f32 %v8435_v25, %v5437_v50  ;;  %v4695_v6 = vrot.slane %v4694_v12, 2 }
 0x734   : > { %v4701_v34 = vmax.f32 %v4699_v28, %v4700_v63  ;;  %v4714_v20 = vrot.slane %v4713_v4, 4  ;;  %v5440_v23 = vsel %vm225_vm0, %v5153_v57, -inf  ;;  %v4708_v7 = vmax.f32 %v4706_v14, %v4707_v31 }
 0x735   : > { %v5160_v60 = vmax.f32 %v5158_v45, %v5159_v18  ;;  %v5167_v8 = vmax.f32 %v5165_v5, %v5166_v36  ;;  %v5588_v13 = vsel %vm5542_vm12, %v5438_v61, %v5587_v58  ;;  %v5441_v24 = vmax.f32 %v8438_v43, %v5440_v23 }
 0x736   : > { %v4696_v62 = vmax.f32 %v4694_v12, %v4695_v6  ;;  %v4702_v16 = vrot.slane %v4701_v34, 2  ;;  %v4715_v9 = vmax.f32 %v4713_v4, %v4714_v20  ;;  %v4117_v46 = vadd.f32 %v8520_v33, %v4116_v10 }
 0x737   : > { %v5443_v11 = vsel %vm225_vm0, %v5160_v60, -inf  ;;  %v5446_v25 = vsel %vm225_vm0, %v5167_v8, -inf  ;;  %v5589_v27 = vsel %vm5544_vm13, %v5441_v24, %v5588_v13  ;;  %v4709_v54 = vrot.slane %v4708_v7, 2 }
 0x738   : > { %v5444_v58 = vmax.f32 %v8441_v15, %v5443_v11  ;;  %v5447_v43 = vmax.f32 %v8444_v38, %v5446_v25  ;;  %v4697_v59 = vrot.slane %v4696_v62, 1  ;;  %v4703_v0 = vmax.f32 %v4701_v34, %v4702_v16 }
 0x739   : > { %v4716_v42 = vrot.slane %v4715_v9, 2  ;;  %v4156_v56 = vmax.f32 %v4117_v46, 0.0  ;;  %v5559_v39 = vsel %vm5540_vm11, %v5339_v17, %v5558_v26  ;;  %v4069_v51 = vadd.f32 %v8520_v33, %v4068_v37 }
 0x73a   : > { %v5590_v55 = vsel %vm5546_vm14, %v5444_v58, %v5589_v27  ;;  %v4698_v30 = vmax.f32 %v4696_v62, %v4697_v59  ;;  %v4704_v15 = vrot.slane %v4703_v0, 1  ;;  %v4710_v44 = vmax.f32 %v4708_v7, %v4709_v54  ;;  %v4119_v58 = vpop.f32.mrf.mxu2 }
 0x73b   : > { %v5591_v49 = vsel %vm5548_vm15, %v5447_v43, %v5590_v55  ;;  %v4717_v48 = vmax.f32 %v4715_v9, %v4716_v42  ;;  %v4276_v53 = vrot.slane %v4156_v56, 2  ;;  %v4277_v35 = vrot.slane %v4156_v56, 4 }
 0x73c   : > { %5613 = vst.msk [vmem:[%s8168_s23 + $0x30] sm:$0xff] %vm225_vm0, %v5591_v49  ;;  %v5341_v38 = vsel %vm225_vm0, %v4698_v30, -inf  ;;  %v4278_v40 = vrot.slane %v4156_v56, 6  ;;  %v4705_v52 = vmax.f32 %v4703_v0, %v4704_v15  ;;  %v4711_v1 = vrot.slane %v4710_v44, 1 }
 0x73d   : > { %v4718_v17 = vrot.slane %v4717_v48, 1  ;;  %v5342_v29 = vmax.f32 %v8454_v19, %v5341_v38  ;;  %v5168_v41 = vsel %vm228_vm1, %v4156_v56, -inf  ;;  %v5175_v26 = vsel %vm228_vm1, %v4276_v53, -inf }
 0x73e   : > { %v5182_v47 = vsel %vm228_vm1, %v4277_v35, -inf  ;;  %v5189_v21 = vsel %vm228_vm1, %v4278_v40, -inf  ;;  %v4712_v28 = vmax.f32 %v4710_v44, %v4711_v1  ;;  %v5344_v45 = vsel %vm225_vm0, %v4705_v52, -inf  ;;  %v4071_v1 = vpop.f32.mrf.mxu1 }
 0x73f   : > { %v4719_v3 = vmax.f32 %v4717_v48, %v4718_v17  ;;  %v5560_v5 = vsel %vm5542_vm12, %v5342_v29, %v5559_v39  ;;  %v5345_v63 = vmax.f32 %v8457_v32, %v5344_v45  ;;  %v5169_v50 = vrot.slane %v5168_v41, 4 }
 0x740   : > { %v5176_v12 = vrot.slane %v5175_v26, 4  ;;  %v5183_v14 = vrot.slane %v5182_v47, 4  ;;  %v5347_v19 = vsel %vm225_vm0, %v4712_v28, -inf  ;;  %v5190_v57 = vrot.slane %v5189_v21, 4 }
 0x741   : > { %v5350_v4 = vsel %vm225_vm0, %v4719_v3, -inf  ;;  %v4140_v18 = vmax.f32 %v4069_v51, 0.0  ;;  %v5348_v36 = vmax.f32 %v8460_v22, %v5347_v19  ;;  %v5561_v6 = vsel %vm5544_vm13, %v5345_v63, %v5560_v5 }
 0x742   : > { %v5351_v61 = vmax.f32 %v8463_v2, %v5350_v4  ;;  %v5170_v34 = vmax.f32 %v5168_v41, %v5169_v50  ;;  %v5177_v31 = vmax.f32 %v5175_v26, %v5176_v12  ;;  %v5184_v20 = vmax.f32 %v5182_v47, %v5183_v14  ;;  %v4122_v63 = vpop.f32.mrf.mxu2 }
 0x743   : > { %v5191_v32 = vmax.f32 %v5189_v21, %v5190_v57  ;;  %v4228_v10 = vrot.slane %v4140_v18, 2  ;;  %v5562_v60 = vsel %vm5546_vm14, %v5348_v36, %v5561_v6  ;;  %v4229_v23 = vrot.slane %v4140_v18, 4 }
 0x744   : > { %v5171_v8 = vrot.slane %v5170_v34, 2  ;;  %v4230_v13 = vrot.slane %v4140_v18, 6  ;;  %v5563_v24 = vsel %vm5548_vm15, %v5351_v61, %v5562_v60  ;;  %v5178_v62 = vrot.slane %v5177_v31, 2 }
 0x745   : > { %v5185_v16 = vrot.slane %v5184_v20, 2  ;;  %v5192_v22 = vrot.slane %v5191_v32, 2  ;;  %5609 = vst.msk [vmem:[%s8168_s23 + $0x10] sm:$0xff] %vm225_vm0, %v5563_v24  ;;  %v4720_v2 = vsel %vm228_vm1, %v4140_v18, -inf  ;;  %v4727_v7 = vsel %vm228_vm1, %v4228_v10, -inf }
 0x746   : > { %v4734_v11 = vsel %vm228_vm1, %v4229_v23, -inf  ;;  %v5172_v25 = vmax.f32 %v5170_v34, %v5171_v8  ;;  %v5179_v9 = vmax.f32 %v5177_v31, %v5178_v62  ;;  %v4721_v37 = vrot.slane %v4720_v2, 4 }
 0x747   : > { %v5186_v46 = vmax.f32 %v5184_v20, %v5185_v16  ;;  %v5193_v43 = vmax.f32 %v5191_v32, %v5192_v22  ;;  %v4728_v27 = vrot.slane %v4727_v7, 4  ;;  %v4735_v59 = vrot.slane %v4734_v11, 4 }
 0x748   : > { %v4741_v0 = vsel %vm228_vm1, %v4230_v13, -inf  ;;  %v4722_v54 = vmax.f32 %v4720_v2, %v4721_v37  ;;  %v4120_v55 = vadd.f32 %v8520_v33, %v4119_v58  ;;  %v5173_v30 = vrot.slane %v5172_v25, 1 }
 0x749   : > { %v4729_v42 = vmax.f32 %v4727_v7, %v4728_v27  ;;  %v4736_v56 = vmax.f32 %v4734_v11, %v4735_v59  ;;  %v4742_v39 = vrot.slane %v4741_v0, 4  ;;  %v5180_v51 = vrot.slane %v5179_v9, 1 }
 0x74a   : > { %v4723_v49 = vrot.slane %v4722_v54, 2  ;;  %v5187_v15 = vrot.slane %v5186_v46, 1  ;;  %v5194_v44 = vrot.slane %v5193_v43, 1  ;;  %v4157_v52 = vmax.f32 %v4120_v55, 0.0 }
 0x74b   : > { %v4730_v48 = vrot.slane %v4729_v42, 2  ;;  %v4743_v38 = vmax.f32 %v4741_v0, %v4742_v39  ;;  %v4737_v35 = vrot.slane %v4736_v56, 2  ;;  %v5174_v17 = vmax.f32 %v5172_v25, %v5173_v30 }
 0x74c   : > { %v4724_v53 = vmax.f32 %v4722_v54, %v4723_v49  ;;  %v5181_v29 = vmax.f32 %v5179_v9, %v5180_v51  ;;  %v5188_v41 = vmax.f32 %v5186_v46, %v5187_v15  ;;  %v5195_v26 = vmax.f32 %v5193_v43, %v5194_v44 }
 0x74d   : > { %v4744_v40 = vrot.slane %v4743_v38, 2  ;;  %v4731_v47 = vmax.f32 %v4729_v42, %v4730_v48  ;;  %v4279_v21 = vrot.slane %v4157_v52, 2  ;;  %v4280_v28 = vrot.slane %v4157_v52, 4  ;;  %v4074_v42 = vpop.f32.mrf.mxu1 }
 0x74e   : > { %v4281_v3 = vrot.slane %v4157_v52, 6  ;;  %v5196_v45 = vsel %vm228_vm1, %v4157_v52, -inf  ;;  %v4072_v5 = vadd.f32 %v8520_v33, %v4071_v1  ;;  %v4725_v50 = vrot.slane %v4724_v53, 1 }
 0x74f   : > { %v4738_v12 = vmax.f32 %v4736_v56, %v4737_v35  ;;  %v4745_v14 = vmax.f32 %v4743_v38, %v4744_v40  ;;  %v5197_v19 = vrot.slane %v5196_v45, 4  ;;  %v8558_v4 = vsel %vm225_vm0, %v5174_v17, -inf }
 0x750   : > { %v5203_v57 = vsel %vm228_vm1, %v4279_v21, -inf  ;;  %v5210_v18 = vsel %vm228_vm1, %v4280_v28, -inf  ;;  %v5217_v36 = vsel %vm228_vm1, %v4281_v3, -inf  ;;  %v8564_v61 = vsel %vm225_vm0, %v5181_v29, -inf }
 0x751   : > { %v4732_v6 = vrot.slane %v4731_v47, 1  ;;  %v5198_v34 = vmax.f32 %v5196_v45, %v5197_v19  ;;  %v4123_v31 = vadd.f32 %v8520_v33, %v4122_v63  ;;  %v5204_v20 = vrot.slane %v5203_v57, 4 }
 0x752   : > { %v5211_v32 = vrot.slane %v5210_v18, 4  ;;  %v5218_v10 = vrot.slane %v5217_v36, 4  ;;  %v4141_v60 = vmax.f32 %v4072_v5, 0.0  ;;  %v4726_v8 = vmax.f32 %v4724_v53, %v4725_v50 }
 0x753   : > { %v4739_v23 = vrot.slane %v4738_v12, 1  ;;  %v4746_v13 = vrot.slane %v4745_v14, 1  ;;  %v5199_v24 = vrot.slane %v5198_v34, 2  ;;  %v5205_v62 = vmax.f32 %v5203_v57, %v5204_v20 }
 0x754   : > { %v5212_v16 = vmax.f32 %v5210_v18, %v5211_v32  ;;  %v5219_v22 = vmax.f32 %v5217_v36, %v5218_v10  ;;  %v4231_v2 = vrot.slane %v4141_v60, 2  ;;  %v4232_v11 = vrot.slane %v4141_v60, 4 }
 0x755   : > { %v5200_v7 = vmax.f32 %v5198_v34, %v5199_v24  ;;  %v4233_v25 = vrot.slane %v4141_v60, 6  ;;  %v4748_v9 = vsel %vm228_vm1, %v4141_v60, -inf  ;;  %v5206_v46 = vrot.slane %v5205_v62, 2 }
 0x756   : > { %v5213_v37 = vrot.slane %v5212_v16, 2  ;;  %v5220_v58 = vrot.slane %v5219_v22, 2  ;;  %v4749_v43 = vrot.slane %v4748_v9, 4  ;;  %v4733_v27 = vmax.f32 %v4731_v47, %v4732_v6 }
 0x757   : > { %v4755_v59 = vsel %vm228_vm1, %v4231_v2, -inf  ;;  %v4762_v0 = vsel %vm228_vm1, %v4232_v11, -inf  ;;  %v4769_v54 = vsel %vm228_vm1, %v4233_v25, -inf  ;;  %v5201_v56 = vrot.slane %v5200_v7, 1 }
 0x758   : > { %v5207_v39 = vmax.f32 %v5205_v62, %v5206_v46  ;;  %v5214_v55 = vmax.f32 %v5212_v16, %v5213_v37  ;;  %v5221_v30 = vmax.f32 %v5219_v22, %v5220_v58  ;;  %v4750_v51 = vmax.f32 %v4748_v9, %v4749_v43 }
 0x759   : > { %v4756_v49 = vrot.slane %v4755_v59, 4  ;;  %v4763_v15 = vrot.slane %v4762_v0, 4  ;;  %v4158_v44 = vmax.f32 %v4123_v31, 0.0  ;;  %v4740_v48 = vmax.f32 %v4738_v12, %v4739_v23 }
 0x75a   : > { %v4747_v38 = vmax.f32 %v4745_v14, %v4746_v13  ;;  %v4770_v53 = vrot.slane %v4769_v54, 4  ;;  %v4075_v35 = vadd.f32 %v8520_v33, %v4074_v42  ;;  %v8573_v40 = vsel %vm225_vm0, %v5188_v41, -inf }
 0x75b   : > { %v5208_v52 = vrot.slane %v5207_v39, 1  ;;  %v5215_v1 = vrot.slane %v5214_v55, 1  ;;  %v5222_v17 = vrot.slane %v5221_v30, 1  ;;  %v8576_v29 = vsel %vm225_vm0, %v5195_v26, -inf }
 0x75c   : > { %v8579_v47 = vsel %vm225_vm0, %v4726_v8, -inf  ;;  %v8582_v21 = vsel %vm225_vm0, %v4733_v27, -inf  ;;  %v5202_v28 = vmax.f32 %v5200_v7, %v5201_v56  ;;  %v4751_v3 = vrot.slane %v4750_v51, 2 }
 0x75d   : > { %v4757_v45 = vmax.f32 %v4755_v59, %v4756_v49  ;;  %v4764_v5 = vmax.f32 %v4762_v0, %v4763_v15  ;;  %v4282_v63 = vrot.slane %v4158_v44, 2  ;;  %v8585_v41 = vsel %vm225_vm0, %v4740_v48, -inf }
 0x75e   : > { %v8588_v50 = vsel %vm225_vm0, %v4747_v38, -inf  ;;  %v4771_v12 = vmax.f32 %v4769_v54, %v4770_v53  ;;  %v4142_v26 = vmax.f32 %v4075_v35, 0.0  ;;  %v5209_v14 = vmax.f32 %v5207_v39, %v5208_v52 }
 0x75f   : > { %v5216_v19 = vmax.f32 %v5214_v55, %v5215_v1  ;;  %v5223_v57 = vmax.f32 %v5221_v30, %v5222_v17  ;;  %v4283_v18 = vrot.slane %v4158_v44, 4  ;;  %v8591_v36 = vsel %vm225_vm0, %v5202_v28, -inf }
 0x760   : > { %v4284_v6 = vrot.slane %v4158_v44, 6  ;;  %v5224_v34 = vsel %vm228_vm1, %v4158_v44, -inf  ;;  %v5231_v31 = vsel %vm228_vm1, %v4282_v63, -inf  ;;  %v4752_v20 = vmax.f32 %v4750_v51, %v4751_v3 }
 0x761   : > { %v4758_v32 = vrot.slane %v4757_v45, 2  ;;  %v4765_v10 = vrot.slane %v4764_v5, 2  ;;  %v5225_v60 = vrot.slane %v5224_v34, 4  ;;  %v4772_v8 = vrot.slane %v4771_v12, 2 }
 0x762   : > { %v5232_v23 = vrot.slane %v5231_v31, 4  ;;  %v5238_v13 = vsel %vm228_vm1, %v4283_v18, -inf  ;;  %v5245_v24 = vsel %vm228_vm1, %v4284_v6, -inf  ;;  %v8598_v62 = vsel %vm225_vm0, %v5209_v14, -inf }
 0x763   : > { %v8601_v16 = vsel %vm225_vm0, %v5216_v19, -inf  ;;  %v8604_v22 = vsel %vm225_vm0, %v5223_v57, -inf  ;;  %v5226_v2 = vmax.f32 %v5224_v34, %v5225_v60  ;;  %v5239_v11 = vrot.slane %v5238_v13, 4 }
 0x764   : > { %v5233_v7 = vmax.f32 %v5231_v31, %v5232_v23  ;;  %v5246_v25 = vrot.slane %v5245_v24, 4  ;;  %v4234_v9 = vrot.slane %v4142_v26, 2  ;;  %v4753_v46 = vrot.slane %v4752_v20, 1  ;;  %v4125_v31 = vpop.f32.mrf.mxu2 }
 0x765   : > { %v8606_v37 = vmax.f32 %v4757_v45, %v4758_v32  ;;  %v8608_v58 = vmax.f32 %v4764_v5, %v4765_v10  ;;  %v5227_v43 = vrot.slane %v5226_v2, 2  ;;  %v5240_v59 = vmax.f32 %v5238_v13, %v5239_v11 }
 0x766   : > { %v5234_v27 = vrot.slane %v5233_v7, 2  ;;  %v5247_v0 = vmax.f32 %v5245_v24, %v5246_v25  ;;  %v4235_v54 = vrot.slane %v4142_v26, 4  ;;  %v4236_v56 = vrot.slane %v4142_v26, 6 }
 0x767   : > { %v5228_v42 = vmax.f32 %v5226_v2, %v5227_v43  ;;  %v4776_v39 = vsel %vm228_vm1, %v4142_v26, -inf  ;;  %v4783_v55 = vsel %vm228_vm1, %v4234_v9, -inf  ;;  %v5241_v51 = vrot.slane %v5240_v59, 2 }
 0x768   : > { %v5235_v30 = vmax.f32 %v5233_v7, %v5234_v27  ;;  %v5248_v49 = vrot.slane %v5247_v0, 2  ;;  %v4777_v15 = vrot.slane %v4776_v39, 4  ;;  %v4784_v48 = vrot.slane %v4783_v55, 4 }
 0x769   : > { %v5229_v44 = vrot.slane %v5228_v42, 1  ;;  %v4790_v38 = vsel %vm228_vm1, %v4235_v54, -inf  ;;  %v4797_v53 = vsel %vm228_vm1, %v4236_v56, -inf  ;;  %v5242_v52 = vmax.f32 %v5240_v59, %v5241_v51 }
 0x76a   : > { %v5236_v35 = vrot.slane %v5235_v30, 1  ;;  %v5249_v1 = vmax.f32 %v5247_v0, %v5248_v49  ;;  %v4778_v17 = vmax.f32 %v4776_v39, %v4777_v15  ;;  %v4785_v3 = vmax.f32 %v4783_v55, %v4784_v48  ;;  %v4077_v55 = vpop.f32.mrf.mxu1 }
 0x76b   : > { %v5230_v28 = vmax.f32 %v5228_v42, %v5229_v44  ;;  %v4791_v45 = vrot.slane %v4790_v38, 4  ;;  %v4798_v5 = vrot.slane %v4797_v53, 4  ;;  %v5243_v26 = vrot.slane %v5242_v52, 1 }
 0x76c   : > { %v5237_v63 = vmax.f32 %v5235_v30, %v5236_v35  ;;  %v5250_v14 = vrot.slane %v5249_v1, 1  ;;  %v4779_v19 = vrot.slane %v4778_v17, 2  ;;  %v8614_v57 = vmax.f32 %v4771_v12, %v4772_v8 }
 0x76d   : > { %v4786_v18 = vrot.slane %v4785_v3, 2  ;;  %v4792_v6 = vmax.f32 %v4790_v38, %v4791_v45  ;;  %v4799_v34 = vmax.f32 %v4797_v53, %v4798_v5  ;;  %v4754_v32 = vmax.f32 %v4752_v20, %v4753_v46 }
 0x76e   : > { %v5244_v10 = vmax.f32 %v5242_v52, %v5243_v26  ;;  %v5449_v60 = vsel %vm225_vm0, %v5230_v28, -inf  ;;  %v5452_v23 = vsel %vm225_vm0, %v5237_v63, -inf  ;;  %v4780_v24 = vmax.f32 %v4778_v17, %v4779_v19 }
 0x76f   : > { %v5453_v13 = vmax.f32 %v8564_v61, %v5452_v23  ;;  %v4787_v2 = vmax.f32 %v4785_v3, %v4786_v18  ;;  %v4793_v7 = vrot.slane %v4792_v6, 2  ;;  %v5251_v11 = vmax.f32 %v5249_v1, %v5250_v14 }
 0x770   : > { %v5455_v25 = vsel %vm225_vm0, %v5244_v10, -inf  ;;  %v4800_v12 = vrot.slane %v4799_v34, 2  ;;  %v4126_v8 = vadd.f32 %v8520_v33, %v4125_v31  ;;  %v4760_v9 = vrot.slane %v8606_v37, 1 }
 0x771   : > { %v5450_v20 = vmax.f32 %v8558_v4, %v5449_v60  ;;  %v5456_v46 = vmax.f32 %v8573_v40, %v5455_v25  ;;  %v4781_v43 = vrot.slane %v4780_v24, 1  ;;  %v4788_v27 = vrot.slane %v4787_v2, 1 }
 0x772   : > { %v4794_v59 = vmax.f32 %v4792_v6, %v4793_v7  ;;  %v4801_v0 = vmax.f32 %v4799_v34, %v4800_v12  ;;  %v4159_v61 = vmax.f32 %v4126_v8, 0.0  ;;  %v4767_v54 = vrot.slane %v8608_v58, 1 }
 0x773   : > { %v4774_v42 = vrot.slane %v8614_v57, 1  ;;  %v8627_v56 = vsel %vm225_vm0, %v4754_v32, -inf  ;;  %v5592_v39 = vsel %vm5536_vm9, %v5453_v13, %v5450_v20  ;;  %v5458_v30 = vsel %vm225_vm0, %v5251_v11, -inf }
 0x774   : > { %v4782_v4 = vmax.f32 %v4780_v24, %v4781_v43  ;;  %v4789_v51 = vmax.f32 %v4787_v2, %v4788_v27  ;;  %v4795_v40 = vrot.slane %v4794_v59, 1  ;;  %v8632_v49 = vmax.f32 %v8606_v37, %v4760_v9 }
 0x775   : > { %v4802_v15 = vrot.slane %v4801_v0, 1  ;;  %v4285_v44 = vrot.slane %v4159_v61, 2  ;;  %v4286_v48 = vrot.slane %v4159_v61, 4  ;;  %v5593_v38 = vsel %vm5538_vm10, %v5456_v46, %v5592_v39 }
 0x776   : > { %v4796_v53 = vmax.f32 %v4794_v59, %v4795_v40  ;;  %v4287_v35 = vrot.slane %v4159_v61, 6  ;;  %v4078_v52 = vadd.f32 %v8520_v33, %v4077_v55  ;;  %v5459_v1 = vmax.f32 %v8576_v29, %v5458_v30 }
 0x777   : > { %v5252_v17 = vsel %vm228_vm1, %v4159_v61, -inf  ;;  %v5259_v28 = vsel %vm228_vm1, %v4285_v44, -inf  ;;  %v5266_v3 = vsel %vm228_vm1, %v4286_v48, -inf  ;;  %v5353_v37 = vsel %vm225_vm0, %v4782_v4, -inf }
 0x778   : > { %v5356_v45 = vsel %vm225_vm0, %v4789_v51, -inf  ;;  %v5253_v5 = vrot.slane %v5252_v17, 4  ;;  %v5260_v63 = vrot.slane %v5259_v28, 4  ;;  %v5594_v26 = vsel %vm5540_vm11, %v5459_v1, %v5593_v38 }
 0x779   : > { %v8643_v14 = vmax.f32 %v4801_v0, %v4802_v15  ;;  %v8646_v33 = vsel %vm225_vm0, %v4796_v53, -inf  ;;  %v5267_v29 = vrot.slane %v5266_v3, 4  ;;  %v5273_v6 = vsel %vm228_vm1, %v4287_v35, -inf }
 0x77a   : > { %v5254_v19 = vmax.f32 %v5252_v17, %v5253_v5  ;;  %v5261_v18 = vmax.f32 %v5259_v28, %v5260_v63  ;;  %v4143_v34 = vmax.f32 %v4078_v52, 0.0  ;;  %v5354_v31 = vmax.f32 %v8579_v47, %v5353_v37 }
 0x77b   : > { %v5357_v32 = vmax.f32 %v8582_v21, %v5356_v45  ;;  %v5268_v10 = vmax.f32 %v5266_v3, %v5267_v29  ;;  %v5274_v60 = vrot.slane %v5273_v6, 4  ;;  %v5360_v23 = vmax.f32 %v8585_v41, %v8646_v33 }
 0x77c   : > { %v5255_v13 = vrot.slane %v5254_v19, 2  ;;  %v5262_v24 = vrot.slane %v5261_v18, 2  ;;  %v4237_v2 = vrot.slane %v4143_v34, 2  ;;  %v4238_v25 = vrot.slane %v4143_v34, 4 }
 0x77d   : > { %v5269_v7 = vrot.slane %v5268_v10, 2  ;;  %v5275_v11 = vmax.f32 %v5273_v6, %v5274_v60  ;;  %v4239_v12 = vrot.slane %v4143_v34, 6  ;;  %v4804_v20 = vsel %vm228_vm1, %v4143_v34, -inf }
 0x77e   : > { %v5256_v8 = vmax.f32 %v5254_v19, %v5255_v13  ;;  %v5263_v9 = vmax.f32 %v5261_v18, %v5262_v24  ;;  %v4811_v47 = vsel %vm228_vm1, %v4237_v2, -inf  ;;  %v4805_v43 = vrot.slane %v4804_v20, 4 }
 0x77f   : > { %v5270_v46 = vmax.f32 %v5268_v10, %v5269_v7  ;;  %v5276_v21 = vrot.slane %v5275_v11, 2  ;;  %v4812_v27 = vrot.slane %v4811_v47, 4  ;;  %v4818_v41 = vsel %vm228_vm1, %v4238_v25, -inf }
 0x780   : > { %v5257_v59 = vrot.slane %v5256_v8, 1  ;;  %v5264_v0 = vrot.slane %v5263_v9, 1  ;;  %v4825_v61 = vsel %vm228_vm1, %v4239_v12, -inf  ;;  %v4806_v30 = vmax.f32 %v4804_v20, %v4805_v43 }
 0x781   : > { %v5271_v39 = vrot.slane %v5270_v46, 1  ;;  %v5277_v55 = vmax.f32 %v5275_v11, %v5276_v21  ;;  %v4813_v4 = vmax.f32 %v4811_v47, %v4812_v27  ;;  %v4819_v15 = vrot.slane %v4818_v41, 4 }
 0x782   : > { %v5258_v51 = vmax.f32 %v5256_v8, %v5257_v59  ;;  %v5265_v40 = vmax.f32 %v5263_v9, %v5264_v0  ;;  %v4826_v44 = vrot.slane %v4825_v61, 4  ;;  %v4807_v53 = vrot.slane %v4806_v30, 2 }
 0x783   : > { %v5272_v48 = vmax.f32 %v5270_v46, %v5271_v39  ;;  %v5278_v38 = vrot.slane %v5277_v55, 1  ;;  %v4814_v35 = vrot.slane %v4813_v4, 2  ;;  %v4820_v17 = vmax.f32 %v4818_v41, %v4819_v15 }
 0x784   : > { %v5461_v52 = vsel %vm225_vm0, %v5258_v51, -inf  ;;  %v5464_v1 = vsel %vm225_vm0, %v5265_v40, -inf  ;;  %v4827_v28 = vmax.f32 %v4825_v61, %v4826_v44  ;;  %v4808_v33 = vmax.f32 %v4806_v30, %v4807_v53 }
 0x785   : > { %v5279_v3 = vmax.f32 %v5277_v55, %v5278_v38  ;;  %v5462_v37 = vmax.f32 %v8591_v36, %v5461_v52  ;;  %v5465_v45 = vmax.f32 %v8598_v62, %v5464_v1  ;;  %v5467_v5 = vsel %vm225_vm0, %v5272_v48, -inf }
 0x786   : > { %v5468_v63 = vmax.f32 %v8601_v16, %v5467_v5  ;;  %v4815_v29 = vmax.f32 %v4813_v4, %v4814_v35  ;;  %v4821_v19 = vrot.slane %v4820_v17, 2  ;;  %v5564_v18 = vsel %vm5536_vm9, %v5357_v32, %v5354_v31 }
 0x787   : > { %v5470_v6 = vsel %vm225_vm0, %v5279_v3, -inf  ;;  %v5595_v34 = vsel %vm5542_vm12, %v5462_v37, %v5594_v26  ;;  %v4828_v10 = vrot.slane %v4827_v28, 2  ;;  %v4809_v62 = vrot.slane %v4808_v33, 1 }
 0x788   : > { %v5471_v60 = vmax.f32 %v8604_v22, %v5470_v6  ;;  %v5596_v36 = vsel %vm5544_vm13, %v5465_v45, %v5595_v34  ;;  %v4816_v13 = vrot.slane %v4815_v29, 1  ;;  %v5362_v16 = vsel %vm225_vm0, %v8643_v14, -inf }
 0x789   : > { %v5597_v24 = vsel %vm5546_vm14, %v5468_v63, %v5596_v36  ;;  %v4822_v2 = vmax.f32 %v4820_v17, %v4821_v19  ;;  %v4829_v7 = vmax.f32 %v4827_v28, %v4828_v10  ;;  %v4768_v31 = vmax.f32 %v8608_v58, %v4767_v54 }
 0x78a   : > { %v5598_v26 = vsel %vm5548_vm15, %v5471_v60, %v5597_v24  ;;  %v4810_v32 = vmax.f32 %v4808_v33, %v4809_v62  ;;  %v4817_v11 = vmax.f32 %v4815_v29, %v4816_v13  ;;  %v4775_v22 = vmax.f32 %v8614_v57, %v4774_v42 }
 0x78b   : > { %v5565_v25 = vsel %vm5538_vm10, %v5360_v23, %v5564_v18  ;;  %5614 = vst.msk [vmem:[%s8168_s23 + $0x38] sm:$0xff] %vm225_vm0, %v5598_v26  ;;  %v4823_v14 = vrot.slane %v4822_v2, 1  ;;  %v4830_v12 = vrot.slane %v4829_v7, 1  ;;  %v5367_v8 = vsel %vm225_vm0, %v8632_v49, -inf }
 0x78c   : > { %v5363_v9 = vmax.f32 %v8588_v50, %v5362_v16  ;;  %v5365_v58 = vsel %vm225_vm0, %v4810_v32, -inf  ;;  %v5368_v54 = vsel %vm225_vm0, %v4817_v11, -inf  ;;  %v5370_v46 = vsel %vm225_vm0, %v4768_v31, -inf }
 0x78d   : > { %v4824_v20 = vmax.f32 %v4822_v2, %v4823_v14  ;;  %v4831_v47 = vmax.f32 %v4829_v7, %v4830_v12  ;;  %v5366_v57 = vmax.f32 %v8627_v56, %v5365_v58  ;;  %v5369_v42 = vmax.f32 %v5367_v8, %v5368_v54 }
 0x78e   : > { %v5566_v23 = vsel %vm5540_vm11, %v5363_v9, %v5565_v25  ;;  %v5373_v43 = vsel %vm225_vm0, %v4775_v22, -inf }
 0x78f   : > { %v5371_v21 = vsel %vm225_vm0, %v4824_v20, -inf  ;;  %v5374_v49 = vsel %vm225_vm0, %v4831_v47, -inf  ;;  %v5567_v50 = vsel %vm5542_vm12, %v5366_v57, %v5566_v23 }
 0x790   : > { %v5372_v27 = vmax.f32 %v5370_v46, %v5371_v21  ;;  %v5568_v59 = vsel %vm5544_vm13, %v5369_v42, %v5567_v50  ;;  %v5375_v0 = vmax.f32 %v5373_v43, %v5374_v49 }
 0x792   : > { %v5569_v41 = vsel %vm5546_vm14, %v5372_v27, %v5568_v59 }
 0x793   : > { %v5570_v56 = vsel %vm5548_vm15, %v5375_v0, %v5569_v41 }
 0x794   : > { %5610 = vst.msk [vmem:[%s8168_s23 + $0x18] sm:$0xff] %vm225_vm0, %v5570_v56 }
 0x795 PF: > { %s15_s18 = sadd.s32 1, %s5793_s18  }
 0x796   : > { %p12_p4 = scmp.ge.s32.totalorder %s15_s18, 4  }
 0x798   :  { %14 = sbr.rel (!%p12_p4) target bundleno = 1 (0x1), region = 73 }

</bundles_post_ra>
